<compile_context>
chip_gen: v6e
topology: v6e:2x2x1
jax: 0.10.0
libtpu: 0.0.40
codegen_flags: <defaults>
</compile_context>

<pallas_src>
import functools
import math

import jax
import jax.numpy as jnp
from jax.experimental import pallas as pl
from jax.experimental.pallas import tpu as pltpu


# ---------------------------------------------------------------------------
# Kernel A: patch-embed GEMM + folded BN1 + ReLU + SE attention + pairwise
#           squared distances (Gram form), all batches in one block.
#   outputs: embed (B*N, C)  and  dist2 (B, N, N)
# ---------------------------------------------------------------------------
def fused_embed_se_dist(patches, w_mat, scale, shift, wa_t, a_scale, a_shift,
                        *, B, N):
    M, K = patches.shape
    C = w_mat.shape[1]

    def kernel(p_ref, w_ref, s_ref, sh_ref, wa_ref, as_ref, ash_ref,
               o_ref, d_ref):
        # --- conv-as-GEMM (bf16 operands, f32 accumulation) + BN1 + ReLU ---
        feat = jnp.dot(p_ref[...], w_ref[...],
                       preferred_element_type=jnp.float32)          # (M, C)
        feat = jnp.maximum(feat * s_ref[...] + sh_ref[...], 0.0)

        for b in range(B):                                           # static
            fb = feat[b * N:(b + 1) * N, :]                          # (N, C)

            # --- SE attention: avg-pool over N, 1x1 conv, BN2, sigmoid ---
            pooled = jnp.mean(fb, axis=0, keepdims=True)             # (1, C)
            a = jnp.dot(pooled, wa_ref[...],
                        preferred_element_type=jnp.float32)          # (1, C)
            a = a * as_ref[...] + ash_ref[...]
            a = 1.0 / (1.0 + jnp.exp(-a))                            # sigmoid
            eb = fb * a                                              # (N, C)
            o_ref[b * N:(b + 1) * N, :] = eb.astype(o_ref.dtype)

            # --- pairwise squared distance via Gram matrix (no sqrt) ---
            eb2 = eb * eb
            sq_row = jnp.sum(eb2, axis=1, keepdims=True)             # (N, 1)
            ones_nc = jnp.ones((N, C), jnp.float32)
            # sq_col[i, j] = ||eb[j]||^2  (broadcast via tiny matmul, no transpose)
            sq_col = jax.lax.dot_general(
                ones_nc, eb2, (((1,), (1,)), ((), ())),
                preferred_element_type=jnp.float32)                  # (N, N)
            gram = jax.lax.dot_general(
                eb, eb, (((1,), (1,)), ((), ())),
                preferred_element_type=jnp.float32)                  # (N, N)
            d_ref[b] = jnp.maximum(sq_row + sq_col - 2.0 * gram, 0.0)

    return pl.pallas_call(
        kernel,
        out_shape=(jax.ShapeDtypeStruct((M, C), jnp.float32),
                   jax.ShapeDtypeStruct((B, N, N), jnp.float32)),
        grid_spec=pltpu.PrefetchScalarGridSpec(
            num_scalar_prefetch=0,
            grid=(1,),
            in_specs=[
                pl.BlockSpec((M, K), lambda i: (0, 0)),
                pl.BlockSpec((K, C), lambda i: (0, 0)),
                pl.BlockSpec((1, C), lambda i: (0, 0)),
                pl.BlockSpec((1, C), lambda i: (0, 0)),
                pl.BlockSpec((C, C), lambda i: (0, 0)),
                pl.BlockSpec((1, C), lambda i: (0, 0)),
                pl.BlockSpec((1, C), lambda i: (0, 0)),
            ],
            out_specs=(
                pl.BlockSpec((M, C), lambda i: (0, 0)),
                pl.BlockSpec((B, N, N), lambda i: (0, 0, 0)),
            ),
        ),
        compiler_params=pltpu.CompilerParams(
            dimension_semantics=("arbitrary",)),
    )(patches, w_mat, scale, shift, wa_t, a_scale, a_shift)


# ---------------------------------------------------------------------------
# Kernel B: fused edge linear layer (linearity: mean over k already folded
#           into the input):  out = edge_mean @ W^T + b, both batches in one
#           (B*N, C) block.
# ---------------------------------------------------------------------------
def edge_linear(edge, w_t, bias):
    M, C = edge.shape
    Co = w_t.shape[1]

    def kernel(e_ref, w_ref, b_ref, o_ref):
        o_ref[...] = (jnp.dot(e_ref[...], w_ref[...],
                              preferred_element_type=jnp.float32)
                      + b_ref[...]).astype(o_ref.dtype)

    return pl.pallas_call(
        kernel,
        out_shape=jax.ShapeDtypeStruct((M, Co), jnp.float32),
        grid_spec=pltpu.PrefetchScalarGridSpec(
            num_scalar_prefetch=0,
            grid=(1,),
            in_specs=[
                pl.BlockSpec((M, C), lambda i: (0, 0)),
                pl.BlockSpec((C, Co), lambda i: (0, 0)),
                pl.BlockSpec((1, Co), lambda i: (0, 0)),
            ],
            out_specs=pl.BlockSpec((M, Co), lambda i: (0, 0)),
        ),
        compiler_params=pltpu.CompilerParams(
            dimension_semantics=("arbitrary",)),
    )(edge, w_t, bias)


# ---------------------------------------------------------------------------
# Plain-JAX glue
# ---------------------------------------------------------------------------
def upsample2x_bilinear(x):
    """PyTorch nn.Upsample(scale_factor=2, mode='bilinear', align_corners=False)."""
    B, C, Hi, Wi = x.shape

    def coords(n_in, n_out):
        src = (jnp.arange(n_out, dtype=jnp.float32) + 0.5) / 2.0 - 0.5
        src = jnp.maximum(src, 0.0)
        i0 = jnp.minimum(jnp.floor(src).astype(jnp.int32), n_in - 1)
        i1 = jnp.minimum(i0 + 1, n_in - 1)
        frac = src - i0.astype(jnp.float32)
        return i0, i1, frac

    y0, y1, fy = coords(Hi, 2 * Hi)
    x0, x1, fx = coords(Wi, 2 * Wi)
    row = (x[:, :, y0, :] * (1.0 - fy)[None, None, :, None]
           + x[:, :, y1, :] * fy[None, None, :, None])
    out = (row[:, :, :, x0] * (1.0 - fx)[None, None, None, :]
           + row[:, :, :, x1] * fx[None, None, None, :])
    return out


def make_sine_pos_encoding(d_model, max_shape):
    h, w = max_shape
    y_pos = jnp.cumsum(jnp.ones((h, w), jnp.float32), axis=0)[None]
    x_pos = jnp.cumsum(jnp.ones((h, w), jnp.float32), axis=1)[None]
    div = jnp.exp(jnp.arange(0, d_model // 2, 2, dtype=jnp.float32)
                  * (-math.log(10000.0) / (d_model // 2)))[:, None, None]
    pe = jnp.zeros((d_model, h, w), jnp.float32)
    pe = pe.at[0::4].set(jnp.sin(x_pos * div))
    pe = pe.at[1::4].set(jnp.cos(x_pos * div))
    pe = pe.at[2::4].set(jnp.sin(y_pos * div))
    pe = pe.at[3::4].set(jnp.cos(y_pos * div))
    return pe[None]                                   # (1, d_model, h, w)


def init_params(key):
    ks = jax.random.split(key, 13)
    p = {}
    p["conv_w"] = 0.02 * jax.random.normal(ks[0], (16, 64, 16, 16), jnp.float32)
    p["conv_b"] = 0.02 * jax.random.normal(ks[1], (16,), jnp.float32)
    p["bn1_gamma"] = 1.0 + 0.1 * jax.random.normal(ks[2], (16,), jnp.float32)
    p["bn1_beta"] = 0.1 * jax.random.normal(ks[3], (16,), jnp.float32)
    p["bn1_mean"] = 0.1 * jax.random.normal(ks[4], (16,), jnp.float32)
    p["bn1_var"] = 1.0 + 0.1 * jnp.abs(jax.random.normal(ks[5], (16,), jnp.float32))
    p["atten_w"] = 0.1 * jax.random.normal(ks[6], (16, 16), jnp.float32)   # 1x1 conv, no bias
    p["bn2_gamma"] = 1.0 + 0.1 * jax.random.normal(ks[7], (16,), jnp.float32)
    p["bn2_beta"] = 0.1 * jax.random.normal(ks[8], (16,), jnp.float32)
    p["bn2_mean"] = 0.1 * jax.random.normal(ks[9], (16,), jnp.float32)
    p["bn2_var"] = 1.0 + 0.1 * jnp.abs(jax.random.normal(ks[10], (16,), jnp.float32))
    p["lin_w"] = 0.25 * jax.random.normal(ks[11], (16, 16), jnp.float32)   # (out, in)
    p["lin_b"] = 0.1 * jax.random.normal(ks[12], (16,), jnp.float32)
    return p


@functools.partial(jax.jit, static_argnums=(2,))
def struct_info_forward(x, params, k_neighbors):
    B, Cin, H, W = x.shape
    ksz, C, eps = 16, 16, 1e-5
    h, w = H // ksz, W // ksz
    N = h * w
    M = B * N
    K = Cin * ksz * ksz

    # ---- im2col for Conv2d(64,16,16,stride=16,pad=0); fused with bf16 cast
    #      inside this jit so no extra standalone f32 HBM copy survives.
    patches = x.reshape(B, Cin, h, ksz, w, ksz)
    patches = patches.transpose(0, 2, 4, 1, 3, 5).reshape(M, K)
    patches = patches.astype(jnp.bfloat16)
    w_mat = params["conv_w"].transpose(1, 2, 3, 0).reshape(K, C)
    w_mat = w_mat.astype(jnp.bfloat16)

    # folded BN1 (with conv bias) and BN2 affine params
    scale = params["bn1_gamma"] / jnp.sqrt(params["bn1_var"] + eps)
    shift = params["bn1_beta"] + (params["conv_b"] - params["bn1_mean"]) * scale
    a_scale = params["bn2_gamma"] / jnp.sqrt(params["bn2_var"] + eps)
    a_shift = params["bn2_beta"] - params["bn2_mean"] * a_scale

    # ---- Kernel A: conv+BN+ReLU, SE attention, pairwise squared distances
    embed, dist2 = fused_embed_se_dist(
        patches, w_mat,
        scale.reshape(1, C), shift.reshape(1, C),
        params["atten_w"].T,
        a_scale.reshape(1, C), a_shift.reshape(1, C),
        B=B, N=N)
    feat2 = embed.reshape(B, N, C)

    # ---- KNN selection (XLA: argsort of squared distances is order-identical
    #      to argsort of distances; torch.topk descending == argsort(-dist)).
    topk_index = jnp.argsort(-dist2, axis=-1)                          # (B, N, N)
    interval = N / k_neighbors
    knn_array = jnp.arange(interval / 2, N, interval).astype(jnp.int32)
    knn_index = topk_index[:, :, knn_array]                            # (B, N, k)
    knn_feat = jax.vmap(lambda f, ix: f[ix])(feat2, knn_index)         # (B, N, k, C)

    # linearity: mean_j((knn_j - f) @ W + b) == (mean_j(knn_j) - f) @ W + b
    edge_mean = knn_feat.mean(axis=2) - feat2                          # (B, N, C)
    knn_edge = edge_linear(edge_mean.reshape(M, C),
                           params["lin_w"].T,
                           params["lin_b"].reshape(1, C))              # (M, C) Pallas
    knn_map = knn_edge.reshape(B, N, C).transpose(0, 2, 1).reshape(B, C, h, w)

    # ---- two 2x bilinear upsamples (XLA)
    up = upsample2x_bilinear(upsample2x_bilinear(knn_map))             # (B, C, 4h, 4w)

    # ---- positional encoding:  out = up + pos_embed2(up)  (= 2*up + pe)
    pe = make_sine_pos_encoding(C, (60, 80))[:, :, :4 * h, :4 * w]
    out = up + (up + pe)
    return out


if __name__ == "__main__":
    K_NEIGHBORS = 4
    x = jax.random.normal(jax.random.PRNGKey(0), (2, 64, 64, 64), jnp.float32)
    params = init_params(jax.random.PRNGKey(1))
    out = struct_info_forward(x, params, K_NEIGHBORS)
    out = jax.block_until_ready(out)
    assert out.shape == (2, 16, 16, 16)
    assert jnp.all(jnp.isfinite(out))
    print("KERNEL_OK")
</pallas_src>

<mosaic_0001>
module attributes {stable_mosaic.version = 11 : i64} {
  func.func @kernel(%arg0: i32, %arg1: memref<32x16384xbf16, #tpu.memory_space<vmem>>, %arg2: memref<16384x16xbf16, #tpu.memory_space<vmem>>, %arg3: memref<1x16xf32, #tpu.memory_space<vmem>>, %arg4: memref<1x16xf32, #tpu.memory_space<vmem>>, %arg5: memref<16x16xf32, #tpu.memory_space<vmem>>, %arg6: memref<1x16xf32, #tpu.memory_space<vmem>>, %arg7: memref<1x16xf32, #tpu.memory_space<vmem>>, %arg8: memref<32x16xf32, #tpu.memory_space<vmem>>, %arg9: memref<2x16x16xf32, #tpu.memory_space<vmem>>) attributes {dimension_semantics = [#tpu.dimension_semantics<arbitrary>], iteration_bounds = array<i64: 1>, scalar_prefetch = 0 : i64, scratch_operands = 0 : i64, tpu.core_type = #tpu.core_type<tc>, window_params = [{pipeline_mode = #tpu.pipeline_mode<synchronous>, transform_indices = @transform_0, window_bounds = array<i64: 32, 16384>}, {pipeline_mode = #tpu.pipeline_mode<synchronous>, transform_indices = @transform_1, window_bounds = array<i64: 16384, 16>}, {pipeline_mode = #tpu.pipeline_mode<synchronous>, transform_indices = @transform_2, window_bounds = array<i64: 1, 16>}, {pipeline_mode = #tpu.pipeline_mode<synchronous>, transform_indices = @transform_3, window_bounds = array<i64: 1, 16>}, {pipeline_mode = #tpu.pipeline_mode<synchronous>, transform_indices = @transform_4, window_bounds = array<i64: 16, 16>}, {pipeline_mode = #tpu.pipeline_mode<synchronous>, transform_indices = @transform_5, window_bounds = array<i64: 1, 16>}, {pipeline_mode = #tpu.pipeline_mode<synchronous>, transform_indices = @transform_6, window_bounds = array<i64: 1, 16>}, {pipeline_mode = #tpu.pipeline_mode<synchronous>, transform_indices = @transform_7, window_bounds = array<i64: 32, 16>}, {pipeline_mode = #tpu.pipeline_mode<synchronous>, transform_indices = @transform_8, window_bounds = array<i64: 2, 16, 16>}]} {
    %c0 = arith.constant 0 : index
    %c0_0 = arith.constant 0 : index
    %0 = vector.load %arg1[%c0, %c0_0] : memref<32x16384xbf16, #tpu.memory_space<vmem>>, vector<32x16384xbf16>
    %c0_1 = arith.constant 0 : index
    %c0_2 = arith.constant 0 : index
    %1 = vector.load %arg2[%c0_1, %c0_2] : memref<16384x16xbf16, #tpu.memory_space<vmem>>, vector<16384x16xbf16>
    %cst = arith.constant dense<0.000000e+00> : vector<32x16xf32>
    %2 = tpu.matmul %0, %1, %cst {dimension_numbers = #tpu.dot_dimension_numbers<[1], [0], [0], [1], [0, 0, 1, 1], [], []>} : vector<32x16384xbf16>, vector<16384x16xbf16>, vector<32x16xf32> -> vector<32x16xf32>
    %c0_3 = arith.constant 0 : index
    %c0_4 = arith.constant 0 : index
    %3 = vector.load %arg3[%c0_3, %c0_4] : memref<1x16xf32, #tpu.memory_space<vmem>>, vector<1x16xf32>
    %4 = vector.broadcast %3 : vector<1x16xf32> to vector<32x16xf32>
    %5 = arith.mulf %2, %4 : vector<32x16xf32>
    %c0_5 = arith.constant 0 : index
    %c0_6 = arith.constant 0 : index
    %6 = vector.load %arg4[%c0_5, %c0_6] : memref<1x16xf32, #tpu.memory_space<vmem>>, vector<1x16xf32>
    %7 = vector.broadcast %6 : vector<1x16xf32> to vector<32x16xf32>
    %8 = arith.addf %5, %7 : vector<32x16xf32>
    %cst_7 = arith.constant 0.000000e+00 : f32
    %9 = vector.broadcast %cst_7 : f32 to vector<32x16xf32>
    %10 = arith.maximumf %8, %9 : vector<32x16xf32>
    %11 = vector.extract_strided_slice %10 {offsets = [0, 0], sizes = [16, 16], strides = [1, 1]} : vector<32x16xf32> to vector<16x16xf32>
    %cst_8 = arith.constant dense<0.000000e+00> : vector<16xf32>
    %12 = vector.multi_reduction <add>, %11, %cst_8 [0] : vector<16x16xf32> to vector<16xf32>
    %13 = vector.shape_cast %12 : vector<16xf32> to vector<1x16xf32>
    %cst_9 = arith.constant 1.600000e+01 : f32
    %14 = vector.broadcast %cst_9 : f32 to vector<1x16xf32>
    %15 = arith.divf %13, %14 : vector<1x16xf32>
    %c0_10 = arith.constant 0 : index
    %c0_11 = arith.constant 0 : index
    %16 = vector.load %arg5[%c0_10, %c0_11] : memref<16x16xf32, #tpu.memory_space<vmem>>, vector<16x16xf32>
    %cst_12 = arith.constant dense<0.000000e+00> : vector<1x16xf32>
    %17 = tpu.matmul %15, %16, %cst_12 {dimension_numbers = #tpu.dot_dimension_numbers<[1], [0], [0], [1], [0, 0, 1, 1], [], []>} : vector<1x16xf32>, vector<16x16xf32>, vector<1x16xf32> -> vector<1x16xf32>
    %c0_13 = arith.constant 0 : index
    %c0_14 = arith.constant 0 : index
    %18 = vector.load %arg6[%c0_13, %c0_14] : memref<1x16xf32, #tpu.memory_space<vmem>>, vector<1x16xf32>
    %19 = arith.mulf %17, %18 : vector<1x16xf32>
    %c0_15 = arith.constant 0 : index
    %c0_16 = arith.constant 0 : index
    %20 = vector.load %arg7[%c0_15, %c0_16] : memref<1x16xf32, #tpu.memory_space<vmem>>, vector<1x16xf32>
    %21 = arith.addf %19, %20 : vector<1x16xf32>
    %cst_17 = arith.constant 0.000000e+00 : f32
    %22 = vector.broadcast %cst_17 : f32 to vector<1x16xf32>
    %23 = arith.subf %22, %21 : vector<1x16xf32>
    %24 = math.exp %23 : vector<1x16xf32>
    %cst_18 = arith.constant 1.000000e+00 : f32
    %25 = vector.broadcast %cst_18 : f32 to vector<1x16xf32>
    %26 = arith.addf %25, %24 : vector<1x16xf32>
    %cst_19 = arith.constant 1.000000e+00 : f32
    %27 = vector.broadcast %cst_19 : f32 to vector<1x16xf32>
    %28 = arith.divf %27, %26 : vector<1x16xf32>
    %29 = vector.broadcast %28 : vector<1x16xf32> to vector<16x16xf32>
    %30 = arith.mulf %11, %29 : vector<16x16xf32>
    %c0_20 = arith.constant 0 : index
    %c0_21 = arith.constant 0 : index
    %31 = vector.load %arg8[%c0_20, %c0_21] : memref<32x16xf32, #tpu.memory_space<vmem>>, vector<16x16xf32>
    tpu.vector_store %arg8[%c0_20, %c0_21], %30 {strides = array<i32>} : memref<32x16xf32, #tpu.memory_space<vmem>>, vector<16x16xf32>,
    %32 = arith.mulf %30, %30 : vector<16x16xf32>
    %cst_22 = arith.constant dense<0.000000e+00> : vector<16xf32>
    %33 = vector.multi_reduction <add>, %32, %cst_22 [1] : vector<16x16xf32> to vector<16xf32>
    %34 = vector.shape_cast %33 : vector<16xf32> to vector<16x1xf32>
    %cst_23 = arith.constant 1.000000e+00 : f32
    %35 = vector.broadcast %cst_23 : f32 to vector<16x16xf32>
    %cst_24 = arith.constant dense<0.000000e+00> : vector<16x16xf32>
    %36 = tpu.matmul %35, %32, %cst_24 {dimension_numbers = #tpu.dot_dimension_numbers<[1], [1], [0], [0], [0, 0, 1, 0], [], []>} : vector<16x16xf32>, vector<16x16xf32>, vector<16x16xf32> -> vector<16x16xf32>
    %cst_25 = arith.constant dense<0.000000e+00> : vector<16x16xf32>
    %37 = tpu.matmul %30, %30, %cst_25 {dimension_numbers = #tpu.dot_dimension_numbers<[1], [1], [0], [0], [0, 0, 1, 0], [], []>} : vector<16x16xf32>, vector<16x16xf32>, vector<16x16xf32> -> vector<16x16xf32>
    %38 = vector.broadcast %34 : vector<16x1xf32> to vector<16x16xf32>
    %39 = arith.addf %38, %36 : vector<16x16xf32>
    %cst_26 = arith.constant 2.000000e+00 : f32
    %40 = vector.broadcast %cst_26 : f32 to vector<16x16xf32>
    %41 = arith.mulf %40, %37 : vector<16x16xf32>
    %42 = arith.subf %39, %41 : vector<16x16xf32>
    %cst_27 = arith.constant 0.000000e+00 : f32
    %43 = vector.broadcast %cst_27 : f32 to vector<16x16xf32>
    %44 = arith.maximumf %42, %43 : vector<16x16xf32>
    %c0_28 = arith.constant 0 : index
    %c0_29 = arith.constant 0 : index
    %c0_30 = arith.constant 0 : index
    %45 = vector.load %arg9[%c0_28, %c0_29, %c0_30] : memref<2x16x16xf32, #tpu.memory_space<vmem>>, vector<1x16x16xf32>
    %46 = vector.shape_cast %45 : vector<1x16x16xf32> to vector<16x16xf32>
    %47 = vector.shape_cast %44 : vector<16x16xf32> to vector<1x16x16xf32>
    tpu.vector_store %arg9[%c0_28, %c0_29, %c0_30], %47 {strides = array<i32>} : memref<2x16x16xf32, #tpu.memory_space<vmem>>, vector<1x16x16xf32>,
    %48 = vector.extract_strided_slice %10 {offsets = [16, 0], sizes = [16, 16], strides = [1, 1]} : vector<32x16xf32> to vector<16x16xf32>
    %cst_31 = arith.constant dense<0.000000e+00> : vector<16xf32>
    %49 = vector.multi_reduction <add>, %48, %cst_31 [0] : vector<16x16xf32> to vector<16xf32>
    %50 = vector.shape_cast %49 : vector<16xf32> to vector<1x16xf32>
    %cst_32 = arith.constant 1.600000e+01 : f32
    %51 = vector.broadcast %cst_32 : f32 to vector<1x16xf32>
    %52 = arith.divf %50, %51 : vector<1x16xf32>
    %c0_33 = arith.constant 0 : index
    %c0_34 = arith.constant 0 : index
    %53 = vector.load %arg5[%c0_33, %c0_34] : memref<16x16xf32, #tpu.memory_space<vmem>>, vector<16x16xf32>
    %cst_35 = arith.constant dense<0.000000e+00> : vector<1x16xf32>
    %54 = tpu.matmul %52, %53, %cst_35 {dimension_numbers = #tpu.dot_dimension_numbers<[1], [0], [0], [1], [0, 0, 1, 1], [], []>} : vector<1x16xf32>, vector<16x16xf32>, vector<1x16xf32> -> vector<1x16xf32>
    %c0_36 = arith.constant 0 : index
    %c0_37 = arith.constant 0 : index
    %55 = vector.load %arg6[%c0_36, %c0_37] : memref<1x16xf32, #tpu.memory_space<vmem>>, vector<1x16xf32>
    %56 = arith.mulf %54, %55 : vector<1x16xf32>
    %c0_38 = arith.constant 0 : index
    %c0_39 = arith.constant 0 : index
    %57 = vector.load %arg7[%c0_38, %c0_39] : memref<1x16xf32, #tpu.memory_space<vmem>>, vector<1x16xf32>
    %58 = arith.addf %56, %57 : vector<1x16xf32>
    %cst_40 = arith.constant 0.000000e+00 : f32
    %59 = vector.broadcast %cst_40 : f32 to vector<1x16xf32>
    %60 = arith.subf %59, %58 : vector<1x16xf32>
    %61 = math.exp %60 : vector<1x16xf32>
    %cst_41 = arith.constant 1.000000e+00 : f32
    %62 = vector.broadcast %cst_41 : f32 to vector<1x16xf32>
    %63 = arith.addf %62, %61 : vector<1x16xf32>
    %cst_42 = arith.constant 1.000000e+00 : f32
    %64 = vector.broadcast %cst_42 : f32 to vector<1x16xf32>
    %65 = arith.divf %64, %63 : vector<1x16xf32>
    %66 = vector.broadcast %65 : vector<1x16xf32> to vector<16x16xf32>
    %67 = arith.mulf %48, %66 : vector<16x16xf32>
    %c16 = arith.constant 16 : index
    %c0_43 = arith.constant 0 : index
    %68 = vector.load %arg8[%c16, %c0_43] : memref<32x16xf32, #tpu.memory_space<vmem>>, vector<16x16xf32>
    tpu.vector_store %arg8[%c16, %c0_43], %67 {strides = array<i32>} : memref<32x16xf32, #tpu.memory_space<vmem>>, vector<16x16xf32>,
    %69 = arith.mulf %67, %67 : vector<16x16xf32>
    %cst_44 = arith.constant dense<0.000000e+00> : vector<16xf32>
    %70 = vector.multi_reduction <add>, %69, %cst_44 [1] : vector<16x16xf32> to vector<16xf32>
    %71 = vector.shape_cast %70 : vector<16xf32> to vector<16x1xf32>
    %cst_45 = arith.constant 1.000000e+00 : f32
    %72 = vector.broadcast %cst_45 : f32 to vector<16x16xf32>
    %cst_46 = arith.constant dense<0.000000e+00> : vector<16x16xf32>
    %73 = tpu.matmul %72, %69, %cst_46 {dimension_numbers = #tpu.dot_dimension_numbers<[1], [1], [0], [0], [0, 0, 1, 0], [], []>} : vector<16x16xf32>, vector<16x16xf32>, vector<16x16xf32> -> vector<16x16xf32>
    %cst_47 = arith.constant dense<0.000000e+00> : vector<16x16xf32>
    %74 = tpu.matmul %67, %67, %cst_47 {dimension_numbers = #tpu.dot_dimension_numbers<[1], [1], [0], [0], [0, 0, 1, 0], [], []>} : vector<16x16xf32>, vector<16x16xf32>, vector<16x16xf32> -> vector<16x16xf32>
    %75 = vector.broadcast %71 : vector<16x1xf32> to vector<16x16xf32>
    %76 = arith.addf %75, %73 : vector<16x16xf32>
    %cst_48 = arith.constant 2.000000e+00 : f32
    %77 = vector.broadcast %cst_48 : f32 to vector<16x16xf32>
    %78 = arith.mulf %77, %74 : vector<16x16xf32>
    %79 = arith.subf %76, %78 : vector<16x16xf32>
    %cst_49 = arith.constant 0.000000e+00 : f32
    %80 = vector.broadcast %cst_49 : f32 to vector<16x16xf32>
    %81 = arith.maximumf %79, %80 : vector<16x16xf32>
    %c1 = arith.constant 1 : index
    %c0_50 = arith.constant 0 : index
    %c0_51 = arith.constant 0 : index
    %82 = vector.load %arg9[%c1, %c0_50, %c0_51] : memref<2x16x16xf32, #tpu.memory_space<vmem>>, vector<1x16x16xf32>
    %83 = vector.shape_cast %82 : vector<1x16x16xf32> to vector<16x16xf32>
    %84 = vector.shape_cast %81 : vector<16x16xf32> to vector<1x16x16xf32>
    tpu.vector_store %arg9[%c1, %c0_50, %c0_51], %84 {strides = array<i32>} : memref<2x16x16xf32, #tpu.memory_space<vmem>>, vector<1x16x16xf32>,
    return
  }
  func.func @transform_0(%arg0: i32) -> (i32, i32) {
    %c0_i32 = arith.constant 0 : i32
    %c0_i32_0 = arith.constant 0 : i32
    %c0_i32_1 = arith.constant 0 : i32
    return %c0_i32, %c0_i32_0 : i32, i32
  }
  func.func @transform_1(%arg0: i32) -> (i32, i32) {
    %c0_i32 = arith.constant 0 : i32
    %c0_i32_0 = arith.constant 0 : i32
    %c0_i32_1 = arith.constant 0 : i32
    return %c0_i32, %c0_i32_0 : i32, i32
  }
  func.func @transform_2(%arg0: i32) -> (i32, i32) {
    %c0_i32 = arith.constant 0 : i32
    %c0_i32_0 = arith.constant 0 : i32
    %c0_i32_1 = arith.constant 0 : i32
    return %c0_i32, %c0_i32_0 : i32, i32
  }
  func.func @transform_3(%arg0: i32) -> (i32, i32) {
    %c0_i32 = arith.constant 0 : i32
    %c0_i32_0 = arith.constant 0 : i32
    %c0_i32_1 = arith.constant 0 : i32
    return %c0_i32, %c0_i32_0 : i32, i32
  }
  func.func @transform_4(%arg0: i32) -> (i32, i32) {
    %c0_i32 = arith.constant 0 : i32
    %c0_i32_0 = arith.constant 0 : i32
    %c0_i32_1 = arith.constant 0 : i32
    return %c0_i32, %c0_i32_0 : i32, i32
  }
  func.func @transform_5(%arg0: i32) -> (i32, i32) {
    %c0_i32 = arith.constant 0 : i32
    %c0_i32_0 = arith.constant 0 : i32
    %c0_i32_1 = arith.constant 0 : i32
    return %c0_i32, %c0_i32_0 : i32, i32
  }
  func.func @transform_6(%arg0: i32) -> (i32, i32) {
    %c0_i32 = arith.constant 0 : i32
    %c0_i32_0 = arith.constant 0 : i32
    %c0_i32_1 = arith.constant 0 : i32
    return %c0_i32, %c0_i32_0 : i32, i32
  }
  func.func @transform_7(%arg0: i32) -> (i32, i32) {
    %c0_i32 = arith.constant 0 : i32
    %c0_i32_0 = arith.constant 0 : i32
    %c0_i32_1 = arith.constant 0 : i32
    return %c0_i32, %c0_i32_0 : i32, i32
  }
  func.func @transform_8(%arg0: i32) -> (i32, i32, i32) {
    %c0_i32 = arith.constant 0 : i32
    %c0_i32_0 = arith.constant 0 : i32
    %c0_i32_1 = arith.constant 0 : i32
    %c0_i32_2 = arith.constant 0 : i32
    return %c0_i32, %c0_i32_0, %c0_i32_1 : i32, i32, i32
  }
}

module attributes {stable_mosaic.version = 11 : i64} {
  func.func @kernel(%arg0: i32, %arg1: memref<32x16xf32, #tpu.memory_space<vmem>>, %arg2: memref<16x16xf32, #tpu.memory_space<vmem>>, %arg3: memref<1x16xf32, #tpu.memory_space<vmem>>, %arg4: memref<32x16xf32, #tpu.memory_space<vmem>>) attributes {dimension_semantics = [#tpu.dimension_semantics<arbitrary>], iteration_bounds = array<i64: 1>, scalar_prefetch = 0 : i64, scratch_operands = 0 : i64, tpu.core_type = #tpu.core_type<tc>, window_params = [{pipeline_mode = #tpu.pipeline_mode<synchronous>, transform_indices = @transform_0, window_bounds = array<i64: 32, 16>}, {pipeline_mode = #tpu.pipeline_mode<synchronous>, transform_indices = @transform_1, window_bounds = array<i64: 16, 16>}, {pipeline_mode = #tpu.pipeline_mode<synchronous>, transform_indices = @transform_2, window_bounds = array<i64: 1, 16>}, {pipeline_mode = #tpu.pipeline_mode<synchronous>, transform_indices = @transform_3, window_bounds = array<i64: 32, 16>}]} {
    %c0 = arith.constant 0 : index
    %c0_0 = arith.constant 0 : index
    %0 = vector.load %arg1[%c0, %c0_0] : memref<32x16xf32, #tpu.memory_space<vmem>>, vector<32x16xf32>
    %c0_1 = arith.constant 0 : index
    %c0_2 = arith.constant 0 : index
    %1 = vector.load %arg2[%c0_1, %c0_2] : memref<16x16xf32, #tpu.memory_space<vmem>>, vector<16x16xf32>
    %cst = arith.constant dense<0.000000e+00> : vector<32x16xf32>
    %2 = tpu.matmul %0, %1, %cst {dimension_numbers = #tpu.dot_dimension_numbers<[1], [0], [0], [1], [0, 0, 1, 1], [], []>} : vector<32x16xf32>, vector<16x16xf32>, vector<32x16xf32> -> vector<32x16xf32>
    %c0_3 = arith.constant 0 : index
    %c0_4 = arith.constant 0 : index
    %3 = vector.load %arg3[%c0_3, %c0_4] : memref<1x16xf32, #tpu.memory_space<vmem>>, vector<1x16xf32>
    %4 = vector.broadcast %3 : vector<1x16xf32> to vector<32x16xf32>
    %5 = arith.addf %2, %4 : vector<32x16xf32>
    %c0_5 = arith.constant 0 : index
    %c0_6 = arith.constant 0 : index
    %6 = vector.load %arg4[%c0_5, %c0_6] : memref<32x16xf32, #tpu.memory_space<vmem>>, vector<32x16xf32>
    tpu.vector_store %arg4[%c0_5, %c0_6], %5 {strides = array<i32>} : memref<32x16xf32, #tpu.memory_space<vmem>>, vector<32x16xf32>,
    return
  }
  func.func @transform_0(%arg0: i32) -> (i32, i32) {
    %c0_i32 = arith.constant 0 : i32
    %c0_i32_0 = arith.constant 0 : i32
    %c0_i32_1 = arith.constant 0 : i32
    return %c0_i32, %c0_i32_0 : i32, i32
  }
  func.func @transform_1(%arg0: i32) -> (i32, i32) {
    %c0_i32 = arith.constant 0 : i32
    %c0_i32_0 = arith.constant 0 : i32
    %c0_i32_1 = arith.constant 0 : i32
    return %c0_i32, %c0_i32_0 : i32, i32
  }
  func.func @transform_2(%arg0: i32) -> (i32, i32) {
    %c0_i32 = arith.constant 0 : i32
    %c0_i32_0 = arith.constant 0 : i32
    %c0_i32_1 = arith.constant 0 : i32
    return %c0_i32, %c0_i32_0 : i32, i32
  }
  func.func @transform_3(%arg0: i32) -> (i32, i32) {
    %c0_i32 = arith.constant 0 : i32
    %c0_i32_0 = arith.constant 0 : i32
    %c0_i32_1 = arith.constant 0 : i32
    return %c0_i32, %c0_i32_0 : i32, i32
  }
}

</mosaic_0001>

<bundles_post_ra>
// kernel: neg.1
= control target key start
LH: loop header
LB: loop body
LE: loop exit
PB: predicated region body
PF: predicated region fallthrough
CT: control target
= control target key end

     0   :  { %s72_s0 = inlined_call_operand.vmem [shape: f32[2,16,16], index: 0, kind: input, shape index: {}]   ;;  %s73_s1 = inlined_call_operand.vmem [shape: f32[2,16,16], index: 1, kind: output, shape index: {}]  }
   0x1   :  { %v2_v0 = vld [vmem:[%s72_s0] sm:$0xff]  ;;  %v32_v1 = vld [vmem:[%s72_s0 + $0x10] sm:$0xff]  ;;  %v34_v2 = vld [vmem:[%s72_s0 + $0x8] sm:$0xff] }
   0x2   :  { %v5_v3 = vxor.u32 2147483648, %v2_v0  ;;  %v12_v4 = vxor.u32 2147483648, %v32_v1  ;;  %v20_v5 = vxor.u32 2147483648, %v34_v2  ;;  %v36_v6 = vld [vmem:[%s72_s0 + $0x18] sm:$0xff] }
   0x3   :  { %v28_v7 = vxor.u32 2147483648, %v36_v6 }
   0x4   :  { %7 = vst [vmem:[%s73_s1] sm:$0xff] %v5_v3  ;;  %33 = vst [vmem:[%s73_s1 + $0x10] sm:$0xff] %v12_v4 }
   0x5   :  { %35 = vst [vmem:[%s73_s1 + $0x8] sm:$0xff] %v20_v5  ;;  %37 = vst [vmem:[%s73_s1 + $0x18] sm:$0xff] %v28_v7 }

// kernel: sub.0
= control target key start
LH: loop header
LB: loop body
LE: loop exit
PB: predicated region body
PF: predicated region fallthrough
CT: control target
= control target key end

     0   :  { %s100_s0 = inlined_call_operand.vmem [shape: f32[32,16], index: 0, kind: input, shape index: {}]   ;;  %s101_s1 = inlined_call_operand.vmem [shape: f32[32,16], index: 1, kind: input, shape index: {}]   ;;  %s102_s2 = inlined_call_operand.vmem [shape: f32[32,16], index: 2, kind: output, shape index: {}]  }
   0x1   :  { %v3_v0 = vld [vmem:[%s100_s0] sm:$0xff]  ;;  %v40_v2 = vld [vmem:[%s100_s0 + $0x8] sm:$0xff]  ;;  %v43_v5 = vld [vmem:[%s100_s0 + $0x10] sm:$0xff] }
   0x2   :  { %v4_v1 = vld [vmem:[%s101_s1] sm:$0xff]  ;;  %v41_v4 = vld [vmem:[%s101_s1 + $0x8] sm:$0xff]  ;;  %v44_v6 = vld [vmem:[%s101_s1 + $0x10] sm:$0xff] }
   0x3   :  { %v7_v3 = vsub.f32 %v3_v0, %v4_v1  ;;  %v16_v7 = vsub.f32 %v40_v2, %v41_v4  ;;  %v26_v8 = vsub.f32 %v43_v5, %v44_v6  ;;  %v46_v9 = vld [vmem:[%s100_s0 + $0x18] sm:$0xff] }
   0x4   :  { %v47_v10 = vld [vmem:[%s101_s1 + $0x18] sm:$0xff] }
   0x5   :  { %9 = vst [vmem:[%s102_s2] sm:$0xff] %v7_v3  ;;  %v36_v11 = vsub.f32 %v46_v9, %v47_v10  ;;  %42 = vst [vmem:[%s102_s2 + $0x8] sm:$0xff] %v16_v7 }
   0x6   :  { %45 = vst [vmem:[%s102_s2 + $0x10] sm:$0xff] %v26_v8 }
   0x7   :  { %48 = vst [vmem:[%s102_s2 + $0x18] sm:$0xff] %v36_v11 }

// kernel: struct_info_forward.3
= control target key start
LH: loop header
LB: loop body
LE: loop exit
PB: predicated region body
PF: predicated region fallthrough
CT: control target
= control target key end

     0   :  { %vm27_vm0 = vcmask 130048   ;;  %s219_s1 = inlined_call_operand.vmem [shape: f32[16,16], index: 1, kind: input, shape index: {}]   ;;  %s220_s0 = inlined_call_operand.vmem [shape: f32[32,16], index: 0, kind: input, shape index: {}]   ;;  %s221_s2 = inlined_call_operand.vmem [shape: f32[1,16], index: 2, kind: input, shape index: {}]   ;;  %s222_s3 = inlined_call_operand.vmem [shape: f32[32,16], index: 3, kind: output, shape index: {}]  }
   0x1   :  { %v19_v0 = vld [vmem:[%s219_s1 + $0x8] sm:$0xff]  ;;  %v18_v1 = vld [vmem:[%s219_s1] sm:$0xff]  ;;  %v16_v3 = vld [vmem:[%s220_s0 + $0x10] sm:$0xff] }
   0x2   :  { %144 = vmatprep.subr.mxu0 %v19_v0  ;;  %154 = vmatprep.subr.mxu1 %v19_v0  ;;  %v14_v2 = vld [vmem:[%s220_s0] sm:$0xff]  ;;  %v15_v4 = vld [vmem:[%s220_s0 + $0x8] sm:$0xff]  ;;  %v17_v5 = vld [vmem:[%s220_s0 + $0x18] sm:$0xff] }
   0x3   :  { %145 = vmatpush3.msra.mxu0 %v19_v0  ;;  %156 = vmatpush3.msra.mxu1 %v19_v0  ;;  %v133_v6 = vld [vmem:[%s221_s2] ss:$0 sm:$0xff] }
   0x4   :  { %146 = vmatprep.subr.mxu0 %v18_v1  ;;  %155 = vmatprep.subr.mxu1 %v18_v1 }
   0x5   :  { %147 = vmatpush3.msra.mxu0 %v18_v1  ;;  %157 = vmatpush3.msra.mxu1 %v18_v1 }
   0x6   :  { %148 = vmatprep.mubr.msk.f32.mxu0 %vm27_vm0, %v14_v2  ;;  %151 = vmatprep.mubr.msk.f32.mxu1 %vm27_vm0, %v16_v3 }
   0x7   :  { %149 = vmatmul.mubr.msk.f32.vlgmr.msra.gmra.mxu0 %vm27_vm0, %v15_v4  ;;  %152 = vmatmul.mubr.msk.f32.vlgmr.msra.gmra.mxu1 %vm27_vm0, %v17_v5 }
  0xc7   :  { %v150_v7 = vpop.f32.mrf.mxu0  ;;  %v153_v8 = vpop.f32.mrf.mxu1 }
  0xc8   :  { %v112_v9 = vadd.f32 %v150_v7, %v133_v6  ;;  %v122_v10 = vadd.f32 %v153_v8, %v133_v6 }
  0xc9   :  { %v106_v11 = vpop.f32.mrf.mxu0  ;;  %v116_v12 = vpop.f32.mrf.mxu1 }
  0xca   :  { %126 = vst.msk [vmem:[%s222_s3 + $0x8] sm:$0xff] %vm27_vm0, %v112_v9  ;;  %128 = vst.msk [vmem:[%s222_s3 + $0x18] sm:$0xff] %vm27_vm0, %v122_v10  ;;  %v107_v13 = vadd.f32 %v133_v6, %v106_v11  ;;  %v117_v14 = vadd.f32 %v133_v6, %v116_v12 }
  0xcc   :  { %125 = vst.msk [vmem:[%s222_s3] sm:$0xff] %vm27_vm0, %v107_v13  ;;  %127 = vst.msk [vmem:[%s222_s3 + $0x10] sm:$0xff] %vm27_vm0, %v117_v14 }

// kernel: struct_info_forward.2
= control target key start
LH: loop header
LB: loop body
LE: loop exit
PB: predicated region body
PF: predicated region fallthrough
CT: control target
= control target key end

     0   :  { %vm17693_vm0 = vmmov 0   ;;  %vm12919_vm1 = vcmask 130048   ;;  %s22107_s1 = inlined_call_operand.vmem [shape: bf16[16384,16], index: 1, kind: input, shape index: {}]   ;;  %s22108_s0 = inlined_call_operand.vmem [shape: bf16[32,16384], index: 0, kind: input, shape index: {}]   ;;  %s22109_s4 = inlined_call_operand.vmem [shape: f32[16,16], index: 4, kind: input, shape index: {}]   ;;  %s22110_s2 = inlined_call_operand.vmem [shape: f32[1,16], index: 2, kind: input, shape index: {}]   ;;  %s22111_s3 = inlined_call_operand.vmem [shape: f32[1,16], index: 3, kind: input, shape index: {}]   ;;  %s22112_s5 = inlined_call_operand.vmem [shape: f32[1,16], index: 5, kind: input, shape index: {}]   ;;  %s22113_s6 = inlined_call_operand.vmem [shape: f32[1,16], index: 6, kind: input, shape index: {}]   ;;  %s22114_s7 = inlined_call_operand.vmem [shape: f32[32,16], index: 7, kind: output, shape index: {0}]   ;;  %s22115_s8 = inlined_call_operand.vmem [shape: f32[2,16,16], index: 8, kind: output, shape index: {1}]  }
   0x1   :  { %v16660_v0 = vld [vmem:[%s22107_s1 + $0x78] sm:$0xff]   ;;  %v16664_v4 = vld [vmem:[%s22107_s1 + $0x70] sm:$0xff]   ;;  %v16668_v8 = vld [vmem:[%s22107_s1 + $0x68] sm:$0xff]  }
   0x2   :  { %v16661_v1 = vld [vmem:[%s22107_s1 + $0xf8] sm:$0xff]   ;;  %14801 = vmatprep.subr.bf16.mxu0 %v16660_v0  ;;  %v16665_v5 = vld [vmem:[%s22107_s1 + $0xf0] sm:$0xff]   ;;  %v16669_v9 = vld [vmem:[%s22107_s1 + $0xe8] sm:$0xff]  }
   0x3   :  { %v16662_v2 = vld [vmem:[%s22107_s1 + $0x38] sm:$0xff]   ;;  %14829 = vmatprep.subr.bf16.mxu1 %v16661_v1  ;;  %v16666_v6 = vld [vmem:[%s22107_s1 + $0x30] sm:$0xff]   ;;  %v16670_v10 = vld [vmem:[%s22107_s1 + $0x28] sm:$0xff]  }
   0x4   :  { %v16663_v3 = vld [vmem:[%s22107_s1 + $0xb8] sm:$0xff]   ;;  %14802 = vmatpush3.bf16.msra.mxu0 %v16662_v2  ;;  %v16667_v7 = vld [vmem:[%s22107_s1 + $0xb0] sm:$0xff]   ;;  %v16671_v11 = vld [vmem:[%s22107_s1 + $0xa8] sm:$0xff]  }
   0x5   :  { %14830 = vmatpush3.bf16.msra.mxu1 %v16663_v3  ;;  %14803 = vmatprep.subr.bf16.mxu0 %v16664_v4  ;;  %v16672_v12 = vld [vmem:[%s22107_s1 + $0x60] sm:$0xff]   ;;  %v16676_v16 = vld [vmem:[%s22107_s1 + $0x58] sm:$0xff]   ;;  %v16680_v20 = vld [vmem:[%s22107_s1 + $0x50] sm:$0xff]  }
   0x6   :  { %14831 = vmatprep.subr.bf16.mxu1 %v16665_v5  ;;  %v16673_v13 = vld [vmem:[%s22107_s1 + $0xe0] sm:$0xff]   ;;  %v16677_v17 = vld [vmem:[%s22107_s1 + $0xd8] sm:$0xff]   ;;  %v16681_v21 = vld [vmem:[%s22107_s1 + $0xd0] sm:$0xff]  }
   0x7   :  { %v16674_v14 = vld [vmem:[%s22107_s1 + $0x20] sm:$0xff]   ;;  %v16678_v18 = vld [vmem:[%s22107_s1 + $0x18] sm:$0xff]   ;;  %v16682_v22 = vld [vmem:[%s22107_s1 + $0x10] sm:$0xff]  }
   0x8   :  { %14804 = vmatpush3.bf16.msra.mxu0 %v16666_v6  ;;  %v16675_v15 = vld [vmem:[%s22107_s1 + $0xa0] sm:$0xff]   ;;  %v16679_v19 = vld [vmem:[%s22107_s1 + $0x98] sm:$0xff]   ;;  %v16683_v23 = vld [vmem:[%s22107_s1 + $0x90] sm:$0xff]  }
   0x9   :  { %14832 = vmatpush3.bf16.msra.mxu1 %v16667_v7  ;;  %14805 = vmatprep.subr.bf16.mxu0 %v16668_v8  ;;  %v16684_v24 = vld [vmem:[%s22107_s1 + $0x48] sm:$0xff]   ;;  %v16688_v28 = vld [vmem:[%s22107_s1 + $0x40] sm:$0xff]   ;;  %v16692_v40 = vld [vmem:[%s22107_s1 + $0x178] sm:$0xff]  }
   0xa   :  { %14833 = vmatprep.subr.bf16.mxu1 %v16669_v9  ;;  %v16685_v25 = vld [vmem:[%s22107_s1 + $0xc8] sm:$0xff]   ;;  %v16689_v29 = vld [vmem:[%s22107_s1 + $0xc0] sm:$0xff]   ;;  %v16693_v41 = vld [vmem:[%s22107_s1 + $0x1f8] sm:$0xff]  }
   0xb   :  { %v16686_v26 = vld [vmem:[%s22107_s1 + $0x8] sm:$0xff]   ;;  %v16690_v30 = vld [vmem:[%s22107_s1] sm:$0xff]   ;;  %v16694_v42 = vld [vmem:[%s22107_s1 + $0x138] sm:$0xff]  }
   0xc   :  { %14806 = vmatpush3.bf16.msra.mxu0 %v16670_v10  ;;  %v16687_v27 = vld [vmem:[%s22107_s1 + $0x88] sm:$0xff]   ;;  %v16691_v31 = vld [vmem:[%s22107_s1 + $0x80] sm:$0xff]   ;;  %v16695_v43 = vld [vmem:[%s22107_s1 + $0x1b8] sm:$0xff]  }
   0xd   :  { %14834 = vmatpush3.bf16.msra.mxu1 %v16671_v11  ;;  %14807 = vmatprep.subr.bf16.mxu0 %v16672_v12  ;;  %v29_v32 = vld [vmem:[%s22108_s0] sm:$0xff]  ;;  %v30_v34 = vld [vmem:[%s22108_s0 + $0x8] sm:$0xff]  ;;  %v16696_v44 = vld [vmem:[%s22107_s1 + $0x170] sm:$0xff]  }
   0xe   :  { %14835 = vmatprep.subr.bf16.mxu1 %v16673_v13  ;;  %v93_v33 = vld [vmem:[%s22108_s0 + $0x200] sm:$0xff]  ;;  %v94_v37 = vld [vmem:[%s22108_s0 + $0x208] sm:$0xff]  ;;  %v16697_v45 = vld [vmem:[%s22107_s1 + $0x1f0] sm:$0xff]  }
   0xf   :  { %v13499_v35 = vcombine.low %v29_v32, %v93_v33  ;;  %v13500_v36 = vcombine.high %v29_v32, %v93_v33  ;;  %v13501_v38 = vcombine.low %v30_v34, %v94_v37  ;;  %v13502_v39 = vcombine.high %v30_v34, %v94_v37  ;;  %v16698_v46 = vld [vmem:[%s22107_s1 + $0x130] sm:$0xff]   ;;  %v16700_v48 = vld [vmem:[%s22107_s1 + $0x168] sm:$0xff]   ;;  %v16704_v52 = vld [vmem:[%s22107_s1 + $0x160] sm:$0xff]  }
  0x10   :  { %14808 = vmatpush3.bf16.msra.mxu0 %v16674_v14  ;;  %v16699_v47 = vld [vmem:[%s22107_s1 + $0x1b0] sm:$0xff]   ;;  %v16701_v49 = vld [vmem:[%s22107_s1 + $0x1e8] sm:$0xff]   ;;  %v16705_v53 = vld [vmem:[%s22107_s1 + $0x1e0] sm:$0xff]  }
  0x11   :  { %14836 = vmatpush3.bf16.msra.mxu1 %v16675_v15  ;;  %14809 = vmatprep.subr.bf16.mxu0 %v16676_v16  ;;  %v16702_v50 = vld [vmem:[%s22107_s1 + $0x128] sm:$0xff]   ;;  %v16706_v54 = vld [vmem:[%s22107_s1 + $0x120] sm:$0xff]   ;;  %v16708_v56 = vld [vmem:[%s22107_s1 + $0x158] sm:$0xff]  }
  0x12   :  { %14837 = vmatprep.subr.bf16.mxu1 %v16677_v17  ;;  %9789 = vmatprep.mubr.bf16.mxu0 %v13500_v36  ;;  %v16703_v51 = vld [vmem:[%s22107_s1 + $0x1a8] sm:$0xff]   ;;  %v16707_v55 = vld [vmem:[%s22107_s1 + $0x1a0] sm:$0xff]   ;;  %v16709_v57 = vld [vmem:[%s22107_s1 + $0x1d8] sm:$0xff]  }
  0x13   :  { %9838 = vmatprep.mubr.bf16.mxu1 %v13502_v39  ;;  %v16710_v58 = vld [vmem:[%s22107_s1 + $0x118] sm:$0xff]   ;;  %v157_v60 = vld [vmem:[%s22108_s0 + $0x400] sm:$0xff]  ;;  %v158_v63 = vld [vmem:[%s22108_s0 + $0x408] sm:$0xff] }
  0x14   :  { %14810 = vmatpush3.bf16.msra.mxu0 %v16678_v18  ;;  %v16711_v59 = vld [vmem:[%s22107_s1 + $0x198] sm:$0xff]   ;;  %v221_v61 = vld [vmem:[%s22108_s0 + $0x600] sm:$0xff]  ;;  %v222_v0 = vld [vmem:[%s22108_s0 + $0x608] sm:$0xff] }
  0x15   :  { %14838 = vmatpush3.bf16.msra.mxu1 %v16679_v19  ;;  %14811 = vmatprep.subr.bf16.mxu0 %v16680_v20  ;;  %v13628_v62 = vcombine.high %v157_v60, %v221_v61  ;;  %v13627_v1 = vcombine.low %v157_v60, %v221_v61  ;;  %v13630_v2 = vcombine.high %v158_v63, %v222_v0  ;;  %v16712_v4 = vld [vmem:[%s22107_s1 + $0x150] sm:$0xff]   ;;  %v16716_v8 = vld [vmem:[%s22107_s1 + $0x148] sm:$0xff]   ;;  %v16720_v12 = vld [vmem:[%s22107_s1 + $0x140] sm:$0xff]  }
  0x16   :  { %14839 = vmatprep.subr.bf16.mxu1 %v16681_v21  ;;  %v13629_v3 = vcombine.low %v158_v63, %v222_v0  ;;  %v16713_v5 = vld [vmem:[%s22107_s1 + $0x1d0] sm:$0xff]   ;;  %v16717_v9 = vld [vmem:[%s22107_s1 + $0x1c8] sm:$0xff]   ;;  %v16721_v13 = vld [vmem:[%s22107_s1 + $0x1c0] sm:$0xff]  }
  0x17   :  { %v16714_v6 = vld [vmem:[%s22107_s1 + $0x110] sm:$0xff]   ;;  %v16718_v10 = vld [vmem:[%s22107_s1 + $0x108] sm:$0xff]   ;;  %v16722_v14 = vld [vmem:[%s22107_s1 + $0x100] sm:$0xff]  }
  0x18   :  { %14812 = vmatpush3.bf16.msra.mxu0 %v16682_v22  ;;  %v16715_v7 = vld [vmem:[%s22107_s1 + $0x190] sm:$0xff]   ;;  %v16719_v11 = vld [vmem:[%s22107_s1 + $0x188] sm:$0xff]   ;;  %v16723_v15 = vld [vmem:[%s22107_s1 + $0x180] sm:$0xff]  }
  0x19   :  { %14840 = vmatpush3.bf16.msra.mxu1 %v16683_v23  ;;  %14813 = vmatprep.subr.bf16.mxu0 %v16684_v24  ;;  %v31_v16 = vld [vmem:[%s22108_s0 + $0x10] sm:$0xff]  ;;  %v32_v18 = vld [vmem:[%s22108_s0 + $0x18] sm:$0xff]  ;;  %v16732_v36 = vld [vmem:[%s22107_s1 + $0x268] sm:$0xff]  }
  0x1a   :  { %14841 = vmatprep.subr.bf16.mxu1 %v16685_v25  ;;  %v95_v17 = vld [vmem:[%s22108_s0 + $0x210] sm:$0xff]  ;;  %v96_v19 = vld [vmem:[%s22108_s0 + $0x218] sm:$0xff]  ;;  %v16733_v37 = vld [vmem:[%s22107_s1 + $0x2e8] sm:$0xff]  }
  0x1b   :  { %v13503_v20 = vcombine.low %v31_v16, %v95_v17  ;;  %v13504_v21 = vcombine.high %v31_v16, %v95_v17  ;;  %v13505_v22 = vcombine.low %v32_v18, %v96_v19  ;;  %v13506_v23 = vcombine.high %v32_v18, %v96_v19  ;;  %v16724_v24 = vld [vmem:[%s22107_s1 + $0x278] sm:$0xff]   ;;  %v159_v32 = vld [vmem:[%s22108_s0 + $0x410] sm:$0xff]  ;;  %v16752_v60 = vld [vmem:[%s22107_s1 + $0x240] sm:$0xff]  }
  0x1c   :  { %14814 = vmatpush3.bf16.msra.mxu0 %v16686_v26  ;;  %v16725_v25 = vld [vmem:[%s22107_s1 + $0x2f8] sm:$0xff]   ;;  %v223_v33 = vld [vmem:[%s22108_s0 + $0x610] sm:$0xff]  ;;  %v16753_v61 = vld [vmem:[%s22107_s1 + $0x2c0] sm:$0xff]  }
  0x1d   :  { %14842 = vmatpush3.bf16.msra.mxu1 %v16687_v27  ;;  %14815 = vmatprep.subr.bf16.mxu0 %v16688_v28  ;;  %v16726_v26 = vld [vmem:[%s22107_s1 + $0x238] sm:$0xff]   ;;  %v16728_v28 = vld [vmem:[%s22107_s1 + $0x270] sm:$0xff]   ;;  %v13632_v34 = vcombine.high %v159_v32, %v223_v33  ;;  %v16755_v63 = vld [vmem:[%s22107_s1 + $0x280] sm:$0xff]  }
  0x1e   :  { %14843 = vmatprep.subr.bf16.mxu1 %v16689_v29  ;;  %v16727_v27 = vld [vmem:[%s22107_s1 + $0x2b8] sm:$0xff]   ;;  %v16729_v29 = vld [vmem:[%s22107_s1 + $0x2f0] sm:$0xff]   ;;  %v33_v0 = vld [vmem:[%s22108_s0 + $0x20] sm:$0xff] }
  0x1f   :  { %v224_v39 = vld [vmem:[%s22108_s0 + $0x618] sm:$0xff]  ;;  %v161_v16 = vld [vmem:[%s22108_s0 + $0x420] sm:$0xff] }
  0x20   :  { %14816 = vmatpush3.bf16.msra.mxu0 %v16690_v30  ;;  %v16730_v30 = vld [vmem:[%s22107_s1 + $0x230] sm:$0xff]   ;;  %v225_v17 = vld [vmem:[%s22108_s0 + $0x620] sm:$0xff] }
  0x21   :  { %14844 = vmatpush3.bf16.msra.mxu1 %v16691_v31  ;;  %14857 = vmatprep.subr.bf16.mxu0 %v16692_v40  ;;  %v16731_v31 = vld [vmem:[%s22107_s1 + $0x2b0] sm:$0xff]   ;;  %v13636_v18 = vcombine.high %v161_v16, %v225_v17  ;;  %v13635_v19 = vcombine.low %v161_v16, %v225_v17  ;;  %v16804_v16 = vld [vmem:[%s22107_s1 + $0x458] sm:$0xff]  }
  0x22   :  { %14885 = vmatprep.subr.bf16.mxu1 %v16693_v41  ;;  %v16734_v41 = vld [vmem:[%s22107_s1 + $0x228] sm:$0xff]   ;;  %v16805_v17 = vld [vmem:[%s22107_s1 + $0x4d8] sm:$0xff]  }
  0x23   :  { %9790 = vmatmul.mubr.bf16.vlgmr.msra.gmra.mxu0 %v13499_v35  ;;  %v13631_v35 = vcombine.low %v159_v32, %v223_v33  ;;  %v16772_v32 = vld [vmem:[%s22107_s1 + $0x358] sm:$0xff]  }
  0x24   :  { %9839 = vmatmul.mubr.bf16.vlgmr.msra.gmra.mxu1 %v13501_v38  ;;  %14858 = vmatpush3.bf16.msra.mxu0 %v16694_v42  ;;  %v160_v38 = vld [vmem:[%s22108_s0 + $0x418] sm:$0xff] }
  0x25   :  { %14886 = vmatpush3.bf16.msra.mxu1 %v16695_v43  ;;  %14859 = vmatprep.subr.bf16.mxu0 %v16696_v44  ;;  %v13634_v40 = vcombine.high %v160_v38, %v224_v39  ;;  %v13633_v42 = vcombine.low %v160_v38, %v224_v39  ;;  %v16735_v43 = vld [vmem:[%s22107_s1 + $0x2a8] sm:$0xff]   ;;  %v16736_v44 = vld [vmem:[%s22107_s1 + $0x260] sm:$0xff]   ;;  %v16773_v33 = vld [vmem:[%s22107_s1 + $0x3d8] sm:$0xff]  }
  0x26   :  { %14887 = vmatprep.subr.bf16.mxu1 %v16697_v45  ;;  %9797 = vmatprep.mubr.bf16.mxu0 %v13628_v62  ;;  %v16737_v45 = vld [vmem:[%s22107_s1 + $0x2e0] sm:$0xff]   ;;  %v16778_v38 = vld [vmem:[%s22107_s1 + $0x310] sm:$0xff]  }
  0x27   :  { %9846 = vmatprep.mubr.bf16.mxu1 %v13630_v2  ;;  %v16754_v62 = vld [vmem:[%s22107_s1 + $0x200] sm:$0xff]   ;;  %v16779_v39 = vld [vmem:[%s22107_s1 + $0x390] sm:$0xff]  }
  0x28   :  { %14860 = vmatpush3.bf16.msra.mxu0 %v16698_v46  ;;  %v16738_v46 = vld [vmem:[%s22107_s1 + $0x220] sm:$0xff]  }
  0x29   :  { %14888 = vmatpush3.bf16.msra.mxu1 %v16699_v47  ;;  %14861 = vmatprep.subr.bf16.mxu0 %v16700_v48  ;;  %v16739_v47 = vld [vmem:[%s22107_s1 + $0x2a0] sm:$0xff]   ;;  %v16740_v48 = vld [vmem:[%s22107_s1 + $0x258] sm:$0xff]  }
  0x2a   :  { %14889 = vmatprep.subr.bf16.mxu1 %v16701_v49  ;;  %v16741_v49 = vld [vmem:[%s22107_s1 + $0x2d8] sm:$0xff]  }
  0x2b   :  { %9798 = vmatmul.mubr.bf16.gmra.mxu0 %v13627_v1  ;;  %v97_v1 = vld [vmem:[%s22108_s0 + $0x220] sm:$0xff] }
  0x2c   :  { %14862 = vmatpush3.bf16.msra.mxu0 %v16702_v50  ;;  %9847 = vmatmul.mubr.bf16.gmra.mxu1 %v13629_v3  ;;  %v16742_v50 = vld [vmem:[%s22107_s1 + $0x218] sm:$0xff]   ;;  %v13507_v2 = vcombine.low %v33_v0, %v97_v1  ;;  %v13508_v3 = vcombine.high %v33_v0, %v97_v1  ;;  %v163_v0 = vld [vmem:[%s22108_s0 + $0x430] sm:$0xff] }
  0x2d   :  { %14890 = vmatpush3.bf16.msra.mxu1 %v16703_v51  ;;  %14863 = vmatprep.subr.bf16.mxu0 %v16704_v52  ;;  %v16743_v51 = vld [vmem:[%s22107_s1 + $0x298] sm:$0xff]   ;;  %v16744_v52 = vld [vmem:[%s22107_s1 + $0x250] sm:$0xff]  }
  0x2e   :  { %14891 = vmatprep.subr.bf16.mxu1 %v16705_v53  ;;  %9887 = vmatprep.mubr.bf16.mxu0 %v13504_v21  ;;  %v16745_v53 = vld [vmem:[%s22107_s1 + $0x2d0] sm:$0xff]   ;;  %v16765_v21 = vld [vmem:[%s22107_s1 + $0x3e8] sm:$0xff]  }
  0x2f   :  { %9936 = vmatprep.mubr.bf16.mxu1 %v13506_v23  ;;  %v226_v23 = vld [vmem:[%s22108_s0 + $0x628] sm:$0xff]  ;;  %v227_v1 = vld [vmem:[%s22108_s0 + $0x630] sm:$0xff] }
  0x30   :  { %14864 = vmatpush3.bf16.msra.mxu0 %v16706_v54  ;;  %v16746_v54 = vld [vmem:[%s22107_s1 + $0x210] sm:$0xff]  }
  0x31   :  { %14892 = vmatpush3.bf16.msra.mxu1 %v16707_v55  ;;  %14865 = vmatprep.subr.bf16.mxu0 %v16708_v56  ;;  %v16747_v55 = vld [vmem:[%s22107_s1 + $0x290] sm:$0xff]   ;;  %v16748_v56 = vld [vmem:[%s22107_s1 + $0x248] sm:$0xff]  }
  0x32   :  { %14893 = vmatprep.subr.bf16.mxu1 %v16709_v57  ;;  %v16749_v57 = vld [vmem:[%s22107_s1 + $0x2c8] sm:$0xff]  }
  0x34   :  { %14866 = vmatpush3.bf16.msra.mxu0 %v16710_v58  ;;  %v16750_v58 = vld [vmem:[%s22107_s1 + $0x208] sm:$0xff]  }
  0x35   :  { %14894 = vmatpush3.bf16.msra.mxu1 %v16711_v59  ;;  %14867 = vmatprep.subr.bf16.mxu0 %v16712_v4  ;;  %v16751_v59 = vld [vmem:[%s22107_s1 + $0x288] sm:$0xff]  }
  0x36   :  { %14895 = vmatprep.subr.bf16.mxu1 %v16713_v5  ;;  %v34_v4 = vld [vmem:[%s22108_s0 + $0x28] sm:$0xff] }
  0x37   :  { %v98_v5 = vld [vmem:[%s22108_s0 + $0x228] sm:$0xff] }
  0x38   :  { %14868 = vmatpush3.bf16.msra.mxu0 %v16714_v6  ;;  %v13509_v6 = vcombine.low %v34_v4, %v98_v5 }
  0x39   :  { %14896 = vmatpush3.bf16.msra.mxu1 %v16715_v7  ;;  %14869 = vmatprep.subr.bf16.mxu0 %v16716_v8  ;;  %v13510_v7 = vcombine.high %v34_v4, %v98_v5  ;;  %v16756_v8 = vld [vmem:[%s22107_s1 + $0x378] sm:$0xff]   ;;  %v16796_v4 = vld [vmem:[%s22107_s1 + $0x468] sm:$0xff]  }
  0x3a   :  { %14897 = vmatprep.subr.bf16.mxu1 %v16717_v9  ;;  %v16757_v9 = vld [vmem:[%s22107_s1 + $0x3f8] sm:$0xff]   ;;  %v16797_v5 = vld [vmem:[%s22107_s1 + $0x4e8] sm:$0xff]  }
  0x3c   :  { %14870 = vmatpush3.bf16.msra.mxu0 %v16718_v10  ;;  %v16758_v10 = vld [vmem:[%s22107_s1 + $0x338] sm:$0xff]  }
  0x3d   :  { %14898 = vmatpush3.bf16.msra.mxu1 %v16719_v11  ;;  %14871 = vmatprep.subr.bf16.mxu0 %v16720_v12  ;;  %v16759_v11 = vld [vmem:[%s22107_s1 + $0x3b8] sm:$0xff]   ;;  %v16760_v12 = vld [vmem:[%s22107_s1 + $0x370] sm:$0xff]  }
  0x3e   :  { %14899 = vmatprep.subr.bf16.mxu1 %v16721_v13  ;;  %v16761_v13 = vld [vmem:[%s22107_s1 + $0x3f0] sm:$0xff]  }
  0x40   :  { %14872 = vmatpush3.bf16.msra.mxu0 %v16722_v14  ;;  %v16762_v14 = vld [vmem:[%s22107_s1 + $0x330] sm:$0xff]  }
  0x41   :  { %14900 = vmatpush3.bf16.msra.mxu1 %v16723_v15  ;;  %14913 = vmatprep.subr.bf16.mxu0 %v16724_v24  ;;  %v16763_v15 = vld [vmem:[%s22107_s1 + $0x3b0] sm:$0xff]  }
  0x42   :  { %14941 = vmatprep.subr.bf16.mxu1 %v16725_v25  ;;  %v16766_v25 = vld [vmem:[%s22107_s1 + $0x328] sm:$0xff]  }
  0x43   :  { %9888 = vmatmul.mubr.bf16.vlgmr.msra.gmra.mxu0 %v13503_v20  ;;  %v16764_v20 = vld [vmem:[%s22107_s1 + $0x368] sm:$0xff]  }
  0x44   :  { %9937 = vmatmul.mubr.bf16.vlgmr.msra.gmra.mxu1 %v13505_v22  ;;  %14914 = vmatpush3.bf16.msra.mxu0 %v16726_v26  ;;  %v162_v22 = vld [vmem:[%s22108_s0 + $0x428] sm:$0xff] }
  0x45   :  { %14942 = vmatpush3.bf16.msra.mxu1 %v16727_v27  ;;  %14915 = vmatprep.subr.bf16.mxu0 %v16728_v28  ;;  %v13638_v24 = vcombine.high %v162_v22, %v226_v23  ;;  %v13637_v26 = vcombine.low %v162_v22, %v226_v23  ;;  %v16767_v27 = vld [vmem:[%s22107_s1 + $0x3a8] sm:$0xff]   ;;  %v16768_v28 = vld [vmem:[%s22107_s1 + $0x360] sm:$0xff]   ;;  %v16810_v22 = vld [vmem:[%s22107_s1 + $0x410] sm:$0xff]  }
  0x46   :  { %14943 = vmatprep.subr.bf16.mxu1 %v16729_v29  ;;  %9895 = vmatprep.mubr.bf16.mxu0 %v13632_v34  ;;  %v16769_v29 = vld [vmem:[%s22107_s1 + $0x3e0] sm:$0xff]   ;;  %v16774_v34 = vld [vmem:[%s22107_s1 + $0x318] sm:$0xff]   ;;  %v16811_v23 = vld [vmem:[%s22107_s1 + $0x490] sm:$0xff]  }
  0x47   :  { %9944 = vmatprep.mubr.bf16.mxu1 %v13634_v40  ;;  %v16780_v40 = vld [vmem:[%s22107_s1 + $0x348] sm:$0xff]  }
  0x48   :  { %14916 = vmatpush3.bf16.msra.mxu0 %v16730_v30  ;;  %v16770_v30 = vld [vmem:[%s22107_s1 + $0x320] sm:$0xff]  }
  0x49   :  { %14944 = vmatpush3.bf16.msra.mxu1 %v16731_v31  ;;  %14917 = vmatprep.subr.bf16.mxu0 %v16732_v36  ;;  %v16771_v31 = vld [vmem:[%s22107_s1 + $0x3a0] sm:$0xff]   ;;  %v16776_v36 = vld [vmem:[%s22107_s1 + $0x350] sm:$0xff]  }
  0x4a   :  { %14945 = vmatprep.subr.bf16.mxu1 %v16733_v37  ;;  %v16777_v37 = vld [vmem:[%s22107_s1 + $0x3d0] sm:$0xff]  }
  0x4b   :  { %9896 = vmatmul.mubr.bf16.gmra.mxu0 %v13631_v35  ;;  %v16775_v35 = vld [vmem:[%s22107_s1 + $0x398] sm:$0xff]  }
  0x4c   :  { %14918 = vmatpush3.bf16.msra.mxu0 %v16734_v41  ;;  %9945 = vmatmul.mubr.bf16.gmra.mxu1 %v13633_v42  ;;  %v16781_v41 = vld [vmem:[%s22107_s1 + $0x3c8] sm:$0xff]  }
  0x4d   :  { %14946 = vmatpush3.bf16.msra.mxu1 %v16735_v43  ;;  %14919 = vmatprep.subr.bf16.mxu0 %v16736_v44  ;;  %v16782_v42 = vld [vmem:[%s22107_s1 + $0x308] sm:$0xff]   ;;  %v16784_v44 = vld [vmem:[%s22107_s1 + $0x340] sm:$0xff]  }
  0x4e   :  { %14947 = vmatprep.subr.bf16.mxu1 %v16737_v45  ;;  %9985 = vmatprep.mubr.bf16.mxu0 %v13508_v3  ;;  %v16783_v43 = vld [vmem:[%s22107_s1 + $0x388] sm:$0xff]   ;;  %v16785_v45 = vld [vmem:[%s22107_s1 + $0x3c0] sm:$0xff]   ;;  %v13639_v3 = vcombine.low %v163_v0, %v227_v1 }
  0x4f   :  { %10034 = vmatprep.mubr.bf16.mxu1 %v13510_v7  ;;  %v228_v7 = vld [vmem:[%s22108_s0 + $0x638] sm:$0xff] }
  0x50   :  { %14920 = vmatpush3.bf16.msra.mxu0 %v16738_v46  ;;  %v16786_v46 = vld [vmem:[%s22107_s1 + $0x300] sm:$0xff]  }
  0x51   :  { %14948 = vmatpush3.bf16.msra.mxu1 %v16739_v47  ;;  %14921 = vmatprep.subr.bf16.mxu0 %v16740_v48  ;;  %v16787_v47 = vld [vmem:[%s22107_s1 + $0x380] sm:$0xff]   ;;  %v35_v48 = vld [vmem:[%s22108_s0 + $0x30] sm:$0xff] }
  0x52   :  { %14949 = vmatprep.subr.bf16.mxu1 %v16741_v49  ;;  %v99_v49 = vld [vmem:[%s22108_s0 + $0x230] sm:$0xff] }
  0x54   :  { %14922 = vmatpush3.bf16.msra.mxu0 %v16742_v50  ;;  %v36_v50 = vld [vmem:[%s22108_s0 + $0x38] sm:$0xff] }
  0x55   :  { %14950 = vmatpush3.bf16.msra.mxu1 %v16743_v51  ;;  %14923 = vmatprep.subr.bf16.mxu0 %v16744_v52  ;;  %v13511_v51 = vcombine.low %v35_v48, %v99_v49  ;;  %v13512_v52 = vcombine.high %v35_v48, %v99_v49  ;;  %v165_v48 = vld [vmem:[%s22108_s0 + $0x440] sm:$0xff] }
  0x56   :  { %14951 = vmatprep.subr.bf16.mxu1 %v16745_v53  ;;  %v100_v53 = vld [vmem:[%s22108_s0 + $0x238] sm:$0xff]  ;;  %v229_v49 = vld [vmem:[%s22108_s0 + $0x640] sm:$0xff] }
  0x58   :  { %14924 = vmatpush3.bf16.msra.mxu0 %v16746_v54  ;;  %v13513_v54 = vcombine.low %v36_v50, %v100_v53 }
  0x59   :  { %14952 = vmatpush3.bf16.msra.mxu1 %v16747_v55  ;;  %14925 = vmatprep.subr.bf16.mxu0 %v16748_v56  ;;  %v13514_v55 = vcombine.high %v36_v50, %v100_v53  ;;  %v16788_v56 = vld [vmem:[%s22107_s1 + $0x478] sm:$0xff]   ;;  %v13644_v50 = vcombine.high %v165_v48, %v229_v49  ;;  %v16829_v53 = vld [vmem:[%s22107_s1 + $0x5e8] sm:$0xff]  }
  0x5a   :  { %14953 = vmatprep.subr.bf16.mxu1 %v16749_v57  ;;  %v16789_v57 = vld [vmem:[%s22107_s1 + $0x4f8] sm:$0xff]  }
  0x5c   :  { %14926 = vmatpush3.bf16.msra.mxu0 %v16750_v58  ;;  %v16790_v58 = vld [vmem:[%s22107_s1 + $0x438] sm:$0xff]  }
  0x5d   :  { %14954 = vmatpush3.bf16.msra.mxu1 %v16751_v59  ;;  %14927 = vmatprep.subr.bf16.mxu0 %v16752_v60  ;;  %v16791_v59 = vld [vmem:[%s22107_s1 + $0x4b8] sm:$0xff]   ;;  %v16792_v60 = vld [vmem:[%s22107_s1 + $0x470] sm:$0xff]  }
  0x5e   :  { %14955 = vmatprep.subr.bf16.mxu1 %v16753_v61  ;;  %v16793_v61 = vld [vmem:[%s22107_s1 + $0x4f0] sm:$0xff]  }
  0x60   :  { %14928 = vmatpush3.bf16.msra.mxu0 %v16754_v62  ;;  %v16794_v62 = vld [vmem:[%s22107_s1 + $0x430] sm:$0xff]  }
  0x61   :  { %14956 = vmatpush3.bf16.msra.mxu1 %v16755_v63  ;;  %14969 = vmatprep.subr.bf16.mxu0 %v16756_v8  ;;  %v16795_v63 = vld [vmem:[%s22107_s1 + $0x4b0] sm:$0xff]  }
  0x62   :  { %14997 = vmatprep.subr.bf16.mxu1 %v16757_v9  ;;  %v16798_v9 = vld [vmem:[%s22107_s1 + $0x428] sm:$0xff]  }
  0x63   :  { %9986 = vmatmul.mubr.bf16.vlgmr.msra.gmra.mxu0 %v13507_v2  ;;  %v13640_v2 = vcombine.high %v163_v0, %v227_v1  ;;  %v16836_v0 = vld [vmem:[%s22107_s1 + $0x558] sm:$0xff]  }
  0x64   :  { %10035 = vmatmul.mubr.bf16.vlgmr.msra.gmra.mxu1 %v13509_v6  ;;  %14970 = vmatpush3.bf16.msra.mxu0 %v16758_v10  ;;  %v164_v6 = vld [vmem:[%s22108_s0 + $0x438] sm:$0xff] }
  0x65   :  { %14998 = vmatpush3.bf16.msra.mxu1 %v16759_v11  ;;  %14971 = vmatprep.subr.bf16.mxu0 %v16760_v12  ;;  %v13642_v8 = vcombine.high %v164_v6, %v228_v7  ;;  %v13641_v10 = vcombine.low %v164_v6, %v228_v7  ;;  %v16799_v11 = vld [vmem:[%s22107_s1 + $0x4a8] sm:$0xff]   ;;  %v16800_v12 = vld [vmem:[%s22107_s1 + $0x460] sm:$0xff]   ;;  %v16837_v1 = vld [vmem:[%s22107_s1 + $0x5d8] sm:$0xff]  }
  0x66   :  { %14999 = vmatprep.subr.bf16.mxu1 %v16761_v13  ;;  %9993 = vmatprep.mubr.bf16.mxu0 %v13636_v18  ;;  %v16801_v13 = vld [vmem:[%s22107_s1 + $0x4e0] sm:$0xff]   ;;  %v16806_v18 = vld [vmem:[%s22107_s1 + $0x418] sm:$0xff]   ;;  %v16842_v6 = vld [vmem:[%s22107_s1 + $0x510] sm:$0xff]  }
  0x67   :  { %10042 = vmatprep.mubr.bf16.mxu1 %v13638_v24  ;;  %v16812_v24 = vld [vmem:[%s22107_s1 + $0x448] sm:$0xff]   ;;  %v16843_v7 = vld [vmem:[%s22107_s1 + $0x590] sm:$0xff]  }
  0x68   :  { %14972 = vmatpush3.bf16.msra.mxu0 %v16762_v14  ;;  %v16802_v14 = vld [vmem:[%s22107_s1 + $0x420] sm:$0xff]  }
  0x69   :  { %15000 = vmatpush3.bf16.msra.mxu1 %v16763_v15  ;;  %14973 = vmatprep.subr.bf16.mxu0 %v16764_v20  ;;  %v16803_v15 = vld [vmem:[%s22107_s1 + $0x4a0] sm:$0xff]   ;;  %v16808_v20 = vld [vmem:[%s22107_s1 + $0x450] sm:$0xff]  }
  0x6a   :  { %15001 = vmatprep.subr.bf16.mxu1 %v16765_v21  ;;  %v16809_v21 = vld [vmem:[%s22107_s1 + $0x4d0] sm:$0xff]  }
  0x6b   :  { %9994 = vmatmul.mubr.bf16.gmra.mxu0 %v13635_v19  ;;  %v16807_v19 = vld [vmem:[%s22107_s1 + $0x498] sm:$0xff]  }
  0x6c   :  { %14974 = vmatpush3.bf16.msra.mxu0 %v16766_v25  ;;  %10043 = vmatmul.mubr.bf16.gmra.mxu1 %v13637_v26  ;;  %v16813_v25 = vld [vmem:[%s22107_s1 + $0x4c8] sm:$0xff]  }
  0x6d   :  { %15002 = vmatpush3.bf16.msra.mxu1 %v16767_v27  ;;  %14975 = vmatprep.subr.bf16.mxu0 %v16768_v28  ;;  %v16814_v26 = vld [vmem:[%s22107_s1 + $0x408] sm:$0xff]   ;;  %v16816_v28 = vld [vmem:[%s22107_s1 + $0x440] sm:$0xff]  }
  0x6e   :  { %15003 = vmatprep.subr.bf16.mxu1 %v16769_v29  ;;  %10083 = vmatprep.mubr.bf16.mxu0 %v13512_v52  ;;  %v16815_v27 = vld [vmem:[%s22107_s1 + $0x488] sm:$0xff]   ;;  %v16817_v29 = vld [vmem:[%s22107_s1 + $0x4c0] sm:$0xff]  }
  0x6f   :  { %10132 = vmatprep.mubr.bf16.mxu1 %v13514_v55  ;;  %v16828_v52 = vld [vmem:[%s22107_s1 + $0x568] sm:$0xff]  }
  0x70   :  { %14976 = vmatpush3.bf16.msra.mxu0 %v16770_v30  ;;  %v16818_v30 = vld [vmem:[%s22107_s1 + $0x400] sm:$0xff]   ;;  %v230_v55 = vld [vmem:[%s22108_s0 + $0x648] sm:$0xff] }
  0x71   :  { %15004 = vmatpush3.bf16.msra.mxu1 %v16771_v31  ;;  %14977 = vmatprep.subr.bf16.mxu0 %v16772_v32  ;;  %v16819_v31 = vld [vmem:[%s22107_s1 + $0x480] sm:$0xff]  }
  0x72   :  { %15005 = vmatprep.subr.bf16.mxu1 %v16773_v33  ;;  %v37_v32 = vld [vmem:[%s22108_s0 + $0x40] sm:$0xff] }
  0x73   :  { %v101_v33 = vld [vmem:[%s22108_s0 + $0x240] sm:$0xff] }
  0x74   :  { %14978 = vmatpush3.bf16.msra.mxu0 %v16774_v34  ;;  %v38_v34 = vld [vmem:[%s22108_s0 + $0x48] sm:$0xff] }
  0x75   :  { %15006 = vmatpush3.bf16.msra.mxu1 %v16775_v35  ;;  %14979 = vmatprep.subr.bf16.mxu0 %v16776_v36  ;;  %v102_v35 = vld [vmem:[%s22108_s0 + $0x248] sm:$0xff]  ;;  %v13515_v36 = vcombine.low %v37_v32, %v101_v33 }
  0x76   :  { %15007 = vmatprep.subr.bf16.mxu1 %v16777_v37  ;;  %v13516_v37 = vcombine.high %v37_v32, %v101_v33  ;;  %v167_v32 = vld [vmem:[%s22108_s0 + $0x450] sm:$0xff] }
  0x77   :  { %v231_v33 = vld [vmem:[%s22108_s0 + $0x650] sm:$0xff] }
  0x78   :  { %14980 = vmatpush3.bf16.msra.mxu0 %v16778_v38  ;;  %v13517_v38 = vcombine.low %v38_v34, %v102_v35 }
  0x79   :  { %15008 = vmatpush3.bf16.msra.mxu1 %v16779_v39  ;;  %14981 = vmatprep.subr.bf16.mxu0 %v16780_v40  ;;  %v13518_v39 = vcombine.high %v38_v34, %v102_v35  ;;  %v16820_v40 = vld [vmem:[%s22107_s1 + $0x578] sm:$0xff]   ;;  %v13648_v34 = vcombine.high %v167_v32, %v231_v33  ;;  %v13647_v35 = vcombine.low %v167_v32, %v231_v33 }
  0x7a   :  { %15009 = vmatprep.subr.bf16.mxu1 %v16781_v41  ;;  %v16821_v41 = vld [vmem:[%s22107_s1 + $0x5f8] sm:$0xff]  }
  0x7c   :  { %14982 = vmatpush3.bf16.msra.mxu0 %v16782_v42  ;;  %v16822_v42 = vld [vmem:[%s22107_s1 + $0x538] sm:$0xff]  }
  0x7d   :  { %15010 = vmatpush3.bf16.msra.mxu1 %v16783_v43  ;;  %14983 = vmatprep.subr.bf16.mxu0 %v16784_v44  ;;  %v16823_v43 = vld [vmem:[%s22107_s1 + $0x5b8] sm:$0xff]   ;;  %v16824_v44 = vld [vmem:[%s22107_s1 + $0x570] sm:$0xff]  }
  0x7e   :  { %15011 = vmatprep.subr.bf16.mxu1 %v16785_v45  ;;  %v16825_v45 = vld [vmem:[%s22107_s1 + $0x5f0] sm:$0xff]  }
  0x80   :  { %14984 = vmatpush3.bf16.msra.mxu0 %v16786_v46  ;;  %v16826_v46 = vld [vmem:[%s22107_s1 + $0x530] sm:$0xff]  }
  0x81   :  { %15012 = vmatpush3.bf16.msra.mxu1 %v16787_v47  ;;  %15025 = vmatprep.subr.bf16.mxu0 %v16788_v56  ;;  %v16827_v47 = vld [vmem:[%s22107_s1 + $0x5b0] sm:$0xff]  }
  0x82   :  { %15053 = vmatprep.subr.bf16.mxu1 %v16789_v57  ;;  %v16830_v57 = vld [vmem:[%s22107_s1 + $0x528] sm:$0xff]  }
  0x83   :  { %10084 = vmatmul.mubr.bf16.vlgmr.msra.gmra.mxu0 %v13511_v51  ;;  %v13643_v51 = vcombine.low %v165_v48, %v229_v49  ;;  %v16868_v48 = vld [vmem:[%s22107_s1 + $0x658] sm:$0xff]  }
  0x84   :  { %10133 = vmatmul.mubr.bf16.vlgmr.msra.gmra.mxu1 %v13513_v54  ;;  %15026 = vmatpush3.bf16.msra.mxu0 %v16790_v58  ;;  %v166_v54 = vld [vmem:[%s22108_s0 + $0x448] sm:$0xff]  ;;  %v16869_v49 = vld [vmem:[%s22107_s1 + $0x6d8] sm:$0xff]  }
  0x85   :  { %15054 = vmatpush3.bf16.msra.mxu1 %v16791_v59  ;;  %15027 = vmatprep.subr.bf16.mxu0 %v16792_v60  ;;  %v13646_v56 = vcombine.high %v166_v54, %v230_v55  ;;  %v13645_v58 = vcombine.low %v166_v54, %v230_v55  ;;  %v16831_v59 = vld [vmem:[%s22107_s1 + $0x5a8] sm:$0xff]   ;;  %v16832_v60 = vld [vmem:[%s22107_s1 + $0x560] sm:$0xff]   ;;  %v16873_v54 = vld [vmem:[%s22107_s1 + $0x6d0] sm:$0xff]  }
  0x86   :  { %15055 = vmatprep.subr.bf16.mxu1 %v16793_v61  ;;  %10091 = vmatprep.mubr.bf16.mxu0 %v13640_v2  ;;  %v16833_v61 = vld [vmem:[%s22107_s1 + $0x5e0] sm:$0xff]   ;;  %v16838_v2 = vld [vmem:[%s22107_s1 + $0x518] sm:$0xff]  }
  0x87   :  { %10140 = vmatprep.mubr.bf16.mxu1 %v13642_v8  ;;  %v16844_v8 = vld [vmem:[%s22107_s1 + $0x548] sm:$0xff]  }
  0x88   :  { %15028 = vmatpush3.bf16.msra.mxu0 %v16794_v62  ;;  %v16834_v62 = vld [vmem:[%s22107_s1 + $0x520] sm:$0xff]  }
  0x89   :  { %15056 = vmatpush3.bf16.msra.mxu1 %v16795_v63  ;;  %15029 = vmatprep.subr.bf16.mxu0 %v16796_v4  ;;  %v16835_v63 = vld [vmem:[%s22107_s1 + $0x5a0] sm:$0xff]   ;;  %v16840_v4 = vld [vmem:[%s22107_s1 + $0x550] sm:$0xff]  }
  0x8a   :  { %15057 = vmatprep.subr.bf16.mxu1 %v16797_v5  ;;  %v16841_v5 = vld [vmem:[%s22107_s1 + $0x5d0] sm:$0xff]  }
  0x8b   :  { %10092 = vmatmul.mubr.bf16.gmra.mxu0 %v13639_v3  ;;  %v16839_v3 = vld [vmem:[%s22107_s1 + $0x598] sm:$0xff]  }
  0x8c   :  { %15030 = vmatpush3.bf16.msra.mxu0 %v16798_v9  ;;  %10141 = vmatmul.mubr.bf16.gmra.mxu1 %v13641_v10  ;;  %v16845_v9 = vld [vmem:[%s22107_s1 + $0x5c8] sm:$0xff]  }
  0x8d   :  { %15058 = vmatpush3.bf16.msra.mxu1 %v16799_v11  ;;  %15031 = vmatprep.subr.bf16.mxu0 %v16800_v12  ;;  %v16846_v10 = vld [vmem:[%s22107_s1 + $0x508] sm:$0xff]   ;;  %v16848_v12 = vld [vmem:[%s22107_s1 + $0x540] sm:$0xff]  }
  0x8e   :  { %15059 = vmatprep.subr.bf16.mxu1 %v16801_v13  ;;  %10181 = vmatprep.mubr.bf16.mxu0 %v13516_v37  ;;  %v16847_v11 = vld [vmem:[%s22107_s1 + $0x588] sm:$0xff]   ;;  %v16849_v13 = vld [vmem:[%s22107_s1 + $0x5c0] sm:$0xff]  }
  0x8f   :  { %10230 = vmatprep.mubr.bf16.mxu1 %v13518_v39  ;;  %v16861_v37 = vld [vmem:[%s22107_s1 + $0x6e8] sm:$0xff]   ;;  %v232_v39 = vld [vmem:[%s22108_s0 + $0x658] sm:$0xff] }
  0x90   :  { %15032 = vmatpush3.bf16.msra.mxu0 %v16802_v14  ;;  %v16850_v14 = vld [vmem:[%s22107_s1 + $0x500] sm:$0xff]  }
  0x91   :  { %15060 = vmatpush3.bf16.msra.mxu1 %v16803_v15  ;;  %15033 = vmatprep.subr.bf16.mxu0 %v16804_v16  ;;  %v16851_v15 = vld [vmem:[%s22107_s1 + $0x580] sm:$0xff]   ;;  %v39_v16 = vld [vmem:[%s22108_s0 + $0x50] sm:$0xff] }
  0x92   :  { %15061 = vmatprep.subr.bf16.mxu1 %v16805_v17  ;;  %v103_v17 = vld [vmem:[%s22108_s0 + $0x250] sm:$0xff] }
  0x94   :  { %15034 = vmatpush3.bf16.msra.mxu0 %v16806_v18  ;;  %v13519_v18 = vcombine.low %v39_v16, %v103_v17 }
  0x95   :  { %15062 = vmatpush3.bf16.msra.mxu1 %v16807_v19  ;;  %15035 = vmatprep.subr.bf16.mxu0 %v16808_v20  ;;  %v13520_v19 = vcombine.high %v39_v16, %v103_v17  ;;  %v40_v20 = vld [vmem:[%s22108_s0 + $0x58] sm:$0xff]  ;;  %v42_v16 = vld [vmem:[%s22108_s0 + $0x68] sm:$0xff] }
  0x96   :  { %15063 = vmatprep.subr.bf16.mxu1 %v16809_v21  ;;  %v104_v21 = vld [vmem:[%s22108_s0 + $0x258] sm:$0xff] }
  0x98   :  { %15036 = vmatpush3.bf16.msra.mxu0 %v16810_v22  ;;  %v13521_v22 = vcombine.low %v40_v20, %v104_v21 }
  0x99   :  { %15064 = vmatpush3.bf16.msra.mxu1 %v16811_v23  ;;  %15037 = vmatprep.subr.bf16.mxu0 %v16812_v24  ;;  %v13522_v23 = vcombine.high %v40_v20, %v104_v21  ;;  %v16852_v24 = vld [vmem:[%s22107_s1 + $0x678] sm:$0xff]  }
  0x9a   :  { %15065 = vmatprep.subr.bf16.mxu1 %v16813_v25  ;;  %v16853_v25 = vld [vmem:[%s22107_s1 + $0x6f8] sm:$0xff]  }
  0x9c   :  { %15038 = vmatpush3.bf16.msra.mxu0 %v16814_v26  ;;  %v16854_v26 = vld [vmem:[%s22107_s1 + $0x638] sm:$0xff]  }
  0x9d   :  { %15066 = vmatpush3.bf16.msra.mxu1 %v16815_v27  ;;  %15039 = vmatprep.subr.bf16.mxu0 %v16816_v28  ;;  %v16855_v27 = vld [vmem:[%s22107_s1 + $0x6b8] sm:$0xff]   ;;  %v16856_v28 = vld [vmem:[%s22107_s1 + $0x670] sm:$0xff]  }
  0x9e   :  { %15067 = vmatprep.subr.bf16.mxu1 %v16817_v29  ;;  %v16857_v29 = vld [vmem:[%s22107_s1 + $0x6f0] sm:$0xff]  }
  0xa0   :  { %15040 = vmatpush3.bf16.msra.mxu0 %v16818_v30  ;;  %v16858_v30 = vld [vmem:[%s22107_s1 + $0x630] sm:$0xff]  }
  0xa1   :  { %15068 = vmatpush3.bf16.msra.mxu1 %v16819_v31  ;;  %15081 = vmatprep.subr.bf16.mxu0 %v16820_v40  ;;  %v16859_v31 = vld [vmem:[%s22107_s1 + $0x6b0] sm:$0xff]  }
  0xa2   :  { %15109 = vmatprep.subr.bf16.mxu1 %v16821_v41  ;;  %v16862_v41 = vld [vmem:[%s22107_s1 + $0x628] sm:$0xff]  }
  0xa3   :  { %10182 = vmatmul.mubr.bf16.vlgmr.msra.gmra.mxu0 %v13515_v36  ;;  %v16860_v36 = vld [vmem:[%s22107_s1 + $0x668] sm:$0xff]  }
  0xa4   :  { %10231 = vmatmul.mubr.bf16.vlgmr.msra.gmra.mxu1 %v13517_v38  ;;  %15082 = vmatpush3.bf16.msra.mxu0 %v16822_v42  ;;  %v168_v38 = vld [vmem:[%s22108_s0 + $0x458] sm:$0xff] }
  0xa5   :  { %15110 = vmatpush3.bf16.msra.mxu1 %v16823_v43  ;;  %15083 = vmatprep.subr.bf16.mxu0 %v16824_v44  ;;  %v13650_v40 = vcombine.high %v168_v38, %v232_v39  ;;  %v13649_v42 = vcombine.low %v168_v38, %v232_v39  ;;  %v16863_v43 = vld [vmem:[%s22107_s1 + $0x6a8] sm:$0xff]   ;;  %v16864_v44 = vld [vmem:[%s22107_s1 + $0x660] sm:$0xff]  }
  0xa6   :  { %15111 = vmatprep.subr.bf16.mxu1 %v16825_v45  ;;  %10189 = vmatprep.mubr.bf16.mxu0 %v13644_v50  ;;  %v16865_v45 = vld [vmem:[%s22107_s1 + $0x6e0] sm:$0xff]   ;;  %v16870_v50 = vld [vmem:[%s22107_s1 + $0x618] sm:$0xff]   ;;  %v170_v39 = vld [vmem:[%s22108_s0 + $0x468] sm:$0xff] }
  0xa7   :  { %10238 = vmatprep.mubr.bf16.mxu1 %v13646_v56  ;;  %v16874_v56 = vld [vmem:[%s22107_s1 + $0x610] sm:$0xff]  }
  0xa8   :  { %15084 = vmatpush3.bf16.msra.mxu0 %v16826_v46  ;;  %v16866_v46 = vld [vmem:[%s22107_s1 + $0x620] sm:$0xff]  }
  0xa9   :  { %15112 = vmatpush3.bf16.msra.mxu1 %v16827_v47  ;;  %15085 = vmatprep.subr.bf16.mxu0 %v16828_v52  ;;  %v16867_v47 = vld [vmem:[%s22107_s1 + $0x6a0] sm:$0xff]   ;;  %v16872_v52 = vld [vmem:[%s22107_s1 + $0x650] sm:$0xff]  }
  0xaa   :  { %15113 = vmatprep.subr.bf16.mxu1 %v16829_v53 }
  0xab   :  { %10190 = vmatmul.mubr.bf16.gmra.mxu0 %v13643_v51  ;;  %v16871_v51 = vld [vmem:[%s22107_s1 + $0x698] sm:$0xff]  }
  0xac   :  { %15086 = vmatpush3.bf16.msra.mxu0 %v16830_v57  ;;  %10239 = vmatmul.mubr.bf16.gmra.mxu1 %v13645_v58  ;;  %v16875_v58 = vld [vmem:[%s22107_s1 + $0x690] sm:$0xff]  }
  0xad   :  { %15114 = vmatpush3.bf16.msra.mxu1 %v16831_v59  ;;  %15087 = vmatprep.subr.bf16.mxu0 %v16832_v60 }
  0xae   :  { %15115 = vmatprep.subr.bf16.mxu1 %v16833_v61  ;;  %10279 = vmatprep.mubr.bf16.mxu0 %v13520_v19  ;;  %v16876_v61 = vld [vmem:[%s22107_s1 + $0x648] sm:$0xff]  }
  0xaf   :  { %10328 = vmatprep.mubr.bf16.mxu1 %v13522_v23  ;;  %v106_v19 = vld [vmem:[%s22108_s0 + $0x268] sm:$0xff]  ;;  %v16885_v23 = vld [vmem:[%s22107_s1 + $0x7f8] sm:$0xff]  }
  0xb0   :  { %15088 = vmatpush3.bf16.msra.mxu0 %v16834_v62  ;;  %v13525_v20 = vcombine.low %v42_v16, %v106_v19  ;;  %v13526_v21 = vcombine.high %v42_v16, %v106_v19 }
  0xb1   :  { %15116 = vmatpush3.bf16.msra.mxu1 %v16835_v63  ;;  %15089 = vmatprep.subr.bf16.mxu0 %v16836_v0  ;;  %v16877_v0 = vld [vmem:[%s22107_s1 + $0x6c8] sm:$0xff]  }
  0xb2   :  { %15117 = vmatprep.subr.bf16.mxu1 %v16837_v1 }
  0xb4   :  { %15090 = vmatpush3.bf16.msra.mxu0 %v16838_v2  ;;  %v16878_v2 = vld [vmem:[%s22107_s1 + $0x608] sm:$0xff]  }
  0xb5   :  { %15118 = vmatpush3.bf16.msra.mxu1 %v16839_v3  ;;  %15091 = vmatprep.subr.bf16.mxu0 %v16840_v4 }
  0xb6   :  { %15119 = vmatprep.subr.bf16.mxu1 %v16841_v5  ;;  %v16879_v5 = vld [vmem:[%s22107_s1 + $0x688] sm:$0xff]  }
  0xb8   :  { %15092 = vmatpush3.bf16.msra.mxu0 %v16842_v6 }
  0xb9   :  { %15120 = vmatpush3.bf16.msra.mxu1 %v16843_v7  ;;  %15093 = vmatprep.subr.bf16.mxu0 %v16844_v8  ;;  %v16880_v8 = vld [vmem:[%s22107_s1 + $0x640] sm:$0xff]  }
  0xba   :  { %15121 = vmatprep.subr.bf16.mxu1 %v16845_v9 }
  0xbc   :  { %15094 = vmatpush3.bf16.msra.mxu0 %v16846_v10  ;;  %v16881_v10 = vld [vmem:[%s22107_s1 + $0x6c0] sm:$0xff]  }
  0xbd   :  { %15122 = vmatpush3.bf16.msra.mxu1 %v16847_v11  ;;  %15095 = vmatprep.subr.bf16.mxu0 %v16848_v12  ;;  %v16882_v11 = vld [vmem:[%s22107_s1 + $0x600] sm:$0xff]  }
  0xbe   :  { %15123 = vmatprep.subr.bf16.mxu1 %v16849_v13  ;;  %v16883_v13 = vld [vmem:[%s22107_s1 + $0x680] sm:$0xff]  }
  0xc0   :  { %15096 = vmatpush3.bf16.msra.mxu0 %v16850_v14  ;;  %v41_v14 = vld [vmem:[%s22108_s0 + $0x60] sm:$0xff] }
  0xc1   :  { %15124 = vmatpush3.bf16.msra.mxu1 %v16851_v15  ;;  %15137 = vmatprep.subr.bf16.mxu0 %v16852_v24  ;;  %v105_v15 = vld [vmem:[%s22108_s0 + $0x260] sm:$0xff]  ;;  %v16886_v24 = vld [vmem:[%s22107_s1 + $0x738] sm:$0xff]  }
  0xc2   :  { %15165 = vmatprep.subr.bf16.mxu1 %v16853_v25  ;;  %v13523_v17 = vcombine.low %v41_v14, %v105_v15  ;;  %v16887_v25 = vld [vmem:[%s22107_s1 + $0x7b8] sm:$0xff]  }
  0xc3   :  { %10280 = vmatmul.mubr.bf16.vlgmr.msra.gmra.mxu0 %v13519_v18  ;;  %v13524_v18 = vcombine.high %v41_v14, %v105_v15  ;;  %v16909_v15 = vld [vmem:[%s22107_s1 + $0x7c8] sm:$0xff]  }
  0xc4   :  { %10329 = vmatmul.mubr.bf16.vlgmr.msra.gmra.mxu1 %v13521_v22  ;;  %15138 = vmatpush3.bf16.msra.mxu0 %v16854_v26  ;;  %v16884_v22 = vld [vmem:[%s22107_s1 + $0x778] sm:$0xff]   ;;  %v16888_v26 = vld [vmem:[%s22107_s1 + $0x770] sm:$0xff]  }
  0xc5   :  { %15166 = vmatpush3.bf16.msra.mxu1 %v16855_v27  ;;  %15139 = vmatprep.subr.bf16.mxu0 %v16856_v28  ;;  %v16889_v27 = vld [vmem:[%s22107_s1 + $0x7f0] sm:$0xff]  }
  0xc6   :  { %15167 = vmatprep.subr.bf16.mxu1 %v16857_v29  ;;  %10287 = vmatprep.mubr.bf16.mxu0 %v13648_v34  ;;  %v16890_v28 = vld [vmem:[%s22107_s1 + $0x730] sm:$0xff]  }
  0xc7   :  { %10336 = vmatprep.mubr.bf16.mxu1 %v13650_v40  ;;  %v16891_v29 = vld [vmem:[%s22107_s1 + $0x7b0] sm:$0xff]   ;;  %v234_v40 = vld [vmem:[%s22108_s0 + $0x668] sm:$0xff] }
  0xc8   :  { %15140 = vmatpush3.bf16.msra.mxu0 %v16858_v30  ;;  %v169_v30 = vld [vmem:[%s22108_s0 + $0x460] sm:$0xff] }
  0xc9   :  { %15168 = vmatpush3.bf16.msra.mxu1 %v16859_v31  ;;  %15141 = vmatprep.subr.bf16.mxu0 %v16860_v36  ;;  %v233_v31 = vld [vmem:[%s22108_s0 + $0x660] sm:$0xff] }
  0xca   :  { %15169 = vmatprep.subr.bf16.mxu1 %v16861_v37  ;;  %v13652_v33 = vcombine.high %v169_v30, %v233_v31  ;;  %v13651_v34 = vcombine.low %v169_v30, %v233_v31  ;;  %v16893_v37 = vld [vmem:[%s22107_s1 + $0x7e8] sm:$0xff]  }
  0xcb   :  { %10288 = vmatmul.mubr.bf16.gmra.mxu0 %v13647_v35  ;;  %v16892_v35 = vld [vmem:[%s22107_s1 + $0x768] sm:$0xff]  }
  0xcc   :  { %15142 = vmatpush3.bf16.msra.mxu0 %v16862_v41  ;;  %10337 = vmatmul.mubr.bf16.gmra.mxu1 %v13649_v42 }
  0xcd   :  { %15170 = vmatpush3.bf16.msra.mxu1 %v16863_v43  ;;  %15143 = vmatprep.subr.bf16.mxu0 %v16864_v44  ;;  %v13654_v43 = vcombine.high %v170_v39, %v234_v40  ;;  %v16894_v44 = vld [vmem:[%s22107_s1 + $0x728] sm:$0xff]  }
  0xce   :  { %15171 = vmatprep.subr.bf16.mxu1 %v16865_v45  ;;  %10377 = vmatprep.mubr.bf16.mxu0 %v13524_v18  ;;  %v13653_v45 = vcombine.low %v170_v39, %v234_v40  ;;  %v16916_v39 = vld [vmem:[%s22107_s1 + $0x878] sm:$0xff]  }
  0xcf   :  { %10426 = vmatprep.mubr.bf16.mxu1 %v13526_v21 }
  0xd0   :  { %15144 = vmatpush3.bf16.msra.mxu0 %v16866_v46 }
  0xd1   :  { %15172 = vmatpush3.bf16.msra.mxu1 %v16867_v47  ;;  %15145 = vmatprep.subr.bf16.mxu0 %v16868_v48  ;;  %v16895_v48 = vld [vmem:[%s22107_s1 + $0x7a8] sm:$0xff]  }
  0xd2   :  { %15173 = vmatprep.subr.bf16.mxu1 %v16869_v49 }
  0xd4   :  { %15146 = vmatpush3.bf16.msra.mxu0 %v16870_v50  ;;  %v16896_v50 = vld [vmem:[%s22107_s1 + $0x760] sm:$0xff]  }
  0xd5   :  { %15174 = vmatpush3.bf16.msra.mxu1 %v16871_v51  ;;  %15147 = vmatprep.subr.bf16.mxu0 %v16872_v52 }
  0xd6   :  { %15175 = vmatprep.subr.bf16.mxu1 %v16873_v54 }
  0xd8   :  { %15148 = vmatpush3.bf16.msra.mxu0 %v16874_v56  ;;  %v16898_v56 = vld [vmem:[%s22107_s1 + $0x720] sm:$0xff]  }
  0xd9   :  { %15176 = vmatpush3.bf16.msra.mxu1 %v16875_v58  ;;  %15149 = vmatprep.subr.bf16.mxu0 %v16876_v61  ;;  %v16899_v58 = vld [vmem:[%s22107_s1 + $0x7a0] sm:$0xff]   ;;  %v16901_v61 = vld [vmem:[%s22107_s1 + $0x7d8] sm:$0xff]  }
  0xda   :  { %15177 = vmatprep.subr.bf16.mxu1 %v16877_v0  ;;  %v16904_v0 = vld [vmem:[%s22107_s1 + $0x750] sm:$0xff]  }
  0xdc   :  { %15150 = vmatpush3.bf16.msra.mxu0 %v16878_v2 }
  0xdd   :  { %15178 = vmatpush3.bf16.msra.mxu1 %v16879_v5  ;;  %15151 = vmatprep.subr.bf16.mxu0 %v16880_v8  ;;  %v16906_v5 = vld [vmem:[%s22107_s1 + $0x710] sm:$0xff]  }
  0xde   :  { %15179 = vmatprep.subr.bf16.mxu1 %v16881_v10  ;;  %v16907_v8 = vld [vmem:[%s22107_s1 + $0x790] sm:$0xff]  }
  0xe0   :  { %15152 = vmatpush3.bf16.msra.mxu0 %v16882_v11  ;;  %v16908_v11 = vld [vmem:[%s22107_s1 + $0x748] sm:$0xff]  }
  0xe1   :  { %15180 = vmatpush3.bf16.msra.mxu1 %v16883_v13  ;;  %15193 = vmatprep.subr.bf16.mxu0 %v16884_v22 }
  0xe2   :  { %15221 = vmatprep.subr.bf16.mxu1 %v16885_v23  ;;  %v16913_v23 = vld [vmem:[%s22107_s1 + $0x7c0] sm:$0xff]  }
  0xe3   :  { %v14817_v53 = vpop.f32.mrf.mxu0  ;;  %10378 = vmatmul.mubr.bf16.vlgmr.msra.gmra.mxu0 %v13523_v17  ;;  %v16910_v17 = vld [vmem:[%s22107_s1 + $0x708] sm:$0xff]  }
  0xe4   :  { %v14845_v55 = vpop.f32.mrf.mxu1  ;;  %10427 = vmatmul.mubr.bf16.vlgmr.msra.gmra.mxu1 %v13525_v20  ;;  %15194 = vmatpush3.bf16.msra.mxu0 %v16886_v24  ;;  %v16911_v20 = vld [vmem:[%s22107_s1 + $0x788] sm:$0xff]  }
  0xe5   :  { %v14818_v57 = vpop.f32.mrf.mxu0  ;;  %15222 = vmatpush3.bf16.msra.mxu1 %v16887_v25  ;;  %15195 = vmatprep.subr.bf16.mxu0 %v16888_v26 }
  0xe6   :  { %v14819_v59 = vadd.f32 %v14818_v57, %v14817_v53  ;;  %v14846_v60 = vpop.f32.mrf.mxu1  ;;  %15223 = vmatprep.subr.bf16.mxu1 %v16889_v27  ;;  %10385 = vmatprep.mubr.bf16.mxu0 %v13652_v33  ;;  %v16897_v53 = vld [vmem:[%s22107_s1 + $0x7e0] sm:$0xff]   ;;  %v108_v33 = vld [vmem:[%s22108_s0 + $0x278] sm:$0xff] }
  0xe7   :  { %v14847_v62 = vadd.f32 %v14846_v60, %v14845_v55  ;;  %v14820_v63 = vpop.f32.mrf.mxu0  ;;  %10434 = vmatprep.mubr.bf16.mxu1 %v13654_v43  ;;  %v16914_v27 = vld [vmem:[%s22107_s1 + $0x700] sm:$0xff]  }
  0xe8   :  { %v14848_v1 = vpop.f32.mrf.mxu1  ;;  %15196 = vmatpush3.bf16.msra.mxu0 %v16890_v28  ;;  %v16915_v28 = vld [vmem:[%s22107_s1 + $0x780] sm:$0xff]  }
  0xe9   :  { %v18541_v3 = vadd.f32 %v14847_v62, %v14819_v59  ;;  %v14821_v4 = vpop.f32.mrf.mxu0  ;;  %15224 = vmatpush3.bf16.msra.mxu1 %v16891_v29  ;;  %15197 = vmatprep.subr.bf16.mxu0 %v16892_v35  ;;  %v16900_v59 = vld [vmem:[%s22107_s1 + $0x758] sm:$0xff]   ;;  %v43_v29 = vld [vmem:[%s22108_s0 + $0x70] sm:$0xff] }
  0xea   :  { %v14822_v6 = vadd.f32 %v14821_v4, %v14820_v63  ;;  %v14849_v7 = vpop.f32.mrf.mxu1  ;;  %15225 = vmatprep.subr.bf16.mxu1 %v16893_v37  ;;  %v16902_v62 = vld [vmem:[%s22107_s1 + $0x718] sm:$0xff]   ;;  %v16905_v4 = vld [vmem:[%s22107_s1 + $0x7d0] sm:$0xff]  }
  0xeb   :  { %v14850_v9 = vadd.f32 %v14849_v7, %v14848_v1  ;;  %v14823_v32 = vpop.f32.mrf.mxu0  ;;  %10386 = vmatmul.mubr.bf16.gmra.mxu0 %v13651_v34  ;;  %v16903_v63 = vld [vmem:[%s22107_s1 + $0x798] sm:$0xff]  }
  0xec   :  { %v14851_v36 = vpop.f32.mrf.mxu1  ;;  %15198 = vmatpush3.bf16.msra.mxu0 %v16894_v44  ;;  %10435 = vmatmul.mubr.bf16.gmra.mxu1 %v13653_v45  ;;  %v16918_v44 = vld [vmem:[%s22107_s1 + $0x838] sm:$0xff]  }
  0xed   :  { %v18555_v12 = vadd.f32 %v14850_v9, %v14822_v6  ;;  %v14824_v38 = vpop.f32.mrf.mxu0  ;;  %15226 = vmatpush3.bf16.msra.mxu1 %v16895_v48  ;;  %15199 = vmatprep.subr.bf16.mxu0 %v16896_v50  ;;  %v16920_v50 = vld [vmem:[%s22107_s1 + $0x870] sm:$0xff]  }
  0xee   :  { %v14825_v41 = vadd.f32 %v14824_v38, %v14823_v32  ;;  %v14852_v42 = vpop.f32.mrf.mxu1  ;;  %15227 = vmatprep.subr.bf16.mxu1 %v16897_v53  ;;  %v44_v32 = vld [vmem:[%s22108_s0 + $0x78] sm:$0xff] }
  0xef   :  { %v14853_v46 = vadd.f32 %v14852_v42, %v14851_v36  ;;  %v14826_v47 = vpop.f32.mrf.mxu0  ;;  %v13529_v37 = vcombine.low %v44_v32, %v108_v33  ;;  %v13530_v38 = vcombine.high %v44_v32, %v108_v33  ;;  %v16917_v42 = vld [vmem:[%s22107_s1 + $0x8f8] sm:$0xff]   ;;  %v16941_v32 = vld [vmem:[%s22107_s1 + $0x8c8] sm:$0xff]  }
  0xf0   :  { %v14854_v49 = vpop.f32.mrf.mxu1  ;;  %15200 = vmatpush3.bf16.msra.mxu0 %v16898_v56 }
  0xf1   :  { %v18623_v51 = vadd.f32 %v14853_v46, %v14825_v41  ;;  %v14827_v52 = vpop.f32.mrf.mxu0  ;;  %15228 = vmatpush3.bf16.msra.mxu1 %v16899_v58  ;;  %15201 = vmatprep.subr.bf16.mxu0 %v16900_v59  ;;  %v171_v59 = vld [vmem:[%s22108_s0 + $0x470] sm:$0xff] }
  0xf2   :  { %v14828_v54 = vadd.f32 %v14827_v52, %v14826_v47  ;;  %v14855_v55 = vpop.f32.mrf.mxu1  ;;  %15229 = vmatprep.subr.bf16.mxu1 %v16901_v61  ;;  %10524 = vmatprep.mubr.bf16.mxu1 %v13530_v38  ;;  %v16919_v47 = vld [vmem:[%s22107_s1 + $0x8b8] sm:$0xff]   ;;  %v16921_v52 = vld [vmem:[%s22107_s1 + $0x8f0] sm:$0xff]   ;;  %v16944_v38 = vld [vmem:[%s22107_s1 + $0x840] sm:$0xff]  }
  0xf3   :  { %v14856_v57 = vadd.f32 %v14855_v55, %v14854_v49  ;;  %v16922_v55 = vld [vmem:[%s22107_s1 + $0x830] sm:$0xff]  }
  0xf4   :  { %15202 = vmatpush3.bf16.msra.mxu0 %v16902_v62 }
  0xf5   :  { %v18637_v60 = vadd.f32 %v14856_v57, %v14828_v54  ;;  %15230 = vmatpush3.bf16.msra.mxu1 %v16903_v63  ;;  %15203 = vmatprep.subr.bf16.mxu0 %v16904_v0  ;;  %v16923_v57 = vld [vmem:[%s22107_s1 + $0x8b0] sm:$0xff]   ;;  %v16924_v63 = vld [vmem:[%s22107_s1 + $0x868] sm:$0xff]  }
  0xf6   :  { %15231 = vmatprep.subr.bf16.mxu1 %v16905_v4  ;;  %v236_v4 = vld [vmem:[%s22108_s0 + $0x678] sm:$0xff] }
  0xf8   :  { %15204 = vmatpush3.bf16.msra.mxu0 %v16906_v5 }
  0xf9   :  { %15232 = vmatpush3.bf16.msra.mxu1 %v16907_v8  ;;  %15205 = vmatprep.subr.bf16.mxu0 %v16908_v11  ;;  %v16927_v8 = vld [vmem:[%s22107_s1 + $0x8a8] sm:$0xff]   ;;  %v16930_v11 = vld [vmem:[%s22107_s1 + $0x820] sm:$0xff]  }
  0xfa   :  { %15233 = vmatprep.subr.bf16.mxu1 %v16909_v15  ;;  %v16933_v15 = vld [vmem:[%s22107_s1 + $0x8d8] sm:$0xff]  }
  0xfc   :  { %15206 = vmatpush3.bf16.msra.mxu0 %v16910_v17  ;;  %v16935_v17 = vld [vmem:[%s22107_s1 + $0x898] sm:$0xff]  }
  0xfd   :  { %15234 = vmatpush3.bf16.msra.mxu1 %v16911_v20 }
  0xfe   :  { %15235 = vmatprep.subr.bf16.mxu1 %v16913_v23  ;;  %v16938_v23 = vld [vmem:[%s22107_s1 + $0x810] sm:$0xff]  }
 0x101   :  { %15236 = vmatpush3.bf16.msra.mxu1 %v16915_v28 }
 0x102   :  { %15277 = vmatprep.subr.bf16.mxu1 %v16917_v42 }
 0x103   :  { %v14873_v1 = vpop.f32.mrf.mxu0 }
 0x104   :  { %v14901_v2 = vpop.f32.mrf.mxu1  ;;  %10525 = vmatmul.mubr.bf16.vlgmr.msra.gmra.mxu1 %v13529_v37 }
 0x105   :  { %v14874_v6 = vpop.f32.mrf.mxu0  ;;  %15278 = vmatpush3.bf16.msra.mxu1 %v16919_v47 }
 0x106   :  { %v14902_v7 = vpop.f32.mrf.mxu1  ;;  %v14875_v9 = vadd.f32 %v14874_v6, %v14873_v1  ;;  %15279 = vmatprep.subr.bf16.mxu1 %v16921_v52  ;;  %v16925_v1 = vld [vmem:[%s22107_s1 + $0x8e8] sm:$0xff]  }
 0x107   :  { %v14903_v10 = vadd.f32 %v14902_v7, %v14901_v2  ;;  %v14876_v13 = vpop.f32.mrf.mxu0  ;;  %v172_v2 = vld [vmem:[%s22108_s0 + $0x478] sm:$0xff]  ;;  %v16926_v6 = vld [vmem:[%s22107_s1 + $0x828] sm:$0xff]  }
 0x108   :  { %v14904_v14 = vpop.f32.mrf.mxu1  ;;  %v9890_v16 = vadd.f32 %v14875_v9, %v18541_v3  ;;  %v16912_v3 = vld [vmem:[%s22107_s1 + $0x740] sm:$0xff]   ;;  %v13658_v5 = vcombine.high %v172_v2, %v236_v4  ;;  %v13657_v7 = vcombine.low %v172_v2, %v236_v4  ;;  %v16951_v2 = vld [vmem:[%s22107_s1 + $0x9b8] sm:$0xff]  }
 0x109   :  { %v14877_v18 = vpop.f32.mrf.mxu0  ;;  %15207 = vmatprep.subr.bf16.mxu0 %v16912_v3  ;;  %15280 = vmatpush3.bf16.msra.mxu1 %v16923_v57  ;;  %v16928_v9 = vld [vmem:[%s22107_s1 + $0x860] sm:$0xff]   ;;  %v16948_v57 = vld [vmem:[%s22107_s1 + $0x978] sm:$0xff]  }
 0x10a   :  { %v14905_v19 = vpop.f32.mrf.mxu1  ;;  %v18673_v21 = vadd.f32 %v14903_v10, %v9890_v16  ;;  %v14878_v22 = vadd.f32 %v14877_v18, %v14876_v13  ;;  %15208 = vmatpush3.bf16.msra.mxu0 %v16914_v27  ;;  %15281 = vmatprep.subr.bf16.mxu1 %v16925_v1  ;;  %v16929_v10 = vld [vmem:[%s22107_s1 + $0x8e0] sm:$0xff]   ;;  %v16934_v16 = vld [vmem:[%s22107_s1 + $0x818] sm:$0xff]  }
 0x10b   :  { %v14906_v25 = vadd.f32 %v14905_v19, %v14904_v14  ;;  %v14879_v26 = vpop.f32.mrf.mxu0  ;;  %15249 = vmatprep.subr.bf16.mxu0 %v16916_v39  ;;  %10532 = vmatprep.mubr.bf16.mxu1 %v13658_v5  ;;  %v16931_v13 = vld [vmem:[%s22107_s1 + $0x8a0] sm:$0xff]   ;;  %v16932_v14 = vld [vmem:[%s22107_s1 + $0x858] sm:$0xff]   ;;  %v16936_v19 = vld [vmem:[%s22107_s1 + $0x850] sm:$0xff]  }
 0x10c   :  { %v9893_v24 = vadd.f32 %v14878_v22, %v18555_v12  ;;  %v107_v12 = vld [vmem:[%s22108_s0 + $0x270] sm:$0xff]  ;;  %v14907_v40 = vpop.f32.mrf.mxu1  ;;  %10533 = vmatmul.mubr.bf16.gmra.mxu1 %v13657_v7 }
 0x10d   :  { %v14880_v31 = vpop.f32.mrf.mxu0  ;;  %v13527_v35 = vcombine.low %v43_v29, %v107_v12  ;;  %v13528_v36 = vcombine.high %v43_v29, %v107_v12  ;;  %15282 = vmatpush3.bf16.msra.mxu1 %v16927_v8  ;;  %v16937_v22 = vld [vmem:[%s22107_s1 + $0x8d0] sm:$0xff]   ;;  %v16940_v29 = vld [vmem:[%s22107_s1 + $0x848] sm:$0xff]  }
 0x10e   :  { %v18691_v30 = vadd.f32 %v14906_v25, %v9893_v24  ;;  %v14881_v34 = vadd.f32 %v14880_v31, %v14879_v26  ;;  %v14908_v45 = vpop.f32.mrf.mxu1  ;;  %15283 = vmatprep.subr.bf16.mxu1 %v16929_v10  ;;  %v16939_v26 = vld [vmem:[%s22107_s1 + $0x890] sm:$0xff]  }
 0x10f   :  { %v14882_v41 = vpop.f32.mrf.mxu0  ;;  %10475 = vmatprep.mubr.bf16.mxu0 %v13528_v36  ;;  %v14909_v48 = vadd.f32 %v14908_v45, %v14907_v40  ;;  %v16947_v45 = vld [vmem:[%s22107_s1 + $0x880] sm:$0xff]   ;;  %v16953_v7 = vld [vmem:[%s22107_s1 + $0x9f0] sm:$0xff]  }
 0x110   :  { %v9898_v43 = vadd.f32 %v14881_v34, %v18623_v51  ;;  %10476 = vmatmul.mubr.bf16.vlgmr.msra.gmra.mxu0 %v13527_v35  ;;  %v14910_v51 = vpop.f32.mrf.mxu1  ;;  %v16942_v34 = vld [vmem:[%s22107_s1 + $0x808] sm:$0xff]   ;;  %v16954_v10 = vld [vmem:[%s22107_s1 + $0x930] sm:$0xff]  }
 0x111   :  { %v14883_v46 = vpop.f32.mrf.mxu0  ;;  %15250 = vmatpush3.bf16.msra.mxu0 %v16918_v44  ;;  %15284 = vmatpush3.bf16.msra.mxu1 %v16931_v13  ;;  %v16955_v13 = vld [vmem:[%s22107_s1 + $0x9b0] sm:$0xff]  }
 0x112   :  { %v14884_v49 = vadd.f32 %v14883_v46, %v14882_v41  ;;  %v18721_v53 = vadd.f32 %v14909_v48, %v9898_v43  ;;  %15251 = vmatprep.subr.bf16.mxu0 %v16920_v50  ;;  %v14911_v56 = vpop.f32.mrf.mxu1  ;;  %15285 = vmatprep.subr.bf16.mxu1 %v16933_v15  ;;  %v16945_v41 = vld [vmem:[%s22107_s1 + $0x8c0] sm:$0xff]   ;;  %v46_v50 = vld [vmem:[%s22108_s0 + $0x88] sm:$0xff] }
 0x113   :  { %v14912_v58 = vadd.f32 %v14911_v56, %v14910_v51  ;;  %v16946_v43 = vld [vmem:[%s22107_s1 + $0x800] sm:$0xff]   ;;  %v110_v51 = vld [vmem:[%s22108_s0 + $0x288] sm:$0xff] }
 0x114   :  { %v9901_v54 = vadd.f32 %v14884_v49, %v18637_v60  ;;  %v235_v60 = vld [vmem:[%s22108_s0 + $0x670] sm:$0xff]  ;;  %v109_v46 = vld [vmem:[%s22108_s0 + $0x280] sm:$0xff]  ;;  %v13534_v56 = vcombine.high %v46_v50, %v110_v51 }
 0x115   :  { %15252 = vmatpush3.bf16.msra.mxu0 %v16922_v55  ;;  %v13656_v61 = vcombine.high %v171_v59, %v235_v60  ;;  %v13655_v62 = vcombine.low %v171_v59, %v235_v60  ;;  %15286 = vmatpush3.bf16.msra.mxu1 %v16935_v17  ;;  %v13533_v55 = vcombine.low %v46_v50, %v110_v51  ;;  %v16949_v59 = vld [vmem:[%s22107_s1 + $0x9f8] sm:$0xff]   ;;  %v16975_v51 = vld [vmem:[%s22107_s1 + $0x988] sm:$0xff]  }
 0x116   :  { %v18739_v0 = vadd.f32 %v14912_v58, %v9901_v54  ;;  %15253 = vmatprep.subr.bf16.mxu0 %v16924_v63  ;;  %15287 = vmatprep.subr.bf16.mxu1 %v16937_v22  ;;  %v238_v22 = vld [vmem:[%s22108_s0 + $0x688] sm:$0xff] }
 0x117   :  { %10483 = vmatprep.mubr.bf16.mxu0 %v13656_v61  ;;  %10622 = vmatprep.mubr.bf16.mxu1 %v13534_v56  ;;  %v16977_v56 = vld [vmem:[%s22107_s1 + $0x9c0] sm:$0xff]  }
 0x118   :  { %10484 = vmatmul.mubr.bf16.gmra.mxu0 %v13655_v62  ;;  %v16950_v62 = vld [vmem:[%s22107_s1 + $0x938] sm:$0xff]  }
 0x119   :  { %15254 = vmatpush3.bf16.msra.mxu0 %v16926_v6  ;;  %15288 = vmatpush3.bf16.msra.mxu1 %v16939_v26  ;;  %v16960_v26 = vld [vmem:[%s22107_s1 + $0x960] sm:$0xff]  }
 0x11a   :  { %15255 = vmatprep.subr.bf16.mxu0 %v16928_v9  ;;  %15289 = vmatprep.subr.bf16.mxu1 %v16941_v32  ;;  %v16966_v32 = vld [vmem:[%s22107_s1 + $0x918] sm:$0xff]  }
 0x11d   :  { %15256 = vmatpush3.bf16.msra.mxu0 %v16930_v11 }
 0x11e   :  { %15257 = vmatprep.subr.bf16.mxu0 %v16932_v14  ;;  %v173_v14 = vld [vmem:[%s22108_s0 + $0x480] sm:$0xff] }
 0x121   :  { %15258 = vmatpush3.bf16.msra.mxu0 %v16934_v16 }
 0x122   :  { %15259 = vmatprep.subr.bf16.mxu0 %v16936_v19  ;;  %v16957_v19 = vld [vmem:[%s22107_s1 + $0x9e8] sm:$0xff]  }
 0x123   :  { %v14929_v18 = vpop.f32.mrf.mxu0 }
 0x124   :  { %v14957_v20 = vpop.f32.mrf.mxu1 }
 0x125   :  { %v14930_v3 = vpop.f32.mrf.mxu0  ;;  %15260 = vmatpush3.bf16.msra.mxu0 %v16938_v23  ;;  %v16958_v23 = vld [vmem:[%s22107_s1 + $0x928] sm:$0xff]  }
 0x126   :  { %v14931_v24 = vadd.f32 %v14930_v3, %v14929_v18  ;;  %v14958_v25 = vpop.f32.mrf.mxu1  ;;  %15261 = vmatprep.subr.bf16.mxu0 %v16940_v29  ;;  %v16956_v18 = vld [vmem:[%s22107_s1 + $0x968] sm:$0xff]   ;;  %v16963_v29 = vld [vmem:[%s22107_s1 + $0x9a0] sm:$0xff]  }
 0x127   :  { %v14959_v27 = vadd.f32 %v14958_v25, %v14957_v20  ;;  %v14932_v28 = vpop.f32.mrf.mxu0  ;;  %v174_v20 = vld [vmem:[%s22108_s0 + $0x488] sm:$0xff] }
 0x128   :  { %v9988_v31 = vadd.f32 %v14931_v24, %v18673_v21  ;;  %v14960_v12 = vpop.f32.mrf.mxu1  ;;  %v16943_v21 = vld [vmem:[%s22107_s1 + $0x888] sm:$0xff]   ;;  %v13662_v3 = vcombine.high %v174_v20, %v238_v22  ;;  %v13661_v24 = vcombine.low %v174_v20, %v238_v22 }
 0x129   :  { %v14933_v33 = vpop.f32.mrf.mxu0  ;;  %15262 = vmatpush3.bf16.msra.mxu0 %v16942_v34  ;;  %15290 = vmatpush3.bf16.msra.mxu1 %v16943_v21  ;;  %v16959_v25 = vld [vmem:[%s22107_s1 + $0x9a8] sm:$0xff]   ;;  %v16968_v34 = vld [vmem:[%s22107_s1 + $0x950] sm:$0xff]  }
 0x12a   :  { %v18802_v35 = vadd.f32 %v14959_v27, %v9988_v31  ;;  %v14934_v36 = vadd.f32 %v14933_v33, %v14932_v28  ;;  %v14961_v37 = vpop.f32.mrf.mxu1  ;;  %15263 = vmatprep.subr.bf16.mxu0 %v16944_v38  ;;  %15291 = vmatprep.subr.bf16.mxu1 %v16945_v41  ;;  %v16961_v27 = vld [vmem:[%s22107_s1 + $0x9e0] sm:$0xff]   ;;  %v16964_v31 = vld [vmem:[%s22107_s1 + $0x958] sm:$0xff]   ;;  %v16970_v38 = vld [vmem:[%s22107_s1 + $0x910] sm:$0xff]  }
 0x12b   :  { %v14962_v40 = vadd.f32 %v14961_v37, %v14960_v12  ;;  %v14935_v42 = vpop.f32.mrf.mxu0  ;;  %v16962_v28 = vld [vmem:[%s22107_s1 + $0x920] sm:$0xff]   ;;  %v16965_v12 = vld [vmem:[%s22107_s1 + $0x9d8] sm:$0xff]   ;;  %v16969_v37 = vld [vmem:[%s22107_s1 + $0x9d0] sm:$0xff]  }
 0x12c   :  { %v9991_v39 = vadd.f32 %v14934_v36, %v18691_v30  ;;  %v45_v30 = vld [vmem:[%s22108_s0 + $0x80] sm:$0xff]  ;;  %v14963_v54 = vpop.f32.mrf.mxu1  ;;  %v16967_v33 = vld [vmem:[%s22107_s1 + $0x998] sm:$0xff]  }
 0x12d   :  { %v14936_v47 = vpop.f32.mrf.mxu0  ;;  %15264 = vmatpush3.bf16.msra.mxu0 %v16946_v43  ;;  %v13531_v48 = vcombine.low %v45_v30, %v109_v46  ;;  %v13532_v49 = vcombine.high %v45_v30, %v109_v46  ;;  %15292 = vmatpush3.bf16.msra.mxu1 %v16947_v45  ;;  %v16972_v43 = vld [vmem:[%s22107_s1 + $0x948] sm:$0xff]  }
 0x12e   :  { %v18817_v44 = vadd.f32 %v14962_v40, %v9991_v39  ;;  %v14937_v52 = vadd.f32 %v14936_v47, %v14935_v42  ;;  %v14964_v61 = vpop.f32.mrf.mxu1  ;;  %15305 = vmatprep.subr.bf16.mxu0 %v16948_v57  ;;  %15333 = vmatprep.subr.bf16.mxu1 %v16949_v59  ;;  %v16971_v40 = vld [vmem:[%s22107_s1 + $0x990] sm:$0xff]   ;;  %v16973_v46 = vld [vmem:[%s22107_s1 + $0x9c8] sm:$0xff]  }
 0x12f   :  { %v14938_v58 = vpop.f32.mrf.mxu0  ;;  %10573 = vmatprep.mubr.bf16.mxu0 %v13532_v49  ;;  %v14965_v63 = vadd.f32 %v14964_v61, %v14963_v54  ;;  %v16974_v49 = vld [vmem:[%s22107_s1 + $0x908] sm:$0xff]   ;;  %v16979_v61 = vld [vmem:[%s22107_s1 + $0x980] sm:$0xff]  }
 0x130   :  { %v9996_v60 = vadd.f32 %v14937_v52, %v18721_v53  ;;  %10574 = vmatmul.mubr.bf16.vlgmr.msra.gmra.mxu0 %v13531_v48  ;;  %10623 = vmatmul.mubr.bf16.vlgmr.msra.gmra.mxu1 %v13533_v55  ;;  %v14966_v5 = vpop.f32.mrf.mxu1  ;;  %v16952_v53 = vld [vmem:[%s22107_s1 + $0x970] sm:$0xff]  }
 0x131   :  { %v14939_v1 = vpop.f32.mrf.mxu0  ;;  %15306 = vmatpush3.bf16.msra.mxu0 %v16950_v62  ;;  %15334 = vmatpush3.bf16.msra.mxu1 %v16951_v2  ;;  %v48_v2 = vld [vmem:[%s22108_s0 + $0x98] sm:$0xff] }
 0x132   :  { %v14940_v4 = vadd.f32 %v14939_v1, %v14938_v58  ;;  %v18850_v6 = vadd.f32 %v14965_v63, %v9996_v60  ;;  %v14967_v9 = vpop.f32.mrf.mxu1  ;;  %15307 = vmatprep.subr.bf16.mxu0 %v16952_v53  ;;  %15335 = vmatprep.subr.bf16.mxu1 %v16953_v7  ;;  %v16978_v60 = vld [vmem:[%s22107_s1 + $0x900] sm:$0xff]   ;;  %v111_v1 = vld [vmem:[%s22108_s0 + $0x290] sm:$0xff]  ;;  %v112_v7 = vld [vmem:[%s22108_s0 + $0x298] sm:$0xff] }
 0x133   :  { %v14968_v11 = vadd.f32 %v14967_v9, %v14966_v5  ;;  %10630 = vmatprep.mubr.bf16.mxu1 %v13662_v3  ;;  %v16984_v3 = vld [vmem:[%s22107_s1 + $0xa70] sm:$0xff]  }
 0x134   :  { %v9999_v8 = vadd.f32 %v14940_v4, %v18739_v0  ;;  %v237_v0 = vld [vmem:[%s22108_s0 + $0x680] sm:$0xff] }
 0x135   :  { %15308 = vmatpush3.bf16.msra.mxu0 %v16954_v10  ;;  %15336 = vmatpush3.bf16.msra.mxu1 %v16955_v13  ;;  %v13660_v16 = vcombine.high %v173_v14, %v237_v0  ;;  %v13659_v17 = vcombine.low %v173_v14, %v237_v0  ;;  %v13537_v10 = vcombine.low %v48_v2, %v112_v7  ;;  %v16980_v13 = vld [vmem:[%s22107_s1 + $0xa78] sm:$0xff]  }
 0x136   :  { %v18868_v15 = vadd.f32 %v14968_v11, %v9999_v8  ;;  %15309 = vmatprep.subr.bf16.mxu0 %v16956_v18  ;;  %15337 = vmatprep.subr.bf16.mxu1 %v16957_v19  ;;  %v13538_v11 = vcombine.high %v48_v2, %v112_v7  ;;  %v16981_v0 = vld [vmem:[%s22107_s1 + $0xaf8] sm:$0xff]   ;;  %v17007_v7 = vld [vmem:[%s22107_s1 + $0xa88] sm:$0xff]  }
 0x137   :  { %10581 = vmatprep.mubr.bf16.mxu0 %v13660_v16  ;;  %v16982_v18 = vld [vmem:[%s22107_s1 + $0xa38] sm:$0xff]  }
 0x138   :  { %10582 = vmatmul.mubr.bf16.gmra.mxu0 %v13659_v17  ;;  %10631 = vmatmul.mubr.bf16.gmra.mxu1 %v13661_v24 }
 0x139   :  { %15310 = vmatpush3.bf16.msra.mxu0 %v16958_v23  ;;  %15338 = vmatpush3.bf16.msra.mxu1 %v16959_v25  ;;  %v16985_v25 = vld [vmem:[%s22107_s1 + $0xaf0] sm:$0xff]  }
 0x13a   :  { %15311 = vmatprep.subr.bf16.mxu0 %v16960_v26  ;;  %15339 = vmatprep.subr.bf16.mxu1 %v16961_v27  ;;  %v16986_v27 = vld [vmem:[%s22107_s1 + $0xa30] sm:$0xff]  }
 0x13b   :  { %10720 = vmatprep.mubr.bf16.mxu1 %v13538_v11 }
 0x13d   :  { %15312 = vmatpush3.bf16.msra.mxu0 %v16962_v28  ;;  %15340 = vmatpush3.bf16.msra.mxu1 %v16963_v29  ;;  %v16987_v29 = vld [vmem:[%s22107_s1 + $0xab0] sm:$0xff]  }
 0x13e   :  { %15313 = vmatprep.subr.bf16.mxu0 %v16964_v31  ;;  %15341 = vmatprep.subr.bf16.mxu1 %v16965_v12  ;;  %v239_v31 = vld [vmem:[%s22108_s0 + $0x690] sm:$0xff] }
 0x141   :  { %15314 = vmatpush3.bf16.msra.mxu0 %v16966_v32  ;;  %15342 = vmatpush3.bf16.msra.mxu1 %v16967_v33  ;;  %v16988_v33 = vld [vmem:[%s22107_s1 + $0xa68] sm:$0xff]  }
 0x142   :  { %15315 = vmatprep.subr.bf16.mxu0 %v16968_v34  ;;  %15343 = vmatprep.subr.bf16.mxu1 %v16969_v37  ;;  %v176_v37 = vld [vmem:[%s22108_s0 + $0x498] sm:$0xff] }
 0x143   :  { %v14985_v36 = vpop.f32.mrf.mxu0 }
 0x144   :  { %v15013_v21 = vpop.f32.mrf.mxu1 }
 0x145   :  { %v14986_v39 = vpop.f32.mrf.mxu0  ;;  %15316 = vmatpush3.bf16.msra.mxu0 %v16970_v38  ;;  %15344 = vmatpush3.bf16.msra.mxu1 %v16971_v40 }
 0x146   :  { %v14987_v41 = vadd.f32 %v14986_v39, %v14985_v36  ;;  %v15014_v42 = vpop.f32.mrf.mxu1  ;;  %15317 = vmatprep.subr.bf16.mxu0 %v16972_v43  ;;  %15345 = vmatprep.subr.bf16.mxu1 %v16973_v46  ;;  %v16989_v36 = vld [vmem:[%s22107_s1 + $0xae8] sm:$0xff]   ;;  %v16993_v43 = vld [vmem:[%s22107_s1 + $0xae0] sm:$0xff]   ;;  %v16996_v46 = vld [vmem:[%s22107_s1 + $0xa58] sm:$0xff]  }
 0x147   :  { %v15015_v45 = vadd.f32 %v15014_v42, %v15013_v21  ;;  %v14988_v30 = vpop.f32.mrf.mxu0  ;;  %v240_v21 = vld [vmem:[%s22108_s0 + $0x698] sm:$0xff]  ;;  %v16990_v39 = vld [vmem:[%s22107_s1 + $0xa28] sm:$0xff]   ;;  %v16992_v42 = vld [vmem:[%s22107_s1 + $0xa60] sm:$0xff]  }
 0x148   :  { %v10086_v47 = vadd.f32 %v14987_v41, %v18802_v35  ;;  %v15016_v48 = vpop.f32.mrf.mxu1  ;;  %v16976_v35 = vld [vmem:[%s22107_s1 + $0x940] sm:$0xff]   ;;  %v13666_v38 = vcombine.high %v176_v37, %v240_v21  ;;  %v13665_v40 = vcombine.low %v176_v37, %v240_v21  ;;  %v16991_v41 = vld [vmem:[%s22107_s1 + $0xaa8] sm:$0xff]  }
 0x149   :  { %v14989_v50 = vpop.f32.mrf.mxu0  ;;  %15318 = vmatpush3.bf16.msra.mxu0 %v16974_v49  ;;  %15346 = vmatpush3.bf16.msra.mxu1 %v16975_v51  ;;  %v16999_v49 = vld [vmem:[%s22107_s1 + $0xa98] sm:$0xff]  }
 0x14a   :  { %v18937_v52 = vadd.f32 %v15015_v45, %v10086_v47  ;;  %v14990_v54 = vadd.f32 %v14989_v50, %v14988_v30  ;;  %v15017_v55 = vpop.f32.mrf.mxu1  ;;  %15319 = vmatprep.subr.bf16.mxu0 %v16976_v35  ;;  %15347 = vmatprep.subr.bf16.mxu1 %v16977_v56  ;;  %v16994_v45 = vld [vmem:[%s22107_s1 + $0xa20] sm:$0xff]   ;;  %v16997_v47 = vld [vmem:[%s22107_s1 + $0xad8] sm:$0xff]   ;;  %v17000_v50 = vld [vmem:[%s22107_s1 + $0xa50] sm:$0xff]  }
 0x14b   :  { %v15018_v58 = vadd.f32 %v15017_v55, %v15016_v48  ;;  %v14991_v59 = vpop.f32.mrf.mxu0  ;;  %v16995_v30 = vld [vmem:[%s22107_s1 + $0xaa0] sm:$0xff]   ;;  %v16998_v48 = vld [vmem:[%s22107_s1 + $0xa18] sm:$0xff]   ;;  %v17001_v55 = vld [vmem:[%s22107_s1 + $0xad0] sm:$0xff]  }
 0x14c   :  { %v10089_v57 = vadd.f32 %v14990_v54, %v18817_v44  ;;  %v47_v44 = vld [vmem:[%s22108_s0 + $0x90] sm:$0xff]  ;;  %v15019_v8 = vpop.f32.mrf.mxu1 }
 0x14d   :  { %v14992_v63 = vpop.f32.mrf.mxu0  ;;  %15320 = vmatpush3.bf16.msra.mxu0 %v16978_v60  ;;  %15348 = vmatpush3.bf16.msra.mxu1 %v16979_v61  ;;  %v13535_v5 = vcombine.low %v47_v44, %v111_v1  ;;  %v13536_v53 = vcombine.high %v47_v44, %v111_v1  ;;  %v17002_v35 = vld [vmem:[%s22107_s1 + $0xa10] sm:$0xff]   ;;  %v17004_v61 = vld [vmem:[%s22107_s1 + $0xa48] sm:$0xff]  }
 0x14e   :  { %v18952_v62 = vadd.f32 %v15018_v58, %v10089_v57  ;;  %v14993_v4 = vadd.f32 %v14992_v63, %v14991_v59  ;;  %v15020_v16 = vpop.f32.mrf.mxu1  ;;  %15361 = vmatprep.subr.bf16.mxu0 %v16980_v13  ;;  %15389 = vmatprep.subr.bf16.mxu1 %v16981_v0  ;;  %v17003_v58 = vld [vmem:[%s22107_s1 + $0xa90] sm:$0xff]   ;;  %v17005_v1 = vld [vmem:[%s22107_s1 + $0xac8] sm:$0xff]   ;;  %v17010_v0 = vld [vmem:[%s22107_s1 + $0xa00] sm:$0xff]  }
 0x14f   :  { %v14994_v9 = vpop.f32.mrf.mxu0  ;;  %10671 = vmatprep.mubr.bf16.mxu0 %v13536_v53  ;;  %v15021_v19 = vadd.f32 %v15020_v16, %v15019_v8  ;;  %v17011_v16 = vld [vmem:[%s22107_s1 + $0xa80] sm:$0xff]  }
 0x150   :  { %v10094_v14 = vadd.f32 %v14993_v4, %v18850_v6  ;;  %10672 = vmatmul.mubr.bf16.vlgmr.msra.gmra.mxu0 %v13535_v5  ;;  %10721 = vmatmul.mubr.bf16.vlgmr.msra.gmra.mxu1 %v13537_v10  ;;  %v16983_v6 = vld [vmem:[%s22107_s1 + $0xab8] sm:$0xff]   ;;  %v15022_v22 = vpop.f32.mrf.mxu1  ;;  %v17006_v4 = vld [vmem:[%s22107_s1 + $0xa08] sm:$0xff]   ;;  %v17009_v10 = vld [vmem:[%s22107_s1 + $0xac0] sm:$0xff]  }
 0x151   :  { %v14995_v17 = vpop.f32.mrf.mxu0  ;;  %15362 = vmatpush3.bf16.msra.mxu0 %v16982_v18  ;;  %15390 = vmatpush3.bf16.msra.mxu1 %v16983_v6  ;;  %v114_v6 = vld [vmem:[%s22108_s0 + $0x2a8] sm:$0xff] }
 0x152   :  { %v14996_v20 = vadd.f32 %v14995_v17, %v14994_v9  ;;  %v18982_v23 = vadd.f32 %v15021_v19, %v10094_v14  ;;  %v15023_v26 = vpop.f32.mrf.mxu1  ;;  %15363 = vmatprep.subr.bf16.mxu0 %v16984_v3  ;;  %15391 = vmatprep.subr.bf16.mxu1 %v16985_v25  ;;  %v49_v17 = vld [vmem:[%s22108_s0 + $0xa0] sm:$0xff] }
 0x153   :  { %v15024_v28 = vadd.f32 %v15023_v26, %v15022_v22  ;;  %10728 = vmatprep.mubr.bf16.mxu1 %v13666_v38 }
 0x154   :  { %v10097_v24 = vadd.f32 %v14996_v20, %v18868_v15  ;;  %v175_v15 = vld [vmem:[%s22108_s0 + $0x490] sm:$0xff]  ;;  %v50_v20 = vld [vmem:[%s22108_s0 + $0xa8] sm:$0xff] }
 0x155   :  { %15364 = vmatpush3.bf16.msra.mxu0 %v16986_v27  ;;  %v13664_v12 = vcombine.high %v175_v15, %v239_v31  ;;  %v13663_v32 = vcombine.low %v175_v15, %v239_v31  ;;  %15392 = vmatpush3.bf16.msra.mxu1 %v16987_v29  ;;  %v13541_v25 = vcombine.low %v50_v20, %v114_v6  ;;  %v17012_v27 = vld [vmem:[%s22107_s1 + $0xb78] sm:$0xff]  }
 0x156   :  { %v19003_v34 = vadd.f32 %v15024_v28, %v10097_v24  ;;  %15365 = vmatprep.subr.bf16.mxu0 %v16988_v33  ;;  %15393 = vmatprep.subr.bf16.mxu1 %v16989_v36  ;;  %v13542_v26 = vcombine.high %v50_v20, %v114_v6  ;;  %v17013_v15 = vld [vmem:[%s22107_s1 + $0xbf8] sm:$0xff]   ;;  %v17037_v20 = vld [vmem:[%s22107_s1 + $0xbc8] sm:$0xff]  }
 0x157   :  { %10679 = vmatprep.mubr.bf16.mxu0 %v13664_v12  ;;  %v17014_v12 = vld [vmem:[%s22107_s1 + $0xb38] sm:$0xff]  }
 0x158   :  { %10680 = vmatmul.mubr.bf16.gmra.mxu0 %v13663_v32  ;;  %10729 = vmatmul.mubr.bf16.gmra.mxu1 %v13665_v40  ;;  %v17015_v36 = vld [vmem:[%s22107_s1 + $0xbb8] sm:$0xff]  }
 0x159   :  { %15366 = vmatpush3.bf16.msra.mxu0 %v16990_v39  ;;  %15394 = vmatpush3.bf16.msra.mxu1 %v16991_v41  ;;  %v17017_v39 = vld [vmem:[%s22107_s1 + $0xbf0] sm:$0xff]  }
 0x15a   :  { %15367 = vmatprep.subr.bf16.mxu0 %v16992_v42  ;;  %15395 = vmatprep.subr.bf16.mxu1 %v16993_v43  ;;  %v17018_v42 = vld [vmem:[%s22107_s1 + $0xb30] sm:$0xff]  }
 0x15b   :  { %10818 = vmatprep.mubr.bf16.mxu1 %v13542_v26  ;;  %v17040_v26 = vld [vmem:[%s22107_s1 + $0xb40] sm:$0xff]  }
 0x15d   :  { %15368 = vmatpush3.bf16.msra.mxu0 %v16994_v45  ;;  %15396 = vmatpush3.bf16.msra.mxu1 %v16995_v30  ;;  %v17019_v45 = vld [vmem:[%s22107_s1 + $0xbb0] sm:$0xff]  }
 0x15e   :  { %15369 = vmatprep.subr.bf16.mxu0 %v16996_v46  ;;  %15397 = vmatprep.subr.bf16.mxu1 %v16997_v47  ;;  %v177_v46 = vld [vmem:[%s22108_s0 + $0x4a0] sm:$0xff] }
 0x161   :  { %15370 = vmatpush3.bf16.msra.mxu0 %v16998_v48  ;;  %15398 = vmatpush3.bf16.msra.mxu1 %v16999_v49  ;;  %v17020_v49 = vld [vmem:[%s22107_s1 + $0xb68] sm:$0xff]  }
 0x162   :  { %15371 = vmatprep.subr.bf16.mxu0 %v17000_v50  ;;  %15399 = vmatprep.subr.bf16.mxu1 %v17001_v55  ;;  %v242_v55 = vld [vmem:[%s22108_s0 + $0x6a8] sm:$0xff] }
 0x163   :  { %v15041_v51 = vpop.f32.mrf.mxu0 }
 0x164   :  { %v15069_v54 = vpop.f32.mrf.mxu1 }
 0x165   :  { %v15042_v56 = vpop.f32.mrf.mxu0  ;;  %15372 = vmatpush3.bf16.msra.mxu0 %v17002_v35  ;;  %15400 = vmatpush3.bf16.msra.mxu1 %v17003_v58  ;;  %v17023_v58 = vld [vmem:[%s22107_s1 + $0xba8] sm:$0xff]  }
 0x166   :  { %v15070_v57 = vpop.f32.mrf.mxu1  ;;  %v15043_v59 = vadd.f32 %v15042_v56, %v15041_v51  ;;  %15373 = vmatprep.subr.bf16.mxu0 %v17004_v61  ;;  %15401 = vmatprep.subr.bf16.mxu1 %v17005_v1  ;;  %v17021_v51 = vld [vmem:[%s22107_s1 + $0xbe8] sm:$0xff]   ;;  %v17026_v61 = vld [vmem:[%s22107_s1 + $0xb20] sm:$0xff]   ;;  %v17029_v1 = vld [vmem:[%s22107_s1 + $0xbd8] sm:$0xff]  }
 0x167   :  { %v15071_v60 = vadd.f32 %v15070_v57, %v15069_v54  ;;  %v15044_v63 = vpop.f32.mrf.mxu0  ;;  %v178_v54 = vld [vmem:[%s22108_s0 + $0x4a8] sm:$0xff] }
 0x168   :  { %v15072_v44 = vpop.f32.mrf.mxu1  ;;  %v10184_v2 = vadd.f32 %v15043_v59, %v18937_v52  ;;  %v17008_v52 = vld [vmem:[%s22107_s1 + $0xa40] sm:$0xff]   ;;  %v13670_v35 = vcombine.high %v178_v54, %v242_v55  ;;  %v17022_v56 = vld [vmem:[%s22107_s1 + $0xb28] sm:$0xff]   ;;  %v13669_v57 = vcombine.low %v178_v54, %v242_v55  ;;  %v17047_v54 = vld [vmem:[%s22107_s1 + $0xcb8] sm:$0xff]  }
 0x169   :  { %v15045_v5 = vpop.f32.mrf.mxu0  ;;  %15374 = vmatpush3.bf16.msra.mxu0 %v17006_v4  ;;  %15402 = vmatpush3.bf16.msra.mxu1 %v17007_v7  ;;  %v17024_v59 = vld [vmem:[%s22107_s1 + $0xb60] sm:$0xff]   ;;  %v17031_v4 = vld [vmem:[%s22107_s1 + $0xb98] sm:$0xff]  }
 0x16a   :  { %v15073_v53 = vpop.f32.mrf.mxu1  ;;  %v19069_v8 = vadd.f32 %v15071_v60, %v10184_v2  ;;  %v15046_v9 = vadd.f32 %v15045_v5, %v15044_v63  ;;  %15375 = vmatprep.subr.bf16.mxu0 %v17008_v52  ;;  %15403 = vmatprep.subr.bf16.mxu1 %v17009_v10  ;;  %v17025_v60 = vld [vmem:[%s22107_s1 + $0xbe0] sm:$0xff]   ;;  %v17030_v2 = vld [vmem:[%s22107_s1 + $0xb18] sm:$0xff]   ;;  %v17034_v10 = vld [vmem:[%s22107_s1 + $0xb10] sm:$0xff]  }
 0x16b   :  { %v15074_v13 = vadd.f32 %v15073_v53, %v15072_v44  ;;  %v15047_v14 = vpop.f32.mrf.mxu0  ;;  %v17027_v63 = vld [vmem:[%s22107_s1 + $0xba0] sm:$0xff]   ;;  %v17028_v44 = vld [vmem:[%s22107_s1 + $0xb58] sm:$0xff]   ;;  %v17032_v53 = vld [vmem:[%s22107_s1 + $0xb50] sm:$0xff]  }
 0x16c   :  { %v10187_v11 = vadd.f32 %v15046_v9, %v18952_v62  ;;  %v113_v62 = vld [vmem:[%s22108_s0 + $0x2a0] sm:$0xff]  ;;  %v15075_v28 = vpop.f32.mrf.mxu1  ;;  %v17033_v9 = vld [vmem:[%s22107_s1 + $0xbd0] sm:$0xff]  }
 0x16d   :  { %v15048_v19 = vpop.f32.mrf.mxu0  ;;  %15376 = vmatpush3.bf16.msra.mxu0 %v17010_v0  ;;  %15404 = vmatpush3.bf16.msra.mxu1 %v17011_v16  ;;  %v13539_v3 = vcombine.low %v49_v17, %v113_v62  ;;  %v13540_v24 = vcombine.high %v49_v17, %v113_v62  ;;  %v17036_v17 = vld [vmem:[%s22107_s1 + $0xb48] sm:$0xff]  }
 0x16e   :  { %v19087_v18 = vadd.f32 %v15074_v13, %v10187_v11  ;;  %v15049_v22 = vadd.f32 %v15048_v19, %v15047_v14  ;;  %v15076_v32 = vpop.f32.mrf.mxu1  ;;  %15417 = vmatprep.subr.bf16.mxu0 %v17012_v27  ;;  %15445 = vmatprep.subr.bf16.mxu1 %v17013_v15  ;;  %v17035_v14 = vld [vmem:[%s22107_s1 + $0xb90] sm:$0xff]  }
 0x16f   :  { %v15050_v29 = vpop.f32.mrf.mxu0  ;;  %10769 = vmatprep.mubr.bf16.mxu0 %v13540_v24  ;;  %v15077_v37 = vadd.f32 %v15076_v32, %v15075_v28  ;;  %v17043_v32 = vld [vmem:[%s22107_s1 + $0xb80] sm:$0xff]  }
 0x170   :  { %v10192_v31 = vadd.f32 %v15049_v22, %v18982_v23  ;;  %10770 = vmatmul.mubr.bf16.vlgmr.msra.gmra.mxu0 %v13539_v3  ;;  %10819 = vmatmul.mubr.bf16.vlgmr.msra.gmra.mxu1 %v13541_v25  ;;  %v17016_v23 = vld [vmem:[%s22107_s1 + $0xb70] sm:$0xff]   ;;  %v15078_v38 = vpop.f32.mrf.mxu1  ;;  %v17038_v22 = vld [vmem:[%s22107_s1 + $0xb08] sm:$0xff]  }
 0x171   :  { %v15051_v33 = vpop.f32.mrf.mxu0  ;;  %15418 = vmatpush3.bf16.msra.mxu0 %v17014_v12  ;;  %15446 = vmatpush3.bf16.msra.mxu1 %v17015_v36 }
 0x172   :  { %v15052_v21 = vadd.f32 %v15051_v33, %v15050_v29  ;;  %v19117_v40 = vadd.f32 %v15077_v37, %v10192_v31  ;;  %15419 = vmatprep.subr.bf16.mxu0 %v17016_v23  ;;  %v15079_v43 = vpop.f32.mrf.mxu1  ;;  %15447 = vmatprep.subr.bf16.mxu1 %v17017_v39  ;;  %v17041_v29 = vld [vmem:[%s22107_s1 + $0xbc0] sm:$0xff]   ;;  %v115_v33 = vld [vmem:[%s22108_s0 + $0x2b0] sm:$0xff]  ;;  %v52_v23 = vld [vmem:[%s22108_s0 + $0xb8] sm:$0xff] }
 0x173   :  { %v15080_v30 = vadd.f32 %v15079_v43, %v15078_v38  ;;  %10826 = vmatprep.mubr.bf16.mxu1 %v13670_v35  ;;  %v17042_v31 = vld [vmem:[%s22107_s1 + $0xb00] sm:$0xff]   ;;  %v116_v38 = vld [vmem:[%s22108_s0 + $0x2b8] sm:$0xff] }
 0x174   :  { %v10195_v41 = vadd.f32 %v15052_v21, %v19003_v34  ;;  %v241_v34 = vld [vmem:[%s22108_s0 + $0x6a0] sm:$0xff]  ;;  %v13546_v43 = vcombine.high %v52_v23, %v116_v38 }
 0x175   :  { %15420 = vmatpush3.bf16.msra.mxu0 %v17018_v42  ;;  %15448 = vmatpush3.bf16.msra.mxu1 %v17019_v45  ;;  %v13668_v47 = vcombine.high %v177_v46, %v241_v34  ;;  %v13667_v48 = vcombine.low %v177_v46, %v241_v34  ;;  %v13545_v42 = vcombine.low %v52_v23, %v116_v38  ;;  %v17044_v45 = vld [vmem:[%s22107_s1 + $0xc78] sm:$0xff]   ;;  %v17071_v38 = vld [vmem:[%s22107_s1 + $0xc88] sm:$0xff]  }
 0x176   :  { %v19135_v50 = vadd.f32 %v15080_v30, %v10195_v41  ;;  %15421 = vmatprep.subr.bf16.mxu0 %v17020_v49  ;;  %15449 = vmatprep.subr.bf16.mxu1 %v17021_v51  ;;  %v17045_v46 = vld [vmem:[%s22107_s1 + $0xcf8] sm:$0xff]  }
 0x177   :  { %10777 = vmatprep.mubr.bf16.mxu0 %v13668_v47 }
 0x178   :  { %10778 = vmatmul.mubr.bf16.gmra.mxu0 %v13667_v48  ;;  %10827 = vmatmul.mubr.bf16.gmra.mxu1 %v13669_v57  ;;  %v17046_v48 = vld [vmem:[%s22107_s1 + $0xc38] sm:$0xff]   ;;  %v17049_v57 = vld [vmem:[%s22107_s1 + $0xcf0] sm:$0xff]  }
 0x179   :  { %15422 = vmatpush3.bf16.msra.mxu0 %v17022_v56  ;;  %15450 = vmatpush3.bf16.msra.mxu1 %v17023_v58 }
 0x17a   :  { %15423 = vmatprep.subr.bf16.mxu0 %v17024_v59  ;;  %15451 = vmatprep.subr.bf16.mxu1 %v17025_v60  ;;  %v17050_v60 = vld [vmem:[%s22107_s1 + $0xc30] sm:$0xff]  }
 0x17b   :  { %10916 = vmatprep.mubr.bf16.mxu1 %v13546_v43  ;;  %v17073_v43 = vld [vmem:[%s22107_s1 + $0xcc0] sm:$0xff]  }
 0x17d   :  { %15424 = vmatpush3.bf16.msra.mxu0 %v17026_v61  ;;  %15452 = vmatpush3.bf16.msra.mxu1 %v17027_v63  ;;  %v17051_v63 = vld [vmem:[%s22107_s1 + $0xcb0] sm:$0xff]  }
 0x17e   :  { %15425 = vmatprep.subr.bf16.mxu0 %v17028_v44  ;;  %15453 = vmatprep.subr.bf16.mxu1 %v17029_v1  ;;  %v179_v44 = vld [vmem:[%s22108_s0 + $0x4b0] sm:$0xff] }
 0x181   :  { %15426 = vmatpush3.bf16.msra.mxu0 %v17030_v2  ;;  %15454 = vmatpush3.bf16.msra.mxu1 %v17031_v4 }
 0x182   :  { %15427 = vmatprep.subr.bf16.mxu0 %v17032_v53  ;;  %15455 = vmatprep.subr.bf16.mxu1 %v17033_v9  ;;  %v17053_v53 = vld [vmem:[%s22107_s1 + $0xce8] sm:$0xff]   ;;  %v244_v9 = vld [vmem:[%s22108_s0 + $0x6b8] sm:$0xff] }
 0x183   :  { %v15097_v5 = vpop.f32.mrf.mxu0 }
 0x184   :  { %v15125_v7 = vpop.f32.mrf.mxu1 }
 0x185   :  { %v15098_v52 = vpop.f32.mrf.mxu0  ;;  %15428 = vmatpush3.bf16.msra.mxu0 %v17034_v10  ;;  %15456 = vmatpush3.bf16.msra.mxu1 %v17035_v14  ;;  %v17054_v10 = vld [vmem:[%s22107_s1 + $0xc28] sm:$0xff]   ;;  %v17056_v14 = vld [vmem:[%s22107_s1 + $0xc60] sm:$0xff]  }
 0x186   :  { %v15099_v11 = vadd.f32 %v15098_v52, %v15097_v5  ;;  %v15126_v13 = vpop.f32.mrf.mxu1  ;;  %15429 = vmatprep.subr.bf16.mxu0 %v17036_v17  ;;  %15457 = vmatprep.subr.bf16.mxu1 %v17037_v20  ;;  %v17052_v5 = vld [vmem:[%s22107_s1 + $0xc68] sm:$0xff]   ;;  %v17059_v17 = vld [vmem:[%s22107_s1 + $0xca0] sm:$0xff]   ;;  %v17062_v20 = vld [vmem:[%s22107_s1 + $0xc18] sm:$0xff]  }
 0x187   :  { %v15127_v0 = vadd.f32 %v15126_v13, %v15125_v7  ;;  %v15100_v16 = vpop.f32.mrf.mxu0  ;;  %v180_v7 = vld [vmem:[%s22108_s0 + $0x4b8] sm:$0xff]  ;;  %v17055_v13 = vld [vmem:[%s22107_s1 + $0xca8] sm:$0xff]  }
 0x188   :  { %v10282_v19 = vadd.f32 %v15099_v11, %v19069_v8  ;;  %v15128_v62 = vpop.f32.mrf.mxu1  ;;  %v17039_v8 = vld [vmem:[%s22107_s1 + $0xb88] sm:$0xff]   ;;  %v13674_v52 = vcombine.high %v180_v7, %v244_v9  ;;  %v13673_v11 = vcombine.low %v180_v7, %v244_v9 }
 0x189   :  { %v15101_v6 = vpop.f32.mrf.mxu0  ;;  %15430 = vmatpush3.bf16.msra.mxu0 %v17038_v22  ;;  %15458 = vmatpush3.bf16.msra.mxu1 %v17039_v8  ;;  %v17064_v22 = vld [vmem:[%s22107_s1 + $0xc50] sm:$0xff]  }
 0x18a   :  { %v19198_v3 = vadd.f32 %v15127_v0, %v10282_v19  ;;  %v15102_v24 = vadd.f32 %v15101_v6, %v15100_v16  ;;  %v15129_v25 = vpop.f32.mrf.mxu1  ;;  %15431 = vmatprep.subr.bf16.mxu0 %v17040_v26  ;;  %15459 = vmatprep.subr.bf16.mxu1 %v17041_v29  ;;  %v17057_v0 = vld [vmem:[%s22107_s1 + $0xce0] sm:$0xff]   ;;  %v17060_v19 = vld [vmem:[%s22107_s1 + $0xc58] sm:$0xff]   ;;  %v17066_v26 = vld [vmem:[%s22107_s1 + $0xc10] sm:$0xff]  }
 0x18b   :  { %v15130_v28 = vadd.f32 %v15129_v25, %v15128_v62  ;;  %v15103_v15 = vpop.f32.mrf.mxu0  ;;  %v17058_v16 = vld [vmem:[%s22107_s1 + $0xc20] sm:$0xff]   ;;  %v17061_v62 = vld [vmem:[%s22107_s1 + $0xcd8] sm:$0xff]   ;;  %v17065_v25 = vld [vmem:[%s22107_s1 + $0xcd0] sm:$0xff]  }
 0x18c   :  { %v10285_v27 = vadd.f32 %v15102_v24, %v19087_v18  ;;  %v51_v18 = vld [vmem:[%s22108_s0 + $0xb0] sm:$0xff]  ;;  %v15131_v41 = vpop.f32.mrf.mxu1  ;;  %v17063_v6 = vld [vmem:[%s22107_s1 + $0xc98] sm:$0xff]  }
 0x18d   :  { %v15104_v36 = vpop.f32.mrf.mxu0  ;;  %15432 = vmatpush3.bf16.msra.mxu0 %v17042_v31  ;;  %v13543_v37 = vcombine.low %v51_v18, %v115_v33  ;;  %v13544_v21 = vcombine.high %v51_v18, %v115_v33  ;;  %15460 = vmatpush3.bf16.msra.mxu1 %v17043_v32  ;;  %v17068_v31 = vld [vmem:[%s22107_s1 + $0xc48] sm:$0xff]  }
 0x18e   :  { %v19213_v12 = vadd.f32 %v15130_v28, %v10285_v27  ;;  %v15105_v39 = vadd.f32 %v15104_v36, %v15103_v15  ;;  %v15132_v47 = vpop.f32.mrf.mxu1  ;;  %15473 = vmatprep.subr.bf16.mxu0 %v17044_v45  ;;  %15501 = vmatprep.subr.bf16.mxu1 %v17045_v46  ;;  %v17067_v28 = vld [vmem:[%s22107_s1 + $0xc90] sm:$0xff]   ;;  %v17069_v33 = vld [vmem:[%s22107_s1 + $0xcc8] sm:$0xff]  }
 0x18f   :  { %v15106_v30 = vpop.f32.mrf.mxu0  ;;  %10867 = vmatprep.mubr.bf16.mxu0 %v13544_v21  ;;  %v15133_v49 = vadd.f32 %v15132_v47, %v15131_v41  ;;  %v17070_v21 = vld [vmem:[%s22107_s1 + $0xc08] sm:$0xff]   ;;  %v17075_v47 = vld [vmem:[%s22107_s1 + $0xc80] sm:$0xff]  }
 0x190   :  { %v10290_v34 = vadd.f32 %v15105_v39, %v19117_v40  ;;  %10868 = vmatmul.mubr.bf16.vlgmr.msra.gmra.mxu0 %v13543_v37  ;;  %10917 = vmatmul.mubr.bf16.vlgmr.msra.gmra.mxu1 %v13545_v42  ;;  %v15134_v35 = vpop.f32.mrf.mxu1  ;;  %v17048_v40 = vld [vmem:[%s22107_s1 + $0xc70] sm:$0xff]  }
 0x191   :  { %v15107_v51 = vpop.f32.mrf.mxu0  ;;  %15474 = vmatpush3.bf16.msra.mxu0 %v17046_v48  ;;  %15502 = vmatpush3.bf16.msra.mxu1 %v17047_v54  ;;  %v54_v54 = vld [vmem:[%s22108_s0 + $0xc8] sm:$0xff] }
 0x192   :  { %v15108_v55 = vadd.f32 %v15107_v51, %v15106_v30  ;;  %v19246_v56 = vadd.f32 %v15133_v49, %v10290_v34  ;;  %v15135_v59 = vpop.f32.mrf.mxu1  ;;  %15475 = vmatprep.subr.bf16.mxu0 %v17048_v40  ;;  %15503 = vmatprep.subr.bf16.mxu1 %v17049_v57  ;;  %v17074_v34 = vld [vmem:[%s22107_s1 + $0xc00] sm:$0xff]   ;;  %v118_v57 = vld [vmem:[%s22108_s0 + $0x2c8] sm:$0xff] }
 0x193   :  { %v15136_v61 = vadd.f32 %v15135_v59, %v15134_v35  ;;  %10924 = vmatprep.mubr.bf16.mxu1 %v13674_v52  ;;  %v117_v51 = vld [vmem:[%s22108_s0 + $0x2c0] sm:$0xff]  ;;  %v17080_v52 = vld [vmem:[%s22107_s1 + $0xd70] sm:$0xff]  }
 0x194   :  { %v10293_v58 = vadd.f32 %v15108_v55, %v19135_v50  ;;  %v243_v50 = vld [vmem:[%s22108_s0 + $0x6b0] sm:$0xff] }
 0x195   :  { %15476 = vmatpush3.bf16.msra.mxu0 %v17050_v60  ;;  %15504 = vmatpush3.bf16.msra.mxu1 %v17051_v63  ;;  %v13672_v2 = vcombine.high %v179_v44, %v243_v50  ;;  %v13671_v4 = vcombine.low %v179_v44, %v243_v50  ;;  %v13549_v60 = vcombine.low %v54_v54, %v118_v57  ;;  %v17076_v63 = vld [vmem:[%s22107_s1 + $0xd78] sm:$0xff]  }
 0x196   :  { %v19264_v1 = vadd.f32 %v15136_v61, %v10293_v58  ;;  %15477 = vmatprep.subr.bf16.mxu0 %v17052_v5  ;;  %15505 = vmatprep.subr.bf16.mxu1 %v17053_v53  ;;  %v13550_v61 = vcombine.high %v54_v54, %v118_v57  ;;  %v17077_v50 = vld [vmem:[%s22107_s1 + $0xdf8] sm:$0xff]   ;;  %v17103_v57 = vld [vmem:[%s22107_s1 + $0xd88] sm:$0xff]  }
 0x197   :  { %10875 = vmatprep.mubr.bf16.mxu0 %v13672_v2  ;;  %v17078_v5 = vld [vmem:[%s22107_s1 + $0xd38] sm:$0xff]  }
 0x198   :  { %10876 = vmatmul.mubr.bf16.gmra.mxu0 %v13671_v4  ;;  %10925 = vmatmul.mubr.bf16.gmra.mxu1 %v13673_v11 }
 0x199   :  { %15478 = vmatpush3.bf16.msra.mxu0 %v17054_v10  ;;  %15506 = vmatpush3.bf16.msra.mxu1 %v17055_v13  ;;  %v17081_v13 = vld [vmem:[%s22107_s1 + $0xdf0] sm:$0xff]  }
 0x19a   :  { %15479 = vmatprep.subr.bf16.mxu0 %v17056_v14  ;;  %15507 = vmatprep.subr.bf16.mxu1 %v17057_v0  ;;  %v17082_v0 = vld [vmem:[%s22107_s1 + $0xd30] sm:$0xff]  }
 0x19b   :  { %11014 = vmatprep.mubr.bf16.mxu1 %v13550_v61 }
 0x19d   :  { %15480 = vmatpush3.bf16.msra.mxu0 %v17058_v16  ;;  %15508 = vmatpush3.bf16.msra.mxu1 %v17059_v17  ;;  %v17083_v17 = vld [vmem:[%s22107_s1 + $0xdb0] sm:$0xff]  }
 0x19e   :  { %15481 = vmatprep.subr.bf16.mxu0 %v17060_v19  ;;  %15509 = vmatprep.subr.bf16.mxu1 %v17061_v62  ;;  %v245_v19 = vld [vmem:[%s22108_s0 + $0x6c0] sm:$0xff] }
 0x1a1   :  { %15482 = vmatpush3.bf16.msra.mxu0 %v17062_v20  ;;  %15510 = vmatpush3.bf16.msra.mxu1 %v17063_v6  ;;  %v17084_v6 = vld [vmem:[%s22107_s1 + $0xd68] sm:$0xff]  }
 0x1a2   :  { %15483 = vmatprep.subr.bf16.mxu0 %v17064_v22  ;;  %15511 = vmatprep.subr.bf16.mxu1 %v17065_v25  ;;  %v182_v25 = vld [vmem:[%s22108_s0 + $0x4c8] sm:$0xff] }
 0x1a3   :  { %v15153_v24 = vpop.f32.mrf.mxu0 }
 0x1a4   :  { %v15181_v8 = vpop.f32.mrf.mxu1 }
 0x1a5   :  { %v15154_v27 = vpop.f32.mrf.mxu0  ;;  %15484 = vmatpush3.bf16.msra.mxu0 %v17066_v26  ;;  %15512 = vmatpush3.bf16.msra.mxu1 %v17067_v28 }
 0x1a6   :  { %v15155_v29 = vadd.f32 %v15154_v27, %v15153_v24  ;;  %v15182_v15 = vpop.f32.mrf.mxu1  ;;  %15485 = vmatprep.subr.bf16.mxu0 %v17068_v31  ;;  %15513 = vmatprep.subr.bf16.mxu1 %v17069_v33  ;;  %v17085_v24 = vld [vmem:[%s22107_s1 + $0xde8] sm:$0xff]   ;;  %v17089_v31 = vld [vmem:[%s22107_s1 + $0xde0] sm:$0xff]   ;;  %v17092_v33 = vld [vmem:[%s22107_s1 + $0xd58] sm:$0xff]  }
 0x1a7   :  { %v15183_v32 = vadd.f32 %v15182_v15, %v15181_v8  ;;  %v15156_v18 = vpop.f32.mrf.mxu0  ;;  %v246_v8 = vld [vmem:[%s22108_s0 + $0x6c8] sm:$0xff]  ;;  %v17088_v15 = vld [vmem:[%s22107_s1 + $0xd60] sm:$0xff]  }
 0x1a8   :  { %v10380_v36 = vadd.f32 %v15155_v29, %v19198_v3  ;;  %v15184_v37 = vpop.f32.mrf.mxu1  ;;  %v17072_v3 = vld [vmem:[%s22107_s1 + $0xc40] sm:$0xff]   ;;  %v13678_v26 = vcombine.high %v182_v25, %v246_v8  ;;  %v17086_v27 = vld [vmem:[%s22107_s1 + $0xd28] sm:$0xff]   ;;  %v13677_v28 = vcombine.low %v182_v25, %v246_v8 }
 0x1a9   :  { %v15157_v23 = vpop.f32.mrf.mxu0  ;;  %15486 = vmatpush3.bf16.msra.mxu0 %v17070_v21  ;;  %15514 = vmatpush3.bf16.msra.mxu1 %v17071_v38  ;;  %v17087_v29 = vld [vmem:[%s22107_s1 + $0xda8] sm:$0xff]   ;;  %v17095_v21 = vld [vmem:[%s22107_s1 + $0xd98] sm:$0xff]  }
 0x1aa   :  { %v19333_v39 = vadd.f32 %v15183_v32, %v10380_v36  ;;  %v15158_v41 = vadd.f32 %v15157_v23, %v15156_v18  ;;  %v15185_v42 = vpop.f32.mrf.mxu1  ;;  %15487 = vmatprep.subr.bf16.mxu0 %v17072_v3  ;;  %15515 = vmatprep.subr.bf16.mxu1 %v17073_v43  ;;  %v17090_v32 = vld [vmem:[%s22107_s1 + $0xd20] sm:$0xff]   ;;  %v17093_v36 = vld [vmem:[%s22107_s1 + $0xdd8] sm:$0xff]   ;;  %v17096_v23 = vld [vmem:[%s22107_s1 + $0xd50] sm:$0xff]  }
 0x1ab   :  { %v15186_v30 = vadd.f32 %v15185_v42, %v15184_v37  ;;  %v15159_v46 = vpop.f32.mrf.mxu0  ;;  %v17091_v18 = vld [vmem:[%s22107_s1 + $0xda0] sm:$0xff]   ;;  %v17094_v37 = vld [vmem:[%s22107_s1 + $0xd18] sm:$0xff]   ;;  %v17097_v42 = vld [vmem:[%s22107_s1 + $0xdd0] sm:$0xff]  }
 0x1ac   :  { %v10383_v45 = vadd.f32 %v15158_v41, %v19213_v12  ;;  %v53_v12 = vld [vmem:[%s22108_s0 + $0xc0] sm:$0xff]  ;;  %v15187_v58 = vpop.f32.mrf.mxu1  ;;  %v17098_v3 = vld [vmem:[%s22107_s1 + $0xd10] sm:$0xff]  }
 0x1ad   :  { %v15160_v49 = vpop.f32.mrf.mxu0  ;;  %15488 = vmatpush3.bf16.msra.mxu0 %v17074_v34  ;;  %15516 = vmatpush3.bf16.msra.mxu1 %v17075_v47  ;;  %v13547_v35 = vcombine.low %v53_v12, %v117_v51  ;;  %v13548_v40 = vcombine.high %v53_v12, %v117_v51  ;;  %v17100_v47 = vld [vmem:[%s22107_s1 + $0xd48] sm:$0xff]  }
 0x1ae   :  { %v19348_v48 = vadd.f32 %v15186_v30, %v10383_v45  ;;  %v15161_v55 = vadd.f32 %v15160_v49, %v15159_v46  ;;  %v15188_v2 = vpop.f32.mrf.mxu1  ;;  %15529 = vmatprep.subr.bf16.mxu0 %v17076_v63  ;;  %15557 = vmatprep.subr.bf16.mxu1 %v17077_v50  ;;  %v17099_v30 = vld [vmem:[%s22107_s1 + $0xd90] sm:$0xff]   ;;  %v17101_v51 = vld [vmem:[%s22107_s1 + $0xdc8] sm:$0xff]   ;;  %v17106_v50 = vld [vmem:[%s22107_s1 + $0xd00] sm:$0xff]  }
 0x1af   :  { %v15162_v59 = vpop.f32.mrf.mxu0  ;;  %10965 = vmatprep.mubr.bf16.mxu0 %v13548_v40  ;;  %v15189_v53 = vadd.f32 %v15188_v2, %v15187_v58  ;;  %v17107_v2 = vld [vmem:[%s22107_s1 + $0xd80] sm:$0xff]  }
 0x1b0   :  { %v10388_v44 = vadd.f32 %v15161_v55, %v19246_v56  ;;  %10966 = vmatmul.mubr.bf16.vlgmr.msra.gmra.mxu0 %v13547_v35  ;;  %11015 = vmatmul.mubr.bf16.vlgmr.msra.gmra.mxu1 %v13549_v60  ;;  %v17079_v56 = vld [vmem:[%s22107_s1 + $0xdb8] sm:$0xff]   ;;  %v15190_v9 = vpop.f32.mrf.mxu1  ;;  %v17102_v55 = vld [vmem:[%s22107_s1 + $0xd08] sm:$0xff]   ;;  %v17105_v60 = vld [vmem:[%s22107_s1 + $0xdc0] sm:$0xff]  }
 0x1b1   :  { %v15163_v4 = vpop.f32.mrf.mxu0  ;;  %15530 = vmatpush3.bf16.msra.mxu0 %v17078_v5  ;;  %15558 = vmatpush3.bf16.msra.mxu1 %v17079_v56  ;;  %v120_v56 = vld [vmem:[%s22108_s0 + $0x2d8] sm:$0xff] }
 0x1b2   :  { %v15164_v7 = vadd.f32 %v15163_v4, %v15162_v59  ;;  %v19378_v10 = vadd.f32 %v15189_v53, %v10388_v44  ;;  %v15191_v14 = vpop.f32.mrf.mxu1  ;;  %15531 = vmatprep.subr.bf16.mxu0 %v17080_v52  ;;  %15559 = vmatprep.subr.bf16.mxu1 %v17081_v13  ;;  %v55_v4 = vld [vmem:[%s22108_s0 + $0xd0] sm:$0xff] }
 0x1b3   :  { %v15192_v16 = vadd.f32 %v15191_v14, %v15190_v9  ;;  %11022 = vmatprep.mubr.bf16.mxu1 %v13678_v26 }
 0x1b4   :  { %v10391_v11 = vadd.f32 %v15164_v7, %v19264_v1  ;;  %v181_v1 = vld [vmem:[%s22108_s0 + $0x4c0] sm:$0xff]  ;;  %v56_v7 = vld [vmem:[%s22108_s0 + $0xd8] sm:$0xff] }
 0x1b5   :  { %15532 = vmatpush3.bf16.msra.mxu0 %v17082_v0  ;;  %v13676_v62 = vcombine.high %v181_v1, %v245_v19  ;;  %v13675_v20 = vcombine.low %v181_v1, %v245_v19  ;;  %15560 = vmatpush3.bf16.msra.mxu1 %v17083_v17  ;;  %v13553_v13 = vcombine.low %v56_v7, %v120_v56  ;;  %v17108_v0 = vld [vmem:[%s22107_s1 + $0xe78] sm:$0xff]  }
 0x1b6   :  { %v19399_v22 = vadd.f32 %v15192_v16, %v10391_v11  ;;  %15533 = vmatprep.subr.bf16.mxu0 %v17084_v6  ;;  %15561 = vmatprep.subr.bf16.mxu1 %v17085_v24  ;;  %v13554_v14 = vcombine.high %v56_v7, %v120_v56  ;;  %v17109_v1 = vld [vmem:[%s22107_s1 + $0xef8] sm:$0xff]   ;;  %v17133_v7 = vld [vmem:[%s22107_s1 + $0xec8] sm:$0xff]  }
 0x1b7   :  { %10973 = vmatprep.mubr.bf16.mxu0 %v13676_v62  ;;  %v17110_v62 = vld [vmem:[%s22107_s1 + $0xe38] sm:$0xff]  }
 0x1b8   :  { %10974 = vmatmul.mubr.bf16.gmra.mxu0 %v13675_v20  ;;  %11023 = vmatmul.mubr.bf16.gmra.mxu1 %v13677_v28  ;;  %v17111_v24 = vld [vmem:[%s22107_s1 + $0xeb8] sm:$0xff]  }
 0x1b9   :  { %15534 = vmatpush3.bf16.msra.mxu0 %v17086_v27  ;;  %15562 = vmatpush3.bf16.msra.mxu1 %v17087_v29  ;;  %v17113_v27 = vld [vmem:[%s22107_s1 + $0xef0] sm:$0xff]  }
 0x1ba   :  { %15535 = vmatprep.subr.bf16.mxu0 %v17088_v15  ;;  %15563 = vmatprep.subr.bf16.mxu1 %v17089_v31  ;;  %v17114_v15 = vld [vmem:[%s22107_s1 + $0xe30] sm:$0xff]  }
 0x1bb   :  { %11112 = vmatprep.mubr.bf16.mxu1 %v13554_v14  ;;  %v17136_v14 = vld [vmem:[%s22107_s1 + $0xe40] sm:$0xff]  }
 0x1bd   :  { %15536 = vmatpush3.bf16.msra.mxu0 %v17090_v32  ;;  %15564 = vmatpush3.bf16.msra.mxu1 %v17091_v18  ;;  %v17115_v32 = vld [vmem:[%s22107_s1 + $0xeb0] sm:$0xff]  }
 0x1be   :  { %15537 = vmatprep.subr.bf16.mxu0 %v17092_v33  ;;  %15565 = vmatprep.subr.bf16.mxu1 %v17093_v36  ;;  %v183_v33 = vld [vmem:[%s22108_s0 + $0x4d0] sm:$0xff] }
 0x1c1   :  { %15538 = vmatpush3.bf16.msra.mxu0 %v17094_v37  ;;  %15566 = vmatpush3.bf16.msra.mxu1 %v17095_v21  ;;  %v17116_v21 = vld [vmem:[%s22107_s1 + $0xe68] sm:$0xff]  }
 0x1c2   :  { %15539 = vmatprep.subr.bf16.mxu0 %v17096_v23  ;;  %15567 = vmatprep.subr.bf16.mxu1 %v17097_v42  ;;  %v248_v42 = vld [vmem:[%s22108_s0 + $0x6d8] sm:$0xff] }
 0x1c4   :  { %v15237_v41 = vpop.f32.mrf.mxu1 }
 0x1c5   :  { %15540 = vmatpush3.bf16.msra.mxu0 %v17098_v3  ;;  %15568 = vmatpush3.bf16.msra.mxu1 %v17099_v30  ;;  %v17119_v30 = vld [vmem:[%s22107_s1 + $0xea8] sm:$0xff]  }
 0x1c6   :  { %v15238_v45 = vpop.f32.mrf.mxu1  ;;  %15541 = vmatprep.subr.bf16.mxu0 %v17100_v47  ;;  %15569 = vmatprep.subr.bf16.mxu1 %v17101_v51  ;;  %v17122_v47 = vld [vmem:[%s22107_s1 + $0xe20] sm:$0xff]   ;;  %v17125_v51 = vld [vmem:[%s22107_s1 + $0xed8] sm:$0xff]  }
 0x1c7   :  { %v15239_v34 = vadd.f32 %v15238_v45, %v15237_v41  ;;  %v184_v41 = vld [vmem:[%s22108_s0 + $0x4d8] sm:$0xff] }
 0x1c8   :  { %v15240_v12 = vpop.f32.mrf.mxu1  ;;  %v13682_v3 = vcombine.high %v184_v41, %v248_v42  ;;  %v13681_v45 = vcombine.low %v184_v41, %v248_v42  ;;  %v17143_v41 = vld [vmem:[%s22107_s1 + $0xfb8] sm:$0xff]  }
 0x1c9   :  { %15542 = vmatpush3.bf16.msra.mxu0 %v17102_v55  ;;  %15570 = vmatpush3.bf16.msra.mxu1 %v17103_v57  ;;  %v17127_v55 = vld [vmem:[%s22107_s1 + $0xe98] sm:$0xff]  }
 0x1ca   :  { %v15241_v40 = vpop.f32.mrf.mxu1  ;;  %15571 = vmatprep.subr.bf16.mxu1 %v17105_v60  ;;  %v17130_v60 = vld [vmem:[%s22107_s1 + $0xe10] sm:$0xff]  }
 0x1cb   :  { %v15242_v63 = vadd.f32 %v15241_v40, %v15240_v12  ;;  %v17124_v12 = vld [vmem:[%s22107_s1 + $0xe58] sm:$0xff]   ;;  %v17128_v40 = vld [vmem:[%s22107_s1 + $0xe50] sm:$0xff]  }
 0x1cc   :  { %v15243_v16 = vpop.f32.mrf.mxu1 }
 0x1cd   :  { %15572 = vmatpush3.bf16.msra.mxu1 %v17107_v2 }
 0x1ce   :  { %v15244_v20 = vpop.f32.mrf.mxu1  ;;  %15613 = vmatprep.subr.bf16.mxu1 %v17109_v1 }
 0x1cf   :  { %v15245_v25 = vadd.f32 %v15244_v20, %v15243_v16  ;;  %v17139_v20 = vld [vmem:[%s22107_s1 + $0xe80] sm:$0xff]  }
 0x1d0   :  { %v15209_v38 = vpop.f32.mrf.mxu0  ;;  %11113 = vmatmul.mubr.bf16.vlgmr.msra.gmra.mxu1 %v13553_v13  ;;  %v15246_v26 = vpop.f32.mrf.mxu1 }
 0x1d1   :  { %15614 = vmatpush3.bf16.msra.mxu1 %v17111_v24  ;;  %11120 = vmatprep.mubr.bf16.mxu1 %v13682_v3 }
 0x1d2   :  { %v15210_v43 = vpop.f32.mrf.mxu0  ;;  %v15247_v31 = vpop.f32.mrf.mxu1  ;;  %15615 = vmatprep.subr.bf16.mxu1 %v17113_v27 }
 0x1d3   :  { %v15211_v46 = vadd.f32 %v15210_v43, %v15209_v38  ;;  %v15248_v18 = vadd.f32 %v15247_v31, %v15246_v26  ;;  %v17117_v38 = vld [vmem:[%s22107_s1 + $0xee8] sm:$0xff]  }
 0x1d4   :  { %v15212_v49 = vpop.f32.mrf.mxu0  ;;  %v17118_v43 = vld [vmem:[%s22107_s1 + $0xe28] sm:$0xff]  }
 0x1d5   :  { %v10478_v54 = vadd.f32 %v15211_v46, %v19333_v39  ;;  %v17104_v39 = vld [vmem:[%s22107_s1 + $0xd40] sm:$0xff]   ;;  %15616 = vmatpush3.bf16.msra.mxu1 %v17115_v32  ;;  %v122_v26 = vld [vmem:[%s22108_s0 + $0x2e8] sm:$0xff]  ;;  %v17140_v32 = vld [vmem:[%s22107_s1 + $0xf78] sm:$0xff]  }
 0x1d6   :  { %v15213_v35 = vpop.f32.mrf.mxu0  ;;  %15543 = vmatprep.subr.bf16.mxu0 %v17104_v39  ;;  %15617 = vmatprep.subr.bf16.mxu1 %v17117_v38  ;;  %v17120_v46 = vld [vmem:[%s22107_s1 + $0xe60] sm:$0xff]  }
 0x1d7   :  { %v19465_v58 = vadd.f32 %v15239_v34, %v10478_v54  ;;  %v15214_v59 = vadd.f32 %v15213_v35, %v15212_v49  ;;  %15544 = vmatpush3.bf16.msra.mxu0 %v17106_v50  ;;  %v17121_v34 = vld [vmem:[%s22107_s1 + $0xee0] sm:$0xff]   ;;  %v17126_v54 = vld [vmem:[%s22107_s1 + $0xe18] sm:$0xff]  }
 0x1d8   :  { %v15215_v44 = vpop.f32.mrf.mxu0  ;;  %15585 = vmatprep.subr.bf16.mxu0 %v17108_v0  ;;  %11121 = vmatmul.mubr.bf16.gmra.mxu1 %v13681_v45  ;;  %v17123_v49 = vld [vmem:[%s22107_s1 + $0xea0] sm:$0xff]   ;;  %v17145_v45 = vld [vmem:[%s22107_s1 + $0xff0] sm:$0xff]  }
 0x1d9   :  { %v10481_v61 = vadd.f32 %v15214_v59, %v19348_v48  ;;  %v119_v48 = vld [vmem:[%s22108_s0 + $0x2d0] sm:$0xff]  ;;  %15618 = vmatpush3.bf16.msra.mxu1 %v17119_v30 }
 0x1da   :  { %v15216_v53 = vpop.f32.mrf.mxu0  ;;  %v13551_v52 = vcombine.low %v55_v4, %v119_v48  ;;  %v13552_v11 = vcombine.high %v55_v4, %v119_v48  ;;  %15619 = vmatprep.subr.bf16.mxu1 %v17121_v34  ;;  %v17129_v59 = vld [vmem:[%s22107_s1 + $0xed0] sm:$0xff]   ;;  %v17132_v4 = vld [vmem:[%s22107_s1 + $0xe48] sm:$0xff]  }
 0x1db   :  { %v19483_v5 = vadd.f32 %v15242_v63, %v10481_v61  ;;  %v15217_v9 = vadd.f32 %v15216_v53, %v15215_v44  ;;  %v17131_v44 = vld [vmem:[%s22107_s1 + $0xe90] sm:$0xff]  }
 0x1dc   :  { %v15218_v17 = vpop.f32.mrf.mxu0  ;;  %11063 = vmatprep.mubr.bf16.mxu0 %v13552_v11  ;;  %v17146_v34 = vld [vmem:[%s22107_s1 + $0xf30] sm:$0xff]  }
 0x1dd   :  { %v10486_v19 = vadd.f32 %v15217_v9, %v19378_v10  ;;  %11064 = vmatmul.mubr.bf16.vlgmr.msra.gmra.mxu0 %v13551_v52  ;;  %v17112_v10 = vld [vmem:[%s22107_s1 + $0xe70] sm:$0xff]   ;;  %15620 = vmatpush3.bf16.msra.mxu1 %v17123_v49  ;;  %v17134_v9 = vld [vmem:[%s22107_s1 + $0xe08] sm:$0xff]  }
 0x1de   :  { %v15219_v6 = vpop.f32.mrf.mxu0  ;;  %15586 = vmatpush3.bf16.msra.mxu0 %v17110_v62  ;;  %15621 = vmatprep.subr.bf16.mxu1 %v17125_v51  ;;  %v17147_v49 = vld [vmem:[%s22107_s1 + $0xfb0] sm:$0xff]  }
 0x1df   :  { %v15220_v8 = vadd.f32 %v15219_v6, %v15218_v17  ;;  %v19513_v28 = vadd.f32 %v15245_v25, %v10486_v19  ;;  %15587 = vmatprep.subr.bf16.mxu0 %v17112_v10  ;;  %v17137_v17 = vld [vmem:[%s22107_s1 + $0xec0] sm:$0xff]   ;;  %v58_v10 = vld [vmem:[%s22108_s0 + $0xe8] sm:$0xff] }
 0x1e0   :  { %v17138_v19 = vld [vmem:[%s22107_s1 + $0xe00] sm:$0xff]   ;;  %v13558_v31 = vcombine.high %v58_v10, %v122_v26 }
 0x1e1   :  { %v10489_v29 = vadd.f32 %v15220_v8, %v19399_v22  ;;  %v247_v22 = vld [vmem:[%s22108_s0 + $0x6d0] sm:$0xff]  ;;  %15622 = vmatpush3.bf16.msra.mxu1 %v17127_v55  ;;  %v121_v6 = vld [vmem:[%s22108_s0 + $0x2e0] sm:$0xff] }
 0x1e2   :  { %15588 = vmatpush3.bf16.msra.mxu0 %v17114_v15  ;;  %v13680_v36 = vcombine.high %v183_v33, %v247_v22  ;;  %v13679_v37 = vcombine.low %v183_v33, %v247_v22  ;;  %15623 = vmatprep.subr.bf16.mxu1 %v17129_v59  ;;  %v13557_v15 = vcombine.low %v58_v10, %v122_v26  ;;  %v17141_v33 = vld [vmem:[%s22107_s1 + $0xff8] sm:$0xff]   ;;  %v250_v59 = vld [vmem:[%s22108_s0 + $0x6e8] sm:$0xff] }
 0x1e3   :  { %v19531_v23 = vadd.f32 %v15248_v18, %v10489_v29  ;;  %15589 = vmatprep.subr.bf16.mxu0 %v17116_v21  ;;  %11210 = vmatprep.mubr.bf16.mxu1 %v13558_v31  ;;  %v17167_v26 = vld [vmem:[%s22107_s1 + $0xf88] sm:$0xff]   ;;  %v17169_v31 = vld [vmem:[%s22107_s1 + $0xfc0] sm:$0xff]  }
 0x1e4   :  { %11071 = vmatprep.mubr.bf16.mxu0 %v13680_v36 }
 0x1e5   :  { %11072 = vmatmul.mubr.bf16.gmra.mxu0 %v13679_v37  ;;  %15624 = vmatpush3.bf16.msra.mxu1 %v17131_v44  ;;  %v17142_v37 = vld [vmem:[%s22107_s1 + $0xf38] sm:$0xff]   ;;  %v17152_v44 = vld [vmem:[%s22107_s1 + $0xf60] sm:$0xff]  }
 0x1e6   :  { %15590 = vmatpush3.bf16.msra.mxu0 %v17118_v43  ;;  %15625 = vmatprep.subr.bf16.mxu1 %v17133_v7  ;;  %v17158_v7 = vld [vmem:[%s22107_s1 + $0xf18] sm:$0xff]  }
 0x1e7   :  { %15591 = vmatprep.subr.bf16.mxu0 %v17120_v46 }
 0x1ea   :  { %15592 = vmatpush3.bf16.msra.mxu0 %v17122_v47 }
 0x1eb   :  { %15593 = vmatprep.subr.bf16.mxu0 %v17124_v12  ;;  %v185_v12 = vld [vmem:[%s22108_s0 + $0x4e0] sm:$0xff] }
 0x1ee   :  { %15594 = vmatpush3.bf16.msra.mxu0 %v17126_v54 }
 0x1ef   :  { %15595 = vmatprep.subr.bf16.mxu0 %v17128_v40  ;;  %v17149_v40 = vld [vmem:[%s22107_s1 + $0xfe8] sm:$0xff]  }
 0x1f0   :  { %v15265_v35 = vpop.f32.mrf.mxu0  ;;  %v15293_v57 = vpop.f32.mrf.mxu1 }
 0x1f2   :  { %v15266_v39 = vpop.f32.mrf.mxu0  ;;  %v15294_v63 = vpop.f32.mrf.mxu1  ;;  %15596 = vmatpush3.bf16.msra.mxu0 %v17130_v60 }
 0x1f3   :  { %v15267_v61 = vadd.f32 %v15266_v39, %v15265_v35  ;;  %v15295_v50 = vadd.f32 %v15294_v63, %v15293_v57  ;;  %15597 = vmatprep.subr.bf16.mxu0 %v17132_v4  ;;  %v17148_v35 = vld [vmem:[%s22107_s1 + $0xf68] sm:$0xff]   ;;  %v17155_v4 = vld [vmem:[%s22107_s1 + $0xfa0] sm:$0xff]  }
 0x1f4   :  { %v15268_v2 = vpop.f32.mrf.mxu0  ;;  %v15296_v48 = vpop.f32.mrf.mxu1  ;;  %v186_v57 = vld [vmem:[%s22108_s0 + $0x4e8] sm:$0xff] }
 0x1f5   :  { %v10576_v53 = vadd.f32 %v15267_v61, %v19465_v58  ;;  %v17135_v58 = vld [vmem:[%s22107_s1 + $0xe88] sm:$0xff]   ;;  %v13685_v39 = vcombine.low %v186_v57, %v250_v59  ;;  %v13686_v60 = vcombine.high %v186_v57, %v250_v59 }
 0x1f6   :  { %v15269_v56 = vpop.f32.mrf.mxu0  ;;  %v15297_v13 = vpop.f32.mrf.mxu1  ;;  %15598 = vmatpush3.bf16.msra.mxu0 %v17134_v9  ;;  %15626 = vmatpush3.bf16.msra.mxu1 %v17135_v58  ;;  %v17150_v61 = vld [vmem:[%s22107_s1 + $0xf28] sm:$0xff]   ;;  %v17160_v9 = vld [vmem:[%s22107_s1 + $0xf50] sm:$0xff]  }
 0x1f7   :  { %v19594_v52 = vadd.f32 %v15295_v50, %v10576_v53  ;;  %v15270_v11 = vadd.f32 %v15269_v56, %v15268_v2  ;;  %v15298_v16 = vadd.f32 %v15297_v13, %v15296_v48  ;;  %15599 = vmatprep.subr.bf16.mxu0 %v17136_v14  ;;  %15627 = vmatprep.subr.bf16.mxu1 %v17137_v17  ;;  %v17151_v63 = vld [vmem:[%s22107_s1 + $0xfa8] sm:$0xff]   ;;  %v17153_v50 = vld [vmem:[%s22107_s1 + $0xfe0] sm:$0xff]   ;;  %v17156_v53 = vld [vmem:[%s22107_s1 + $0xf58] sm:$0xff]  }
 0x1f8   :  { %v15271_v1 = vpop.f32.mrf.mxu0  ;;  %v15299_v29 = vpop.f32.mrf.mxu1  ;;  %v17154_v2 = vld [vmem:[%s22107_s1 + $0xf20] sm:$0xff]   ;;  %v17157_v48 = vld [vmem:[%s22107_s1 + $0xfd8] sm:$0xff]   ;;  %v17161_v13 = vld [vmem:[%s22107_s1 + $0xfd0] sm:$0xff]  }
 0x1f9   :  { %v10579_v0 = vadd.f32 %v15270_v11, %v19483_v5  ;;  %v57_v5 = vld [vmem:[%s22108_s0 + $0xe0] sm:$0xff]  ;;  %v17159_v56 = vld [vmem:[%s22107_s1 + $0xf98] sm:$0xff]   ;;  %v17162_v14 = vld [vmem:[%s22107_s1 + $0xf10] sm:$0xff]  }
 0x1fa   :  { %v15272_v24 = vpop.f32.mrf.mxu0  ;;  %15600 = vmatpush3.bf16.msra.mxu0 %v17138_v19  ;;  %v13555_v25 = vcombine.low %v57_v5, %v121_v6  ;;  %v13556_v8 = vcombine.high %v57_v5, %v121_v6  ;;  %15628 = vmatpush3.bf16.msra.mxu1 %v17139_v20  ;;  %v15300_v36 = vpop.f32.mrf.mxu1  ;;  %v17164_v19 = vld [vmem:[%s22107_s1 + $0xf48] sm:$0xff]  }
 0x1fb   :  { %v19609_v62 = vadd.f32 %v15298_v16, %v10579_v0  ;;  %v15273_v27 = vadd.f32 %v15272_v24, %v15271_v1  ;;  %v15301_v21 = vadd.f32 %v15300_v36, %v15299_v29  ;;  %15641 = vmatprep.subr.bf16.mxu0 %v17140_v32  ;;  %15669 = vmatprep.subr.bf16.mxu1 %v17141_v33  ;;  %v17163_v16 = vld [vmem:[%s22107_s1 + $0xf90] sm:$0xff]   ;;  %v17165_v6 = vld [vmem:[%s22107_s1 + $0xfc8] sm:$0xff]   ;;  %v17171_v36 = vld [vmem:[%s22107_s1 + $0xf80] sm:$0xff]  }
 0x1fc   :  { %v15274_v18 = vpop.f32.mrf.mxu0  ;;  %11161 = vmatprep.mubr.bf16.mxu0 %v13556_v8  ;;  %v15302_v3 = vpop.f32.mrf.mxu1  ;;  %v17166_v8 = vld [vmem:[%s22107_s1 + $0xf08] sm:$0xff]  }
 0x1fd   :  { %v10584_v22 = vadd.f32 %v15273_v27, %v19513_v28  ;;  %11162 = vmatmul.mubr.bf16.vlgmr.msra.gmra.mxu0 %v13555_v25  ;;  %11211 = vmatmul.mubr.bf16.vlgmr.msra.gmra.mxu1 %v13557_v15  ;;  %v17144_v28 = vld [vmem:[%s22107_s1 + $0xf70] sm:$0xff]  }
 0x1fe   :  { %v15275_v38 = vpop.f32.mrf.mxu0  ;;  %15642 = vmatpush3.bf16.msra.mxu0 %v17142_v37  ;;  %15670 = vmatpush3.bf16.msra.mxu1 %v17143_v41  ;;  %v15303_v46 = vpop.f32.mrf.mxu1  ;;  %v60_v41 = vld [vmem:[%s22108_s0 + $0xf8] sm:$0xff] }
 0x1ff   :  { %v15276_v42 = vadd.f32 %v15275_v38, %v15274_v18  ;;  %v19642_v43 = vadd.f32 %v15301_v21, %v10584_v22  ;;  %15643 = vmatprep.subr.bf16.mxu0 %v17144_v28  ;;  %v15304_v47 = vadd.f32 %v15303_v46, %v15302_v3  ;;  %15671 = vmatprep.subr.bf16.mxu1 %v17145_v45  ;;  %v17170_v22 = vld [vmem:[%s22107_s1 + $0xf00] sm:$0xff]   ;;  %v123_v38 = vld [vmem:[%s22108_s0 + $0x2f0] sm:$0xff]  ;;  %v124_v45 = vld [vmem:[%s22108_s0 + $0x2f8] sm:$0xff] }
 0x200   :  { %11218 = vmatprep.mubr.bf16.mxu1 %v13686_v60 }
 0x201   :  { %v10587_v30 = vadd.f32 %v15276_v42, %v19531_v23  ;;  %v249_v23 = vld [vmem:[%s22108_s0 + $0x6e0] sm:$0xff] }
 0x202   :  { %15644 = vmatpush3.bf16.msra.mxu0 %v17146_v34  ;;  %15672 = vmatpush3.bf16.msra.mxu1 %v17147_v49  ;;  %v13683_v54 = vcombine.low %v185_v12, %v249_v23  ;;  %v13684_v55 = vcombine.high %v185_v12, %v249_v23  ;;  %v13561_v34 = vcombine.low %v60_v41, %v124_v45  ;;  %v17172_v49 = vld [vmem:[%s22107_s1 + $0x1078] sm:$0xff]  }
 0x203   :  { %v19660_v51 = vadd.f32 %v15304_v47, %v10587_v30  ;;  %15645 = vmatprep.subr.bf16.mxu0 %v17148_v35  ;;  %15673 = vmatprep.subr.bf16.mxu1 %v17149_v40  ;;  %v13562_v47 = vcombine.high %v60_v41, %v124_v45  ;;  %v17173_v23 = vld [vmem:[%s22107_s1 + $0x10f8] sm:$0xff]   ;;  %v17199_v45 = vld [vmem:[%s22107_s1 + $0x1088] sm:$0xff]  }
 0x204   :  { %11169 = vmatprep.mubr.bf16.mxu0 %v13684_v55  ;;  %v17174_v35 = vld [vmem:[%s22107_s1 + $0x1038] sm:$0xff]  }
 0x205   :  { %11170 = vmatmul.mubr.bf16.gmra.mxu0 %v13683_v54  ;;  %11219 = vmatmul.mubr.bf16.gmra.mxu1 %v13685_v39  ;;  %v17176_v39 = vld [vmem:[%s22107_s1 + $0x1070] sm:$0xff]  }
 0x206   :  { %15646 = vmatpush3.bf16.msra.mxu0 %v17150_v61  ;;  %15674 = vmatpush3.bf16.msra.mxu1 %v17151_v63  ;;  %v17177_v63 = vld [vmem:[%s22107_s1 + $0x10f0] sm:$0xff]  }
 0x207   :  { %15647 = vmatprep.subr.bf16.mxu0 %v17152_v44  ;;  %15675 = vmatprep.subr.bf16.mxu1 %v17153_v50  ;;  %v17178_v50 = vld [vmem:[%s22107_s1 + $0x1030] sm:$0xff]  }
 0x208   :  { %11308 = vmatprep.mubr.bf16.mxu1 %v13562_v47 }
 0x20a   :  { %15648 = vmatpush3.bf16.msra.mxu0 %v17154_v2  ;;  %15676 = vmatpush3.bf16.msra.mxu1 %v17155_v4  ;;  %v17179_v4 = vld [vmem:[%s22107_s1 + $0x10b0] sm:$0xff]  }
 0x20b   :  { %15649 = vmatprep.subr.bf16.mxu0 %v17156_v53  ;;  %15677 = vmatprep.subr.bf16.mxu1 %v17157_v48  ;;  %v251_v53 = vld [vmem:[%s22108_s0 + $0x6f0] sm:$0xff] }
 0x20e   :  { %15650 = vmatpush3.bf16.msra.mxu0 %v17158_v7  ;;  %15678 = vmatpush3.bf16.msra.mxu1 %v17159_v56  ;;  %v17180_v56 = vld [vmem:[%s22107_s1 + $0x1068] sm:$0xff]  }
 0x20f   :  { %15651 = vmatprep.subr.bf16.mxu0 %v17160_v9  ;;  %15679 = vmatprep.subr.bf16.mxu1 %v17161_v13  ;;  %v188_v13 = vld [vmem:[%s22108_s0 + $0x4f8] sm:$0xff] }
 0x210   :  { %v15321_v11 = vpop.f32.mrf.mxu0  ;;  %v15349_v58 = vpop.f32.mrf.mxu1 }
 0x212   :  { %v15322_v0 = vpop.f32.mrf.mxu0  ;;  %v15350_v1 = vpop.f32.mrf.mxu1  ;;  %15652 = vmatpush3.bf16.msra.mxu0 %v17162_v14  ;;  %15680 = vmatpush3.bf16.msra.mxu1 %v17163_v16  ;;  %v17182_v16 = vld [vmem:[%s22107_s1 + $0x1028] sm:$0xff]  }
 0x213   :  { %v15323_v17 = vadd.f32 %v15322_v0, %v15321_v11  ;;  %v15351_v20 = vadd.f32 %v15350_v1, %v15349_v58  ;;  %15653 = vmatprep.subr.bf16.mxu0 %v17164_v19  ;;  %15681 = vmatprep.subr.bf16.mxu1 %v17165_v6  ;;  %v17181_v11 = vld [vmem:[%s22107_s1 + $0x10e8] sm:$0xff]   ;;  %v252_v58 = vld [vmem:[%s22108_s0 + $0x6f8] sm:$0xff]  ;;  %v17184_v1 = vld [vmem:[%s22107_s1 + $0x1060] sm:$0xff]  }
 0x214   :  { %v15324_v5 = vpop.f32.mrf.mxu0  ;;  %v15352_v25 = vpop.f32.mrf.mxu1  ;;  %v13689_v14 = vcombine.low %v188_v13, %v252_v58  ;;  %v13690_v0 = vcombine.high %v188_v13, %v252_v58  ;;  %v17185_v19 = vld [vmem:[%s22107_s1 + $0x10e0] sm:$0xff]   ;;  %v17188_v6 = vld [vmem:[%s22107_s1 + $0x1058] sm:$0xff]  }
 0x215   :  { %v10674_v24 = vadd.f32 %v15323_v17, %v19594_v52  ;;  %v17168_v52 = vld [vmem:[%s22107_s1 + $0xf40] sm:$0xff]   ;;  %v17183_v17 = vld [vmem:[%s22107_s1 + $0x10a8] sm:$0xff]  }
 0x216   :  { %v15325_v10 = vpop.f32.mrf.mxu0  ;;  %v15353_v15 = vpop.f32.mrf.mxu1  ;;  %15654 = vmatpush3.bf16.msra.mxu0 %v17166_v8  ;;  %15682 = vmatpush3.bf16.msra.mxu1 %v17167_v26  ;;  %v17191_v8 = vld [vmem:[%s22107_s1 + $0x1098] sm:$0xff]  }
 0x217   :  { %v19729_v27 = vadd.f32 %v15351_v20, %v10674_v24  ;;  %v15326_v29 = vadd.f32 %v15325_v10, %v15324_v5  ;;  %v15354_v18 = vadd.f32 %v15353_v15, %v15352_v25  ;;  %15655 = vmatprep.subr.bf16.mxu0 %v17168_v52  ;;  %15683 = vmatprep.subr.bf16.mxu1 %v17169_v31  ;;  %v17186_v20 = vld [vmem:[%s22107_s1 + $0x1020] sm:$0xff]   ;;  %v17189_v24 = vld [vmem:[%s22107_s1 + $0x10d8] sm:$0xff]   ;;  %v17192_v10 = vld [vmem:[%s22107_s1 + $0x1050] sm:$0xff]  }
 0x218   :  { %v15327_v33 = vpop.f32.mrf.mxu0  ;;  %v15355_v30 = vpop.f32.mrf.mxu1  ;;  %v17187_v5 = vld [vmem:[%s22107_s1 + $0x10a0] sm:$0xff]   ;;  %v17190_v25 = vld [vmem:[%s22107_s1 + $0x1018] sm:$0xff]   ;;  %v17193_v15 = vld [vmem:[%s22107_s1 + $0x10d0] sm:$0xff]  }
 0x219   :  { %v10677_v32 = vadd.f32 %v15326_v29, %v19609_v62  ;;  %v59_v62 = vld [vmem:[%s22108_s0 + $0xf0] sm:$0xff] }
 0x21a   :  { %v15328_v21 = vpop.f32.mrf.mxu0  ;;  %15656 = vmatpush3.bf16.msra.mxu0 %v17170_v22  ;;  %15684 = vmatpush3.bf16.msra.mxu1 %v17171_v36  ;;  %v13559_v3 = vcombine.low %v59_v62, %v123_v38  ;;  %v13560_v28 = vcombine.high %v59_v62, %v123_v38  ;;  %v15356_v54 = vpop.f32.mrf.mxu1  ;;  %v17194_v52 = vld [vmem:[%s22107_s1 + $0x1010] sm:$0xff]   ;;  %v17196_v36 = vld [vmem:[%s22107_s1 + $0x1048] sm:$0xff]  }
 0x21b   :  { %v19744_v37 = vadd.f32 %v15354_v18, %v10677_v32  ;;  %v15329_v42 = vadd.f32 %v15328_v21, %v15327_v33  ;;  %v15357_v40 = vadd.f32 %v15356_v54, %v15355_v30  ;;  %15697 = vmatprep.subr.bf16.mxu0 %v17172_v49  ;;  %15725 = vmatprep.subr.bf16.mxu1 %v17173_v23  ;;  %v17195_v18 = vld [vmem:[%s22107_s1 + $0x1090] sm:$0xff]   ;;  %v17197_v38 = vld [vmem:[%s22107_s1 + $0x10c8] sm:$0xff]   ;;  %v17202_v23 = vld [vmem:[%s22107_s1 + $0x1000] sm:$0xff]  }
 0x21c   :  { %v15330_v46 = vpop.f32.mrf.mxu0  ;;  %11259 = vmatprep.mubr.bf16.mxu0 %v13560_v28  ;;  %v15358_v59 = vpop.f32.mrf.mxu1  ;;  %v17203_v54 = vld [vmem:[%s22107_s1 + $0x1080] sm:$0xff]  }
 0x21d   :  { %v10682_v12 = vadd.f32 %v15329_v42, %v19642_v43  ;;  %11260 = vmatmul.mubr.bf16.vlgmr.msra.gmra.mxu0 %v13559_v3  ;;  %11309 = vmatmul.mubr.bf16.vlgmr.msra.gmra.mxu1 %v13561_v34  ;;  %v17175_v43 = vld [vmem:[%s22107_s1 + $0x10b8] sm:$0xff]   ;;  %v17198_v42 = vld [vmem:[%s22107_s1 + $0x1008] sm:$0xff]   ;;  %v17201_v34 = vld [vmem:[%s22107_s1 + $0x10c0] sm:$0xff]  }
 0x21e   :  { %v15331_v55 = vpop.f32.mrf.mxu0  ;;  %15698 = vmatpush3.bf16.msra.mxu0 %v17174_v35  ;;  %15726 = vmatpush3.bf16.msra.mxu1 %v17175_v43  ;;  %v15359_v44 = vpop.f32.mrf.mxu1  ;;  %v126_v43 = vld [vmem:[%s22108_s0 + $0x308] sm:$0xff] }
 0x21f   :  { %v15332_v57 = vadd.f32 %v15331_v55, %v15330_v46  ;;  %v19774_v60 = vadd.f32 %v15357_v40, %v10682_v12  ;;  %15699 = vmatprep.subr.bf16.mxu0 %v17176_v39  ;;  %v15360_v2 = vadd.f32 %v15359_v44, %v15358_v59  ;;  %15727 = vmatprep.subr.bf16.mxu1 %v17177_v63  ;;  %v61_v55 = vld [vmem:[%s22108_s0 + $0x100] sm:$0xff] }
 0x220   :  { %11316 = vmatprep.mubr.bf16.mxu1 %v13690_v0  ;;  %v17209_v0 = vld [vmem:[%s22107_s1 + $0x11f0] sm:$0xff]  }
 0x221   :  { %v10685_v61 = vadd.f32 %v15332_v57, %v19660_v51  ;;  %v187_v51 = vld [vmem:[%s22108_s0 + $0x4f0] sm:$0xff]  ;;  %v62_v57 = vld [vmem:[%s22108_s0 + $0x108] sm:$0xff] }
 0x222   :  { %15700 = vmatpush3.bf16.msra.mxu0 %v17178_v50  ;;  %v13687_v48 = vcombine.low %v187_v51, %v251_v53  ;;  %v13688_v7 = vcombine.high %v187_v51, %v251_v53  ;;  %15728 = vmatpush3.bf16.msra.mxu1 %v17179_v4  ;;  %v13565_v63 = vcombine.low %v62_v57, %v126_v43  ;;  %v17204_v50 = vld [vmem:[%s22107_s1 + $0x1178] sm:$0xff]  }
 0x223   :  { %v19795_v9 = vadd.f32 %v15360_v2, %v10685_v61  ;;  %15701 = vmatprep.subr.bf16.mxu0 %v17180_v56  ;;  %15729 = vmatprep.subr.bf16.mxu1 %v17181_v11  ;;  %v13566_v44 = vcombine.high %v62_v57, %v126_v43  ;;  %v17205_v51 = vld [vmem:[%s22107_s1 + $0x11f8] sm:$0xff]   ;;  %v17229_v57 = vld [vmem:[%s22107_s1 + $0x11c8] sm:$0xff]  }
 0x224   :  { %11267 = vmatprep.mubr.bf16.mxu0 %v13688_v7  ;;  %v17207_v11 = vld [vmem:[%s22107_s1 + $0x11b8] sm:$0xff]  }
 0x225   :  { %11268 = vmatmul.mubr.bf16.gmra.mxu0 %v13687_v48  ;;  %11317 = vmatmul.mubr.bf16.gmra.mxu1 %v13689_v14  ;;  %v17206_v48 = vld [vmem:[%s22107_s1 + $0x1138] sm:$0xff]  }
 0x226   :  { %15702 = vmatpush3.bf16.msra.mxu0 %v17182_v16  ;;  %15730 = vmatpush3.bf16.msra.mxu1 %v17183_v17 }
 0x227   :  { %15703 = vmatprep.subr.bf16.mxu0 %v17184_v1  ;;  %15731 = vmatprep.subr.bf16.mxu1 %v17185_v19  ;;  %v17210_v1 = vld [vmem:[%s22107_s1 + $0x1130] sm:$0xff]  }
 0x228   :  { %11406 = vmatprep.mubr.bf16.mxu1 %v13566_v44  ;;  %v17232_v44 = vld [vmem:[%s22107_s1 + $0x1140] sm:$0xff]  }
 0x22a   :  { %15704 = vmatpush3.bf16.msra.mxu0 %v17186_v20  ;;  %15732 = vmatpush3.bf16.msra.mxu1 %v17187_v5  ;;  %v17211_v20 = vld [vmem:[%s22107_s1 + $0x11b0] sm:$0xff]  }
 0x22b   :  { %15705 = vmatprep.subr.bf16.mxu0 %v17188_v6  ;;  %15733 = vmatprep.subr.bf16.mxu1 %v17189_v24  ;;  %v189_v6 = vld [vmem:[%s22108_s0 + $0x500] sm:$0xff] }
 0x22e   :  { %15706 = vmatpush3.bf16.msra.mxu0 %v17190_v25  ;;  %15734 = vmatpush3.bf16.msra.mxu1 %v17191_v8  ;;  %v17212_v8 = vld [vmem:[%s22107_s1 + $0x1168] sm:$0xff]  }
 0x22f   :  { %15707 = vmatprep.subr.bf16.mxu0 %v17192_v10  ;;  %15735 = vmatprep.subr.bf16.mxu1 %v17193_v15  ;;  %v254_v15 = vld [vmem:[%s22108_s0 + $0x708] sm:$0xff] }
 0x230   :  { %v15377_v26 = vpop.f32.mrf.mxu0  ;;  %v15405_v29 = vpop.f32.mrf.mxu1 }
 0x232   :  { %v15378_v31 = vpop.f32.mrf.mxu0  ;;  %v15406_v32 = vpop.f32.mrf.mxu1  ;;  %15708 = vmatpush3.bf16.msra.mxu0 %v17194_v52  ;;  %15736 = vmatpush3.bf16.msra.mxu1 %v17195_v18  ;;  %v17215_v18 = vld [vmem:[%s22107_s1 + $0x11a8] sm:$0xff]  }
 0x233   :  { %v15379_v33 = vadd.f32 %v15378_v31, %v15377_v26  ;;  %v15407_v22 = vadd.f32 %v15406_v32, %v15405_v29  ;;  %15709 = vmatprep.subr.bf16.mxu0 %v17196_v36  ;;  %15737 = vmatprep.subr.bf16.mxu1 %v17197_v38  ;;  %v17213_v26 = vld [vmem:[%s22107_s1 + $0x11e8] sm:$0xff]   ;;  %v17218_v36 = vld [vmem:[%s22107_s1 + $0x1120] sm:$0xff]   ;;  %v17221_v38 = vld [vmem:[%s22107_s1 + $0x11d8] sm:$0xff]  }
 0x234   :  { %v15380_v21 = vpop.f32.mrf.mxu0  ;;  %v15408_v62 = vpop.f32.mrf.mxu1  ;;  %v190_v29 = vld [vmem:[%s22108_s0 + $0x508] sm:$0xff] }
 0x235   :  { %v10772_v41 = vadd.f32 %v15379_v33, %v19729_v27  ;;  %v17200_v27 = vld [vmem:[%s22107_s1 + $0x1040] sm:$0xff]   ;;  %v13693_v52 = vcombine.low %v190_v29, %v254_v15  ;;  %v13694_v31 = vcombine.high %v190_v29, %v254_v15  ;;  %v17214_v32 = vld [vmem:[%s22107_s1 + $0x1128] sm:$0xff]   ;;  %v17239_v29 = vld [vmem:[%s22107_s1 + $0x12b8] sm:$0xff]  }
 0x236   :  { %v15381_v3 = vpop.f32.mrf.mxu0  ;;  %v15409_v28 = vpop.f32.mrf.mxu1  ;;  %15710 = vmatpush3.bf16.msra.mxu0 %v17198_v42  ;;  %15738 = vmatpush3.bf16.msra.mxu1 %v17199_v45  ;;  %v17216_v33 = vld [vmem:[%s22107_s1 + $0x1160] sm:$0xff]   ;;  %v17223_v42 = vld [vmem:[%s22107_s1 + $0x1198] sm:$0xff]  }
 0x237   :  { %v19861_v30 = vadd.f32 %v15407_v22, %v10772_v41  ;;  %v15382_v46 = vadd.f32 %v15381_v3, %v15380_v21  ;;  %v15410_v49 = vadd.f32 %v15409_v28, %v15408_v62  ;;  %15711 = vmatprep.subr.bf16.mxu0 %v17200_v27  ;;  %15739 = vmatprep.subr.bf16.mxu1 %v17201_v34  ;;  %v17217_v22 = vld [vmem:[%s22107_s1 + $0x11e0] sm:$0xff]   ;;  %v17220_v62 = vld [vmem:[%s22107_s1 + $0x1158] sm:$0xff]   ;;  %v17224_v28 = vld [vmem:[%s22107_s1 + $0x1150] sm:$0xff]  }
 0x238   :  { %v15383_v12 = vpop.f32.mrf.mxu0  ;;  %v15411_v2 = vpop.f32.mrf.mxu1  ;;  %v17219_v21 = vld [vmem:[%s22107_s1 + $0x11a0] sm:$0xff]   ;;  %v17222_v41 = vld [vmem:[%s22107_s1 + $0x1118] sm:$0xff]   ;;  %v17226_v34 = vld [vmem:[%s22107_s1 + $0x1110] sm:$0xff]  }
 0x239   :  { %v10775_v47 = vadd.f32 %v15382_v46, %v19744_v37  ;;  %v125_v37 = vld [vmem:[%s22108_s0 + $0x300] sm:$0xff]  ;;  %v17225_v46 = vld [vmem:[%s22107_s1 + $0x11d0] sm:$0xff]  }
 0x23a   :  { %v15384_v40 = vpop.f32.mrf.mxu0  ;;  %15712 = vmatpush3.bf16.msra.mxu0 %v17202_v23  ;;  %15740 = vmatpush3.bf16.msra.mxu1 %v17203_v54  ;;  %v13563_v39 = vcombine.low %v61_v55, %v125_v37  ;;  %v13564_v61 = vcombine.high %v61_v55, %v125_v37  ;;  %v15412_v7 = vpop.f32.mrf.mxu1  ;;  %v17228_v55 = vld [vmem:[%s22107_s1 + $0x1148] sm:$0xff]  }
 0x23b   :  { %v19879_v35 = vadd.f32 %v15410_v49, %v10775_v47  ;;  %v15385_v59 = vadd.f32 %v15384_v40, %v15383_v12  ;;  %v15413_v13 = vadd.f32 %v15412_v7, %v15411_v2  ;;  %15753 = vmatprep.subr.bf16.mxu0 %v17204_v50  ;;  %15781 = vmatprep.subr.bf16.mxu1 %v17205_v51  ;;  %v17227_v12 = vld [vmem:[%s22107_s1 + $0x1190] sm:$0xff]   ;;  %v17235_v7 = vld [vmem:[%s22107_s1 + $0x1180] sm:$0xff]  }
 0x23c   :  { %v15386_v4 = vpop.f32.mrf.mxu0  ;;  %11357 = vmatprep.mubr.bf16.mxu0 %v13564_v61  ;;  %v15414_v14 = vpop.f32.mrf.mxu1 }
 0x23d   :  { %v10780_v53 = vadd.f32 %v15385_v59, %v19774_v60  ;;  %11358 = vmatmul.mubr.bf16.vlgmr.msra.gmra.mxu0 %v13563_v39  ;;  %11407 = vmatmul.mubr.bf16.vlgmr.msra.gmra.mxu1 %v13565_v63  ;;  %v17208_v60 = vld [vmem:[%s22107_s1 + $0x1170] sm:$0xff]   ;;  %v17230_v59 = vld [vmem:[%s22107_s1 + $0x1108] sm:$0xff]  }
 0x23e   :  { %v15387_v56 = vpop.f32.mrf.mxu0  ;;  %15754 = vmatpush3.bf16.msra.mxu0 %v17206_v48  ;;  %15782 = vmatpush3.bf16.msra.mxu1 %v17207_v11  ;;  %v15415_v19 = vpop.f32.mrf.mxu1 }
 0x23f   :  { %v15388_v58 = vadd.f32 %v15387_v56, %v15386_v4  ;;  %v19909_v16 = vadd.f32 %v15413_v13, %v10780_v53  ;;  %15755 = vmatprep.subr.bf16.mxu0 %v17208_v60  ;;  %15783 = vmatprep.subr.bf16.mxu1 %v17209_v0  ;;  %v15416_v5 = vadd.f32 %v15415_v19, %v15414_v14  ;;  %v17233_v4 = vld [vmem:[%s22107_s1 + $0x11c0] sm:$0xff]   ;;  %v127_v56 = vld [vmem:[%s22108_s0 + $0x310] sm:$0xff]  ;;  %v64_v60 = vld [vmem:[%s22108_s0 + $0x118] sm:$0xff] }
 0x240   :  { %11414 = vmatprep.mubr.bf16.mxu1 %v13694_v31  ;;  %v17234_v53 = vld [vmem:[%s22107_s1 + $0x1100] sm:$0xff]   ;;  %v128_v14 = vld [vmem:[%s22108_s0 + $0x318] sm:$0xff] }
 0x241   :  { %v10783_v17 = vadd.f32 %v15388_v58, %v19795_v9  ;;  %v253_v9 = vld [vmem:[%s22108_s0 + $0x700] sm:$0xff]  ;;  %v13570_v19 = vcombine.high %v64_v60, %v128_v14 }
 0x242   :  { %15756 = vmatpush3.bf16.msra.mxu0 %v17210_v1  ;;  %15784 = vmatpush3.bf16.msra.mxu1 %v17211_v20  ;;  %v13691_v24 = vcombine.low %v189_v6, %v253_v9  ;;  %v13692_v25 = vcombine.high %v189_v6, %v253_v9  ;;  %v13569_v1 = vcombine.low %v64_v60, %v128_v14  ;;  %v17236_v20 = vld [vmem:[%s22107_s1 + $0x1278] sm:$0xff]   ;;  %v17263_v14 = vld [vmem:[%s22107_s1 + $0x1288] sm:$0xff]  }
 0x243   :  { %v19927_v10 = vadd.f32 %v15416_v5, %v10783_v17  ;;  %15757 = vmatprep.subr.bf16.mxu0 %v17212_v8  ;;  %15785 = vmatprep.subr.bf16.mxu1 %v17213_v26  ;;  %v17237_v6 = vld [vmem:[%s22107_s1 + $0x12f8] sm:$0xff]  }
 0x244   :  { %11365 = vmatprep.mubr.bf16.mxu0 %v13692_v25  ;;  %v17238_v25 = vld [vmem:[%s22107_s1 + $0x1238] sm:$0xff]  }
 0x245   :  { %11366 = vmatmul.mubr.bf16.gmra.mxu0 %v13691_v24  ;;  %11415 = vmatmul.mubr.bf16.gmra.mxu1 %v13693_v52 }
 0x246   :  { %15758 = vmatpush3.bf16.msra.mxu0 %v17214_v32  ;;  %15786 = vmatpush3.bf16.msra.mxu1 %v17215_v18  ;;  %v17241_v32 = vld [vmem:[%s22107_s1 + $0x12f0] sm:$0xff]  }
 0x247   :  { %15759 = vmatprep.subr.bf16.mxu0 %v17216_v33  ;;  %15787 = vmatprep.subr.bf16.mxu1 %v17217_v22  ;;  %v17242_v22 = vld [vmem:[%s22107_s1 + $0x1230] sm:$0xff]  }
 0x248   :  { %11504 = vmatprep.mubr.bf16.mxu1 %v13570_v19  ;;  %v17265_v19 = vld [vmem:[%s22107_s1 + $0x12c0] sm:$0xff]  }
 0x24a   :  { %15760 = vmatpush3.bf16.msra.mxu0 %v17218_v36  ;;  %15788 = vmatpush3.bf16.msra.mxu1 %v17219_v21  ;;  %v17243_v21 = vld [vmem:[%s22107_s1 + $0x12b0] sm:$0xff]  }
 0x24b   :  { %15761 = vmatprep.subr.bf16.mxu0 %v17220_v62  ;;  %15789 = vmatprep.subr.bf16.mxu1 %v17221_v38  ;;  %v191_v62 = vld [vmem:[%s22108_s0 + $0x510] sm:$0xff] }
 0x24e   :  { %15762 = vmatpush3.bf16.msra.mxu0 %v17222_v41  ;;  %15790 = vmatpush3.bf16.msra.mxu1 %v17223_v42 }
 0x24f   :  { %15763 = vmatprep.subr.bf16.mxu0 %v17224_v28  ;;  %15791 = vmatprep.subr.bf16.mxu1 %v17225_v46  ;;  %v17245_v28 = vld [vmem:[%s22107_s1 + $0x12e8] sm:$0xff]   ;;  %v256_v46 = vld [vmem:[%s22108_s0 + $0x718] sm:$0xff] }
 0x250   :  { %v15433_v3 = vpop.f32.mrf.mxu0  ;;  %v15461_v45 = vpop.f32.mrf.mxu1 }
 0x252   :  { %v15434_v27 = vpop.f32.mrf.mxu0  ;;  %v15462_v49 = vpop.f32.mrf.mxu1  ;;  %15764 = vmatpush3.bf16.msra.mxu0 %v17226_v34  ;;  %15792 = vmatpush3.bf16.msra.mxu1 %v17227_v12  ;;  %v17248_v12 = vld [vmem:[%s22107_s1 + $0x1260] sm:$0xff]  }
 0x253   :  { %v15435_v47 = vadd.f32 %v15434_v27, %v15433_v3  ;;  %v15463_v23 = vadd.f32 %v15462_v49, %v15461_v45  ;;  %15765 = vmatprep.subr.bf16.mxu0 %v17228_v55  ;;  %15793 = vmatprep.subr.bf16.mxu1 %v17229_v57  ;;  %v17244_v3 = vld [vmem:[%s22107_s1 + $0x1268] sm:$0xff]   ;;  %v192_v45 = vld [vmem:[%s22108_s0 + $0x518] sm:$0xff]  ;;  %v17251_v55 = vld [vmem:[%s22107_s1 + $0x12a0] sm:$0xff]  }
 0x254   :  { %v15436_v54 = vpop.f32.mrf.mxu0  ;;  %v15464_v37 = vpop.f32.mrf.mxu1  ;;  %v13697_v27 = vcombine.low %v192_v45, %v256_v46  ;;  %v13698_v34 = vcombine.high %v192_v45, %v256_v46  ;;  %v17247_v49 = vld [vmem:[%s22107_s1 + $0x12a8] sm:$0xff]   ;;  %v17254_v57 = vld [vmem:[%s22107_s1 + $0x1218] sm:$0xff]  }
 0x255   :  { %v10870_v40 = vadd.f32 %v15435_v47, %v19861_v30  ;;  %v17231_v30 = vld [vmem:[%s22107_s1 + $0x1188] sm:$0xff]  }
 0x256   :  { %v15437_v43 = vpop.f32.mrf.mxu0  ;;  %v15465_v63 = vpop.f32.mrf.mxu1  ;;  %15766 = vmatpush3.bf16.msra.mxu0 %v17230_v59  ;;  %15794 = vmatpush3.bf16.msra.mxu1 %v17231_v30  ;;  %v17246_v47 = vld [vmem:[%s22107_s1 + $0x1228] sm:$0xff]   ;;  %v17256_v59 = vld [vmem:[%s22107_s1 + $0x1250] sm:$0xff]  }
 0x257   :  { %v19990_v39 = vadd.f32 %v15463_v23, %v10870_v40  ;;  %v15438_v61 = vadd.f32 %v15437_v43, %v15436_v54  ;;  %v15466_v2 = vadd.f32 %v15465_v63, %v15464_v37  ;;  %15767 = vmatprep.subr.bf16.mxu0 %v17232_v44  ;;  %15795 = vmatprep.subr.bf16.mxu1 %v17233_v4  ;;  %v17249_v23 = vld [vmem:[%s22107_s1 + $0x12e0] sm:$0xff]   ;;  %v17252_v40 = vld [vmem:[%s22107_s1 + $0x1258] sm:$0xff]   ;;  %v17257_v63 = vld [vmem:[%s22107_s1 + $0x12d0] sm:$0xff]  }
 0x258   :  { %v15439_v51 = vpop.f32.mrf.mxu0  ;;  %v15467_v17 = vpop.f32.mrf.mxu1  ;;  %v17250_v54 = vld [vmem:[%s22107_s1 + $0x1220] sm:$0xff]   ;;  %v17253_v37 = vld [vmem:[%s22107_s1 + $0x12d8] sm:$0xff]   ;;  %v17258_v44 = vld [vmem:[%s22107_s1 + $0x1210] sm:$0xff]  }
 0x259   :  { %v10873_v50 = vadd.f32 %v15438_v61, %v19879_v35  ;;  %v63_v35 = vld [vmem:[%s22108_s0 + $0x110] sm:$0xff]  ;;  %v17255_v43 = vld [vmem:[%s22107_s1 + $0x1298] sm:$0xff]  }
 0x25a   :  { %v15440_v11 = vpop.f32.mrf.mxu0  ;;  %15768 = vmatpush3.bf16.msra.mxu0 %v17234_v53  ;;  %v13567_v13 = vcombine.low %v63_v35, %v127_v56  ;;  %v13568_v58 = vcombine.high %v63_v35, %v127_v56  ;;  %15796 = vmatpush3.bf16.msra.mxu1 %v17235_v7  ;;  %v15468_v24 = vpop.f32.mrf.mxu1  ;;  %v17260_v53 = vld [vmem:[%s22107_s1 + $0x1248] sm:$0xff]  }
 0x25b   :  { %v20005_v48 = vadd.f32 %v15466_v2, %v10873_v50  ;;  %v15441_v0 = vadd.f32 %v15440_v11, %v15439_v51  ;;  %v15469_v8 = vadd.f32 %v15468_v24, %v15467_v17  ;;  %15809 = vmatprep.subr.bf16.mxu0 %v17236_v20  ;;  %15837 = vmatprep.subr.bf16.mxu1 %v17237_v6  ;;  %v17259_v2 = vld [vmem:[%s22107_s1 + $0x1290] sm:$0xff]   ;;  %v17261_v56 = vld [vmem:[%s22107_s1 + $0x12c8] sm:$0xff]   ;;  %v17267_v24 = vld [vmem:[%s22107_s1 + $0x1280] sm:$0xff]  }
 0x25c   :  { %v15442_v5 = vpop.f32.mrf.mxu0  ;;  %11455 = vmatprep.mubr.bf16.mxu0 %v13568_v58  ;;  %v15470_v52 = vpop.f32.mrf.mxu1  ;;  %v17262_v58 = vld [vmem:[%s22107_s1 + $0x1208] sm:$0xff]  }
 0x25d   :  { %v10878_v9 = vadd.f32 %v15441_v0, %v19909_v16  ;;  %11456 = vmatmul.mubr.bf16.vlgmr.msra.gmra.mxu0 %v13567_v13  ;;  %11505 = vmatmul.mubr.bf16.vlgmr.msra.gmra.mxu1 %v13569_v1  ;;  %v17240_v16 = vld [vmem:[%s22107_s1 + $0x1270] sm:$0xff]  }
 0x25e   :  { %v15443_v26 = vpop.f32.mrf.mxu0  ;;  %15810 = vmatpush3.bf16.msra.mxu0 %v17238_v25  ;;  %15838 = vmatpush3.bf16.msra.mxu1 %v17239_v29  ;;  %v15471_v33 = vpop.f32.mrf.mxu1  ;;  %v66_v29 = vld [vmem:[%s22108_s0 + $0x128] sm:$0xff] }
 0x25f   :  { %v15444_v15 = vadd.f32 %v15443_v26, %v15442_v5  ;;  %v20038_v31 = vadd.f32 %v15469_v8, %v10878_v9  ;;  %15811 = vmatprep.subr.bf16.mxu0 %v17240_v16  ;;  %v15472_v36 = vadd.f32 %v15471_v33, %v15470_v52  ;;  %15839 = vmatprep.subr.bf16.mxu1 %v17241_v32  ;;  %v17266_v9 = vld [vmem:[%s22107_s1 + $0x1200] sm:$0xff]   ;;  %v130_v32 = vld [vmem:[%s22108_s0 + $0x328] sm:$0xff] }
 0x260   :  { %11512 = vmatprep.mubr.bf16.mxu1 %v13698_v34  ;;  %v129_v26 = vld [vmem:[%s22108_s0 + $0x320] sm:$0xff] }
 0x261   :  { %v10881_v18 = vadd.f32 %v15444_v15, %v19927_v10  ;;  %v255_v10 = vld [vmem:[%s22108_s0 + $0x710] sm:$0xff] }
 0x262   :  { %15812 = vmatpush3.bf16.msra.mxu0 %v17242_v22  ;;  %15840 = vmatpush3.bf16.msra.mxu1 %v17243_v21  ;;  %v13695_v41 = vcombine.low %v191_v62, %v255_v10  ;;  %v13696_v42 = vcombine.high %v191_v62, %v255_v10  ;;  %v13573_v22 = vcombine.low %v66_v29, %v130_v32  ;;  %v17268_v21 = vld [vmem:[%s22107_s1 + $0x1378] sm:$0xff]  }
 0x263   :  { %v20056_v38 = vadd.f32 %v15472_v36, %v10881_v18  ;;  %15813 = vmatprep.subr.bf16.mxu0 %v17244_v3  ;;  %15841 = vmatprep.subr.bf16.mxu1 %v17245_v28  ;;  %v13574_v36 = vcombine.high %v66_v29, %v130_v32  ;;  %v17269_v10 = vld [vmem:[%s22107_s1 + $0x13f8] sm:$0xff]   ;;  %v17295_v32 = vld [vmem:[%s22107_s1 + $0x1388] sm:$0xff]  }
 0x264   :  { %11463 = vmatprep.mubr.bf16.mxu0 %v13696_v42  ;;  %v17270_v3 = vld [vmem:[%s22107_s1 + $0x1338] sm:$0xff]  }
 0x265   :  { %11464 = vmatmul.mubr.bf16.gmra.mxu0 %v13695_v41  ;;  %11513 = vmatmul.mubr.bf16.gmra.mxu1 %v13697_v27  ;;  %v17272_v27 = vld [vmem:[%s22107_s1 + $0x1370] sm:$0xff]  }
 0x266   :  { %15814 = vmatpush3.bf16.msra.mxu0 %v17246_v47  ;;  %15842 = vmatpush3.bf16.msra.mxu1 %v17247_v49  ;;  %v17273_v49 = vld [vmem:[%s22107_s1 + $0x13f0] sm:$0xff]  }
 0x267   :  { %15815 = vmatprep.subr.bf16.mxu0 %v17248_v12  ;;  %15843 = vmatprep.subr.bf16.mxu1 %v17249_v23  ;;  %v17274_v23 = vld [vmem:[%s22107_s1 + $0x1330] sm:$0xff]  }
 0x268   :  { %11602 = vmatprep.mubr.bf16.mxu1 %v13574_v36 }
 0x26a   :  { %15816 = vmatpush3.bf16.msra.mxu0 %v17250_v54  ;;  %15844 = vmatpush3.bf16.msra.mxu1 %v17251_v55  ;;  %v17275_v55 = vld [vmem:[%s22107_s1 + $0x13b0] sm:$0xff]  }
 0x26b   :  { %15817 = vmatprep.subr.bf16.mxu0 %v17252_v40  ;;  %15845 = vmatprep.subr.bf16.mxu1 %v17253_v37  ;;  %v257_v40 = vld [vmem:[%s22108_s0 + $0x720] sm:$0xff] }
 0x26e   :  { %15818 = vmatpush3.bf16.msra.mxu0 %v17254_v57  ;;  %15846 = vmatpush3.bf16.msra.mxu1 %v17255_v43  ;;  %v17276_v43 = vld [vmem:[%s22107_s1 + $0x1368] sm:$0xff]  }
 0x26f   :  { %15819 = vmatprep.subr.bf16.mxu0 %v17256_v59  ;;  %15847 = vmatprep.subr.bf16.mxu1 %v17257_v63  ;;  %v194_v63 = vld [vmem:[%s22108_s0 + $0x528] sm:$0xff] }
 0x270   :  { %v15489_v61 = vpop.f32.mrf.mxu0  ;;  %v15517_v30 = vpop.f32.mrf.mxu1 }
 0x272   :  { %v15490_v50 = vpop.f32.mrf.mxu0  ;;  %v15518_v51 = vpop.f32.mrf.mxu1  ;;  %15820 = vmatpush3.bf16.msra.mxu0 %v17258_v44  ;;  %15848 = vmatpush3.bf16.msra.mxu1 %v17259_v2  ;;  %v17278_v2 = vld [vmem:[%s22107_s1 + $0x1328] sm:$0xff]  }
 0x273   :  { %v15491_v4 = vadd.f32 %v15490_v50, %v15489_v61  ;;  %v15519_v7 = vadd.f32 %v15518_v51, %v15517_v30  ;;  %15821 = vmatprep.subr.bf16.mxu0 %v17260_v53  ;;  %15849 = vmatprep.subr.bf16.mxu1 %v17261_v56  ;;  %v17277_v61 = vld [vmem:[%s22107_s1 + $0x13e8] sm:$0xff]   ;;  %v17280_v51 = vld [vmem:[%s22107_s1 + $0x1360] sm:$0xff]   ;;  %v17284_v56 = vld [vmem:[%s22107_s1 + $0x1358] sm:$0xff]  }
 0x274   :  { %v15492_v35 = vpop.f32.mrf.mxu0  ;;  %v15520_v13 = vpop.f32.mrf.mxu1  ;;  %v258_v30 = vld [vmem:[%s22108_s0 + $0x728] sm:$0xff]  ;;  %v17281_v53 = vld [vmem:[%s22107_s1 + $0x13e0] sm:$0xff]  }
 0x275   :  { %v10968_v11 = vadd.f32 %v15491_v4, %v19990_v39  ;;  %v17264_v39 = vld [vmem:[%s22107_s1 + $0x1240] sm:$0xff]   ;;  %v13701_v44 = vcombine.low %v194_v63, %v258_v30  ;;  %v13702_v50 = vcombine.high %v194_v63, %v258_v30  ;;  %v17279_v4 = vld [vmem:[%s22107_s1 + $0x13a8] sm:$0xff]  }
 0x276   :  { %v15493_v60 = vpop.f32.mrf.mxu0  ;;  %v15521_v1 = vpop.f32.mrf.mxu1  ;;  %15822 = vmatpush3.bf16.msra.mxu0 %v17262_v58  ;;  %15850 = vmatpush3.bf16.msra.mxu1 %v17263_v14  ;;  %v17287_v58 = vld [vmem:[%s22107_s1 + $0x1398] sm:$0xff]  }
 0x277   :  { %v20125_v0 = vadd.f32 %v15519_v7, %v10968_v11  ;;  %v15494_v17 = vadd.f32 %v15493_v60, %v15492_v35  ;;  %v15522_v5 = vadd.f32 %v15521_v1, %v15520_v13  ;;  %15823 = vmatprep.subr.bf16.mxu0 %v17264_v39  ;;  %15851 = vmatprep.subr.bf16.mxu1 %v17265_v19  ;;  %v17282_v7 = vld [vmem:[%s22107_s1 + $0x1320] sm:$0xff]   ;;  %v17285_v11 = vld [vmem:[%s22107_s1 + $0x13d8] sm:$0xff]   ;;  %v17288_v60 = vld [vmem:[%s22107_s1 + $0x1350] sm:$0xff]  }
 0x278   :  { %v15495_v6 = vpop.f32.mrf.mxu0  ;;  %v15523_v18 = vpop.f32.mrf.mxu1  ;;  %v17283_v35 = vld [vmem:[%s22107_s1 + $0x13a0] sm:$0xff]   ;;  %v17286_v13 = vld [vmem:[%s22107_s1 + $0x1318] sm:$0xff]   ;;  %v17289_v1 = vld [vmem:[%s22107_s1 + $0x13d0] sm:$0xff]  }
 0x279   :  { %v10971_v20 = vadd.f32 %v15494_v17, %v20005_v48  ;;  %v65_v48 = vld [vmem:[%s22108_s0 + $0x120] sm:$0xff]  ;;  %v17290_v39 = vld [vmem:[%s22107_s1 + $0x1310] sm:$0xff]  }
 0x27a   :  { %v15496_v8 = vpop.f32.mrf.mxu0  ;;  %15824 = vmatpush3.bf16.msra.mxu0 %v17266_v9  ;;  %15852 = vmatpush3.bf16.msra.mxu1 %v17267_v24  ;;  %v13571_v52 = vcombine.low %v65_v48, %v129_v26  ;;  %v13572_v16 = vcombine.high %v65_v48, %v129_v26  ;;  %v15524_v41 = vpop.f32.mrf.mxu1  ;;  %v17292_v24 = vld [vmem:[%s22107_s1 + $0x1348] sm:$0xff]  }
 0x27b   :  { %v20140_v25 = vadd.f32 %v15522_v5, %v10971_v20  ;;  %v15497_v15 = vadd.f32 %v15496_v8, %v15495_v6  ;;  %v15525_v28 = vadd.f32 %v15524_v41, %v15523_v18  ;;  %15865 = vmatprep.subr.bf16.mxu0 %v17268_v21  ;;  %15893 = vmatprep.subr.bf16.mxu1 %v17269_v10  ;;  %v17291_v5 = vld [vmem:[%s22107_s1 + $0x1390] sm:$0xff]   ;;  %v17293_v26 = vld [vmem:[%s22107_s1 + $0x13c8] sm:$0xff]   ;;  %v17298_v10 = vld [vmem:[%s22107_s1 + $0x1300] sm:$0xff]  }
 0x27c   :  { %v15498_v33 = vpop.f32.mrf.mxu0  ;;  %11553 = vmatprep.mubr.bf16.mxu0 %v13572_v16  ;;  %v15526_v46 = vpop.f32.mrf.mxu1  ;;  %v17299_v41 = vld [vmem:[%s22107_s1 + $0x1380] sm:$0xff]  }
 0x27d   :  { %v10976_v62 = vadd.f32 %v15497_v15, %v20038_v31  ;;  %11554 = vmatmul.mubr.bf16.vlgmr.msra.gmra.mxu0 %v13571_v52  ;;  %11603 = vmatmul.mubr.bf16.vlgmr.msra.gmra.mxu1 %v13573_v22  ;;  %v17271_v31 = vld [vmem:[%s22107_s1 + $0x13b8] sm:$0xff]   ;;  %v17294_v15 = vld [vmem:[%s22107_s1 + $0x1308] sm:$0xff]   ;;  %v17297_v22 = vld [vmem:[%s22107_s1 + $0x13c0] sm:$0xff]  }
 0x27e   :  { %v15499_v42 = vpop.f32.mrf.mxu0  ;;  %15866 = vmatpush3.bf16.msra.mxu0 %v17270_v3  ;;  %15894 = vmatpush3.bf16.msra.mxu1 %v17271_v31  ;;  %v15527_v12 = vpop.f32.mrf.mxu1  ;;  %v132_v31 = vld [vmem:[%s22108_s0 + $0x338] sm:$0xff] }
 0x27f   :  { %v15500_v45 = vadd.f32 %v15499_v42, %v15498_v33  ;;  %v20170_v34 = vadd.f32 %v15525_v28, %v10976_v62  ;;  %15867 = vmatprep.subr.bf16.mxu0 %v17272_v27  ;;  %v15528_v54 = vadd.f32 %v15527_v12, %v15526_v46  ;;  %15895 = vmatprep.subr.bf16.mxu1 %v17273_v49  ;;  %v67_v42 = vld [vmem:[%s22108_s0 + $0x130] sm:$0xff] }
 0x280   :  { %11610 = vmatprep.mubr.bf16.mxu1 %v13702_v50  ;;  %v17305_v50 = vld [vmem:[%s22107_s1 + $0x14f0] sm:$0xff]  }
 0x281   :  { %v10979_v47 = vadd.f32 %v15500_v45, %v20056_v38  ;;  %v193_v38 = vld [vmem:[%s22108_s0 + $0x520] sm:$0xff]  ;;  %v68_v45 = vld [vmem:[%s22108_s0 + $0x138] sm:$0xff] }
 0x282   :  { %15868 = vmatpush3.bf16.msra.mxu0 %v17274_v23  ;;  %v13699_v37 = vcombine.low %v193_v38, %v257_v40  ;;  %v13700_v57 = vcombine.high %v193_v38, %v257_v40  ;;  %15896 = vmatpush3.bf16.msra.mxu1 %v17275_v55  ;;  %v13577_v49 = vcombine.low %v68_v45, %v132_v31  ;;  %v17300_v23 = vld [vmem:[%s22107_s1 + $0x1478] sm:$0xff]  }
 0x283   :  { %v20191_v59 = vadd.f32 %v15528_v54, %v10979_v47  ;;  %15869 = vmatprep.subr.bf16.mxu0 %v17276_v43  ;;  %15897 = vmatprep.subr.bf16.mxu1 %v17277_v61  ;;  %v13578_v12 = vcombine.high %v68_v45, %v132_v31  ;;  %v17301_v38 = vld [vmem:[%s22107_s1 + $0x14f8] sm:$0xff]   ;;  %v17325_v45 = vld [vmem:[%s22107_s1 + $0x14c8] sm:$0xff]  }
 0x284   :  { %11561 = vmatprep.mubr.bf16.mxu0 %v13700_v57  ;;  %v17303_v61 = vld [vmem:[%s22107_s1 + $0x14b8] sm:$0xff]  }
 0x285   :  { %11562 = vmatmul.mubr.bf16.gmra.mxu0 %v13699_v37  ;;  %11611 = vmatmul.mubr.bf16.gmra.mxu1 %v13701_v44  ;;  %v17302_v37 = vld [vmem:[%s22107_s1 + $0x1438] sm:$0xff]  }
 0x286   :  { %15870 = vmatpush3.bf16.msra.mxu0 %v17278_v2  ;;  %15898 = vmatpush3.bf16.msra.mxu1 %v17279_v4 }
 0x287   :  { %15871 = vmatprep.subr.bf16.mxu0 %v17280_v51  ;;  %15899 = vmatprep.subr.bf16.mxu1 %v17281_v53  ;;  %v17306_v51 = vld [vmem:[%s22107_s1 + $0x1430] sm:$0xff]  }
 0x288   :  { %11700 = vmatprep.mubr.bf16.mxu1 %v13578_v12  ;;  %v17328_v12 = vld [vmem:[%s22107_s1 + $0x1440] sm:$0xff]  }
 0x28a   :  { %15872 = vmatpush3.bf16.msra.mxu0 %v17282_v7  ;;  %15900 = vmatpush3.bf16.msra.mxu1 %v17283_v35  ;;  %v17307_v7 = vld [vmem:[%s22107_s1 + $0x14b0] sm:$0xff]  }
 0x28b   :  { %15873 = vmatprep.subr.bf16.mxu0 %v17284_v56  ;;  %15901 = vmatprep.subr.bf16.mxu1 %v17285_v11  ;;  %v195_v56 = vld [vmem:[%s22108_s0 + $0x530] sm:$0xff] }
 0x28e   :  { %15874 = vmatpush3.bf16.msra.mxu0 %v17286_v13  ;;  %15902 = vmatpush3.bf16.msra.mxu1 %v17287_v58  ;;  %v17308_v58 = vld [vmem:[%s22107_s1 + $0x1468] sm:$0xff]  }
 0x28f   :  { %15875 = vmatprep.subr.bf16.mxu0 %v17288_v60  ;;  %15903 = vmatprep.subr.bf16.mxu1 %v17289_v1  ;;  %v260_v1 = vld [vmem:[%s22108_s0 + $0x738] sm:$0xff] }
 0x290   :  { %v15573_v17 = vpop.f32.mrf.mxu1 }
 0x292   :  { %v15574_v20 = vpop.f32.mrf.mxu1  ;;  %15876 = vmatpush3.bf16.msra.mxu0 %v17290_v39  ;;  %15904 = vmatpush3.bf16.msra.mxu1 %v17291_v5  ;;  %v17311_v5 = vld [vmem:[%s22107_s1 + $0x14a8] sm:$0xff]  }
 0x293   :  { %v15575_v9 = vadd.f32 %v15574_v20, %v15573_v17  ;;  %15877 = vmatprep.subr.bf16.mxu0 %v17292_v24  ;;  %15905 = vmatprep.subr.bf16.mxu1 %v17293_v26  ;;  %v196_v17 = vld [vmem:[%s22108_s0 + $0x538] sm:$0xff]  ;;  %v17310_v20 = vld [vmem:[%s22107_s1 + $0x1428] sm:$0xff]   ;;  %v17314_v24 = vld [vmem:[%s22107_s1 + $0x1420] sm:$0xff]  }
 0x294   :  { %v15576_v48 = vpop.f32.mrf.mxu1  ;;  %v13705_v39 = vcombine.low %v196_v17, %v260_v1  ;;  %v17317_v26 = vld [vmem:[%s22107_s1 + $0x14d8] sm:$0xff]  }
 0x296   :  { %v15577_v16 = vpop.f32.mrf.mxu1  ;;  %15878 = vmatpush3.bf16.msra.mxu0 %v17294_v15  ;;  %15906 = vmatpush3.bf16.msra.mxu1 %v17295_v32  ;;  %v17319_v15 = vld [vmem:[%s22107_s1 + $0x1498] sm:$0xff]  }
 0x297   :  { %v15578_v21 = vadd.f32 %v15577_v16, %v15576_v48  ;;  %15907 = vmatprep.subr.bf16.mxu1 %v17297_v22  ;;  %v17316_v48 = vld [vmem:[%s22107_s1 + $0x1458] sm:$0xff]   ;;  %v17320_v16 = vld [vmem:[%s22107_s1 + $0x1450] sm:$0xff]  }
 0x298   :  { %v15579_v54 = vpop.f32.mrf.mxu1  ;;  %v17322_v22 = vld [vmem:[%s22107_s1 + $0x1410] sm:$0xff]  }
 0x29a   :  { %15908 = vmatpush3.bf16.msra.mxu1 %v17299_v41  ;;  %v15580_v57 = vpop.f32.mrf.mxu1 }
 0x29b   :  { %v15581_v63 = vadd.f32 %v15580_v57, %v15579_v54  ;;  %15949 = vmatprep.subr.bf16.mxu1 %v17301_v38  ;;  %v17331_v57 = vld [vmem:[%s22107_s1 + $0x1480] sm:$0xff]  }
 0x29c   :  { %v15582_v44 = vpop.f32.mrf.mxu1 }
 0x29d   :  { %v15545_v14 = vpop.f32.mrf.mxu0  ;;  %11701 = vmatmul.mubr.bf16.vlgmr.msra.gmra.mxu1 %v13577_v49 }
 0x29e   :  { %15950 = vmatpush3.bf16.msra.mxu1 %v17303_v61  ;;  %v15583_v53 = vpop.f32.mrf.mxu1 }
 0x29f   :  { %v15546_v19 = vpop.f32.mrf.mxu0  ;;  %15951 = vmatprep.subr.bf16.mxu1 %v17305_v50  ;;  %v15584_v35 = vadd.f32 %v15583_v53, %v15582_v44  ;;  %v134_v44 = vld [vmem:[%s22108_s0 + $0x348] sm:$0xff] }
 0x2a0   :  { %v15547_v6 = vadd.f32 %v15546_v19, %v15545_v14  ;;  %v17309_v14 = vld [vmem:[%s22107_s1 + $0x14e8] sm:$0xff]   ;;  %v13706_v19 = vcombine.high %v196_v17, %v260_v1  ;;  %v17335_v17 = vld [vmem:[%s22107_s1 + $0x15b8] sm:$0xff]  }
 0x2a1   :  { %v15548_v8 = vpop.f32.mrf.mxu0 }
 0x2a2   :  { %v11066_v29 = vadd.f32 %v15547_v6, %v20125_v0  ;;  %v17296_v0 = vld [vmem:[%s22107_s1 + $0x1340] sm:$0xff]   ;;  %15952 = vmatpush3.bf16.msra.mxu1 %v17307_v7  ;;  %11708 = vmatprep.mubr.bf16.mxu1 %v13706_v19  ;;  %v17332_v7 = vld [vmem:[%s22107_s1 + $0x1578] sm:$0xff]  }
 0x2a3   :  { %v15549_v52 = vpop.f32.mrf.mxu0  ;;  %15879 = vmatprep.subr.bf16.mxu0 %v17296_v0  ;;  %15953 = vmatprep.subr.bf16.mxu1 %v17309_v14  ;;  %v17312_v6 = vld [vmem:[%s22107_s1 + $0x1460] sm:$0xff]  }
 0x2a4   :  { %v20257_v18 = vadd.f32 %v15575_v9, %v11066_v29  ;;  %v15550_v33 = vadd.f32 %v15549_v52, %v15548_v8  ;;  %15880 = vmatpush3.bf16.msra.mxu0 %v17298_v10  ;;  %v17313_v9 = vld [vmem:[%s22107_s1 + $0x14e0] sm:$0xff]   ;;  %v17318_v29 = vld [vmem:[%s22107_s1 + $0x1418] sm:$0xff]  }
 0x2a5   :  { %v15551_v62 = vpop.f32.mrf.mxu0  ;;  %15921 = vmatprep.subr.bf16.mxu0 %v17300_v23  ;;  %11709 = vmatmul.mubr.bf16.gmra.mxu1 %v13705_v39  ;;  %v17315_v8 = vld [vmem:[%s22107_s1 + $0x14a0] sm:$0xff]  }
 0x2a6   :  { %v11069_v36 = vadd.f32 %v15550_v33, %v20140_v25  ;;  %v131_v25 = vld [vmem:[%s22108_s0 + $0x330] sm:$0xff]  ;;  %15954 = vmatpush3.bf16.msra.mxu1 %v17311_v5 }
 0x2a7   :  { %v15552_v28 = vpop.f32.mrf.mxu0  ;;  %v13575_v27 = vcombine.low %v67_v42, %v131_v25  ;;  %v13576_v47 = vcombine.high %v67_v42, %v131_v25  ;;  %15955 = vmatprep.subr.bf16.mxu1 %v17313_v9  ;;  %v17321_v33 = vld [vmem:[%s22107_s1 + $0x14d0] sm:$0xff]   ;;  %v17324_v42 = vld [vmem:[%s22107_s1 + $0x1448] sm:$0xff]  }
 0x2a8   :  { %v20275_v3 = vadd.f32 %v15578_v21, %v11069_v36  ;;  %v15553_v46 = vadd.f32 %v15552_v28, %v15551_v62  ;;  %v17323_v62 = vld [vmem:[%s22107_s1 + $0x1490] sm:$0xff]  }
 0x2a9   :  { %v15554_v55 = vpop.f32.mrf.mxu0  ;;  %11651 = vmatprep.mubr.bf16.mxu0 %v13576_v47  ;;  %v17338_v9 = vld [vmem:[%s22107_s1 + $0x1530] sm:$0xff]  }
 0x2aa   :  { %v11074_v40 = vadd.f32 %v15553_v46, %v20170_v34  ;;  %11652 = vmatmul.mubr.bf16.vlgmr.msra.gmra.mxu0 %v13575_v27  ;;  %v17304_v34 = vld [vmem:[%s22107_s1 + $0x1470] sm:$0xff]   ;;  %15956 = vmatpush3.bf16.msra.mxu1 %v17315_v8  ;;  %v17326_v46 = vld [vmem:[%s22107_s1 + $0x1408] sm:$0xff]  }
 0x2ab   :  { %v15555_v43 = vpop.f32.mrf.mxu0  ;;  %15922 = vmatpush3.bf16.msra.mxu0 %v17302_v37  ;;  %15957 = vmatprep.subr.bf16.mxu1 %v17317_v26  ;;  %v17339_v8 = vld [vmem:[%s22107_s1 + $0x15b0] sm:$0xff]  }
 0x2ac   :  { %v15556_v30 = vadd.f32 %v15555_v43, %v15554_v55  ;;  %v20305_v2 = vadd.f32 %v15581_v63, %v11074_v40  ;;  %15923 = vmatprep.subr.bf16.mxu0 %v17304_v34  ;;  %v17329_v55 = vld [vmem:[%s22107_s1 + $0x14c0] sm:$0xff]   ;;  %v70_v34 = vld [vmem:[%s22108_s0 + $0x148] sm:$0xff] }
 0x2ad   :  { %v17330_v40 = vld [vmem:[%s22107_s1 + $0x1400] sm:$0xff]   ;;  %v13582_v53 = vcombine.high %v70_v34, %v134_v44 }
 0x2ae   :  { %v11077_v4 = vadd.f32 %v15556_v30, %v20191_v59  ;;  %v259_v59 = vld [vmem:[%s22108_s0 + $0x730] sm:$0xff]  ;;  %15958 = vmatpush3.bf16.msra.mxu1 %v17319_v15  ;;  %v133_v43 = vld [vmem:[%s22108_s0 + $0x340] sm:$0xff] }
 0x2af   :  { %15924 = vmatpush3.bf16.msra.mxu0 %v17306_v51  ;;  %v13703_v11 = vcombine.low %v195_v56, %v259_v59  ;;  %v13704_v13 = vcombine.high %v195_v56, %v259_v59  ;;  %15959 = vmatprep.subr.bf16.mxu1 %v17321_v33  ;;  %v13581_v51 = vcombine.low %v70_v34, %v134_v44  ;;  %v17333_v56 = vld [vmem:[%s22107_s1 + $0x15f8] sm:$0xff]   ;;  %v262_v33 = vld [vmem:[%s22108_s0 + $0x748] sm:$0xff] }
 0x2b0   :  { %v20323_v60 = vadd.f32 %v15584_v35, %v11077_v4  ;;  %15925 = vmatprep.subr.bf16.mxu0 %v17308_v58  ;;  %11798 = vmatprep.mubr.bf16.mxu1 %v13582_v53  ;;  %v17359_v44 = vld [vmem:[%s22107_s1 + $0x1588] sm:$0xff]   ;;  %v17361_v53 = vld [vmem:[%s22107_s1 + $0x15c0] sm:$0xff]  }
 0x2b1   :  { %11659 = vmatprep.mubr.bf16.mxu0 %v13704_v13  ;;  %v17334_v13 = vld [vmem:[%s22107_s1 + $0x1538] sm:$0xff]  }
 0x2b2   :  { %11660 = vmatmul.mubr.bf16.gmra.mxu0 %v13703_v11  ;;  %15960 = vmatpush3.bf16.msra.mxu1 %v17323_v62  ;;  %v17344_v62 = vld [vmem:[%s22107_s1 + $0x1560] sm:$0xff]  }
 0x2b3   :  { %15926 = vmatpush3.bf16.msra.mxu0 %v17310_v20  ;;  %15961 = vmatprep.subr.bf16.mxu1 %v17325_v45  ;;  %v17337_v20 = vld [vmem:[%s22107_s1 + $0x15f0] sm:$0xff]   ;;  %v17350_v45 = vld [vmem:[%s22107_s1 + $0x1518] sm:$0xff]  }
 0x2b4   :  { %15927 = vmatprep.subr.bf16.mxu0 %v17312_v6 }
 0x2b7   :  { %15928 = vmatpush3.bf16.msra.mxu0 %v17314_v24 }
 0x2b8   :  { %15929 = vmatprep.subr.bf16.mxu0 %v17316_v48  ;;  %v197_v48 = vld [vmem:[%s22108_s0 + $0x540] sm:$0xff] }
 0x2bb   :  { %15930 = vmatpush3.bf16.msra.mxu0 %v17318_v29 }
 0x2bc   :  { %15931 = vmatprep.subr.bf16.mxu0 %v17320_v16  ;;  %v17341_v16 = vld [vmem:[%s22107_s1 + $0x15e8] sm:$0xff]  }
 0x2bd   :  { %v15601_v52 = vpop.f32.mrf.mxu0  ;;  %v15629_v32 = vpop.f32.mrf.mxu1 }
 0x2bf   :  { %v15602_v0 = vpop.f32.mrf.mxu0  ;;  %v15630_v21 = vpop.f32.mrf.mxu1  ;;  %15932 = vmatpush3.bf16.msra.mxu0 %v17322_v22 }
 0x2c0   :  { %v15603_v36 = vadd.f32 %v15602_v0, %v15601_v52  ;;  %v15631_v10 = vadd.f32 %v15630_v21, %v15629_v32  ;;  %15933 = vmatprep.subr.bf16.mxu0 %v17324_v42  ;;  %v17340_v52 = vld [vmem:[%s22107_s1 + $0x1568] sm:$0xff]   ;;  %v17347_v42 = vld [vmem:[%s22107_s1 + $0x15a0] sm:$0xff]  }
 0x2c1   :  { %v15604_v41 = vpop.f32.mrf.mxu0  ;;  %v15632_v25 = vpop.f32.mrf.mxu1  ;;  %v198_v32 = vld [vmem:[%s22108_s0 + $0x548] sm:$0xff] }
 0x2c2   :  { %v11164_v28 = vadd.f32 %v15603_v36, %v20257_v18  ;;  %v17327_v18 = vld [vmem:[%s22107_s1 + $0x1488] sm:$0xff]   ;;  %v13709_v0 = vcombine.low %v198_v32, %v262_v33  ;;  %v13710_v22 = vcombine.high %v198_v32, %v262_v33 }
 0x2c3   :  { %v15605_v31 = vpop.f32.mrf.mxu0  ;;  %v15633_v49 = vpop.f32.mrf.mxu1  ;;  %15934 = vmatpush3.bf16.msra.mxu0 %v17326_v46  ;;  %15962 = vmatpush3.bf16.msra.mxu1 %v17327_v18  ;;  %v17342_v36 = vld [vmem:[%s22107_s1 + $0x1528] sm:$0xff]   ;;  %v17352_v46 = vld [vmem:[%s22107_s1 + $0x1550] sm:$0xff]  }
 0x2c4   :  { %v20386_v27 = vadd.f32 %v15631_v10, %v11164_v28  ;;  %v15606_v47 = vadd.f32 %v15605_v31, %v15604_v41  ;;  %v15634_v54 = vadd.f32 %v15633_v49, %v15632_v25  ;;  %15935 = vmatprep.subr.bf16.mxu0 %v17328_v12  ;;  %15963 = vmatprep.subr.bf16.mxu1 %v17329_v55  ;;  %v17343_v21 = vld [vmem:[%s22107_s1 + $0x15a8] sm:$0xff]   ;;  %v17345_v10 = vld [vmem:[%s22107_s1 + $0x15e0] sm:$0xff]   ;;  %v17348_v28 = vld [vmem:[%s22107_s1 + $0x1558] sm:$0xff]  }
 0x2c5   :  { %v15607_v38 = vpop.f32.mrf.mxu0  ;;  %v15635_v4 = vpop.f32.mrf.mxu1  ;;  %v17346_v41 = vld [vmem:[%s22107_s1 + $0x1520] sm:$0xff]   ;;  %v17349_v25 = vld [vmem:[%s22107_s1 + $0x15d8] sm:$0xff]   ;;  %v17353_v49 = vld [vmem:[%s22107_s1 + $0x15d0] sm:$0xff]  }
 0x2c6   :  { %v11167_v23 = vadd.f32 %v15606_v47, %v20275_v3  ;;  %v69_v3 = vld [vmem:[%s22108_s0 + $0x140] sm:$0xff]  ;;  %v17351_v31 = vld [vmem:[%s22107_s1 + $0x1598] sm:$0xff]   ;;  %v17354_v12 = vld [vmem:[%s22107_s1 + $0x1510] sm:$0xff]  }
 0x2c7   :  { %v15608_v61 = vpop.f32.mrf.mxu0  ;;  %15936 = vmatpush3.bf16.msra.mxu0 %v17330_v40  ;;  %v13579_v63 = vcombine.low %v69_v3, %v133_v43  ;;  %v13580_v30 = vcombine.high %v69_v3, %v133_v43  ;;  %15964 = vmatpush3.bf16.msra.mxu1 %v17331_v57  ;;  %v15636_v11 = vpop.f32.mrf.mxu1  ;;  %v17356_v40 = vld [vmem:[%s22107_s1 + $0x1548] sm:$0xff]  }
 0x2c8   :  { %v20401_v37 = vadd.f32 %v15634_v54, %v11167_v23  ;;  %v15609_v50 = vadd.f32 %v15608_v61, %v15607_v38  ;;  %v15637_v58 = vadd.f32 %v15636_v11, %v15635_v4  ;;  %15977 = vmatprep.subr.bf16.mxu0 %v17332_v7  ;;  %16005 = vmatprep.subr.bf16.mxu1 %v17333_v56  ;;  %v17355_v54 = vld [vmem:[%s22107_s1 + $0x1590] sm:$0xff]   ;;  %v17357_v43 = vld [vmem:[%s22107_s1 + $0x15c8] sm:$0xff]   ;;  %v17363_v11 = vld [vmem:[%s22107_s1 + $0x1580] sm:$0xff]  }
 0x2c9   :  { %v15610_v35 = vpop.f32.mrf.mxu0  ;;  %11749 = vmatprep.mubr.bf16.mxu0 %v13580_v30  ;;  %v15638_v39 = vpop.f32.mrf.mxu1  ;;  %v17358_v30 = vld [vmem:[%s22107_s1 + $0x1508] sm:$0xff]  }
 0x2ca   :  { %v11172_v59 = vadd.f32 %v15609_v50, %v20305_v2  ;;  %11750 = vmatmul.mubr.bf16.vlgmr.msra.gmra.mxu0 %v13579_v63  ;;  %11799 = vmatmul.mubr.bf16.vlgmr.msra.gmra.mxu1 %v13581_v51  ;;  %v17336_v2 = vld [vmem:[%s22107_s1 + $0x1570] sm:$0xff]  }
 0x2cb   :  { %v15611_v14 = vpop.f32.mrf.mxu0  ;;  %15978 = vmatpush3.bf16.msra.mxu0 %v17334_v13  ;;  %16006 = vmatpush3.bf16.msra.mxu1 %v17335_v17  ;;  %v15639_v6 = vpop.f32.mrf.mxu1  ;;  %v72_v17 = vld [vmem:[%s22108_s0 + $0x158] sm:$0xff] }
 0x2cc   :  { %v15612_v1 = vadd.f32 %v15611_v14, %v15610_v35  ;;  %v20434_v19 = vadd.f32 %v15637_v58, %v11172_v59  ;;  %15979 = vmatprep.subr.bf16.mxu0 %v17336_v2  ;;  %v15640_v24 = vadd.f32 %v15639_v6, %v15638_v39  ;;  %16007 = vmatprep.subr.bf16.mxu1 %v17337_v20  ;;  %v17362_v59 = vld [vmem:[%s22107_s1 + $0x1500] sm:$0xff]   ;;  %v135_v14 = vld [vmem:[%s22108_s0 + $0x350] sm:$0xff]  ;;  %v136_v20 = vld [vmem:[%s22108_s0 + $0x358] sm:$0xff] }
 0x2cd   :  { %11806 = vmatprep.mubr.bf16.mxu1 %v13710_v22 }
 0x2ce   :  { %v11175_v5 = vadd.f32 %v15612_v1, %v20323_v60  ;;  %v261_v60 = vld [vmem:[%s22108_s0 + $0x740] sm:$0xff] }
 0x2cf   :  { %15980 = vmatpush3.bf16.msra.mxu0 %v17338_v9  ;;  %16008 = vmatpush3.bf16.msra.mxu1 %v17339_v8  ;;  %v13707_v29 = vcombine.low %v197_v48, %v261_v60  ;;  %v13708_v15 = vcombine.high %v197_v48, %v261_v60  ;;  %v13585_v9 = vcombine.low %v72_v17, %v136_v20  ;;  %v17364_v8 = vld [vmem:[%s22107_s1 + $0x1678] sm:$0xff]  }
 0x2d0   :  { %v20452_v26 = vadd.f32 %v15640_v24, %v11175_v5  ;;  %15981 = vmatprep.subr.bf16.mxu0 %v17340_v52  ;;  %16009 = vmatprep.subr.bf16.mxu1 %v17341_v16  ;;  %v13586_v24 = vcombine.high %v72_v17, %v136_v20  ;;  %v17365_v60 = vld [vmem:[%s22107_s1 + $0x16f8] sm:$0xff]   ;;  %v17391_v20 = vld [vmem:[%s22107_s1 + $0x1688] sm:$0xff]  }
 0x2d1   :  { %11757 = vmatprep.mubr.bf16.mxu0 %v13708_v15  ;;  %v17366_v52 = vld [vmem:[%s22107_s1 + $0x1638] sm:$0xff]  }
 0x2d2   :  { %11758 = vmatmul.mubr.bf16.gmra.mxu0 %v13707_v29  ;;  %11807 = vmatmul.mubr.bf16.gmra.mxu1 %v13709_v0  ;;  %v17368_v0 = vld [vmem:[%s22107_s1 + $0x1670] sm:$0xff]  }
 0x2d3   :  { %15982 = vmatpush3.bf16.msra.mxu0 %v17342_v36  ;;  %16010 = vmatpush3.bf16.msra.mxu1 %v17343_v21  ;;  %v17369_v21 = vld [vmem:[%s22107_s1 + $0x16f0] sm:$0xff]  }
 0x2d4   :  { %15983 = vmatprep.subr.bf16.mxu0 %v17344_v62  ;;  %16011 = vmatprep.subr.bf16.mxu1 %v17345_v10  ;;  %v17370_v10 = vld [vmem:[%s22107_s1 + $0x1630] sm:$0xff]  }
 0x2d5   :  { %11896 = vmatprep.mubr.bf16.mxu1 %v13586_v24 }
 0x2d7   :  { %15984 = vmatpush3.bf16.msra.mxu0 %v17346_v41  ;;  %16012 = vmatpush3.bf16.msra.mxu1 %v17347_v42  ;;  %v17371_v42 = vld [vmem:[%s22107_s1 + $0x16b0] sm:$0xff]  }
 0x2d8   :  { %15985 = vmatprep.subr.bf16.mxu0 %v17348_v28  ;;  %16013 = vmatprep.subr.bf16.mxu1 %v17349_v25  ;;  %v263_v28 = vld [vmem:[%s22108_s0 + $0x750] sm:$0xff] }
 0x2db   :  { %15986 = vmatpush3.bf16.msra.mxu0 %v17350_v45  ;;  %16014 = vmatpush3.bf16.msra.mxu1 %v17351_v31  ;;  %v17372_v31 = vld [vmem:[%s22107_s1 + $0x1668] sm:$0xff]  }
 0x2dc   :  { %15987 = vmatprep.subr.bf16.mxu0 %v17352_v46  ;;  %16015 = vmatprep.subr.bf16.mxu1 %v17353_v49  ;;  %v200_v49 = vld [vmem:[%s22108_s0 + $0x558] sm:$0xff] }
 0x2dd   :  { %v15657_v47 = vpop.f32.mrf.mxu0  ;;  %v15685_v18 = vpop.f32.mrf.mxu1 }
 0x2df   :  { %v15658_v23 = vpop.f32.mrf.mxu0  ;;  %v15686_v38 = vpop.f32.mrf.mxu1  ;;  %15988 = vmatpush3.bf16.msra.mxu0 %v17354_v12  ;;  %16016 = vmatpush3.bf16.msra.mxu1 %v17355_v54  ;;  %v17374_v54 = vld [vmem:[%s22107_s1 + $0x1628] sm:$0xff]  }
 0x2e0   :  { %v15659_v55 = vadd.f32 %v15658_v23, %v15657_v47  ;;  %v15687_v57 = vadd.f32 %v15686_v38, %v15685_v18  ;;  %15989 = vmatprep.subr.bf16.mxu0 %v17356_v40  ;;  %16017 = vmatprep.subr.bf16.mxu1 %v17357_v43  ;;  %v17373_v47 = vld [vmem:[%s22107_s1 + $0x16e8] sm:$0xff]   ;;  %v264_v18 = vld [vmem:[%s22108_s0 + $0x758] sm:$0xff]  ;;  %v17376_v38 = vld [vmem:[%s22107_s1 + $0x1660] sm:$0xff]  }
 0x2e1   :  { %v15660_v3 = vpop.f32.mrf.mxu0  ;;  %v15688_v63 = vpop.f32.mrf.mxu1  ;;  %v13713_v12 = vcombine.low %v200_v49, %v264_v18  ;;  %v13714_v23 = vcombine.high %v200_v49, %v264_v18  ;;  %v17377_v40 = vld [vmem:[%s22107_s1 + $0x16e0] sm:$0xff]   ;;  %v17380_v43 = vld [vmem:[%s22107_s1 + $0x1658] sm:$0xff]  }
 0x2e2   :  { %v11262_v61 = vadd.f32 %v15659_v55, %v20386_v27  ;;  %v17360_v27 = vld [vmem:[%s22107_s1 + $0x1540] sm:$0xff]   ;;  %v17375_v55 = vld [vmem:[%s22107_s1 + $0x16a8] sm:$0xff]  }
 0x2e3   :  { %v15661_v34 = vpop.f32.mrf.mxu0  ;;  %v15689_v51 = vpop.f32.mrf.mxu1  ;;  %15990 = vmatpush3.bf16.msra.mxu0 %v17358_v30  ;;  %16018 = vmatpush3.bf16.msra.mxu1 %v17359_v44  ;;  %v17383_v30 = vld [vmem:[%s22107_s1 + $0x1698] sm:$0xff]  }
 0x2e4   :  { %v20521_v50 = vadd.f32 %v15687_v57, %v11262_v61  ;;  %v15662_v4 = vadd.f32 %v15661_v34, %v15660_v3  ;;  %v15690_v35 = vadd.f32 %v15689_v51, %v15688_v63  ;;  %15991 = vmatprep.subr.bf16.mxu0 %v17360_v27  ;;  %16019 = vmatprep.subr.bf16.mxu1 %v17361_v53  ;;  %v17378_v57 = vld [vmem:[%s22107_s1 + $0x1620] sm:$0xff]   ;;  %v17381_v61 = vld [vmem:[%s22107_s1 + $0x16d8] sm:$0xff]   ;;  %v17384_v34 = vld [vmem:[%s22107_s1 + $0x1650] sm:$0xff]  }
 0x2e5   :  { %v15663_v56 = vpop.f32.mrf.mxu0  ;;  %v15691_v5 = vpop.f32.mrf.mxu1  ;;  %v17379_v3 = vld [vmem:[%s22107_s1 + $0x16a0] sm:$0xff]   ;;  %v17382_v63 = vld [vmem:[%s22107_s1 + $0x1618] sm:$0xff]   ;;  %v17385_v51 = vld [vmem:[%s22107_s1 + $0x16d0] sm:$0xff]  }
 0x2e6   :  { %v11265_v7 = vadd.f32 %v15662_v4, %v20401_v37  ;;  %v71_v37 = vld [vmem:[%s22108_s0 + $0x150] sm:$0xff] }
 0x2e7   :  { %v15664_v58 = vpop.f32.mrf.mxu0  ;;  %15992 = vmatpush3.bf16.msra.mxu0 %v17362_v59  ;;  %16020 = vmatpush3.bf16.msra.mxu1 %v17363_v11  ;;  %v13583_v39 = vcombine.low %v71_v37, %v135_v14  ;;  %v13584_v2 = vcombine.high %v71_v37, %v135_v14  ;;  %v15692_v29 = vpop.f32.mrf.mxu1  ;;  %v17386_v27 = vld [vmem:[%s22107_s1 + $0x1610] sm:$0xff]   ;;  %v17388_v11 = vld [vmem:[%s22107_s1 + $0x1648] sm:$0xff]  }
 0x2e8   :  { %v20536_v13 = vadd.f32 %v15690_v35, %v11265_v7  ;;  %v15665_v1 = vadd.f32 %v15664_v58, %v15663_v56  ;;  %v15693_v16 = vadd.f32 %v15692_v29, %v15691_v5  ;;  %16033 = vmatprep.subr.bf16.mxu0 %v17364_v8  ;;  %16061 = vmatprep.subr.bf16.mxu1 %v17365_v60  ;;  %v17387_v35 = vld [vmem:[%s22107_s1 + $0x1690] sm:$0xff]   ;;  %v17389_v14 = vld [vmem:[%s22107_s1 + $0x16c8] sm:$0xff]   ;;  %v17394_v60 = vld [vmem:[%s22107_s1 + $0x1600] sm:$0xff]  }
 0x2e9   :  { %v15666_v6 = vpop.f32.mrf.mxu0  ;;  %11847 = vmatprep.mubr.bf16.mxu0 %v13584_v2  ;;  %v15694_v33 = vpop.f32.mrf.mxu1  ;;  %v17395_v29 = vld [vmem:[%s22107_s1 + $0x1680] sm:$0xff]  }
 0x2ea   :  { %v11270_v48 = vadd.f32 %v15665_v1, %v20434_v19  ;;  %11848 = vmatmul.mubr.bf16.vlgmr.msra.gmra.mxu0 %v13583_v39  ;;  %11897 = vmatmul.mubr.bf16.vlgmr.msra.gmra.mxu1 %v13585_v9  ;;  %v17367_v19 = vld [vmem:[%s22107_s1 + $0x16b8] sm:$0xff]   ;;  %v17390_v1 = vld [vmem:[%s22107_s1 + $0x1608] sm:$0xff]   ;;  %v17393_v9 = vld [vmem:[%s22107_s1 + $0x16c0] sm:$0xff]  }
 0x2eb   :  { %v15667_v15 = vpop.f32.mrf.mxu0  ;;  %16034 = vmatpush3.bf16.msra.mxu0 %v17366_v52  ;;  %16062 = vmatpush3.bf16.msra.mxu1 %v17367_v19  ;;  %v15695_v62 = vpop.f32.mrf.mxu1  ;;  %v138_v19 = vld [vmem:[%s22108_s0 + $0x368] sm:$0xff] }
 0x2ec   :  { %v15668_v32 = vadd.f32 %v15667_v15, %v15666_v6  ;;  %v20566_v22 = vadd.f32 %v15693_v16, %v11270_v48  ;;  %16035 = vmatprep.subr.bf16.mxu0 %v17368_v0  ;;  %v15696_v41 = vadd.f32 %v15695_v62, %v15694_v33  ;;  %16063 = vmatprep.subr.bf16.mxu1 %v17369_v21  ;;  %v73_v15 = vld [vmem:[%s22108_s0 + $0x160] sm:$0xff] }
 0x2ed   :  { %11904 = vmatprep.mubr.bf16.mxu1 %v13714_v23  ;;  %v17401_v23 = vld [vmem:[%s22107_s1 + $0x17f0] sm:$0xff]  }
 0x2ee   :  { %v11273_v36 = vadd.f32 %v15668_v32, %v20452_v26  ;;  %v199_v26 = vld [vmem:[%s22108_s0 + $0x550] sm:$0xff]  ;;  %v74_v32 = vld [vmem:[%s22108_s0 + $0x168] sm:$0xff] }
 0x2ef   :  { %16036 = vmatpush3.bf16.msra.mxu0 %v17370_v10  ;;  %v13711_v25 = vcombine.low %v199_v26, %v263_v28  ;;  %v13712_v45 = vcombine.high %v199_v26, %v263_v28  ;;  %16064 = vmatpush3.bf16.msra.mxu1 %v17371_v42  ;;  %v13589_v21 = vcombine.low %v74_v32, %v138_v19  ;;  %v17396_v10 = vld [vmem:[%s22107_s1 + $0x1778] sm:$0xff]  }
 0x2f0   :  { %v20587_v46 = vadd.f32 %v15696_v41, %v11273_v36  ;;  %16037 = vmatprep.subr.bf16.mxu0 %v17372_v31  ;;  %16065 = vmatprep.subr.bf16.mxu1 %v17373_v47  ;;  %v13590_v62 = vcombine.high %v74_v32, %v138_v19  ;;  %v17397_v26 = vld [vmem:[%s22107_s1 + $0x17f8] sm:$0xff]   ;;  %v17421_v32 = vld [vmem:[%s22107_s1 + $0x17c8] sm:$0xff]  }
 0x2f1   :  { %11855 = vmatprep.mubr.bf16.mxu0 %v13712_v45  ;;  %v17399_v47 = vld [vmem:[%s22107_s1 + $0x17b8] sm:$0xff]  }
 0x2f2   :  { %11856 = vmatmul.mubr.bf16.gmra.mxu0 %v13711_v25  ;;  %11905 = vmatmul.mubr.bf16.gmra.mxu1 %v13713_v12  ;;  %v17398_v25 = vld [vmem:[%s22107_s1 + $0x1738] sm:$0xff]  }
 0x2f3   :  { %16038 = vmatpush3.bf16.msra.mxu0 %v17374_v54  ;;  %16066 = vmatpush3.bf16.msra.mxu1 %v17375_v55 }
 0x2f4   :  { %16039 = vmatprep.subr.bf16.mxu0 %v17376_v38  ;;  %16067 = vmatprep.subr.bf16.mxu1 %v17377_v40  ;;  %v17402_v38 = vld [vmem:[%s22107_s1 + $0x1730] sm:$0xff]  }
 0x2f5   :  { %11994 = vmatprep.mubr.bf16.mxu1 %v13590_v62  ;;  %v17424_v62 = vld [vmem:[%s22107_s1 + $0x1740] sm:$0xff]  }
 0x2f7   :  { %16040 = vmatpush3.bf16.msra.mxu0 %v17378_v57  ;;  %16068 = vmatpush3.bf16.msra.mxu1 %v17379_v3  ;;  %v17403_v57 = vld [vmem:[%s22107_s1 + $0x17b0] sm:$0xff]  }
 0x2f8   :  { %16041 = vmatprep.subr.bf16.mxu0 %v17380_v43  ;;  %16069 = vmatprep.subr.bf16.mxu1 %v17381_v61  ;;  %v201_v43 = vld [vmem:[%s22108_s0 + $0x560] sm:$0xff] }
 0x2fb   :  { %16042 = vmatpush3.bf16.msra.mxu0 %v17382_v63  ;;  %16070 = vmatpush3.bf16.msra.mxu1 %v17383_v30  ;;  %v17404_v30 = vld [vmem:[%s22107_s1 + $0x1768] sm:$0xff]  }
 0x2fc   :  { %16043 = vmatprep.subr.bf16.mxu0 %v17384_v34  ;;  %16071 = vmatprep.subr.bf16.mxu1 %v17385_v51  ;;  %v266_v51 = vld [vmem:[%s22108_s0 + $0x768] sm:$0xff] }
 0x2fd   :  { %v15713_v44 = vpop.f32.mrf.mxu0  ;;  %v15741_v4 = vpop.f32.mrf.mxu1 }
 0x2ff   :  { %v15714_v53 = vpop.f32.mrf.mxu0  ;;  %v15742_v7 = vpop.f32.mrf.mxu1  ;;  %16044 = vmatpush3.bf16.msra.mxu0 %v17386_v27  ;;  %16072 = vmatpush3.bf16.msra.mxu1 %v17387_v35  ;;  %v17407_v35 = vld [vmem:[%s22107_s1 + $0x17a8] sm:$0xff]  }
 0x300   :  { %v15715_v56 = vadd.f32 %v15714_v53, %v15713_v44  ;;  %v15743_v59 = vadd.f32 %v15742_v7, %v15741_v4  ;;  %16045 = vmatprep.subr.bf16.mxu0 %v17388_v11  ;;  %16073 = vmatprep.subr.bf16.mxu1 %v17389_v14  ;;  %v17405_v44 = vld [vmem:[%s22107_s1 + $0x17e8] sm:$0xff]   ;;  %v17410_v11 = vld [vmem:[%s22107_s1 + $0x1720] sm:$0xff]   ;;  %v17413_v14 = vld [vmem:[%s22107_s1 + $0x17d8] sm:$0xff]  }
 0x301   :  { %v15716_v58 = vpop.f32.mrf.mxu0  ;;  %v15744_v37 = vpop.f32.mrf.mxu1  ;;  %v202_v4 = vld [vmem:[%s22108_s0 + $0x568] sm:$0xff] }
 0x302   :  { %v11360_v17 = vadd.f32 %v15715_v56, %v20521_v50  ;;  %v17392_v50 = vld [vmem:[%s22107_s1 + $0x1640] sm:$0xff]   ;;  %v13717_v27 = vcombine.low %v202_v4, %v266_v51  ;;  %v13718_v53 = vcombine.high %v202_v4, %v266_v51  ;;  %v17406_v7 = vld [vmem:[%s22107_s1 + $0x1728] sm:$0xff]   ;;  %v17431_v4 = vld [vmem:[%s22107_s1 + $0x18b8] sm:$0xff]  }
 0x303   :  { %v15717_v39 = vpop.f32.mrf.mxu0  ;;  %v15745_v2 = vpop.f32.mrf.mxu1  ;;  %16046 = vmatpush3.bf16.msra.mxu0 %v17390_v1  ;;  %16074 = vmatpush3.bf16.msra.mxu1 %v17391_v20  ;;  %v17408_v56 = vld [vmem:[%s22107_s1 + $0x1760] sm:$0xff]   ;;  %v17415_v1 = vld [vmem:[%s22107_s1 + $0x1798] sm:$0xff]  }
 0x304   :  { %v20653_v5 = vadd.f32 %v15743_v59, %v11360_v17  ;;  %v15718_v6 = vadd.f32 %v15717_v39, %v15716_v58  ;;  %v15746_v8 = vadd.f32 %v15745_v2, %v15744_v37  ;;  %16047 = vmatprep.subr.bf16.mxu0 %v17392_v50  ;;  %16075 = vmatprep.subr.bf16.mxu1 %v17393_v9  ;;  %v17409_v59 = vld [vmem:[%s22107_s1 + $0x17e0] sm:$0xff]   ;;  %v17412_v37 = vld [vmem:[%s22107_s1 + $0x1758] sm:$0xff]   ;;  %v17416_v2 = vld [vmem:[%s22107_s1 + $0x1750] sm:$0xff]  }
 0x305   :  { %v15719_v48 = vpop.f32.mrf.mxu0  ;;  %v15747_v41 = vpop.f32.mrf.mxu1  ;;  %v17411_v58 = vld [vmem:[%s22107_s1 + $0x17a0] sm:$0xff]   ;;  %v17414_v17 = vld [vmem:[%s22107_s1 + $0x1718] sm:$0xff]   ;;  %v17418_v9 = vld [vmem:[%s22107_s1 + $0x1710] sm:$0xff]  }
 0x306   :  { %v11363_v24 = vadd.f32 %v15718_v6, %v20536_v13  ;;  %v137_v13 = vld [vmem:[%s22108_s0 + $0x360] sm:$0xff]  ;;  %v17417_v6 = vld [vmem:[%s22107_s1 + $0x17d0] sm:$0xff]  }
 0x307   :  { %v15720_v16 = vpop.f32.mrf.mxu0  ;;  %16048 = vmatpush3.bf16.msra.mxu0 %v17394_v60  ;;  %16076 = vmatpush3.bf16.msra.mxu1 %v17395_v29  ;;  %v13587_v0 = vcombine.low %v73_v15, %v137_v13  ;;  %v13588_v36 = vcombine.high %v73_v15, %v137_v13  ;;  %v15748_v45 = vpop.f32.mrf.mxu1  ;;  %v17420_v15 = vld [vmem:[%s22107_s1 + $0x1748] sm:$0xff]  }
 0x308   :  { %v20671_v52 = vadd.f32 %v15746_v8, %v11363_v24  ;;  %v15721_v33 = vadd.f32 %v15720_v16, %v15719_v48  ;;  %v15749_v49 = vadd.f32 %v15748_v45, %v15747_v41  ;;  %16089 = vmatprep.subr.bf16.mxu0 %v17396_v10  ;;  %16117 = vmatprep.subr.bf16.mxu1 %v17397_v26  ;;  %v17419_v48 = vld [vmem:[%s22107_s1 + $0x1790] sm:$0xff]   ;;  %v17427_v45 = vld [vmem:[%s22107_s1 + $0x1780] sm:$0xff]  }
 0x309   :  { %v15722_v42 = vpop.f32.mrf.mxu0  ;;  %11945 = vmatprep.mubr.bf16.mxu0 %v13588_v36  ;;  %v15750_v12 = vpop.f32.mrf.mxu1 }
 0x30a   :  { %v11368_v28 = vadd.f32 %v15721_v33, %v20566_v22  ;;  %11946 = vmatmul.mubr.bf16.vlgmr.msra.gmra.mxu0 %v13587_v0  ;;  %11995 = vmatmul.mubr.bf16.vlgmr.msra.gmra.mxu1 %v13589_v21  ;;  %v17400_v22 = vld [vmem:[%s22107_s1 + $0x1770] sm:$0xff]   ;;  %v17422_v33 = vld [vmem:[%s22107_s1 + $0x1708] sm:$0xff]  }
 0x30b   :  { %v15723_v31 = vpop.f32.mrf.mxu0  ;;  %16090 = vmatpush3.bf16.msra.mxu0 %v17398_v25  ;;  %16118 = vmatpush3.bf16.msra.mxu1 %v17399_v47  ;;  %v15751_v40 = vpop.f32.mrf.mxu1 }
 0x30c   :  { %v15724_v18 = vadd.f32 %v15723_v31, %v15722_v42  ;;  %v20701_v54 = vadd.f32 %v15749_v49, %v11368_v28  ;;  %16091 = vmatprep.subr.bf16.mxu0 %v17400_v22  ;;  %16119 = vmatprep.subr.bf16.mxu1 %v17401_v23  ;;  %v15752_v3 = vadd.f32 %v15751_v40, %v15750_v12  ;;  %v17425_v42 = vld [vmem:[%s22107_s1 + $0x17c0] sm:$0xff]   ;;  %v139_v31 = vld [vmem:[%s22108_s0 + $0x370] sm:$0xff]  ;;  %v76_v22 = vld [vmem:[%s22108_s0 + $0x178] sm:$0xff] }
 0x30d   :  { %12002 = vmatprep.mubr.bf16.mxu1 %v13718_v53  ;;  %v17426_v28 = vld [vmem:[%s22107_s1 + $0x1700] sm:$0xff]   ;;  %v140_v12 = vld [vmem:[%s22108_s0 + $0x378] sm:$0xff] }
 0x30e   :  { %v11371_v55 = vadd.f32 %v15724_v18, %v20587_v46  ;;  %v265_v46 = vld [vmem:[%s22108_s0 + $0x760] sm:$0xff]  ;;  %v13594_v40 = vcombine.high %v76_v22, %v140_v12 }
 0x30f   :  { %16092 = vmatpush3.bf16.msra.mxu0 %v17402_v38  ;;  %16120 = vmatpush3.bf16.msra.mxu1 %v17403_v57  ;;  %v13715_v61 = vcombine.low %v201_v43, %v265_v46  ;;  %v13716_v63 = vcombine.high %v201_v43, %v265_v46  ;;  %v13593_v38 = vcombine.low %v76_v22, %v140_v12  ;;  %v17428_v57 = vld [vmem:[%s22107_s1 + $0x1878] sm:$0xff]   ;;  %v17455_v12 = vld [vmem:[%s22107_s1 + $0x1888] sm:$0xff]  }
 0x310   :  { %v20719_v34 = vadd.f32 %v15752_v3, %v11371_v55  ;;  %16093 = vmatprep.subr.bf16.mxu0 %v17404_v30  ;;  %16121 = vmatprep.subr.bf16.mxu1 %v17405_v44  ;;  %v17429_v43 = vld [vmem:[%s22107_s1 + $0x18f8] sm:$0xff]  }
 0x311   :  { %11953 = vmatprep.mubr.bf16.mxu0 %v13716_v63  ;;  %v17430_v63 = vld [vmem:[%s22107_s1 + $0x1838] sm:$0xff]  }
 0x312   :  { %11954 = vmatmul.mubr.bf16.gmra.mxu0 %v13715_v61  ;;  %12003 = vmatmul.mubr.bf16.gmra.mxu1 %v13717_v27 }
 0x313   :  { %16094 = vmatpush3.bf16.msra.mxu0 %v17406_v7  ;;  %16122 = vmatpush3.bf16.msra.mxu1 %v17407_v35  ;;  %v17433_v7 = vld [vmem:[%s22107_s1 + $0x18f0] sm:$0xff]  }
 0x314   :  { %16095 = vmatprep.subr.bf16.mxu0 %v17408_v56  ;;  %16123 = vmatprep.subr.bf16.mxu1 %v17409_v59  ;;  %v17434_v59 = vld [vmem:[%s22107_s1 + $0x1830] sm:$0xff]  }
 0x315   :  { %12092 = vmatprep.mubr.bf16.mxu1 %v13594_v40  ;;  %v17457_v40 = vld [vmem:[%s22107_s1 + $0x18c0] sm:$0xff]  }
 0x317   :  { %16096 = vmatpush3.bf16.msra.mxu0 %v17410_v11  ;;  %16124 = vmatpush3.bf16.msra.mxu1 %v17411_v58  ;;  %v17435_v58 = vld [vmem:[%s22107_s1 + $0x18b0] sm:$0xff]  }
 0x318   :  { %16097 = vmatprep.subr.bf16.mxu0 %v17412_v37  ;;  %16125 = vmatprep.subr.bf16.mxu1 %v17413_v14  ;;  %v203_v37 = vld [vmem:[%s22108_s0 + $0x570] sm:$0xff] }
 0x31b   :  { %16098 = vmatpush3.bf16.msra.mxu0 %v17414_v17  ;;  %16126 = vmatpush3.bf16.msra.mxu1 %v17415_v1 }
 0x31c   :  { %16099 = vmatprep.subr.bf16.mxu0 %v17416_v2  ;;  %16127 = vmatprep.subr.bf16.mxu1 %v17417_v6  ;;  %v17437_v2 = vld [vmem:[%s22107_s1 + $0x18e8] sm:$0xff]   ;;  %v268_v6 = vld [vmem:[%s22108_s0 + $0x778] sm:$0xff] }
 0x31d   :  { %v15769_v39 = vpop.f32.mrf.mxu0  ;;  %v15797_v20 = vpop.f32.mrf.mxu1 }
 0x31f   :  { %v15770_v50 = vpop.f32.mrf.mxu0  ;;  %v15798_v8 = vpop.f32.mrf.mxu1  ;;  %16100 = vmatpush3.bf16.msra.mxu0 %v17418_v9  ;;  %16128 = vmatpush3.bf16.msra.mxu1 %v17419_v48  ;;  %v17440_v48 = vld [vmem:[%s22107_s1 + $0x1860] sm:$0xff]  }
 0x320   :  { %v15771_v24 = vadd.f32 %v15770_v50, %v15769_v39  ;;  %v15799_v60 = vadd.f32 %v15798_v8, %v15797_v20  ;;  %16101 = vmatprep.subr.bf16.mxu0 %v17420_v15  ;;  %16129 = vmatprep.subr.bf16.mxu1 %v17421_v32  ;;  %v17436_v39 = vld [vmem:[%s22107_s1 + $0x1868] sm:$0xff]   ;;  %v204_v20 = vld [vmem:[%s22108_s0 + $0x578] sm:$0xff]  ;;  %v17443_v15 = vld [vmem:[%s22107_s1 + $0x18a0] sm:$0xff]  }
 0x321   :  { %v15772_v29 = vpop.f32.mrf.mxu0  ;;  %v15800_v13 = vpop.f32.mrf.mxu1  ;;  %v13721_v50 = vcombine.low %v204_v20, %v268_v6  ;;  %v13722_v9 = vcombine.high %v204_v20, %v268_v6  ;;  %v17439_v8 = vld [vmem:[%s22107_s1 + $0x18a8] sm:$0xff]   ;;  %v17446_v32 = vld [vmem:[%s22107_s1 + $0x1818] sm:$0xff]  }
 0x322   :  { %v11458_v16 = vadd.f32 %v15771_v24, %v20653_v5  ;;  %v17423_v5 = vld [vmem:[%s22107_s1 + $0x1788] sm:$0xff]  }
 0x323   :  { %v15773_v19 = vpop.f32.mrf.mxu0  ;;  %v15801_v21 = vpop.f32.mrf.mxu1  ;;  %16102 = vmatpush3.bf16.msra.mxu0 %v17422_v33  ;;  %16130 = vmatpush3.bf16.msra.mxu1 %v17423_v5  ;;  %v17438_v24 = vld [vmem:[%s22107_s1 + $0x1828] sm:$0xff]   ;;  %v17448_v33 = vld [vmem:[%s22107_s1 + $0x1850] sm:$0xff]  }
 0x324   :  { %v20782_v0 = vadd.f32 %v15799_v60, %v11458_v16  ;;  %v15774_v36 = vadd.f32 %v15773_v19, %v15772_v29  ;;  %v15802_v41 = vadd.f32 %v15801_v21, %v15800_v13  ;;  %16103 = vmatprep.subr.bf16.mxu0 %v17424_v62  ;;  %16131 = vmatprep.subr.bf16.mxu1 %v17425_v42  ;;  %v17441_v60 = vld [vmem:[%s22107_s1 + $0x18e0] sm:$0xff]   ;;  %v17444_v16 = vld [vmem:[%s22107_s1 + $0x1858] sm:$0xff]   ;;  %v17449_v21 = vld [vmem:[%s22107_s1 + $0x18d0] sm:$0xff]  }
 0x325   :  { %v15775_v26 = vpop.f32.mrf.mxu0  ;;  %v15803_v55 = vpop.f32.mrf.mxu1  ;;  %v17442_v29 = vld [vmem:[%s22107_s1 + $0x1820] sm:$0xff]   ;;  %v17445_v13 = vld [vmem:[%s22107_s1 + $0x18d8] sm:$0xff]   ;;  %v17450_v62 = vld [vmem:[%s22107_s1 + $0x1810] sm:$0xff]  }
 0x326   :  { %v11461_v10 = vadd.f32 %v15774_v36, %v20671_v52  ;;  %v75_v52 = vld [vmem:[%s22108_s0 + $0x170] sm:$0xff]  ;;  %v17447_v19 = vld [vmem:[%s22107_s1 + $0x1898] sm:$0xff]  }
 0x327   :  { %v15776_v47 = vpop.f32.mrf.mxu0  ;;  %16104 = vmatpush3.bf16.msra.mxu0 %v17426_v28  ;;  %v13591_v49 = vcombine.low %v75_v52, %v139_v31  ;;  %v13592_v18 = vcombine.high %v75_v52, %v139_v31  ;;  %16132 = vmatpush3.bf16.msra.mxu1 %v17427_v45  ;;  %v15804_v61 = vpop.f32.mrf.mxu1  ;;  %v17452_v28 = vld [vmem:[%s22107_s1 + $0x1848] sm:$0xff]  }
 0x328   :  { %v20797_v25 = vadd.f32 %v15802_v41, %v11461_v10  ;;  %v15777_v23 = vadd.f32 %v15776_v47, %v15775_v26  ;;  %v15805_v30 = vadd.f32 %v15804_v61, %v15803_v55  ;;  %16145 = vmatprep.subr.bf16.mxu0 %v17428_v57  ;;  %16173 = vmatprep.subr.bf16.mxu1 %v17429_v43  ;;  %v17451_v41 = vld [vmem:[%s22107_s1 + $0x1890] sm:$0xff]   ;;  %v17453_v31 = vld [vmem:[%s22107_s1 + $0x18c8] sm:$0xff]   ;;  %v17459_v61 = vld [vmem:[%s22107_s1 + $0x1880] sm:$0xff]  }
 0x329   :  { %v15778_v3 = vpop.f32.mrf.mxu0  ;;  %12043 = vmatprep.mubr.bf16.mxu0 %v13592_v18  ;;  %v15806_v27 = vpop.f32.mrf.mxu1  ;;  %v17454_v18 = vld [vmem:[%s22107_s1 + $0x1808] sm:$0xff]  }
 0x32a   :  { %v11466_v46 = vadd.f32 %v15777_v23, %v20701_v54  ;;  %12044 = vmatmul.mubr.bf16.vlgmr.msra.gmra.mxu0 %v13591_v49  ;;  %12093 = vmatmul.mubr.bf16.vlgmr.msra.gmra.mxu1 %v13593_v38  ;;  %v17432_v54 = vld [vmem:[%s22107_s1 + $0x1870] sm:$0xff]  }
 0x32b   :  { %v15779_v44 = vpop.f32.mrf.mxu0  ;;  %16146 = vmatpush3.bf16.msra.mxu0 %v17430_v63  ;;  %16174 = vmatpush3.bf16.msra.mxu1 %v17431_v4  ;;  %v15807_v56 = vpop.f32.mrf.mxu1  ;;  %v78_v4 = vld [vmem:[%s22108_s0 + $0x188] sm:$0xff] }
 0x32c   :  { %v15780_v51 = vadd.f32 %v15779_v44, %v15778_v3  ;;  %v20830_v53 = vadd.f32 %v15805_v30, %v11466_v46  ;;  %16147 = vmatprep.subr.bf16.mxu0 %v17432_v54  ;;  %v15808_v11 = vadd.f32 %v15807_v56, %v15806_v27  ;;  %16175 = vmatprep.subr.bf16.mxu1 %v17433_v7  ;;  %v17458_v46 = vld [vmem:[%s22107_s1 + $0x1800] sm:$0xff]   ;;  %v142_v7 = vld [vmem:[%s22108_s0 + $0x388] sm:$0xff] }
 0x32d   :  { %12100 = vmatprep.mubr.bf16.mxu1 %v13722_v9  ;;  %v141_v44 = vld [vmem:[%s22108_s0 + $0x380] sm:$0xff] }
 0x32e   :  { %v11469_v35 = vadd.f32 %v15780_v51, %v20719_v34  ;;  %v267_v34 = vld [vmem:[%s22108_s0 + $0x770] sm:$0xff] }
 0x32f   :  { %16148 = vmatpush3.bf16.msra.mxu0 %v17434_v59  ;;  %16176 = vmatpush3.bf16.msra.mxu1 %v17435_v58  ;;  %v13719_v17 = vcombine.low %v203_v37, %v267_v34  ;;  %v13720_v1 = vcombine.high %v203_v37, %v267_v34  ;;  %v13597_v59 = vcombine.low %v78_v4, %v142_v7  ;;  %v17460_v58 = vld [vmem:[%s22107_s1 + $0x1978] sm:$0xff]  }
 0x330   :  { %v20848_v14 = vadd.f32 %v15808_v11, %v11469_v35  ;;  %16149 = vmatprep.subr.bf16.mxu0 %v17436_v39  ;;  %16177 = vmatprep.subr.bf16.mxu1 %v17437_v2  ;;  %v13598_v11 = vcombine.high %v78_v4, %v142_v7  ;;  %v17461_v34 = vld [vmem:[%s22107_s1 + $0x19f8] sm:$0xff]   ;;  %v17487_v7 = vld [vmem:[%s22107_s1 + $0x1988] sm:$0xff]  }
 0x331   :  { %12051 = vmatprep.mubr.bf16.mxu0 %v13720_v1  ;;  %v17462_v39 = vld [vmem:[%s22107_s1 + $0x1938] sm:$0xff]  }
 0x332   :  { %12052 = vmatmul.mubr.bf16.gmra.mxu0 %v13719_v17  ;;  %12101 = vmatmul.mubr.bf16.gmra.mxu1 %v13721_v50  ;;  %v17464_v50 = vld [vmem:[%s22107_s1 + $0x1970] sm:$0xff]  }
 0x333   :  { %16150 = vmatpush3.bf16.msra.mxu0 %v17438_v24  ;;  %16178 = vmatpush3.bf16.msra.mxu1 %v17439_v8  ;;  %v17465_v8 = vld [vmem:[%s22107_s1 + $0x19f0] sm:$0xff]  }
 0x334   :  { %16151 = vmatprep.subr.bf16.mxu0 %v17440_v48  ;;  %16179 = vmatprep.subr.bf16.mxu1 %v17441_v60  ;;  %v17466_v60 = vld [vmem:[%s22107_s1 + $0x1930] sm:$0xff]  }
 0x335   :  { %12190 = vmatprep.mubr.bf16.mxu1 %v13598_v11  ;;  %v17489_v11 = vld [vmem:[%s22107_s1 + $0x19c0] sm:$0xff]  }
 0x337   :  { %16152 = vmatpush3.bf16.msra.mxu0 %v17442_v29  ;;  %16180 = vmatpush3.bf16.msra.mxu1 %v17443_v15  ;;  %v17467_v15 = vld [vmem:[%s22107_s1 + $0x19b0] sm:$0xff]  }
 0x338   :  { %16153 = vmatprep.subr.bf16.mxu0 %v17444_v16  ;;  %16181 = vmatprep.subr.bf16.mxu1 %v17445_v13  ;;  %v269_v16 = vld [vmem:[%s22108_s0 + $0x780] sm:$0xff] }
 0x33b   :  { %16154 = vmatpush3.bf16.msra.mxu0 %v17446_v32  ;;  %16182 = vmatpush3.bf16.msra.mxu1 %v17447_v19  ;;  %v17468_v19 = vld [vmem:[%s22107_s1 + $0x1968] sm:$0xff]  }
 0x33c   :  { %16155 = vmatprep.subr.bf16.mxu0 %v17448_v33  ;;  %16183 = vmatprep.subr.bf16.mxu1 %v17449_v21  ;;  %v206_v21 = vld [vmem:[%s22108_s0 + $0x588] sm:$0xff] }
 0x33d   :  { %v15825_v36 = vpop.f32.mrf.mxu0  ;;  %v15853_v5 = vpop.f32.mrf.mxu1 }
 0x33f   :  { %v15826_v10 = vpop.f32.mrf.mxu0  ;;  %v15854_v26 = vpop.f32.mrf.mxu1  ;;  %16156 = vmatpush3.bf16.msra.mxu0 %v17450_v62  ;;  %16184 = vmatpush3.bf16.msra.mxu1 %v17451_v41  ;;  %v17470_v41 = vld [vmem:[%s22107_s1 + $0x1928] sm:$0xff]  }
 0x340   :  { %v15827_v42 = vadd.f32 %v15826_v10, %v15825_v36  ;;  %v15855_v45 = vadd.f32 %v15854_v26, %v15853_v5  ;;  %16157 = vmatprep.subr.bf16.mxu0 %v17452_v28  ;;  %16185 = vmatprep.subr.bf16.mxu1 %v17453_v31  ;;  %v17469_v36 = vld [vmem:[%s22107_s1 + $0x19e8] sm:$0xff]   ;;  %v17472_v26 = vld [vmem:[%s22107_s1 + $0x1960] sm:$0xff]   ;;  %v17476_v31 = vld [vmem:[%s22107_s1 + $0x1958] sm:$0xff]  }
 0x341   :  { %v15828_v52 = vpop.f32.mrf.mxu0  ;;  %v15856_v49 = vpop.f32.mrf.mxu1  ;;  %v270_v5 = vld [vmem:[%s22108_s0 + $0x788] sm:$0xff]  ;;  %v17473_v28 = vld [vmem:[%s22107_s1 + $0x19e0] sm:$0xff]  }
 0x342   :  { %v11556_v47 = vadd.f32 %v15827_v42, %v20782_v0  ;;  %v17456_v0 = vld [vmem:[%s22107_s1 + $0x1840] sm:$0xff]   ;;  %v13725_v62 = vcombine.low %v206_v21, %v270_v5  ;;  %v13726_v10 = vcombine.high %v206_v21, %v270_v5  ;;  %v17471_v42 = vld [vmem:[%s22107_s1 + $0x19a8] sm:$0xff]  }
 0x343   :  { %v15829_v22 = vpop.f32.mrf.mxu0  ;;  %v15857_v38 = vpop.f32.mrf.mxu1  ;;  %16158 = vmatpush3.bf16.msra.mxu0 %v17454_v18  ;;  %16186 = vmatpush3.bf16.msra.mxu1 %v17455_v12  ;;  %v17479_v18 = vld [vmem:[%s22107_s1 + $0x1998] sm:$0xff]  }
 0x344   :  { %v20917_v23 = vadd.f32 %v15855_v45, %v11556_v47  ;;  %v15830_v55 = vadd.f32 %v15829_v22, %v15828_v52  ;;  %v15858_v3 = vadd.f32 %v15857_v38, %v15856_v49  ;;  %16159 = vmatprep.subr.bf16.mxu0 %v17456_v0  ;;  %16187 = vmatprep.subr.bf16.mxu1 %v17457_v40  ;;  %v17474_v45 = vld [vmem:[%s22107_s1 + $0x1920] sm:$0xff]   ;;  %v17477_v47 = vld [vmem:[%s22107_s1 + $0x19d8] sm:$0xff]   ;;  %v17480_v22 = vld [vmem:[%s22107_s1 + $0x1950] sm:$0xff]  }
 0x345   :  { %v15831_v43 = vpop.f32.mrf.mxu0  ;;  %v15859_v35 = vpop.f32.mrf.mxu1  ;;  %v17475_v52 = vld [vmem:[%s22107_s1 + $0x19a0] sm:$0xff]   ;;  %v17478_v49 = vld [vmem:[%s22107_s1 + $0x1918] sm:$0xff]   ;;  %v17481_v38 = vld [vmem:[%s22107_s1 + $0x19d0] sm:$0xff]  }
 0x346   :  { %v11559_v57 = vadd.f32 %v15830_v55, %v20797_v25  ;;  %v77_v25 = vld [vmem:[%s22108_s0 + $0x180] sm:$0xff]  ;;  %v17482_v0 = vld [vmem:[%s22107_s1 + $0x1910] sm:$0xff]  }
 0x347   :  { %v15832_v30 = vpop.f32.mrf.mxu0  ;;  %16160 = vmatpush3.bf16.msra.mxu0 %v17458_v46  ;;  %16188 = vmatpush3.bf16.msra.mxu1 %v17459_v61  ;;  %v13595_v27 = vcombine.low %v77_v25, %v141_v44  ;;  %v13596_v54 = vcombine.high %v77_v25, %v141_v44  ;;  %v15860_v17 = vpop.f32.mrf.mxu1  ;;  %v17484_v61 = vld [vmem:[%s22107_s1 + $0x1948] sm:$0xff]  }
 0x348   :  { %v20932_v63 = vadd.f32 %v15858_v3, %v11559_v57  ;;  %v15833_v51 = vadd.f32 %v15832_v30, %v15831_v43  ;;  %v15861_v2 = vadd.f32 %v15860_v17, %v15859_v35  ;;  %16201 = vmatprep.subr.bf16.mxu0 %v17460_v58  ;;  %16229 = vmatprep.subr.bf16.mxu1 %v17461_v34  ;;  %v17483_v3 = vld [vmem:[%s22107_s1 + $0x1990] sm:$0xff]   ;;  %v17485_v44 = vld [vmem:[%s22107_s1 + $0x19c8] sm:$0xff]   ;;  %v17490_v34 = vld [vmem:[%s22107_s1 + $0x1900] sm:$0xff]  }
 0x349   :  { %v15834_v56 = vpop.f32.mrf.mxu0  ;;  %12141 = vmatprep.mubr.bf16.mxu0 %v13596_v54  ;;  %v15862_v6 = vpop.f32.mrf.mxu1  ;;  %v17491_v17 = vld [vmem:[%s22107_s1 + $0x1980] sm:$0xff]  }
 0x34a   :  { %v11564_v37 = vadd.f32 %v15833_v51, %v20830_v53  ;;  %12142 = vmatmul.mubr.bf16.vlgmr.msra.gmra.mxu0 %v13595_v27  ;;  %12191 = vmatmul.mubr.bf16.vlgmr.msra.gmra.mxu1 %v13597_v59  ;;  %v17463_v53 = vld [vmem:[%s22107_s1 + $0x19b8] sm:$0xff]   ;;  %v17486_v51 = vld [vmem:[%s22107_s1 + $0x1908] sm:$0xff]  }
 0x34b   :  { %v15835_v1 = vpop.f32.mrf.mxu0  ;;  %16202 = vmatpush3.bf16.msra.mxu0 %v17462_v39  ;;  %16230 = vmatpush3.bf16.msra.mxu1 %v17463_v53  ;;  %v15863_v48 = vpop.f32.mrf.mxu1  ;;  %v144_v53 = vld [vmem:[%s22108_s0 + $0x398] sm:$0xff] }
 0x34c   :  { %v15836_v20 = vadd.f32 %v15835_v1, %v15834_v56  ;;  %v20962_v9 = vadd.f32 %v15861_v2, %v11564_v37  ;;  %16203 = vmatprep.subr.bf16.mxu0 %v17464_v50  ;;  %v15864_v29 = vadd.f32 %v15863_v48, %v15862_v6  ;;  %16231 = vmatprep.subr.bf16.mxu1 %v17465_v8  ;;  %v79_v1 = vld [vmem:[%s22108_s0 + $0x190] sm:$0xff] }
 0x34d   :  { %12198 = vmatprep.mubr.bf16.mxu1 %v13726_v10  ;;  %v17497_v10 = vld [vmem:[%s22107_s1 + $0x1af0] sm:$0xff]  }
 0x34e   :  { %v11567_v24 = vadd.f32 %v15836_v20, %v20848_v14  ;;  %v205_v14 = vld [vmem:[%s22108_s0 + $0x580] sm:$0xff]  ;;  %v80_v20 = vld [vmem:[%s22108_s0 + $0x198] sm:$0xff] }
 0x34f   :  { %16204 = vmatpush3.bf16.msra.mxu0 %v17466_v60  ;;  %v13723_v13 = vcombine.low %v205_v14, %v269_v16  ;;  %v13724_v32 = vcombine.high %v205_v14, %v269_v16  ;;  %16232 = vmatpush3.bf16.msra.mxu1 %v17467_v15  ;;  %v13601_v8 = vcombine.low %v80_v20, %v144_v53  ;;  %v17492_v60 = vld [vmem:[%s22107_s1 + $0x1a78] sm:$0xff]  }
 0x350   :  { %v20983_v33 = vadd.f32 %v15864_v29, %v11567_v24  ;;  %16205 = vmatprep.subr.bf16.mxu0 %v17468_v19  ;;  %16233 = vmatprep.subr.bf16.mxu1 %v17469_v36  ;;  %v13602_v48 = vcombine.high %v80_v20, %v144_v53  ;;  %v17493_v14 = vld [vmem:[%s22107_s1 + $0x1af8] sm:$0xff]   ;;  %v17517_v20 = vld [vmem:[%s22107_s1 + $0x1ac8] sm:$0xff]  }
 0x351   :  { %12149 = vmatprep.mubr.bf16.mxu0 %v13724_v32  ;;  %v17495_v36 = vld [vmem:[%s22107_s1 + $0x1ab8] sm:$0xff]  }
 0x352   :  { %12150 = vmatmul.mubr.bf16.gmra.mxu0 %v13723_v13  ;;  %12199 = vmatmul.mubr.bf16.gmra.mxu1 %v13725_v62  ;;  %v17494_v13 = vld [vmem:[%s22107_s1 + $0x1a38] sm:$0xff]  }
 0x353   :  { %16206 = vmatpush3.bf16.msra.mxu0 %v17470_v41  ;;  %16234 = vmatpush3.bf16.msra.mxu1 %v17471_v42 }
 0x354   :  { %16207 = vmatprep.subr.bf16.mxu0 %v17472_v26  ;;  %16235 = vmatprep.subr.bf16.mxu1 %v17473_v28  ;;  %v17498_v26 = vld [vmem:[%s22107_s1 + $0x1a30] sm:$0xff]  }
 0x355   :  { %12288 = vmatprep.mubr.bf16.mxu1 %v13602_v48 }
 0x357   :  { %16208 = vmatpush3.bf16.msra.mxu0 %v17474_v45  ;;  %16236 = vmatpush3.bf16.msra.mxu1 %v17475_v52  ;;  %v17499_v45 = vld [vmem:[%s22107_s1 + $0x1ab0] sm:$0xff]  }
 0x358   :  { %16209 = vmatprep.subr.bf16.mxu0 %v17476_v31  ;;  %16237 = vmatprep.subr.bf16.mxu1 %v17477_v47  ;;  %v207_v31 = vld [vmem:[%s22108_s0 + $0x590] sm:$0xff] }
 0x35b   :  { %16210 = vmatpush3.bf16.msra.mxu0 %v17478_v49  ;;  %16238 = vmatpush3.bf16.msra.mxu1 %v17479_v18  ;;  %v17500_v18 = vld [vmem:[%s22107_s1 + $0x1a68] sm:$0xff]  }
 0x35c   :  { %16211 = vmatprep.subr.bf16.mxu0 %v17480_v22  ;;  %16239 = vmatprep.subr.bf16.mxu1 %v17481_v38  ;;  %v272_v38 = vld [vmem:[%s22108_s0 + $0x798] sm:$0xff] }
 0x35d   :  { %v15909_v55 = vpop.f32.mrf.mxu1 }
 0x35f   :  { %v15910_v57 = vpop.f32.mrf.mxu1  ;;  %16212 = vmatpush3.bf16.msra.mxu0 %v17482_v0  ;;  %16240 = vmatpush3.bf16.msra.mxu1 %v17483_v3  ;;  %v17503_v3 = vld [vmem:[%s22107_s1 + $0x1aa8] sm:$0xff]  }
 0x360   :  { %v15911_v46 = vadd.f32 %v15910_v57, %v15909_v55  ;;  %16213 = vmatprep.subr.bf16.mxu0 %v17484_v61  ;;  %16241 = vmatprep.subr.bf16.mxu1 %v17485_v44  ;;  %v208_v55 = vld [vmem:[%s22108_s0 + $0x598] sm:$0xff]  ;;  %v17502_v57 = vld [vmem:[%s22107_s1 + $0x1a28] sm:$0xff]   ;;  %v17506_v61 = vld [vmem:[%s22107_s1 + $0x1a20] sm:$0xff]  }
 0x361   :  { %v15912_v25 = vpop.f32.mrf.mxu1  ;;  %v13729_v0 = vcombine.low %v208_v55, %v272_v38  ;;  %v17509_v44 = vld [vmem:[%s22107_s1 + $0x1ad8] sm:$0xff]  }
 0x363   :  { %v15913_v54 = vpop.f32.mrf.mxu1  ;;  %16214 = vmatpush3.bf16.msra.mxu0 %v17486_v51  ;;  %16242 = vmatpush3.bf16.msra.mxu1 %v17487_v7  ;;  %v17511_v51 = vld [vmem:[%s22107_s1 + $0x1a98] sm:$0xff]  }
 0x364   :  { %v15914_v59 = vadd.f32 %v15913_v54, %v15912_v25  ;;  %16243 = vmatprep.subr.bf16.mxu1 %v17489_v11  ;;  %v17508_v25 = vld [vmem:[%s22107_s1 + $0x1a58] sm:$0xff]   ;;  %v17512_v54 = vld [vmem:[%s22107_s1 + $0x1a50] sm:$0xff]  }
 0x365   :  { %v15915_v29 = vpop.f32.mrf.mxu1 }
 0x367   :  { %16244 = vmatpush3.bf16.msra.mxu1 %v17491_v17  ;;  %v15916_v32 = vpop.f32.mrf.mxu1 }
 0x368   :  { %v15917_v21 = vadd.f32 %v15916_v32, %v15915_v29  ;;  %16285 = vmatprep.subr.bf16.mxu1 %v17493_v14  ;;  %v17523_v32 = vld [vmem:[%s22107_s1 + $0x1a80] sm:$0xff]  }
 0x369   :  { %v15918_v62 = vpop.f32.mrf.mxu1 }
 0x36a   :  { %v15881_v12 = vpop.f32.mrf.mxu0  ;;  %12289 = vmatmul.mubr.bf16.vlgmr.msra.gmra.mxu1 %v13601_v8 }
 0x36b   :  { %16286 = vmatpush3.bf16.msra.mxu1 %v17495_v36  ;;  %v15919_v28 = vpop.f32.mrf.mxu1 }
 0x36c   :  { %v15882_v40 = vpop.f32.mrf.mxu0  ;;  %16287 = vmatprep.subr.bf16.mxu1 %v17497_v10  ;;  %v15920_v52 = vadd.f32 %v15919_v28, %v15918_v62  ;;  %v146_v62 = vld [vmem:[%s22108_s0 + $0x3a8] sm:$0xff] }
 0x36d   :  { %v15883_v43 = vadd.f32 %v15882_v40, %v15881_v12  ;;  %v17501_v12 = vld [vmem:[%s22107_s1 + $0x1ae8] sm:$0xff]   ;;  %v13730_v40 = vcombine.high %v208_v55, %v272_v38  ;;  %v17527_v55 = vld [vmem:[%s22107_s1 + $0x1bb8] sm:$0xff]  }
 0x36e   :  { %v15884_v30 = vpop.f32.mrf.mxu0 }
 0x36f   :  { %v11654_v4 = vadd.f32 %v15883_v43, %v20917_v23  ;;  %v17488_v23 = vld [vmem:[%s22107_s1 + $0x1940] sm:$0xff]   ;;  %16288 = vmatpush3.bf16.msra.mxu1 %v17499_v45  ;;  %12296 = vmatprep.mubr.bf16.mxu1 %v13730_v40  ;;  %v17524_v45 = vld [vmem:[%s22107_s1 + $0x1b78] sm:$0xff]  }
 0x370   :  { %v15885_v27 = vpop.f32.mrf.mxu0  ;;  %16215 = vmatprep.subr.bf16.mxu0 %v17488_v23  ;;  %16289 = vmatprep.subr.bf16.mxu1 %v17501_v12  ;;  %v17504_v43 = vld [vmem:[%s22107_s1 + $0x1a60] sm:$0xff]   ;;  %v17514_v23 = vld [vmem:[%s22107_s1 + $0x1a10] sm:$0xff]  }
 0x371   :  { %v21049_v35 = vadd.f32 %v15911_v46, %v11654_v4  ;;  %v15886_v56 = vadd.f32 %v15885_v27, %v15884_v30  ;;  %16216 = vmatpush3.bf16.msra.mxu0 %v17490_v34  ;;  %v17505_v46 = vld [vmem:[%s22107_s1 + $0x1ae0] sm:$0xff]   ;;  %v17510_v4 = vld [vmem:[%s22107_s1 + $0x1a18] sm:$0xff]  }
 0x372   :  { %v15887_v37 = vpop.f32.mrf.mxu0  ;;  %16257 = vmatprep.subr.bf16.mxu0 %v17492_v60  ;;  %12297 = vmatmul.mubr.bf16.gmra.mxu1 %v13729_v0  ;;  %v17507_v30 = vld [vmem:[%s22107_s1 + $0x1aa0] sm:$0xff]  }
 0x373   :  { %v11657_v58 = vadd.f32 %v15886_v56, %v20932_v63  ;;  %v143_v63 = vld [vmem:[%s22108_s0 + $0x390] sm:$0xff]  ;;  %16290 = vmatpush3.bf16.msra.mxu1 %v17503_v3  ;;  %v17520_v60 = vld [vmem:[%s22107_s1 + $0x1a40] sm:$0xff]  }
 0x374   :  { %v15888_v2 = vpop.f32.mrf.mxu0  ;;  %v13599_v50 = vcombine.low %v79_v1, %v143_v63  ;;  %v13600_v24 = vcombine.high %v79_v1, %v143_v63  ;;  %16291 = vmatprep.subr.bf16.mxu1 %v17505_v46  ;;  %v17513_v56 = vld [vmem:[%s22107_s1 + $0x1ad0] sm:$0xff]   ;;  %v17516_v1 = vld [vmem:[%s22107_s1 + $0x1a48] sm:$0xff]  }
 0x375   :  { %v21067_v39 = vadd.f32 %v15914_v59, %v11657_v58  ;;  %v15889_v6 = vadd.f32 %v15888_v2, %v15887_v37  ;;  %v17515_v37 = vld [vmem:[%s22107_s1 + $0x1a90] sm:$0xff]  }
 0x376   :  { %v15890_v15 = vpop.f32.mrf.mxu0  ;;  %12239 = vmatprep.mubr.bf16.mxu0 %v13600_v24  ;;  %v17530_v46 = vld [vmem:[%s22107_s1 + $0x1b30] sm:$0xff]  }
 0x377   :  { %v11662_v16 = vadd.f32 %v15889_v6, %v20962_v9  ;;  %12240 = vmatmul.mubr.bf16.vlgmr.msra.gmra.mxu0 %v13599_v50  ;;  %v17496_v9 = vld [vmem:[%s22107_s1 + $0x1a70] sm:$0xff]   ;;  %16292 = vmatpush3.bf16.msra.mxu1 %v17507_v30  ;;  %v17518_v6 = vld [vmem:[%s22107_s1 + $0x1a08] sm:$0xff]  }
 0x378   :  { %v15891_v19 = vpop.f32.mrf.mxu0  ;;  %16258 = vmatpush3.bf16.msra.mxu0 %v17494_v13  ;;  %16293 = vmatprep.subr.bf16.mxu1 %v17509_v44  ;;  %v17531_v30 = vld [vmem:[%s22107_s1 + $0x1bb0] sm:$0xff]  }
 0x379   :  { %v15892_v5 = vadd.f32 %v15891_v19, %v15890_v15  ;;  %v21097_v41 = vadd.f32 %v15917_v21, %v11662_v16  ;;  %16259 = vmatprep.subr.bf16.mxu0 %v17496_v9  ;;  %v17521_v15 = vld [vmem:[%s22107_s1 + $0x1ac0] sm:$0xff]   ;;  %v82_v9 = vld [vmem:[%s22108_s0 + $0x1a8] sm:$0xff] }
 0x37a   :  { %v17522_v16 = vld [vmem:[%s22107_s1 + $0x1a00] sm:$0xff]   ;;  %v13606_v28 = vcombine.high %v82_v9, %v146_v62 }
 0x37b   :  { %v11665_v42 = vadd.f32 %v15892_v5, %v20983_v33  ;;  %v271_v33 = vld [vmem:[%s22108_s0 + $0x790] sm:$0xff]  ;;  %16294 = vmatpush3.bf16.msra.mxu1 %v17511_v51  ;;  %v145_v19 = vld [vmem:[%s22108_s0 + $0x3a0] sm:$0xff] }
 0x37c   :  { %16260 = vmatpush3.bf16.msra.mxu0 %v17498_v26  ;;  %v13727_v47 = vcombine.low %v207_v31, %v271_v33  ;;  %v13728_v49 = vcombine.high %v207_v31, %v271_v33  ;;  %16295 = vmatprep.subr.bf16.mxu1 %v17513_v56  ;;  %v13605_v26 = vcombine.low %v82_v9, %v146_v62  ;;  %v17525_v31 = vld [vmem:[%s22107_s1 + $0x1bf8] sm:$0xff]   ;;  %v274_v56 = vld [vmem:[%s22108_s0 + $0x7a8] sm:$0xff] }
 0x37d   :  { %v21115_v22 = vadd.f32 %v15920_v52, %v11665_v42  ;;  %16261 = vmatprep.subr.bf16.mxu0 %v17500_v18  ;;  %12386 = vmatprep.mubr.bf16.mxu1 %v13606_v28  ;;  %v17551_v62 = vld [vmem:[%s22107_s1 + $0x1b88] sm:$0xff]  }
 0x37e   :  { %12247 = vmatprep.mubr.bf16.mxu0 %v13728_v49  ;;  %v17526_v49 = vld [vmem:[%s22107_s1 + $0x1b38] sm:$0xff]  }
 0x37f   :  { %12248 = vmatmul.mubr.bf16.gmra.mxu0 %v13727_v47  ;;  %16296 = vmatpush3.bf16.msra.mxu1 %v17515_v37  ;;  %v17536_v37 = vld [vmem:[%s22107_s1 + $0x1b60] sm:$0xff]  }
 0x380   :  { %16262 = vmatpush3.bf16.msra.mxu0 %v17502_v57  ;;  %16297 = vmatprep.subr.bf16.mxu1 %v17517_v20  ;;  %v17529_v57 = vld [vmem:[%s22107_s1 + $0x1bf0] sm:$0xff]   ;;  %v17542_v20 = vld [vmem:[%s22107_s1 + $0x1b18] sm:$0xff]  }
 0x381   :  { %16263 = vmatprep.subr.bf16.mxu0 %v17504_v43 }
 0x384   :  { %16264 = vmatpush3.bf16.msra.mxu0 %v17506_v61 }
 0x385   :  { %16265 = vmatprep.subr.bf16.mxu0 %v17508_v25  ;;  %v209_v25 = vld [vmem:[%s22108_s0 + $0x5a0] sm:$0xff] }
 0x388   :  { %16266 = vmatpush3.bf16.msra.mxu0 %v17510_v4 }
 0x389   :  { %16267 = vmatprep.subr.bf16.mxu0 %v17512_v54  ;;  %v17533_v54 = vld [vmem:[%s22107_s1 + $0x1be8] sm:$0xff]  }
 0x38a   :  { %v15937_v27 = vpop.f32.mrf.mxu0  ;;  %v15965_v7 = vpop.f32.mrf.mxu1 }
 0x38c   :  { %v15938_v59 = vpop.f32.mrf.mxu0  ;;  %v15966_v58 = vpop.f32.mrf.mxu1  ;;  %16268 = vmatpush3.bf16.msra.mxu0 %v17514_v23 }
 0x38d   :  { %v15939_v11 = vadd.f32 %v15938_v59, %v15937_v27  ;;  %v15967_v34 = vadd.f32 %v15966_v58, %v15965_v7  ;;  %16269 = vmatprep.subr.bf16.mxu0 %v17516_v1  ;;  %v17532_v27 = vld [vmem:[%s22107_s1 + $0x1b68] sm:$0xff]   ;;  %v17539_v1 = vld [vmem:[%s22107_s1 + $0x1ba0] sm:$0xff]  }
 0x38e   :  { %v15940_v17 = vpop.f32.mrf.mxu0  ;;  %v15968_v63 = vpop.f32.mrf.mxu1  ;;  %v210_v7 = vld [vmem:[%s22108_s0 + $0x5a8] sm:$0xff] }
 0x38f   :  { %v11752_v2 = vadd.f32 %v15939_v11, %v21049_v35  ;;  %v17519_v35 = vld [vmem:[%s22107_s1 + $0x1a88] sm:$0xff]   ;;  %v13733_v59 = vcombine.low %v210_v7, %v274_v56  ;;  %v13734_v23 = vcombine.high %v210_v7, %v274_v56 }
 0x390   :  { %v15941_v53 = vpop.f32.mrf.mxu0  ;;  %v15969_v8 = vpop.f32.mrf.mxu1  ;;  %16270 = vmatpush3.bf16.msra.mxu0 %v17518_v6  ;;  %16298 = vmatpush3.bf16.msra.mxu1 %v17519_v35  ;;  %v17534_v11 = vld [vmem:[%s22107_s1 + $0x1b28] sm:$0xff]   ;;  %v17544_v6 = vld [vmem:[%s22107_s1 + $0x1b50] sm:$0xff]  }
 0x391   :  { %v21178_v50 = vadd.f32 %v15967_v34, %v11752_v2  ;;  %v15942_v24 = vadd.f32 %v15941_v53, %v15940_v17  ;;  %v15970_v48 = vadd.f32 %v15969_v8, %v15968_v63  ;;  %16271 = vmatprep.subr.bf16.mxu0 %v17520_v60  ;;  %16299 = vmatprep.subr.bf16.mxu1 %v17521_v15  ;;  %v17535_v58 = vld [vmem:[%s22107_s1 + $0x1ba8] sm:$0xff]   ;;  %v17537_v34 = vld [vmem:[%s22107_s1 + $0x1be0] sm:$0xff]   ;;  %v17540_v2 = vld [vmem:[%s22107_s1 + $0x1b58] sm:$0xff]  }
 0x392   :  { %v15943_v14 = vpop.f32.mrf.mxu0  ;;  %v15971_v42 = vpop.f32.mrf.mxu1  ;;  %v17538_v17 = vld [vmem:[%s22107_s1 + $0x1b20] sm:$0xff]   ;;  %v17541_v63 = vld [vmem:[%s22107_s1 + $0x1bd8] sm:$0xff]   ;;  %v17545_v8 = vld [vmem:[%s22107_s1 + $0x1bd0] sm:$0xff]  }
 0x393   :  { %v11755_v29 = vadd.f32 %v15942_v24, %v21067_v39  ;;  %v81_v39 = vld [vmem:[%s22108_s0 + $0x1a0] sm:$0xff]  ;;  %v17543_v53 = vld [vmem:[%s22107_s1 + $0x1b98] sm:$0xff]  }
 0x394   :  { %v15944_v36 = vpop.f32.mrf.mxu0  ;;  %16272 = vmatpush3.bf16.msra.mxu0 %v17522_v16  ;;  %v13603_v21 = vcombine.low %v81_v39, %v145_v19  ;;  %v13604_v5 = vcombine.high %v81_v39, %v145_v19  ;;  %16300 = vmatpush3.bf16.msra.mxu1 %v17523_v32  ;;  %v15972_v47 = vpop.f32.mrf.mxu1  ;;  %v17548_v16 = vld [vmem:[%s22107_s1 + $0x1b48] sm:$0xff]  }
 0x395   :  { %v21193_v13 = vadd.f32 %v15970_v48, %v11755_v29  ;;  %v15945_v10 = vadd.f32 %v15944_v36, %v15943_v14  ;;  %v15973_v18 = vadd.f32 %v15972_v47, %v15971_v42  ;;  %16313 = vmatprep.subr.bf16.mxu0 %v17524_v45  ;;  %16341 = vmatprep.subr.bf16.mxu1 %v17525_v31  ;;  %v17546_v48 = vld [vmem:[%s22107_s1 + $0x1b10] sm:$0xff]   ;;  %v17549_v19 = vld [vmem:[%s22107_s1 + $0x1bc8] sm:$0xff]   ;;  %v17553_v45 = vld [vmem:[%s22107_s1 + $0x1bc0] sm:$0xff]  }
 0x396   :  { %v15946_v52 = vpop.f32.mrf.mxu0  ;;  %12337 = vmatprep.mubr.bf16.mxu0 %v13604_v5  ;;  %v15974_v0 = vpop.f32.mrf.mxu1  ;;  %v17547_v29 = vld [vmem:[%s22107_s1 + $0x1b90] sm:$0xff]   ;;  %v17550_v5 = vld [vmem:[%s22107_s1 + $0x1b08] sm:$0xff]   ;;  %v17555_v47 = vld [vmem:[%s22107_s1 + $0x1b80] sm:$0xff]  }
 0x397   :  { %v11760_v33 = vadd.f32 %v15945_v10, %v21097_v41  ;;  %12338 = vmatmul.mubr.bf16.vlgmr.msra.gmra.mxu0 %v13603_v21  ;;  %12387 = vmatmul.mubr.bf16.vlgmr.msra.gmra.mxu1 %v13605_v26  ;;  %v17528_v41 = vld [vmem:[%s22107_s1 + $0x1b70] sm:$0xff]  }
 0x398   :  { %v15947_v12 = vpop.f32.mrf.mxu0  ;;  %16314 = vmatpush3.bf16.msra.mxu0 %v17526_v49  ;;  %16342 = vmatpush3.bf16.msra.mxu1 %v17527_v55  ;;  %v15975_v43 = vpop.f32.mrf.mxu1  ;;  %v84_v55 = vld [vmem:[%s22108_s0 + $0x1b8] sm:$0xff] }
 0x399   :  { %v15948_v38 = vadd.f32 %v15947_v12, %v15946_v52  ;;  %v21226_v40 = vadd.f32 %v15973_v18, %v11760_v33  ;;  %16315 = vmatprep.subr.bf16.mxu0 %v17528_v41  ;;  %v15976_v61 = vadd.f32 %v15975_v43, %v15974_v0  ;;  %16343 = vmatprep.subr.bf16.mxu1 %v17529_v57  ;;  %v17554_v33 = vld [vmem:[%s22107_s1 + $0x1b00] sm:$0xff]   ;;  %v83_v12 = vld [vmem:[%s22108_s0 + $0x1b0] sm:$0xff]  ;;  %v148_v57 = vld [vmem:[%s22108_s0 + $0x3b8] sm:$0xff] }
 0x39a   :  { %12394 = vmatprep.mubr.bf16.mxu1 %v13734_v23 }
 0x39b   :  { %v11763_v3 = vadd.f32 %v15948_v38, %v21115_v22  ;;  %v273_v22 = vld [vmem:[%s22108_s0 + $0x7a0] sm:$0xff] }
 0x39c   :  { %16316 = vmatpush3.bf16.msra.mxu0 %v17530_v46  ;;  %16344 = vmatpush3.bf16.msra.mxu1 %v17531_v30  ;;  %v13731_v4 = vcombine.low %v209_v25, %v273_v22  ;;  %v13732_v51 = vcombine.high %v209_v25, %v273_v22  ;;  %v13609_v46 = vcombine.low %v84_v55, %v148_v57  ;;  %v17556_v30 = vld [vmem:[%s22107_s1 + $0x1c78] sm:$0xff]  }
 0x39d   :  { %v21244_v44 = vadd.f32 %v15976_v61, %v11763_v3  ;;  %16317 = vmatprep.subr.bf16.mxu0 %v17532_v27  ;;  %16345 = vmatprep.subr.bf16.mxu1 %v17533_v54  ;;  %v13610_v61 = vcombine.high %v84_v55, %v148_v57  ;;  %v17557_v22 = vld [vmem:[%s22107_s1 + $0x1cf8] sm:$0xff]   ;;  %v17583_v57 = vld [vmem:[%s22107_s1 + $0x1c88] sm:$0xff]  }
 0x39e   :  { %12345 = vmatprep.mubr.bf16.mxu0 %v13732_v51  ;;  %v17558_v27 = vld [vmem:[%s22107_s1 + $0x1c38] sm:$0xff]  }
 0x39f   :  { %12346 = vmatmul.mubr.bf16.gmra.mxu0 %v13731_v4  ;;  %12395 = vmatmul.mubr.bf16.gmra.mxu1 %v13733_v59  ;;  %v17560_v59 = vld [vmem:[%s22107_s1 + $0x1c70] sm:$0xff]  }
 0x3a0   :  { %16318 = vmatpush3.bf16.msra.mxu0 %v17534_v11  ;;  %16346 = vmatpush3.bf16.msra.mxu1 %v17535_v58  ;;  %v17561_v58 = vld [vmem:[%s22107_s1 + $0x1cf0] sm:$0xff]  }
 0x3a1   :  { %16319 = vmatprep.subr.bf16.mxu0 %v17536_v37  ;;  %16347 = vmatprep.subr.bf16.mxu1 %v17537_v34  ;;  %v17562_v34 = vld [vmem:[%s22107_s1 + $0x1c30] sm:$0xff]  }
 0x3a2   :  { %12484 = vmatprep.mubr.bf16.mxu1 %v13610_v61  ;;  %v17585_v61 = vld [vmem:[%s22107_s1 + $0x1cc0] sm:$0xff]  }
 0x3a4   :  { %16320 = vmatpush3.bf16.msra.mxu0 %v17538_v17  ;;  %16348 = vmatpush3.bf16.msra.mxu1 %v17539_v1  ;;  %v17563_v1 = vld [vmem:[%s22107_s1 + $0x1cb0] sm:$0xff]  }
 0x3a5   :  { %16321 = vmatprep.subr.bf16.mxu0 %v17540_v2  ;;  %16349 = vmatprep.subr.bf16.mxu1 %v17541_v63  ;;  %v275_v2 = vld [vmem:[%s22108_s0 + $0x7b0] sm:$0xff] }
 0x3a8   :  { %16322 = vmatpush3.bf16.msra.mxu0 %v17542_v20  ;;  %16350 = vmatpush3.bf16.msra.mxu1 %v17543_v53  ;;  %v17564_v53 = vld [vmem:[%s22107_s1 + $0x1c68] sm:$0xff]  }
 0x3a9   :  { %16323 = vmatprep.subr.bf16.mxu0 %v17544_v6  ;;  %16351 = vmatprep.subr.bf16.mxu1 %v17545_v8  ;;  %v212_v8 = vld [vmem:[%s22108_s0 + $0x5b8] sm:$0xff] }
 0x3aa   :  { %v15993_v24 = vpop.f32.mrf.mxu0  ;;  %v16021_v35 = vpop.f32.mrf.mxu1 }
 0x3ac   :  { %v15994_v60 = vpop.f32.mrf.mxu0  ;;  %v16022_v14 = vpop.f32.mrf.mxu1  ;;  %16324 = vmatpush3.bf16.msra.mxu0 %v17546_v48  ;;  %16352 = vmatpush3.bf16.msra.mxu1 %v17547_v29  ;;  %v17566_v29 = vld [vmem:[%s22107_s1 + $0x1c28] sm:$0xff]  }
 0x3ad   :  { %v15995_v15 = vadd.f32 %v15994_v60, %v15993_v24  ;;  %v16023_v32 = vadd.f32 %v16022_v14, %v16021_v35  ;;  %16325 = vmatprep.subr.bf16.mxu0 %v17548_v16  ;;  %16353 = vmatprep.subr.bf16.mxu1 %v17549_v19  ;;  %v17565_v24 = vld [vmem:[%s22107_s1 + $0x1ce8] sm:$0xff]   ;;  %v276_v35 = vld [vmem:[%s22108_s0 + $0x7b8] sm:$0xff]  ;;  %v17568_v14 = vld [vmem:[%s22107_s1 + $0x1c60] sm:$0xff]  }
 0x3ae   :  { %v15996_v39 = vpop.f32.mrf.mxu0  ;;  %v16024_v21 = vpop.f32.mrf.mxu1  ;;  %v13737_v48 = vcombine.low %v212_v8, %v276_v35  ;;  %v13738_v60 = vcombine.high %v212_v8, %v276_v35  ;;  %v17569_v16 = vld [vmem:[%s22107_s1 + $0x1ce0] sm:$0xff]   ;;  %v17572_v19 = vld [vmem:[%s22107_s1 + $0x1c58] sm:$0xff]  }
 0x3af   :  { %v11850_v36 = vadd.f32 %v15995_v15, %v21178_v50  ;;  %v17552_v50 = vld [vmem:[%s22107_s1 + $0x1b40] sm:$0xff]   ;;  %v17567_v15 = vld [vmem:[%s22107_s1 + $0x1ca8] sm:$0xff]  }
 0x3b0   :  { %v15997_v9 = vpop.f32.mrf.mxu0  ;;  %v16025_v26 = vpop.f32.mrf.mxu1  ;;  %16326 = vmatpush3.bf16.msra.mxu0 %v17550_v5  ;;  %16354 = vmatpush3.bf16.msra.mxu1 %v17551_v62  ;;  %v17575_v5 = vld [vmem:[%s22107_s1 + $0x1c98] sm:$0xff]  }
 0x3b1   :  { %v21313_v10 = vadd.f32 %v16023_v32, %v11850_v36  ;;  %v15998_v42 = vadd.f32 %v15997_v9, %v15996_v39  ;;  %v16026_v28 = vadd.f32 %v16025_v26, %v16024_v21  ;;  %16327 = vmatprep.subr.bf16.mxu0 %v17552_v50  ;;  %16355 = vmatprep.subr.bf16.mxu1 %v17553_v45  ;;  %v17570_v32 = vld [vmem:[%s22107_s1 + $0x1c20] sm:$0xff]   ;;  %v17573_v36 = vld [vmem:[%s22107_s1 + $0x1cd8] sm:$0xff]   ;;  %v17576_v9 = vld [vmem:[%s22107_s1 + $0x1c50] sm:$0xff]  }
 0x3b2   :  { %v15999_v31 = vpop.f32.mrf.mxu0  ;;  %v16027_v3 = vpop.f32.mrf.mxu1  ;;  %v17571_v39 = vld [vmem:[%s22107_s1 + $0x1ca0] sm:$0xff]   ;;  %v17574_v21 = vld [vmem:[%s22107_s1 + $0x1c18] sm:$0xff]   ;;  %v17577_v26 = vld [vmem:[%s22107_s1 + $0x1cd0] sm:$0xff]  }
 0x3b3   :  { %v11853_v52 = vadd.f32 %v15998_v42, %v21193_v13  ;;  %v147_v13 = vld [vmem:[%s22108_s0 + $0x3b0] sm:$0xff] }
 0x3b4   :  { %v16000_v18 = vpop.f32.mrf.mxu0  ;;  %16328 = vmatpush3.bf16.msra.mxu0 %v17554_v33  ;;  %16356 = vmatpush3.bf16.msra.mxu1 %v17555_v47  ;;  %v13607_v0 = vcombine.low %v83_v12, %v147_v13  ;;  %v13608_v41 = vcombine.high %v83_v12, %v147_v13  ;;  %v16028_v4 = vpop.f32.mrf.mxu1  ;;  %v17578_v50 = vld [vmem:[%s22107_s1 + $0x1c10] sm:$0xff]   ;;  %v17580_v47 = vld [vmem:[%s22107_s1 + $0x1c48] sm:$0xff]  }
 0x3b5   :  { %v21328_v49 = vadd.f32 %v16026_v28, %v11853_v52  ;;  %v16001_v38 = vadd.f32 %v16000_v18, %v15999_v31  ;;  %v16029_v54 = vadd.f32 %v16028_v4, %v16027_v3  ;;  %16369 = vmatprep.subr.bf16.mxu0 %v17556_v30  ;;  %16397 = vmatprep.subr.bf16.mxu1 %v17557_v22  ;;  %v17579_v52 = vld [vmem:[%s22107_s1 + $0x1c90] sm:$0xff]   ;;  %v17581_v13 = vld [vmem:[%s22107_s1 + $0x1cc8] sm:$0xff]   ;;  %v17586_v22 = vld [vmem:[%s22107_s1 + $0x1c00] sm:$0xff]  }
 0x3b6   :  { %v16002_v43 = vpop.f32.mrf.mxu0  ;;  %12435 = vmatprep.mubr.bf16.mxu0 %v13608_v41  ;;  %v16030_v56 = vpop.f32.mrf.mxu1  ;;  %v17587_v4 = vld [vmem:[%s22107_s1 + $0x1c80] sm:$0xff]  }
 0x3b7   :  { %v11858_v25 = vadd.f32 %v16001_v38, %v21226_v40  ;;  %12436 = vmatmul.mubr.bf16.vlgmr.msra.gmra.mxu0 %v13607_v0  ;;  %12485 = vmatmul.mubr.bf16.vlgmr.msra.gmra.mxu1 %v13609_v46  ;;  %v17559_v40 = vld [vmem:[%s22107_s1 + $0x1cb8] sm:$0xff]   ;;  %v17582_v38 = vld [vmem:[%s22107_s1 + $0x1c08] sm:$0xff]  }
 0x3b8   :  { %v16003_v51 = vpop.f32.mrf.mxu0  ;;  %16370 = vmatpush3.bf16.msra.mxu0 %v17558_v27  ;;  %16398 = vmatpush3.bf16.msra.mxu1 %v17559_v40  ;;  %v16031_v37 = vpop.f32.mrf.mxu1  ;;  %v150_v40 = vld [vmem:[%s22108_s0 + $0x3c8] sm:$0xff] }
 0x3b9   :  { %v16004_v7 = vadd.f32 %v16003_v51, %v16002_v43  ;;  %v21358_v23 = vadd.f32 %v16029_v54, %v11858_v25  ;;  %16371 = vmatprep.subr.bf16.mxu0 %v17560_v59  ;;  %v16032_v17 = vadd.f32 %v16031_v37, %v16030_v56  ;;  %16399 = vmatprep.subr.bf16.mxu1 %v17561_v58  ;;  %v85_v51 = vld [vmem:[%s22108_s0 + $0x1c0] sm:$0xff] }
 0x3ba   :  { %12492 = vmatprep.mubr.bf16.mxu1 %v13738_v60  ;;  %v17593_v60 = vld [vmem:[%s22107_s1 + $0x1df0] sm:$0xff]  }
 0x3bb   :  { %v11861_v11 = vadd.f32 %v16004_v7, %v21244_v44  ;;  %v211_v44 = vld [vmem:[%s22108_s0 + $0x5b0] sm:$0xff]  ;;  %v86_v7 = vld [vmem:[%s22108_s0 + $0x1c8] sm:$0xff] }
 0x3bc   :  { %16372 = vmatpush3.bf16.msra.mxu0 %v17562_v34  ;;  %v13735_v63 = vcombine.low %v211_v44, %v275_v2  ;;  %v13736_v20 = vcombine.high %v211_v44, %v275_v2  ;;  %16400 = vmatpush3.bf16.msra.mxu1 %v17563_v1  ;;  %v13613_v58 = vcombine.low %v86_v7, %v150_v40  ;;  %v17588_v34 = vld [vmem:[%s22107_s1 + $0x1d78] sm:$0xff]  }
 0x3bd   :  { %v21379_v6 = vadd.f32 %v16032_v17, %v11861_v11  ;;  %16373 = vmatprep.subr.bf16.mxu0 %v17564_v53  ;;  %16401 = vmatprep.subr.bf16.mxu1 %v17565_v24  ;;  %v13614_v37 = vcombine.high %v86_v7, %v150_v40  ;;  %v17589_v44 = vld [vmem:[%s22107_s1 + $0x1df8] sm:$0xff]   ;;  %v17613_v7 = vld [vmem:[%s22107_s1 + $0x1dc8] sm:$0xff]  }
 0x3be   :  { %12443 = vmatprep.mubr.bf16.mxu0 %v13736_v20  ;;  %v17591_v24 = vld [vmem:[%s22107_s1 + $0x1db8] sm:$0xff]  }
 0x3bf   :  { %12444 = vmatmul.mubr.bf16.gmra.mxu0 %v13735_v63  ;;  %12493 = vmatmul.mubr.bf16.gmra.mxu1 %v13737_v48  ;;  %v17590_v63 = vld [vmem:[%s22107_s1 + $0x1d38] sm:$0xff]  }
 0x3c0   :  { %16374 = vmatpush3.bf16.msra.mxu0 %v17566_v29  ;;  %16402 = vmatpush3.bf16.msra.mxu1 %v17567_v15 }
 0x3c1   :  { %16375 = vmatprep.subr.bf16.mxu0 %v17568_v14  ;;  %16403 = vmatprep.subr.bf16.mxu1 %v17569_v16  ;;  %v17594_v14 = vld [vmem:[%s22107_s1 + $0x1d30] sm:$0xff]  }
 0x3c2   :  { %12582 = vmatprep.mubr.bf16.mxu1 %v13614_v37 }
 0x3c4   :  { %16376 = vmatpush3.bf16.msra.mxu0 %v17570_v32  ;;  %16404 = vmatpush3.bf16.msra.mxu1 %v17571_v39  ;;  %v17595_v32 = vld [vmem:[%s22107_s1 + $0x1db0] sm:$0xff]  }
 0x3c5   :  { %16377 = vmatprep.subr.bf16.mxu0 %v17572_v19  ;;  %16405 = vmatprep.subr.bf16.mxu1 %v17573_v36  ;;  %v213_v19 = vld [vmem:[%s22108_s0 + $0x5c0] sm:$0xff] }
 0x3c8   :  { %16378 = vmatpush3.bf16.msra.mxu0 %v17574_v21  ;;  %16406 = vmatpush3.bf16.msra.mxu1 %v17575_v5  ;;  %v17596_v5 = vld [vmem:[%s22107_s1 + $0x1d68] sm:$0xff]  }
 0x3c9   :  { %16379 = vmatprep.subr.bf16.mxu0 %v17576_v9  ;;  %16407 = vmatprep.subr.bf16.mxu1 %v17577_v26  ;;  %v278_v26 = vld [vmem:[%s22108_s0 + $0x7c8] sm:$0xff] }
 0x3ca   :  { %v16049_v62 = vpop.f32.mrf.mxu0  ;;  %v16077_v42 = vpop.f32.mrf.mxu1 }
 0x3cc   :  { %v16050_v28 = vpop.f32.mrf.mxu0  ;;  %v16078_v45 = vpop.f32.mrf.mxu1  ;;  %16380 = vmatpush3.bf16.msra.mxu0 %v17578_v50  ;;  %16408 = vmatpush3.bf16.msra.mxu1 %v17579_v52  ;;  %v17599_v52 = vld [vmem:[%s22107_s1 + $0x1da8] sm:$0xff]  }
 0x3cd   :  { %v16051_v31 = vadd.f32 %v16050_v28, %v16049_v62  ;;  %v16079_v33 = vadd.f32 %v16078_v45, %v16077_v42  ;;  %16381 = vmatprep.subr.bf16.mxu0 %v17580_v47  ;;  %16409 = vmatprep.subr.bf16.mxu1 %v17581_v13  ;;  %v17597_v62 = vld [vmem:[%s22107_s1 + $0x1de8] sm:$0xff]   ;;  %v17602_v47 = vld [vmem:[%s22107_s1 + $0x1d20] sm:$0xff]   ;;  %v17605_v13 = vld [vmem:[%s22107_s1 + $0x1dd8] sm:$0xff]  }
 0x3ce   :  { %v16052_v18 = vpop.f32.mrf.mxu0  ;;  %v16080_v12 = vpop.f32.mrf.mxu1  ;;  %v214_v42 = vld [vmem:[%s22108_s0 + $0x5c8] sm:$0xff] }
 0x3cf   :  { %v11948_v55 = vadd.f32 %v16051_v31, %v21313_v10  ;;  %v17584_v10 = vld [vmem:[%s22107_s1 + $0x1c40] sm:$0xff]   ;;  %v13741_v50 = vcombine.low %v214_v42, %v278_v26  ;;  %v13742_v28 = vcombine.high %v214_v42, %v278_v26  ;;  %v17598_v45 = vld [vmem:[%s22107_s1 + $0x1d28] sm:$0xff]   ;;  %v17623_v42 = vld [vmem:[%s22107_s1 + $0x1eb8] sm:$0xff]  }
 0x3d0   :  { %v16053_v0 = vpop.f32.mrf.mxu0  ;;  %v16081_v41 = vpop.f32.mrf.mxu1  ;;  %16382 = vmatpush3.bf16.msra.mxu0 %v17582_v38  ;;  %16410 = vmatpush3.bf16.msra.mxu1 %v17583_v57  ;;  %v17600_v31 = vld [vmem:[%s22107_s1 + $0x1d60] sm:$0xff]   ;;  %v17607_v38 = vld [vmem:[%s22107_s1 + $0x1d98] sm:$0xff]  }
 0x3d1   :  { %v21445_v3 = vadd.f32 %v16079_v33, %v11948_v55  ;;  %v16054_v43 = vadd.f32 %v16053_v0, %v16052_v18  ;;  %v16082_v46 = vadd.f32 %v16081_v41, %v16080_v12  ;;  %16383 = vmatprep.subr.bf16.mxu0 %v17584_v10  ;;  %16411 = vmatprep.subr.bf16.mxu1 %v17585_v61  ;;  %v17601_v33 = vld [vmem:[%s22107_s1 + $0x1de0] sm:$0xff]   ;;  %v17604_v12 = vld [vmem:[%s22107_s1 + $0x1d58] sm:$0xff]   ;;  %v17608_v41 = vld [vmem:[%s22107_s1 + $0x1d50] sm:$0xff]  }
 0x3d2   :  { %v16055_v25 = vpop.f32.mrf.mxu0  ;;  %v16083_v17 = vpop.f32.mrf.mxu1  ;;  %v17603_v18 = vld [vmem:[%s22107_s1 + $0x1da0] sm:$0xff]   ;;  %v17606_v55 = vld [vmem:[%s22107_s1 + $0x1d18] sm:$0xff]   ;;  %v17610_v10 = vld [vmem:[%s22107_s1 + $0x1d10] sm:$0xff]  }
 0x3d3   :  { %v11951_v30 = vadd.f32 %v16054_v43, %v21328_v49  ;;  %v149_v49 = vld [vmem:[%s22108_s0 + $0x3c0] sm:$0xff]  ;;  %v17609_v43 = vld [vmem:[%s22107_s1 + $0x1dd0] sm:$0xff]  }
 0x3d4   :  { %v16056_v54 = vpop.f32.mrf.mxu0  ;;  %16384 = vmatpush3.bf16.msra.mxu0 %v17586_v22  ;;  %16412 = vmatpush3.bf16.msra.mxu1 %v17587_v4  ;;  %v13611_v59 = vcombine.low %v85_v51, %v149_v49  ;;  %v13612_v11 = vcombine.high %v85_v51, %v149_v49  ;;  %v16084_v20 = vpop.f32.mrf.mxu1  ;;  %v17612_v51 = vld [vmem:[%s22107_s1 + $0x1d48] sm:$0xff]  }
 0x3d5   :  { %v21463_v27 = vadd.f32 %v16082_v46, %v11951_v30  ;;  %v16057_v56 = vadd.f32 %v16056_v54, %v16055_v25  ;;  %v16085_v8 = vadd.f32 %v16084_v20, %v16083_v17  ;;  %16425 = vmatprep.subr.bf16.mxu0 %v17588_v34  ;;  %16453 = vmatprep.subr.bf16.mxu1 %v17589_v44  ;;  %v17611_v25 = vld [vmem:[%s22107_s1 + $0x1d90] sm:$0xff]   ;;  %v17616_v34 = vld [vmem:[%s22107_s1 + $0x1d40] sm:$0xff]  }
 0x3d6   :  { %v16058_v1 = vpop.f32.mrf.mxu0  ;;  %12533 = vmatprep.mubr.bf16.mxu0 %v13612_v11  ;;  %v16086_v48 = vpop.f32.mrf.mxu1  ;;  %v17619_v20 = vld [vmem:[%s22107_s1 + $0x1d80] sm:$0xff]  }
 0x3d7   :  { %v11956_v2 = vadd.f32 %v16057_v56, %v21358_v23  ;;  %12534 = vmatmul.mubr.bf16.vlgmr.msra.gmra.mxu0 %v13611_v59  ;;  %12583 = vmatmul.mubr.bf16.vlgmr.msra.gmra.mxu1 %v13613_v58  ;;  %v17592_v23 = vld [vmem:[%s22107_s1 + $0x1d70] sm:$0xff]   ;;  %v17614_v56 = vld [vmem:[%s22107_s1 + $0x1d08] sm:$0xff]  }
 0x3d8   :  { %v16059_v53 = vpop.f32.mrf.mxu0  ;;  %16426 = vmatpush3.bf16.msra.mxu0 %v17590_v63  ;;  %16454 = vmatpush3.bf16.msra.mxu1 %v17591_v24  ;;  %v16087_v16 = vpop.f32.mrf.mxu1 }
 0x3d9   :  { %v16060_v35 = vadd.f32 %v16059_v53, %v16058_v1  ;;  %v21493_v29 = vadd.f32 %v16085_v8, %v11956_v2  ;;  %16427 = vmatprep.subr.bf16.mxu0 %v17592_v23  ;;  %16455 = vmatprep.subr.bf16.mxu1 %v17593_v60  ;;  %v16088_v39 = vadd.f32 %v16087_v16, %v16086_v48  ;;  %v17617_v1 = vld [vmem:[%s22107_s1 + $0x1dc0] sm:$0xff]   ;;  %v151_v53 = vld [vmem:[%s22108_s0 + $0x3d0] sm:$0xff]  ;;  %v88_v23 = vld [vmem:[%s22108_s0 + $0x1d8] sm:$0xff] }
 0x3da   :  { %12590 = vmatprep.mubr.bf16.mxu1 %v13742_v28  ;;  %v17618_v2 = vld [vmem:[%s22107_s1 + $0x1d00] sm:$0xff]   ;;  %v152_v48 = vld [vmem:[%s22108_s0 + $0x3d8] sm:$0xff] }
 0x3db   :  { %v11959_v15 = vadd.f32 %v16060_v35, %v21379_v6  ;;  %v277_v6 = vld [vmem:[%s22108_s0 + $0x7c0] sm:$0xff]  ;;  %v13618_v16 = vcombine.high %v88_v23, %v152_v48 }
 0x3dc   :  { %16428 = vmatpush3.bf16.msra.mxu0 %v17594_v14  ;;  %16456 = vmatpush3.bf16.msra.mxu1 %v17595_v32  ;;  %v13739_v36 = vcombine.low %v213_v19, %v277_v6  ;;  %v13740_v21 = vcombine.high %v213_v19, %v277_v6  ;;  %v13617_v14 = vcombine.low %v88_v23, %v152_v48  ;;  %v17620_v32 = vld [vmem:[%s22107_s1 + $0x1e78] sm:$0xff]   ;;  %v17647_v48 = vld [vmem:[%s22107_s1 + $0x1e88] sm:$0xff]  }
 0x3dd   :  { %v21511_v9 = vadd.f32 %v16088_v39, %v11959_v15  ;;  %16429 = vmatprep.subr.bf16.mxu0 %v17596_v5  ;;  %16457 = vmatprep.subr.bf16.mxu1 %v17597_v62  ;;  %v17621_v19 = vld [vmem:[%s22107_s1 + $0x1ef8] sm:$0xff]  }
 0x3de   :  { %12541 = vmatprep.mubr.bf16.mxu0 %v13740_v21  ;;  %v17622_v21 = vld [vmem:[%s22107_s1 + $0x1e38] sm:$0xff]  }
 0x3df   :  { %12542 = vmatmul.mubr.bf16.gmra.mxu0 %v13739_v36  ;;  %12591 = vmatmul.mubr.bf16.gmra.mxu1 %v13741_v50 }
 0x3e0   :  { %16430 = vmatpush3.bf16.msra.mxu0 %v17598_v45  ;;  %16458 = vmatpush3.bf16.msra.mxu1 %v17599_v52  ;;  %v17625_v45 = vld [vmem:[%s22107_s1 + $0x1ef0] sm:$0xff]  }
 0x3e1   :  { %16431 = vmatprep.subr.bf16.mxu0 %v17600_v31  ;;  %16459 = vmatprep.subr.bf16.mxu1 %v17601_v33  ;;  %v17626_v33 = vld [vmem:[%s22107_s1 + $0x1e30] sm:$0xff]  }
 0x3e2   :  { %12680 = vmatprep.mubr.bf16.mxu1 %v13618_v16 }
 0x3e4   :  { %16432 = vmatpush3.bf16.msra.mxu0 %v17602_v47  ;;  %16460 = vmatpush3.bf16.msra.mxu1 %v17603_v18  ;;  %v17627_v18 = vld [vmem:[%s22107_s1 + $0x1eb0] sm:$0xff]  }
 0x3e5   :  { %16433 = vmatprep.subr.bf16.mxu0 %v17604_v12  ;;  %16461 = vmatprep.subr.bf16.mxu1 %v17605_v13  ;;  %v215_v12 = vld [vmem:[%s22108_s0 + $0x5d0] sm:$0xff] }
 0x3e8   :  { %16434 = vmatpush3.bf16.msra.mxu0 %v17606_v55  ;;  %16462 = vmatpush3.bf16.msra.mxu1 %v17607_v38 }
 0x3e9   :  { %16435 = vmatprep.subr.bf16.mxu0 %v17608_v41  ;;  %16463 = vmatprep.subr.bf16.mxu1 %v17609_v43  ;;  %v17629_v41 = vld [vmem:[%s22107_s1 + $0x1ee8] sm:$0xff]   ;;  %v280_v43 = vld [vmem:[%s22108_s0 + $0x7d8] sm:$0xff] }
 0x3ea   :  { %v16105_v0 = vpop.f32.mrf.mxu0  ;;  %v16133_v57 = vpop.f32.mrf.mxu1 }
 0x3ec   :  { %v16106_v46 = vpop.f32.mrf.mxu0  ;;  %v16134_v30 = vpop.f32.mrf.mxu1  ;;  %16436 = vmatpush3.bf16.msra.mxu0 %v17610_v10  ;;  %16464 = vmatpush3.bf16.msra.mxu1 %v17611_v25  ;;  %v17632_v25 = vld [vmem:[%s22107_s1 + $0x1e60] sm:$0xff]  }
 0x3ed   :  { %v16107_v61 = vadd.f32 %v16106_v46, %v16105_v0  ;;  %v16135_v22 = vadd.f32 %v16134_v30, %v16133_v57  ;;  %16437 = vmatprep.subr.bf16.mxu0 %v17612_v51  ;;  %16465 = vmatprep.subr.bf16.mxu1 %v17613_v7  ;;  %v17628_v0 = vld [vmem:[%s22107_s1 + $0x1e68] sm:$0xff]   ;;  %v216_v57 = vld [vmem:[%s22108_s0 + $0x5d8] sm:$0xff]  ;;  %v17635_v51 = vld [vmem:[%s22107_s1 + $0x1ea0] sm:$0xff]  }
 0x3ee   :  { %v16108_v4 = vpop.f32.mrf.mxu0  ;;  %v16136_v49 = vpop.f32.mrf.mxu1  ;;  %v13745_v46 = vcombine.low %v216_v57, %v280_v43  ;;  %v13746_v10 = vcombine.high %v216_v57, %v280_v43  ;;  %v17631_v30 = vld [vmem:[%s22107_s1 + $0x1ea8] sm:$0xff]   ;;  %v17638_v7 = vld [vmem:[%s22107_s1 + $0x1e18] sm:$0xff]  }
 0x3ef   :  { %v12046_v54 = vadd.f32 %v16107_v61, %v21445_v3  ;;  %v17615_v3 = vld [vmem:[%s22107_s1 + $0x1d88] sm:$0xff]  }
 0x3f0   :  { %v16109_v40 = vpop.f32.mrf.mxu0  ;;  %v16137_v58 = vpop.f32.mrf.mxu1  ;;  %16438 = vmatpush3.bf16.msra.mxu0 %v17614_v56  ;;  %16466 = vmatpush3.bf16.msra.mxu1 %v17615_v3  ;;  %v17630_v61 = vld [vmem:[%s22107_s1 + $0x1e28] sm:$0xff]   ;;  %v17640_v56 = vld [vmem:[%s22107_s1 + $0x1e50] sm:$0xff]  }
 0x3f1   :  { %v21574_v59 = vadd.f32 %v16135_v22, %v12046_v54  ;;  %v16110_v11 = vadd.f32 %v16109_v40, %v16108_v4  ;;  %v16138_v37 = vadd.f32 %v16137_v58, %v16136_v49  ;;  %16439 = vmatprep.subr.bf16.mxu0 %v17616_v34  ;;  %16467 = vmatprep.subr.bf16.mxu1 %v17617_v1  ;;  %v17633_v22 = vld [vmem:[%s22107_s1 + $0x1ee0] sm:$0xff]   ;;  %v17636_v54 = vld [vmem:[%s22107_s1 + $0x1e58] sm:$0xff]   ;;  %v17641_v58 = vld [vmem:[%s22107_s1 + $0x1ed0] sm:$0xff]  }
 0x3f2   :  { %v16111_v44 = vpop.f32.mrf.mxu0  ;;  %v16139_v15 = vpop.f32.mrf.mxu1  ;;  %v17634_v4 = vld [vmem:[%s22107_s1 + $0x1e20] sm:$0xff]   ;;  %v17637_v49 = vld [vmem:[%s22107_s1 + $0x1ed8] sm:$0xff]  }
 0x3f3   :  { %v12049_v17 = vadd.f32 %v16110_v11, %v21463_v27  ;;  %v87_v27 = vld [vmem:[%s22108_s0 + $0x1d0] sm:$0xff]  ;;  %v17639_v40 = vld [vmem:[%s22107_s1 + $0x1e98] sm:$0xff]  }
 0x3f4   :  { %v16112_v24 = vpop.f32.mrf.mxu0  ;;  %16440 = vmatpush3.bf16.msra.mxu0 %v17618_v2  ;;  %v13615_v8 = vcombine.low %v87_v27, %v151_v53  ;;  %v13616_v35 = vcombine.high %v87_v27, %v151_v53  ;;  %16468 = vmatpush3.bf16.msra.mxu1 %v17619_v20  ;;  %v16140_v36 = vpop.f32.mrf.mxu1  ;;  %v17644_v2 = vld [vmem:[%s22107_s1 + $0x1e48] sm:$0xff]  }
 0x3f5   :  { %v21589_v63 = vadd.f32 %v16138_v37, %v12049_v17  ;;  %v16113_v60 = vadd.f32 %v16112_v24, %v16111_v44  ;;  %v16141_v5 = vadd.f32 %v16140_v36, %v16139_v15  ;;  %16481 = vmatprep.subr.bf16.mxu0 %v17620_v32  ;;  %16509 = vmatprep.subr.bf16.mxu1 %v17621_v19  ;;  %v17642_v37 = vld [vmem:[%s22107_s1 + $0x1e10] sm:$0xff]   ;;  %v17645_v53 = vld [vmem:[%s22107_s1 + $0x1ec8] sm:$0xff]   ;;  %v17649_v32 = vld [vmem:[%s22107_s1 + $0x1ec0] sm:$0xff]  }
 0x3f6   :  { %v16114_v39 = vpop.f32.mrf.mxu0  ;;  %12631 = vmatprep.mubr.bf16.mxu0 %v13616_v35  ;;  %v16142_v50 = vpop.f32.mrf.mxu1  ;;  %v17643_v17 = vld [vmem:[%s22107_s1 + $0x1e90] sm:$0xff]   ;;  %v17646_v35 = vld [vmem:[%s22107_s1 + $0x1e08] sm:$0xff]   ;;  %v17651_v36 = vld [vmem:[%s22107_s1 + $0x1e80] sm:$0xff]  }
 0x3f7   :  { %v12054_v6 = vadd.f32 %v16113_v60, %v21493_v29  ;;  %12632 = vmatmul.mubr.bf16.vlgmr.msra.gmra.mxu0 %v13615_v8  ;;  %12681 = vmatmul.mubr.bf16.vlgmr.msra.gmra.mxu1 %v13617_v14  ;;  %v17624_v29 = vld [vmem:[%s22107_s1 + $0x1e70] sm:$0xff]  }
 0x3f8   :  { %v16115_v62 = vpop.f32.mrf.mxu0  ;;  %16482 = vmatpush3.bf16.msra.mxu0 %v17622_v21  ;;  %16510 = vmatpush3.bf16.msra.mxu1 %v17623_v42  ;;  %v16143_v31 = vpop.f32.mrf.mxu1  ;;  %v90_v42 = vld [vmem:[%s22108_s0 + $0x1e8] sm:$0xff] }
 0x3f9   :  { %v16116_v26 = vadd.f32 %v16115_v62, %v16114_v39  ;;  %v21622_v28 = vadd.f32 %v16141_v5, %v12054_v6  ;;  %16483 = vmatprep.subr.bf16.mxu0 %v17624_v29  ;;  %v16144_v47 = vadd.f32 %v16143_v31, %v16142_v50  ;;  %16511 = vmatprep.subr.bf16.mxu1 %v17625_v45  ;;  %v17650_v6 = vld [vmem:[%s22107_s1 + $0x1e00] sm:$0xff]   ;;  %v154_v45 = vld [vmem:[%s22108_s0 + $0x3e8] sm:$0xff] }
 0x3fa   :  { %12688 = vmatprep.mubr.bf16.mxu1 %v13746_v10  ;;  %v89_v62 = vld [vmem:[%s22108_s0 + $0x1e0] sm:$0xff] }
 0x3fb   :  { %v12057_v52 = vadd.f32 %v16116_v26, %v21511_v9  ;;  %v279_v9 = vld [vmem:[%s22108_s0 + $0x7d0] sm:$0xff] }
 0x3fc   :  { %16484 = vmatpush3.bf16.msra.mxu0 %v17626_v33  ;;  %16512 = vmatpush3.bf16.msra.mxu1 %v17627_v18  ;;  %v13743_v55 = vcombine.low %v215_v12, %v279_v9  ;;  %v13744_v38 = vcombine.high %v215_v12, %v279_v9  ;;  %v13621_v33 = vcombine.low %v90_v42, %v154_v45  ;;  %v17652_v18 = vld [vmem:[%s22107_s1 + $0x1f78] sm:$0xff]  }
 0x3fd   :  { %v21640_v13 = vadd.f32 %v16144_v47, %v12057_v52  ;;  %16485 = vmatprep.subr.bf16.mxu0 %v17628_v0  ;;  %16513 = vmatprep.subr.bf16.mxu1 %v17629_v41  ;;  %v13622_v47 = vcombine.high %v90_v42, %v154_v45  ;;  %v17653_v9 = vld [vmem:[%s22107_s1 + $0x1ff8] sm:$0xff]   ;;  %v17679_v45 = vld [vmem:[%s22107_s1 + $0x1f88] sm:$0xff]  }
 0x3fe   :  { %12639 = vmatprep.mubr.bf16.mxu0 %v13744_v38  ;;  %v17654_v0 = vld [vmem:[%s22107_s1 + $0x1f38] sm:$0xff]  }
 0x3ff   :  { %12640 = vmatmul.mubr.bf16.gmra.mxu0 %v13743_v55  ;;  %12689 = vmatmul.mubr.bf16.gmra.mxu1 %v13745_v46  ;;  %v17656_v46 = vld [vmem:[%s22107_s1 + $0x1f70] sm:$0xff]  }
 0x400   :  { %16486 = vmatpush3.bf16.msra.mxu0 %v17630_v61  ;;  %16514 = vmatpush3.bf16.msra.mxu1 %v17631_v30  ;;  %v17657_v30 = vld [vmem:[%s22107_s1 + $0x1ff0] sm:$0xff]  }
 0x401   :  { %16487 = vmatprep.subr.bf16.mxu0 %v17632_v25  ;;  %16515 = vmatprep.subr.bf16.mxu1 %v17633_v22  ;;  %v17658_v22 = vld [vmem:[%s22107_s1 + $0x1f30] sm:$0xff]  }
 0x402   :  { %12778 = vmatprep.mubr.bf16.mxu1 %v13622_v47  ;;  %v17681_v47 = vld [vmem:[%s22107_s1 + $0x1fc0] sm:$0xff]  }
 0x404   :  { %16488 = vmatpush3.bf16.msra.mxu0 %v17634_v4  ;;  %16516 = vmatpush3.bf16.msra.mxu1 %v17635_v51  ;;  %v17659_v51 = vld [vmem:[%s22107_s1 + $0x1fb0] sm:$0xff]  }
 0x405   :  { %16489 = vmatprep.subr.bf16.mxu0 %v17636_v54  ;;  %16517 = vmatprep.subr.bf16.mxu1 %v17637_v49  ;;  %v281_v54 = vld [vmem:[%s22108_s0 + $0x7e0] sm:$0xff] }
 0x408   :  { %16490 = vmatpush3.bf16.msra.mxu0 %v17638_v7  ;;  %16518 = vmatpush3.bf16.msra.mxu1 %v17639_v40  ;;  %v17660_v40 = vld [vmem:[%s22107_s1 + $0x1f68] sm:$0xff]  }
 0x409   :  { %16491 = vmatprep.subr.bf16.mxu0 %v17640_v56  ;;  %16519 = vmatprep.subr.bf16.mxu1 %v17641_v58  ;;  %v218_v58 = vld [vmem:[%s22108_s0 + $0x5e8] sm:$0xff] }
 0x40a   :  { %v16161_v11 = vpop.f32.mrf.mxu0  ;;  %v16189_v3 = vpop.f32.mrf.mxu1 }
 0x40c   :  { %v16162_v34 = vpop.f32.mrf.mxu0  ;;  %v16190_v44 = vpop.f32.mrf.mxu1  ;;  %16492 = vmatpush3.bf16.msra.mxu0 %v17642_v37  ;;  %16520 = vmatpush3.bf16.msra.mxu1 %v17643_v17  ;;  %v17662_v17 = vld [vmem:[%s22107_s1 + $0x1f28] sm:$0xff]  }
 0x40d   :  { %v16163_v1 = vadd.f32 %v16162_v34, %v16161_v11  ;;  %v16191_v20 = vadd.f32 %v16190_v44, %v16189_v3  ;;  %16493 = vmatprep.subr.bf16.mxu0 %v17644_v2  ;;  %16521 = vmatprep.subr.bf16.mxu1 %v17645_v53  ;;  %v17661_v11 = vld [vmem:[%s22107_s1 + $0x1fe8] sm:$0xff]   ;;  %v17664_v44 = vld [vmem:[%s22107_s1 + $0x1f60] sm:$0xff]   ;;  %v17668_v53 = vld [vmem:[%s22107_s1 + $0x1f58] sm:$0xff]  }
 0x40e   :  { %v16164_v27 = vpop.f32.mrf.mxu0  ;;  %v16192_v8 = vpop.f32.mrf.mxu1  ;;  %v282_v3 = vld [vmem:[%s22108_s0 + $0x7e8] sm:$0xff]  ;;  %v17665_v2 = vld [vmem:[%s22107_s1 + $0x1fe0] sm:$0xff]  }
 0x40f   :  { %v12144_v24 = vadd.f32 %v16163_v1, %v21574_v59  ;;  %v17648_v59 = vld [vmem:[%s22107_s1 + $0x1e40] sm:$0xff]   ;;  %v13749_v37 = vcombine.low %v218_v58, %v282_v3  ;;  %v13750_v34 = vcombine.high %v218_v58, %v282_v3  ;;  %v17663_v1 = vld [vmem:[%s22107_s1 + $0x1fa8] sm:$0xff]  }
 0x410   :  { %v16165_v23 = vpop.f32.mrf.mxu0  ;;  %v16193_v14 = vpop.f32.mrf.mxu1  ;;  %16494 = vmatpush3.bf16.msra.mxu0 %v17646_v35  ;;  %16522 = vmatpush3.bf16.msra.mxu1 %v17647_v48  ;;  %v17671_v35 = vld [vmem:[%s22107_s1 + $0x1f98] sm:$0xff]  }
 0x411   :  { %v21709_v60 = vadd.f32 %v16191_v20, %v12144_v24  ;;  %v16166_v15 = vadd.f32 %v16165_v23, %v16164_v27  ;;  %v16194_v16 = vadd.f32 %v16193_v14, %v16192_v8  ;;  %16495 = vmatprep.subr.bf16.mxu0 %v17648_v59  ;;  %16523 = vmatprep.subr.bf16.mxu1 %v17649_v32  ;;  %v17666_v20 = vld [vmem:[%s22107_s1 + $0x1f20] sm:$0xff]   ;;  %v17669_v24 = vld [vmem:[%s22107_s1 + $0x1fd8] sm:$0xff]   ;;  %v17672_v23 = vld [vmem:[%s22107_s1 + $0x1f50] sm:$0xff]  }
 0x412   :  { %v16167_v19 = vpop.f32.mrf.mxu0  ;;  %v16195_v52 = vpop.f32.mrf.mxu1  ;;  %v17667_v27 = vld [vmem:[%s22107_s1 + $0x1fa0] sm:$0xff]   ;;  %v17670_v8 = vld [vmem:[%s22107_s1 + $0x1f18] sm:$0xff]   ;;  %v17673_v14 = vld [vmem:[%s22107_s1 + $0x1fd0] sm:$0xff]  }
 0x413   :  { %v12147_v39 = vadd.f32 %v16166_v15, %v21589_v63  ;;  %v153_v63 = vld [vmem:[%s22108_s0 + $0x3e0] sm:$0xff]  ;;  %v17674_v59 = vld [vmem:[%s22107_s1 + $0x1f10] sm:$0xff]  }
 0x414   :  { %v16168_v5 = vpop.f32.mrf.mxu0  ;;  %16496 = vmatpush3.bf16.msra.mxu0 %v17650_v6  ;;  %16524 = vmatpush3.bf16.msra.mxu1 %v17651_v36  ;;  %v13619_v50 = vcombine.low %v89_v62, %v153_v63  ;;  %v13620_v29 = vcombine.high %v89_v62, %v153_v63  ;;  %v16196_v55 = vpop.f32.mrf.mxu1  ;;  %v17676_v36 = vld [vmem:[%s22107_s1 + $0x1f48] sm:$0xff]  }
 0x415   :  { %v21724_v21 = vadd.f32 %v16194_v16, %v12147_v39  ;;  %v16169_v26 = vadd.f32 %v16168_v5, %v16167_v19  ;;  %v16197_v41 = vadd.f32 %v16196_v55, %v16195_v52  ;;  %16537 = vmatprep.subr.bf16.mxu0 %v17652_v18  ;;  %16565 = vmatprep.subr.bf16.mxu1 %v17653_v9  ;;  %v17675_v39 = vld [vmem:[%s22107_s1 + $0x1f90] sm:$0xff]   ;;  %v17677_v63 = vld [vmem:[%s22107_s1 + $0x1fc8] sm:$0xff]   ;;  %v17682_v9 = vld [vmem:[%s22107_s1 + $0x1f00] sm:$0xff]  }
 0x416   :  { %v16170_v31 = vpop.f32.mrf.mxu0  ;;  %12729 = vmatprep.mubr.bf16.mxu0 %v13620_v29  ;;  %v16198_v43 = vpop.f32.mrf.mxu1  ;;  %v17683_v55 = vld [vmem:[%s22107_s1 + $0x1f80] sm:$0xff]  }
 0x417   :  { %v12152_v12 = vadd.f32 %v16169_v26, %v21622_v28  ;;  %12730 = vmatmul.mubr.bf16.vlgmr.msra.gmra.mxu0 %v13619_v50  ;;  %12779 = vmatmul.mubr.bf16.vlgmr.msra.gmra.mxu1 %v13621_v33  ;;  %v17655_v28 = vld [vmem:[%s22107_s1 + $0x1fb8] sm:$0xff]   ;;  %v17678_v26 = vld [vmem:[%s22107_s1 + $0x1f08] sm:$0xff]  }
 0x418   :  { %v16171_v38 = vpop.f32.mrf.mxu0  ;;  %16538 = vmatpush3.bf16.msra.mxu0 %v17654_v0  ;;  %16566 = vmatpush3.bf16.msra.mxu1 %v17655_v28  ;;  %v16199_v25 = vpop.f32.mrf.mxu1  ;;  %v156_v28 = vld [vmem:[%s22108_s0 + $0x3f8] sm:$0xff] }
 0x419   :  { %v16172_v57 = vadd.f32 %v16171_v38, %v16170_v31  ;;  %v21754_v10 = vadd.f32 %v16197_v41, %v12152_v12  ;;  %16539 = vmatprep.subr.bf16.mxu0 %v17656_v46  ;;  %v16200_v4 = vadd.f32 %v16199_v25, %v16198_v43  ;;  %16567 = vmatprep.subr.bf16.mxu1 %v17657_v30  ;;  %v91_v38 = vld [vmem:[%s22108_s0 + $0x1f0] sm:$0xff] }
 0x41a   :  { %12786 = vmatprep.mubr.bf16.mxu1 %v13750_v34 }
 0x41b   :  { %v12155_v61 = vadd.f32 %v16172_v57, %v21640_v13  ;;  %v217_v13 = vld [vmem:[%s22108_s0 + $0x5e0] sm:$0xff]  ;;  %v92_v57 = vld [vmem:[%s22108_s0 + $0x1f8] sm:$0xff] }
 0x41c   :  { %16540 = vmatpush3.bf16.msra.mxu0 %v17658_v22  ;;  %v13747_v49 = vcombine.low %v217_v13, %v281_v54  ;;  %v13748_v7 = vcombine.high %v217_v13, %v281_v54  ;;  %16568 = vmatpush3.bf16.msra.mxu1 %v17659_v51  ;;  %v13625_v30 = vcombine.low %v92_v57, %v156_v28  ;;  %v219_v22 = vld [vmem:[%s22108_s0 + $0x5f0] sm:$0xff]  ;;  %v220_v51 = vld [vmem:[%s22108_s0 + $0x5f8] sm:$0xff] }
 0x41d   :  { %v21775_v56 = vadd.f32 %v16200_v4, %v12155_v61  ;;  %16541 = vmatprep.subr.bf16.mxu0 %v17660_v40  ;;  %16569 = vmatprep.subr.bf16.mxu1 %v17661_v11  ;;  %v13626_v25 = vcombine.high %v92_v57, %v156_v28  ;;  %v283_v4 = vld [vmem:[%s22108_s0 + $0x7f0] sm:$0xff] }
 0x41e   :  { %12737 = vmatprep.mubr.bf16.mxu0 %v13748_v7  ;;  %v284_v7 = vld [vmem:[%s22108_s0 + $0x7f8] sm:$0xff] }
 0x41f   :  { %12738 = vmatmul.mubr.bf16.gmra.mxu0 %v13747_v49  ;;  %12787 = vmatmul.mubr.bf16.gmra.mxu1 %v13749_v37  ;;  %v13752_v49 = vcombine.high %v219_v22, %v283_v4  ;;  %v13754_v11 = vcombine.high %v220_v51, %v284_v7 }
 0x420   :  { %16542 = vmatpush3.bf16.msra.mxu0 %v17662_v17  ;;  %16570 = vmatpush3.bf16.msra.mxu1 %v17663_v1 }
 0x421   :  { %16543 = vmatprep.subr.bf16.mxu0 %v17664_v44  ;;  %16571 = vmatprep.subr.bf16.mxu1 %v17665_v2 }
 0x422   :  { %12876 = vmatprep.mubr.bf16.mxu1 %v13626_v25 }
 0x424   :  { %16544 = vmatpush3.bf16.msra.mxu0 %v17666_v20  ;;  %16572 = vmatpush3.bf16.msra.mxu1 %v17667_v27  ;;  %v13751_v20 = vcombine.low %v219_v22, %v283_v4  ;;  %v13753_v27 = vcombine.low %v220_v51, %v284_v7 }
 0x425   :  { %16545 = vmatprep.subr.bf16.mxu0 %v17668_v53  ;;  %16573 = vmatprep.subr.bf16.mxu1 %v17669_v24 }
 0x428   :  { %16546 = vmatpush3.bf16.msra.mxu0 %v17670_v8  ;;  %16574 = vmatpush3.bf16.msra.mxu1 %v17671_v35 }
 0x429   :  { %16547 = vmatprep.subr.bf16.mxu0 %v17672_v23  ;;  %16575 = vmatprep.subr.bf16.mxu1 %v17673_v14 }
 0x42a   :  { %v16245_v15 = vpop.f32.mrf.mxu1 }
 0x42c   :  { %v16246_v32 = vpop.f32.mrf.mxu1  ;;  %16548 = vmatpush3.bf16.msra.mxu0 %v17674_v59  ;;  %16576 = vmatpush3.bf16.msra.mxu1 %v17675_v39 }
 0x42d   :  { %v16247_v6 = vadd.f32 %v16246_v32, %v16245_v15  ;;  %16549 = vmatprep.subr.bf16.mxu0 %v17676_v36  ;;  %16577 = vmatprep.subr.bf16.mxu1 %v17677_v63 }
 0x42e   :  { %v16248_v62 = vpop.f32.mrf.mxu1 }
 0x430   :  { %v16249_v29 = vpop.f32.mrf.mxu1  ;;  %16550 = vmatpush3.bf16.msra.mxu0 %v17678_v26  ;;  %16578 = vmatpush3.bf16.msra.mxu1 %v17679_v45 }
 0x431   :  { %v16250_v33 = vadd.f32 %v16249_v29, %v16248_v62  ;;  %16579 = vmatprep.subr.bf16.mxu1 %v17681_v47 }
 0x432   :  { %v16251_v13 = vpop.f32.mrf.mxu1 }
 0x434   :  { %16580 = vmatpush3.bf16.msra.mxu1 %v17683_v55  ;;  %v16252_v58 = vpop.f32.mrf.mxu1 }
 0x435   :  { %v16253_v37 = vadd.f32 %v16252_v58, %v16251_v13 }
 0x436   :  { %v16254_v17 = vpop.f32.mrf.mxu1 }
 0x437   :  { %v16217_v48 = vpop.f32.mrf.mxu0  ;;  %12877 = vmatmul.mubr.bf16.vlgmr.msra.gmra.mxu1 %v13625_v30 }
 0x438   :  { %12884 = vmatprep.mubr.bf16.mxu1 %v13754_v11  ;;  %v16255_v2 = vpop.f32.mrf.mxu1 }
 0x439   :  { %v16218_v16 = vpop.f32.mrf.mxu0  ;;  %v16256_v53 = vadd.f32 %v16255_v2, %v16254_v17 }
 0x43a   :  { %v16219_v19 = vadd.f32 %v16218_v16, %v16217_v48 }
 0x43b   :  { %v16220_v5 = vpop.f32.mrf.mxu0 }
 0x43c   :  { %v12242_v42 = vadd.f32 %v16219_v19, %v21709_v60  ;;  %v17680_v60 = vld [vmem:[%s22107_s1 + $0x1f40] sm:$0xff]  }
 0x43d   :  { %v16221_v50 = vpop.f32.mrf.mxu0  ;;  %16551 = vmatprep.subr.bf16.mxu0 %v17680_v60 }
 0x43e   :  { %v12291_v52 = vadd.f32 %v16247_v6, %v12242_v42  ;;  %v16222_v31 = vadd.f32 %v16221_v50, %v16220_v5  ;;  %16552 = vmatpush3.bf16.msra.mxu0 %v17682_v9 }
 0x43f   :  { %v16223_v12 = vpop.f32.mrf.mxu0  ;;  %12885 = vmatmul.mubr.bf16.gmra.mxu1 %v13753_v27  ;;  %v21926_v27 = vld [vmem:[%s22109_s4 + $0x8] sm:$0xff] }
 0x440   :  { %v12245_v18 = vadd.f32 %v16222_v31, %v21724_v21  ;;  %v155_v21 = vld [vmem:[%s22108_s0 + $0x3f0] sm:$0xff] }
 0x441   :  { %v16224_v41 = vpop.f32.mrf.mxu0  ;;  %v13623_v46 = vcombine.low %v91_v38, %v155_v21  ;;  %v13624_v61 = vcombine.high %v91_v38, %v155_v21 }
 0x442   :  { %v21857_v0 = vadd.f32 %v16250_v33, %v12245_v18  ;;  %v16225_v43 = vadd.f32 %v16224_v41, %v16223_v12 }
 0x443   :  { %v16226_v54 = vpop.f32.mrf.mxu0  ;;  %12827 = vmatprep.mubr.bf16.mxu0 %v13624_v61 }
 0x444   :  { %v12250_v40 = vadd.f32 %v16225_v43, %v21754_v10  ;;  %12828 = vmatmul.mubr.bf16.vlgmr.msra.gmra.mxu0 %v13623_v46 }
 0x445   :  { %v16227_v3 = vpop.f32.mrf.mxu0  ;;  %12835 = vmatprep.mubr.bf16.mxu0 %v13752_v49 }
 0x446   :  { %v16228_v34 = vadd.f32 %v16227_v3, %v16226_v54  ;;  %v12299_v1 = vadd.f32 %v16253_v37, %v12250_v40 }
 0x448   :  { %v12253_v44 = vadd.f32 %v16228_v34, %v21775_v56 }
 0x44a   :  { %v12302_v10 = vadd.f32 %v16256_v53, %v12253_v44 }
 0x44c   :  { %12836 = vmatmul.mubr.bf16.gmra.mxu0 %v13751_v20  ;;  %v17692_v20 = vmov 0.0  }
 0x44d   :  { %16615 = vmatprep.subr.mxu0 %v17692_v20  ;;  %16619 = vmatprep.mubr.msk.f32.mxu0 %vm17693_vm0, %v17692_v20 }
 0x44e   :  { %16616 = vmatpush3.msra.mxu0 %v21926_v27 }
 0x44f   :  { %16617 = vmatprep.subr.mxu0 %v17692_v20 }
 0x457   :  { %v16273_v24 = vpop.f32.mrf.mxu0  ;;  %v16301_v8 = vpop.f32.mrf.mxu1 }
 0x459   :  { %v16274_v35 = vpop.f32.mrf.mxu0  ;;  %v16302_v48 = vpop.f32.mrf.mxu1 }
 0x45a   :  { %v16275_v23 = vadd.f32 %v16274_v35, %v16273_v24  ;;  %v16303_v15 = vadd.f32 %v16302_v48, %v16301_v8 }
 0x45b   :  { %v21882_v14 = vpop.f32.mrf.mxu0  ;;  %v21888_v56 = vpop.f32.mrf.mxu1 }
 0x45c   :  { %v12340_v59 = vadd.f32 %v16275_v23, %v12291_v52 }
 0x45d   :  { %v21884_v16 = vpop.f32.mrf.mxu0  ;;  %v21890_v19 = vpop.f32.mrf.mxu1 }
 0x45e   :  { %v21886_v32 = vadd.f32 %v16303_v15, %v12340_v59 }
 0x45f   :  { %v16279_v39 = vpop.f32.mrf.mxu0  ;;  %v16307_v5 = vpop.f32.mrf.mxu1 }
 0x461   :  { %v16280_v6 = vpop.f32.mrf.mxu0  ;;  %v16308_v42 = vpop.f32.mrf.mxu1 }
 0x462   :  { %v16281_v36 = vadd.f32 %v16280_v6, %v16279_v39  ;;  %v16309_v26 = vadd.f32 %v16308_v42, %v16307_v5 }
 0x463   :  { %v16282_v62 = vpop.f32.mrf.mxu0  ;;  %v16310_v45 = vpop.f32.mrf.mxu1 }
 0x464   :  { %v12348_v63 = vadd.f32 %v16281_v36, %v12299_v1 }
 0x465   :  { %v16283_v50 = vpop.f32.mrf.mxu0  ;;  %v16311_v33 = vpop.f32.mrf.mxu1 }
 0x466   :  { %v16284_v29 = vadd.f32 %v16283_v50, %v16282_v62  ;;  %v12397_v52 = vadd.f32 %v16309_v26, %v12348_v63  ;;  %v16312_v60 = vadd.f32 %v16311_v33, %v16310_v45 }
 0x468   :  { %v12351_v31 = vadd.f32 %v16284_v29, %v12302_v10  ;;  %v21933_v10 = vld [vmem:[%s22109_s4] sm:$0xff] }
 0x469   :  { %16618 = vmatpush3.msra.mxu0 %v21933_v10 }
 0x46a   :  { %v12400_v47 = vadd.f32 %v16312_v60, %v12351_v31 }
 0x477   :  { %v21892_v18 = vpop.f32.mrf.mxu0  ;;  %v21894_v12 = vpop.f32.mrf.mxu1 }
 0x479   :  { %v21896_v9 = vpop.f32.mrf.mxu0  ;;  %v21898_v55 = vpop.f32.mrf.mxu1 }
 0x47b   :  { %v21900_v38 = vpop.f32.mrf.mxu0  ;;  %v21904_v21 = vpop.f32.mrf.mxu1 }
 0x47d   :  { %v21902_v41 = vpop.f32.mrf.mxu0  ;;  %v21906_v28 = vpop.f32.mrf.mxu1 }
 0x47f   :  { %v16335_v57 = vpop.f32.mrf.mxu0  ;;  %v16363_v61 = vpop.f32.mrf.mxu1 }
 0x481   :  { %v16336_v43 = vpop.f32.mrf.mxu0  ;;  %v16364_v22 = vpop.f32.mrf.mxu1 }
 0x482   :  { %v16337_v46 = vadd.f32 %v16336_v43, %v16335_v57  ;;  %v16365_v51 = vadd.f32 %v16364_v22, %v16363_v61 }
 0x483   :  { %v16338_v30 = vpop.f32.mrf.mxu0  ;;  %v16366_v54 = vpop.f32.mrf.mxu1 }
 0x484   :  { %v12446_v25 = vadd.f32 %v16337_v46, %v12397_v52 }
 0x485   :  { %v16339_v4 = vpop.f32.mrf.mxu0  ;;  %v16367_v40 = vpop.f32.mrf.mxu1 }
 0x486   :  { %v16340_v13 = vadd.f32 %v16339_v4, %v16338_v30  ;;  %v12495_v49 = vadd.f32 %v16365_v51, %v12446_v25  ;;  %v16368_v11 = vadd.f32 %v16367_v40, %v16366_v54 }
 0x488   :  { %v12449_v7 = vadd.f32 %v16340_v13, %v12400_v47 }
 0x48a   :  { %v12498_v58 = vadd.f32 %v16368_v11, %v12449_v7 }
 0x497   :  { %v21908_v3 = vpop.f32.mrf.mxu0  ;;  %v21910_v37 = vpop.f32.mrf.mxu1 }
 0x499   :  { %v21912_v34 = vpop.f32.mrf.mxu0  ;;  %v21914_v17 = vpop.f32.mrf.mxu1 }
 0x49b   :  { %v21916_v1 = vpop.f32.mrf.mxu0  ;;  %v21920_v2 = vpop.f32.mrf.mxu1 }
 0x49d   :  { %v21918_v44 = vpop.f32.mrf.mxu0  ;;  %v21935_v24 = vpop.f32.mrf.mxu1 }
 0x49f   :  { %v16391_v53 = vpop.f32.mrf.mxu0  ;;  %v16419_v23 = vpop.f32.mrf.mxu1 }
 0x4a1   :  { %v16392_v8 = vpop.f32.mrf.mxu0  ;;  %v16420_v59 = vpop.f32.mrf.mxu1 }
 0x4a2   :  { %v16393_v35 = vadd.f32 %v16392_v8, %v16391_v53  ;;  %v16421_v6 = vadd.f32 %v16420_v59, %v16419_v23 }
 0x4a3   :  { %v16394_v48 = vpop.f32.mrf.mxu0  ;;  %v16422_v5 = vpop.f32.mrf.mxu1 }
 0x4a4   :  { %v12544_v15 = vadd.f32 %v16393_v35, %v12495_v49 }
 0x4a5   :  { %v16395_v39 = vpop.f32.mrf.mxu0  ;;  %v16423_v42 = vpop.f32.mrf.mxu1 }
 0x4a6   :  { %v16396_v36 = vadd.f32 %v16395_v39, %v16394_v48  ;;  %v12593_v62 = vadd.f32 %v16421_v6, %v12544_v15  ;;  %v16424_v26 = vadd.f32 %v16423_v42, %v16422_v5 }
 0x4a8   :  { %v12547_v63 = vadd.f32 %v16396_v36, %v12498_v58  ;;  %v16278_v36 = vadd.f32 %v21884_v16, %v21882_v14  ;;  %v16334_v16 = vadd.f32 %v21902_v41, %v21900_v38  ;;  %v16415_v38 = vadd.f32 %v21914_v17, %v21910_v37 }
 0x4a9   :  { %v16390_v41 = vadd.f32 %v21918_v44, %v21916_v1 }
 0x4aa   :  { %v12596_v50 = vadd.f32 %v16424_v26, %v12547_v63  ;;  %v16331_v63 = vadd.f32 %v21896_v9, %v21892_v18 }
 0x4ac   :  { %v12438_v14 = vadd.f32 %v16331_v63, %v21886_v32  ;;  %v16362_v32 = vadd.f32 %v21906_v28, %v21904_v21 }
 0x4b7   :  { %v21940_v29 = vpop.f32.mrf.mxu0  ;;  %v21942_v45 = vpop.f32.mrf.mxu1 }
 0x4b9   :  { %v16442_v52 = vpop.f32.mrf.mxu0  ;;  %v21944_v31 = vpop.f32.mrf.mxu1 }
 0x4ba   :  { %v16471_v21 = vadd.f32 %v21944_v31, %v21942_v45 }
 0x4bb   :  { %v21946_v33 = vpop.f32.mrf.mxu0  ;;  %v21950_v47 = vpop.f32.mrf.mxu1 }
 0x4bd   :  { %v21948_v60 = vpop.f32.mrf.mxu0  ;;  %v21952_v43 = vpop.f32.mrf.mxu1 }
 0x4be   :  { %v16446_v28 = vadd.f32 %v21948_v60, %v21946_v33 }
 0x4bf   :  { %v16447_v57 = vpop.f32.mrf.mxu0  ;;  %v16475_v30 = vpop.f32.mrf.mxu1 }
 0x4c1   :  { %v16448_v46 = vpop.f32.mrf.mxu0  ;;  %v16476_v4 = vpop.f32.mrf.mxu1 }
 0x4c2   :  { %v16449_v61 = vadd.f32 %v16448_v46, %v16447_v57  ;;  %v16477_v51 = vadd.f32 %v16476_v4, %v16475_v30  ;;  %v12343_v57 = vadd.f32 %v16278_v36, %v21857_v0  ;;  %v16359_v30 = vadd.f32 %v21898_v55, %v21894_v12 }
 0x4c3   :  { %v16450_v25 = vpop.f32.mrf.mxu0  ;;  %v16478_v49 = vpop.f32.mrf.mxu1  ;;  %v16387_v0 = vadd.f32 %v21912_v34, %v21908_v3  ;;  %v16443_v34 = vadd.f32 %v16442_v52, %v21940_v29 }
 0x4c4   :  { %v12642_v22 = vadd.f32 %v16449_v61, %v12593_v62  ;;  %v16306_v61 = vadd.f32 %v21890_v19, %v21888_v56 }
 0x4c5   :  { %v16451_v13 = vpop.f32.mrf.mxu0  ;;  %v16479_v11 = vpop.f32.mrf.mxu1 }
 0x4c6   :  { %v16452_v54 = vadd.f32 %v16451_v13, %v16450_v25  ;;  %v12691_v7 = vadd.f32 %v16477_v51, %v12642_v22  ;;  %v16480_v58 = vadd.f32 %v16479_v11, %v16478_v49  ;;  %v12392_v51 = vadd.f32 %v16306_v61, %v12343_v57  ;;  %v14780_v57 = vld [vmem:[%s22111_s3] ss:$0 sm:$0xff] }
 0x4c8   :  { %v12645_v40 = vadd.f32 %v16452_v54, %v12596_v50  ;;  %v12487_v54 = vadd.f32 %v16359_v30, %v12438_v14  ;;  %v12441_v12 = vadd.f32 %v16334_v16, %v12392_v51 }
 0x4ca   :  { %v12694_v53 = vadd.f32 %v16480_v58, %v12645_v40  ;;  %v12536_v49 = vadd.f32 %v16387_v0, %v12487_v54  ;;  %v12490_v3 = vadd.f32 %v16362_v32, %v12441_v12  ;;  %v16418_v58 = vadd.f32 %v21935_v24, %v21920_v2 }
 0x4cc   :  { %v12585_v40 = vadd.f32 %v16415_v38, %v12536_v49  ;;  %v12539_v11 = vadd.f32 %v16390_v41, %v12490_v3 }
 0x4ce   :  { %v12588_v37 = vadd.f32 %v16418_v58, %v12539_v11 }
 0x4d0   :  { %v12637_v44 = vadd.f32 %v16446_v28, %v12588_v37 }
 0x4d7   :  { %v16497_v8 = vpop.f32.mrf.mxu0  ;;  %v16525_v35 = vpop.f32.mrf.mxu1 }
 0x4d9   :  { %v16498_v23 = vpop.f32.mrf.mxu0  ;;  %v16526_v48 = vpop.f32.mrf.mxu1 }
 0x4da   :  { %v16499_v17 = vadd.f32 %v16498_v23, %v16497_v8  ;;  %v16527_v52 = vadd.f32 %v16526_v48, %v16525_v35 }
 0x4db   :  { %v16500_v15 = vpop.f32.mrf.mxu0  ;;  %v16528_v39 = vpop.f32.mrf.mxu1 }
 0x4dd   :  { %v16501_v59 = vpop.f32.mrf.mxu0  ;;  %v16529_v5 = vpop.f32.mrf.mxu1 }
 0x4de   :  { %v16502_v36 = vadd.f32 %v16501_v59, %v16500_v15  ;;  %v16530_v60 = vadd.f32 %v16529_v5, %v16528_v39 }
 0x4df   :  { %v16503_v6 = vpop.f32.mrf.mxu0  ;;  %v16531_v26 = vpop.f32.mrf.mxu1 }
 0x4e1   :  { %v16504_v62 = vpop.f32.mrf.mxu0  ;;  %v16532_v25 = vpop.f32.mrf.mxu1 }
 0x4e2   :  { %v16505_v42 = vadd.f32 %v16504_v62, %v16503_v6  ;;  %v16533_v18 = vadd.f32 %v16532_v25, %v16531_v26  ;;  %v16474_v6 = vadd.f32 %v21952_v43, %v21950_v47  ;;  %v14779_v47 = vld [vmem:[%s22110_s2] ss:$0 sm:$0xff] }
 0x4e3   :  { %v16506_v50 = vpop.f32.mrf.mxu0  ;;  %v16534_v4 = vpop.f32.mrf.mxu1 }
 0x4e4   :  { %v12740_v46 = vadd.f32 %v16505_v42, %v12691_v7  ;;  %v12686_v2 = vadd.f32 %v16474_v6, %v12637_v44 }
 0x4e5   :  { %v16507_v22 = vpop.f32.mrf.mxu0  ;;  %v16535_v19 = vpop.f32.mrf.mxu1 }
 0x4e6   :  { %v16508_v9 = vadd.f32 %v16507_v22, %v16506_v50  ;;  %v21968_v13 = vadd.f32 %v16533_v18, %v12740_v46  ;;  %v16536_v55 = vadd.f32 %v16535_v19, %v16534_v4  ;;  %v12735_v45 = vadd.f32 %v16502_v36, %v12686_v2  ;;  %v13006_v36 = vld [vmem:[%s22112_s5] sm:$0x1] }
 0x4e8   :  { %v12743_v56 = vadd.f32 %v16508_v9, %v12694_v53  ;;  %v12634_v53 = vadd.f32 %v16443_v34, %v12585_v40  ;;  %v12784_v48 = vadd.f32 %v16530_v60, %v12735_v45 }
 0x4ea   :  { %v21976_v7 = vadd.f32 %v16536_v55, %v12743_v56  ;;  %v12683_v1 = vadd.f32 %v16471_v21, %v12634_v53 }
 0x4ec   :  { %v12732_v29 = vadd.f32 %v16499_v17, %v12683_v1 }
 0x4ee   :  { %v12781_v26 = vadd.f32 %v16527_v52, %v12732_v29 }
 0x4f7   :  { %v16581_v63 = vpop.f32.mrf.mxu1 }
 0x4f9   :  { %v16582_v42 = vpop.f32.mrf.mxu1 }
 0x4fa   :  { %v16583_v23 = vadd.f32 %v16582_v42, %v16581_v63  ;;  %v13008_v63 = vld [vmem:[%s22113_s6] sm:$0x1] }
 0x4fb   :  { %v16584_v33 = vpop.f32.mrf.mxu1 }
 0x4fd   :  { %v16585_v35 = vpop.f32.mrf.mxu1 }
 0x4fe   :  { %v16586_v39 = vadd.f32 %v16585_v35, %v16584_v33 }
 0x4ff   :  { %v16587_v61 = vpop.f32.mrf.mxu1 }
 0x501   :  { %v16588_v22 = vpop.f32.mrf.mxu1 }
 0x502   :  { %v16589_v9 = vadd.f32 %v16588_v22, %v16587_v61 }
 0x503   :  { %v16590_v51 = vpop.f32.mrf.mxu1 }
 0x504   :  { %v16553_v62 = vpop.f32.mrf.mxu0 }
 0x505   :  { %v16591_v54 = vpop.f32.mrf.mxu1 }
 0x506   :  { %v16554_v24 = vpop.f32.mrf.mxu0  ;;  %v16592_v38 = vadd.f32 %v16591_v54, %v16590_v51 }
 0x507   :  { %v16555_v31 = vadd.f32 %v16554_v24, %v16553_v62 }
 0x508   :  { %v16556_v50 = vpop.f32.mrf.mxu0 }
 0x509   :  { %v12830_v8 = vadd.f32 %v16555_v31, %v12781_v26 }
 0x50a   :  { %v16557_v43 = vpop.f32.mrf.mxu0 }
 0x50b   :  { %v12879_v15 = vadd.f32 %v16583_v23, %v12830_v8  ;;  %v16558_v59 = vadd.f32 %v16557_v43, %v16556_v50  ;;  %v13016_v43 = vlaneseq }
 0x50c   :  { %v16559_v46 = vpop.f32.mrf.mxu0 }
 0x50d   :  { %v12900_v30 = vmul.f32 %v14779_v47, %v12879_v15  ;;  %v12833_v25 = vadd.f32 %v16558_v59, %v12784_v48  ;;  %v22021_v48 = vshrl.u32 %v13016_v43, 7 }
 0x50e   :  { %v16560_v5 = vpop.f32.mrf.mxu0 }
 0x50f   :  { %v21993_v14 = vadd.f32 %v14780_v57, %v12900_v30  ;;  %v12882_v16 = vadd.f32 %v16586_v39, %v12833_v25  ;;  %v16561_v18 = vadd.f32 %v16560_v5, %v16559_v46  ;;  %v13018_v59 = vsub.s32 0, %v22021_v48 }
 0x510   :  { %v16562_v4 = vpop.f32.mrf.mxu0 }
 0x511   :  { %v12901_v0 = vmul.f32 %v14779_v47, %v12882_v16  ;;  %v12838_v56 = vadd.f32 %v16561_v18, %v21968_v13  ;;  %v12915_v12 = vmax.f32 %v21993_v14, 0.0 }
 0x512   :  { %v16563_v19 = vpop.f32.mrf.mxu0 }
 0x513   :  { %v12912_v55 = vadd.f32 %v14780_v57, %v12901_v0  ;;  %v12887_v32 = vadd.f32 %v16589_v9, %v12838_v56  ;;  %v16564_v49 = vadd.f32 %v16563_v19, %v16562_v4  ;;  %v12920_v40 = vsel %vm12919_vm1, %v12915_v12, 0.0 }
 0x515   :  { %v12916_v41 = vmax.f32 %v12912_v55, 0.0  ;;  %v12902_v3 = vmul.f32 %v14779_v47, %v12887_v32  ;;  %v12841_v34 = vadd.f32 %v16564_v49, %v21976_v7  ;;  %v17694_v7 = vmov 1.0   ;;  %v13292_v32 = vld [vmem:[%s22112_s5] sm:$0x1] }
 0x516   :  { %16626 = vmatprep.mubr.msk.f32.mxu1 %vm12919_vm1, %v17694_v7 }
 0x517   :  { %v12921_v11 = vsel %vm12919_vm1, %v12916_v41, 0.0  ;;  %v22000_v58 = vadd.f32 %v14780_v57, %v12902_v3  ;;  %v12890_v13 = vadd.f32 %v16592_v38, %v12841_v34 }
 0x518   :  { %v12922_v53 = vadd.f32 %v12921_v11, %v12920_v40 }
 0x519   :  { %v12903_v21 = vmul.f32 %v14779_v47, %v12890_v13  ;;  %v12917_v33 = vmax.f32 %v22000_v58, 0.0 }
 0x51a   :  { %v12923_v28 = vrot.slane %v12922_v53, 4 }
 0x51b   :  { %v22002_v37 = vadd.f32 %v14780_v57, %v12903_v21  ;;  %v13207_v23 = vsel %vm12919_vm1, %v12917_v33, 0.0 }
 0x51c   :  { %v12924_v17 = vadd.f32 %v12923_v28, %v12922_v53 }
 0x51d   :  { %v12918_v31 = vmax.f32 %v22002_v37, 0.0 }
 0x51e   :  { %v12925_v1 = vrot.slane %v12924_v17, 2 }
 0x51f   :  { %v13208_v8 = vsel %vm12919_vm1, %v12918_v31, 0.0 }
 0x520   :  { %v12926_v44 = vadd.f32 %v12925_v1, %v12924_v17  ;;  %v13209_v47 = vadd.f32 %v13208_v8, %v13207_v23 }
 0x522   :  { %v12927_v6 = vrot.slane %v12926_v44, 1  ;;  %v13210_v35 = vrot.slane %v13209_v47, 4 }
 0x524   :  { %v12928_v29 = vadd.f32 %v12927_v6, %v12926_v44  ;;  %v13211_v15 = vadd.f32 %v13210_v35, %v13209_v47 }
 0x526   :  { %v12930_v52 = vmul.f32 0.0625, %v12928_v29  ;;  %v13212_v46 = vrot.slane %v13211_v15, 2 }
 0x528   :  { %16620 = vmatmul.mubr.msk.f32.vlgmr.msra.gmra.mxu0 %vm12919_vm1, %v12930_v52  ;;  %v13213_v39 = vadd.f32 %v13212_v46, %v13211_v15 }
 0x52a   :  { %v13214_v16 = vrot.slane %v13213_v39, 1 }
 0x52c   :  { %v13215_v9 = vadd.f32 %v13214_v16, %v13213_v39 }
 0x52e   :  { %v13216_v4 = vmul.f32 0.0625, %v13215_v9 }
 0x5e8   :  { %v13002_v62 = vpop.f32.mrf.mxu0 }
 0x5e9   :  { %v13007_v2 = vmul.f32 %v13006_v36, %v13002_v62 }
 0x5ea   :  { %v16621_v24 = vpop.f32.mrf.mxu0 }
 0x5eb   :  { %v13009_v42 = vadd.f32 %v13008_v63, %v13007_v2 }
 0x5ed   :  { %v13010_v26 = vsub.f32 0.0, %v13009_v42 }
 0x5ef   :  { %v13011_v45 = vmul.f32 1.442695, %v13010_v26 }
 0x5f1   :  { %17684 = vpow2.f32 %v13011_v45 }
 0x5fe   :  { %v17685_v50 = vpop.eup %17684 }
 0x5ff   :  { %v13013_v60 = vadd.f32 1.0, %v17685_v50 }
 0x601   :  { %17686 = vrcp.f32 %v13013_v60 }
 0x60e   :  { %v17687_v57 = vpop.eup %17686 }
 0x60f   :  { %v13019_v61 = vrot.slane %v17687_v57, %v13018_v59 }
 0x611   :  { %v13021_v30 = vmul.f32 %v13019_v61, %v12916_v41  ;;  %v13020_v25 = vmul.f32 %v13019_v61, %v12915_v12  ;;  %v13294_v41 = vld [vmem:[%s22113_s6] sm:$0x1] }
 0x613   :  { %13023 = vst.msk [vmem:[%s22114_s7 + $0x8] sm:$0xff] %vm12919_vm1, %v13021_v30  ;;  %16629 = vmatprep.subr.msk.mxu0 %vm12919_vm1, %v13021_v30  ;;  %13022 = vst.msk [vmem:[%s22114_s7] sm:$0xff] %vm12919_vm1, %v13020_v25  ;;  %16633 = vmatprep.mubr.msk.f32.mxu0 %vm12919_vm1, %v13020_v25  ;;  %v13025_v5 = vmul.f32 %v13021_v30, %v13021_v30  ;;  %v13024_v22 = vmul.f32 %v13020_v25, %v13020_v25 }
 0x614   :  { %16630 = vmatpush3.xpose.msk.msra.mxu0 %vm12919_vm1, %v13021_v30 }
 0x615   :  { %16622 = vmatprep.subr.msk.mxu1 %vm12919_vm1, %v13025_v5  ;;  %16631 = vmatprep.subr.msk.mxu0 %vm12919_vm1, %v13020_v25  ;;  %v13026_v14 = vsel %vm12919_vm1, %v13024_v22, 0.0  ;;  %v13029_v18 = vsel %vm12919_vm1, %v13025_v5, 0.0 }
 0x616   :  { %16623 = vmatpush3.xpose.msk.msra.mxu1 %vm12919_vm1, %v13025_v5  ;;  %13027 = vadd.xlane.f32.xlu0 %v13026_v14 }
 0x617   :  { %16624 = vmatprep.subr.msk.mxu1 %vm12919_vm1, %v13024_v22 }
 0x618   :  { %16632 = vmatpush3.xpose.msk.msra.mxu0 %vm12919_vm1, %v13020_v25 }
 0x61a   :  { %16625 = vmatpush3.xpose.msk.msra.mxu1 %vm12919_vm1, %v13024_v22  ;;  %13030 = vadd.xlane.f32.xlu0 %v13029_v18 }
 0x61b   :  { %16634 = vmatmul.mubr.msk.f32.vlgmr.msra.gmra.mxu0 %vm12919_vm1, %v13021_v30  ;;  %16636 = vmatprep.subr.mxu1 %v17692_v20 }
 0x61d   :  { %16627 = vmatmul.mubr.msk.f32.vlgmr.msra.gmra.mxu1 %vm12919_vm1, %v17694_v7 }
 0x61e   :  { %16637 = vmatpush3.msra.mxu1 %v21926_v27  ;;  %16640 = vmatprep.mubr.msk.f32.mxu1 %vm17693_vm0, %v17692_v20 }
 0x61f   :  { %16638 = vmatprep.subr.mxu1 %v17692_v20 }
 0x620   :  { %16639 = vmatpush3.msra.mxu1 %v21933_v10 }
 0x621   :  { %16641 = vmatmul.mubr.msk.f32.vlgmr.msra.gmra.mxu1 %vm12919_vm1, %v13216_v4 }
 0x622   :  { %16647 = vmatprep.mubr.msk.f32.mxu1 %vm12919_vm1, %v17694_v7 }
 0x69f   :  { %v13028_v51 = vpop.xlane.xlu0 %13027 }
 0x6a3   :  { %v13031_v56 = vpop.xlane.xlu0 %13030 }
 0x6db   :  { %v16635_v0 = vpop.f32.mrf.mxu0 }
 0x6dc   :  { %v13200_v12 = vmul.f32 2.0, %v16635_v0 }
 0x6dd   :  { %v16628_v19 = vpop.f32.mrf.mxu1  ;;  %v13188_v54 = vpop.f32.mrf.mxu0 }
 0x6de   :  { %v13198_v27 = vadd.f32 %v16628_v19, %v13031_v56  ;;  %v13199_v49 = vmul.f32 2.0, %v13188_v54 }
 0x6df   :  { %v13107_v55 = vpop.f32.mrf.mxu1 }
 0x6e0   :  { %v13202_v20 = vsub.f32 %v13198_v27, %v13200_v12  ;;  %v13197_v10 = vadd.f32 %v13107_v55, %v13028_v51 }
 0x6e1   :  { %v13288_v38 = vpop.f32.mrf.mxu1 }
 0x6e2   :  { %v13204_v3 = vmax.f32 %v13202_v20, 0.0  ;;  %v13201_v34 = vsub.f32 %v13197_v10, %v13199_v49  ;;  %v13293_v40 = vmul.f32 %v13292_v32, %v13288_v38 }
 0x6e3   :  { %v16642_v11 = vpop.f32.mrf.mxu1 }
 0x6e4   :  { %13206 = vst.msk [vmem:[%s22115_s8 + $0x8] sm:$0xff] %vm12919_vm1, %v13204_v3  ;;  %v13203_v13 = vmax.f32 %v13201_v34, 0.0  ;;  %v13295_v53 = vadd.f32 %v13294_v41, %v13293_v40 }
 0x6e6   :  { %13205 = vst.msk [vmem:[%s22115_s8] sm:$0xff] %vm12919_vm1, %v13203_v13  ;;  %v13296_v21 = vsub.f32 0.0, %v13295_v53 }
 0x6e8   :  { %v13297_v28 = vmul.f32 1.442695, %v13296_v21 }
 0x6ea   :  { %17688 = vpow2.f32 %v13297_v28 }
 0x6f7   :  { %v17689_v17 = vpop.eup %17688 }
 0x6f8   :  { %v13299_v1 = vadd.f32 1.0, %v17689_v17 }
 0x6fa   :  { %17690 = vrcp.f32 %v13299_v1 }
 0x707   :  { %v17691_v44 = vpop.eup %17690 }
 0x708   :  { %v13305_v6 = vrot.slane %v17691_v44, %v13018_v59 }
 0x70a   :  { %v13307_v29 = vmul.f32 %v13305_v6, %v12918_v31  ;;  %v13306_v52 = vmul.f32 %v13305_v6, %v12917_v33 }
 0x70c   :  { %13309 = vst.msk [vmem:[%s22114_s7 + $0x18] sm:$0xff] %vm12919_vm1, %v13307_v29  ;;  %16650 = vmatprep.subr.msk.mxu0 %vm12919_vm1, %v13307_v29  ;;  %13308 = vst.msk [vmem:[%s22114_s7 + $0x10] sm:$0xff] %vm12919_vm1, %v13306_v52  ;;  %16654 = vmatprep.mubr.msk.f32.mxu0 %vm12919_vm1, %v13306_v52  ;;  %v13311_v36 = vmul.f32 %v13307_v29, %v13307_v29  ;;  %v13310_v37 = vmul.f32 %v13306_v52, %v13306_v52 }
 0x70d   :  { %16651 = vmatpush3.xpose.msk.msra.mxu0 %vm12919_vm1, %v13307_v29 }
 0x70e   :  { %16643 = vmatprep.subr.msk.mxu1 %vm12919_vm1, %v13311_v36  ;;  %16652 = vmatprep.subr.msk.mxu0 %vm12919_vm1, %v13306_v52  ;;  %v13312_v58 = vsel %vm12919_vm1, %v13310_v37, 0.0  ;;  %v13315_v62 = vsel %vm12919_vm1, %v13311_v36, 0.0 }
 0x70f   :  { %16644 = vmatpush3.xpose.msk.msra.mxu1 %vm12919_vm1, %v13311_v36  ;;  %13313 = vadd.xlane.f32.xlu1 %v13312_v58 }
 0x710   :  { %16645 = vmatprep.subr.msk.mxu1 %vm12919_vm1, %v13310_v37 }
 0x711   :  { %16653 = vmatpush3.xpose.msk.msra.mxu0 %vm12919_vm1, %v13306_v52 }
 0x713   :  { %16646 = vmatpush3.xpose.msk.msra.mxu1 %vm12919_vm1, %v13310_v37  ;;  %13316 = vadd.xlane.f32.xlu1 %v13315_v62 }
 0x714   :  { %16655 = vmatmul.mubr.msk.f32.vlgmr.msra.gmra.mxu0 %vm12919_vm1, %v13307_v29 }
 0x716   :  { %16648 = vmatmul.mubr.msk.f32.vlgmr.msra.gmra.mxu1 %vm12919_vm1, %v17694_v7 }
 0x798   :  { %v13314_v63 = vpop.xlane.xlu1 %13313 }
 0x79c   :  { %v13317_v24 = vpop.xlane.xlu1 %13316 }
 0x7d4   :  { %v16656_v2 = vpop.f32.mrf.mxu0 }
 0x7d5   :  { %v13483_v45 = vmul.f32 2.0, %v16656_v2 }
 0x7d6   :  { %v16649_v42 = vpop.f32.mrf.mxu1  ;;  %v13471_v26 = vpop.f32.mrf.mxu0 }
 0x7d7   :  { %v13481_v31 = vadd.f32 %v16649_v42, %v13317_v24  ;;  %v13482_v60 = vmul.f32 2.0, %v13471_v26 }
 0x7d8   :  { %v13390_v50 = vpop.f32.mrf.mxu1 }
 0x7d9   :  { %v13485_v33 = vsub.f32 %v13481_v31, %v13483_v45  ;;  %v13480_v8 = vadd.f32 %v13390_v50, %v13314_v63 }
 0x7db   :  { %v13487_v23 = vmax.f32 %v13485_v33, 0.0  ;;  %v13484_v47 = vsub.f32 %v13480_v8, %v13482_v60 }
 0x7dd   :  { %14800 = vst.msk [vmem:[%s22115_s8 + $0x18] sm:$0xff] %vm12919_vm1, %v13487_v23  ;;  %v13486_v43 = vmax.f32 %v13484_v47, 0.0 }
 0x7df   :  { %14799 = vst.msk [vmem:[%s22115_s8 + $0x10] sm:$0xff] %vm12919_vm1, %v13486_v43 }

</bundles_post_ra>
